<compile_context>
chip_gen: v7x
topology: tpu7x:2x2x1
jax: 0.10.0
libtpu: 0.0.40
codegen_flags: <defaults>
</compile_context>

<pallas_src>
import jax
import jax.numpy as jnp
from jax.experimental import pallas as pl
from jax.experimental.pallas import tpu as pltpu

# Static geometry fixed by the nn.Module (32x32 RGB input, 2 classes).
H = W = 32
HW = H * W                      # 1024 flat positions per image
C_IN, C1, C2 = 3, 6, 16
K = 5
N_FC1, N_FC2, N_CLS = 120, 84, 2
N_CLS_PAD = 128                 # lane-padded logits (real logits in rows 0..1)

# Flat-overscan lane offsets (within one image's 1024-lane segment):
#   conv1 output (oh,ow) at lane 32*oh +  ow, taps at 32*di +   dj
#   pool1 output (ph,pw) at lane 64*ph + 2pw, taps at {0,1,32,33}
#   conv2 output (oh,ow) at lane 64*oh + 2ow, taps at 64*di + 2*dj
#   pool2 output (ph,pw) at lane 128*ph+ 4pw, taps at {0,2,64,66}
MAX_S1 = 32 * (K - 1) + (K - 1)        # 132
MAX_P1 = 33
MAX_S2 = 64 * (K - 1) + 2 * (K - 1)    # 264
MAX_P2 = 66
MAX_TB = 8                              # images per grid step (VMEM-bounded)


def _make_kernel(tb):
    """Builds the fused kernel for a fixed per-step batch tile `tb`."""
    n = tb * HW
    l1 = n - MAX_S1      # conv1 overscan length
    l2 = l1 - MAX_P1     # pool1
    l3 = l2 - MAX_S2     # conv2
    l4 = l3 - MAX_P2     # pool2
    off1 = [32 * (t // K) + (t % K) for t in range(K * K)]
    off2 = [64 * (t // K) + 2 * (t % K) for t in range(K * K)]

    def kernel(x_ref, w1_ref, b1_ref, w2_ref, b2_ref, s_ref,
               wfc1_ref, bfc1_ref, wfc2_ref, bfc2_ref, wfc3_ref, bfc3_ref,
               o_ref):
        x = x_ref[...].astype(jnp.bfloat16)                       # (3, n)

        # ---- conv1 (5x5 valid, 3->6): one tap-fused MXU matmul -------------
        x1 = jnp.concatenate([x[:, s:s + l1] for s in off1], axis=0)   # (75, l1)
        a1 = jnp.maximum(
            jnp.dot(w1_ref[...], x1, preferred_element_type=jnp.float32)
            + b1_ref[...], 0.0)                                   # (6, l1) f32

        # ---- maxpool 2x2 / stride 2 (taps +0,+1,+32,+33) --------------------
        p1 = jnp.maximum(jnp.maximum(a1[:, 0:l2], a1[:, 1:1 + l2]),
                         jnp.maximum(a1[:, 32:32 + l2], a1[:, 33:33 + l2]))
        p1 = p1.astype(jnp.bfloat16)                              # (6, l2)

        # ---- conv2 (5x5 valid, 6->16): one tap-fused MXU matmul -------------
        x2 = jnp.concatenate([p1[:, s:s + l3] for s in off2], axis=0)  # (150, l3)
        a2 = jnp.maximum(
            jnp.dot(w2_ref[...], x2, preferred_element_type=jnp.float32)
            + b2_ref[...], 0.0)                                   # (16, l3) f32

        # ---- maxpool 2x2 / stride 2 (taps +0,+2,+64,+66) --------------------
        p2 = jnp.maximum(jnp.maximum(a2[:, 0:l4], a2[:, 2:2 + l4]),
                         jnp.maximum(a2[:, 64:64 + l4], a2[:, 66:66 + l4]))
        # (16, l4); valid value for image b, tap t lives at lane 1024*b + r_t.

        # ---- flatten via ONE 0/1-selection matmul ---------------------------
        # qbig[c, t*tb + b] = p2[c, 1024*b + r_t]
        qbig = jnp.dot(p2.astype(jnp.bfloat16), s_ref[...],
                       preferred_element_type=jnp.float32)        # (16, 25*tb)
        q = jnp.concatenate([qbig[:, t * tb:(t + 1) * tb]
                             for t in range(K * K)], axis=0)      # (400, tb)
        # row 16*t + c; fc1 weights were column-permuted on the host to match.

        # ---- fc1 -> relu -> fc2 -> relu -> fc3 (padded to 128 rows) ---------
        h1 = jnp.maximum(
            jnp.dot(wfc1_ref[...], q, preferred_element_type=jnp.float32)
            + bfc1_ref[...], 0.0)                                 # (120, tb)
        h2 = jnp.maximum(
            jnp.dot(wfc2_ref[...], h1, preferred_element_type=jnp.float32)
            + bfc2_ref[...], 0.0)                                 # (84, tb)
        h3 = (jnp.dot(wfc3_ref[...], h2, preferred_element_type=jnp.float32)
              + bfc3_ref[...])                                    # (128, tb)
        o_ref[0] = h3

    return kernel, (n, l1, l2, l3, l4)


def _selection_matrix(tb, l4):
    """0/1 matrix S (l4, 25*tb): S[1024*b + 128*ph + 4*pw, t*tb + b] = 1."""
    t = jnp.arange(K * K)
    b = jnp.arange(tb)
    rows = (HW * b[None, :] + (128 * (t // K) + 4 * (t % K))[:, None]).ravel()
    cols = (t[:, None] * tb + b[None, :]).ravel()
    s = jnp.zeros((l4, K * K * tb), jnp.float32).at[rows, cols].set(1.0)
    return s.astype(jnp.bfloat16)


def net_forward(x_nchw, kp):
    """Forward pass equivalent to Net.forward. x_nchw: (B, 3, 32, 32) float32."""
    B = x_nchw.shape[0]
    assert x_nchw.shape[1:] == (C_IN, H, W)

    tb = B if B < MAX_TB else MAX_TB
    bp = ((B + tb - 1) // tb) * tb
    if bp != B:
        x_nchw = jnp.concatenate(
            [x_nchw, jnp.zeros((bp - B, C_IN, H, W), x_nchw.dtype)], axis=0)

    # Channels on sublanes; batch x flattened-space concatenated on lanes.
    x_cat = jnp.transpose(x_nchw, (1, 0, 2, 3)).reshape(C_IN, bp * HW)

    kernel, (n, l1, l2, l3, l4) = _make_kernel(tb)
    sel = _selection_matrix(tb, l4)
    steps = bp // tb

    weights = [kp["w1"], kp["b1"], kp["w2"], kp["b2"], sel,
               kp["wfc1"], kp["bfc1"], kp["wfc2"], kp["bfc2"],
               kp["wfc3"], kp["bfc3"]]
    full2d = lambda i: (0, 0)                 # resident blocks, fetched once
    w_specs = [pl.BlockSpec(w.shape, full2d) for w in weights]

    flops = 2 * steps * (C1 * 75 * l1 + C2 * 150 * l3 + C2 * l4 * K * K * tb
                         + (400 * N_FC1 + N_FC1 * N_FC2 + N_FC2 * N_CLS_PAD) * tb)
    bytes_accessed = (4 * x_cat.size + 4 * bp * N_CLS_PAD
                      + sum(int(w.size) * w.dtype.itemsize for w in weights))

    out = pl.pallas_call(
        kernel,
        out_shape=jax.ShapeDtypeStruct((steps, N_CLS_PAD, tb), jnp.float32),
        grid=(steps,),
        in_specs=[pl.BlockSpec((C_IN, tb * HW), lambda i: (0, i))] + w_specs,
        out_specs=pl.BlockSpec((1, N_CLS_PAD, tb), lambda i: (i, 0, 0)),
        compiler_params=pltpu.CompilerParams(
            dimension_semantics=("parallel",),       # shard steps over v7x TCs
            vmem_limit_bytes=32 * 1024 * 1024),
        cost_estimate=pl.CostEstimate(flops=int(flops), transcendentals=0,
                                      bytes_accessed=int(bytes_accessed)),
    )(x_cat, *weights)

    logits = jnp.transpose(out, (0, 2, 1)).reshape(bp, N_CLS_PAD)
    return logits[:B, :N_CLS]


# ----------------------- parameters (torch-layout) --------------------------

def init_params(key):
    ks = jax.random.split(key, 10)

    def rnd(k, shape, fan_in):
        return (jax.random.normal(k, shape) / jnp.sqrt(fan_in)).astype(jnp.float32)

    return dict(
        conv1_w=rnd(ks[0], (C1, C_IN, K, K), 75.0), conv1_b=rnd(ks[1], (C1,), 75.0),
        conv2_w=rnd(ks[2], (C2, C1, K, K), 150.0), conv2_b=rnd(ks[3], (C2,), 150.0),
        fc1_w=rnd(ks[4], (N_FC1, 400), 400.0), fc1_b=rnd(ks[5], (N_FC1,), 400.0),
        fc2_w=rnd(ks[6], (N_FC2, N_FC1), 120.0), fc2_b=rnd(ks[7], (N_FC2,), 120.0),
        fc3_w=rnd(ks[8], (N_CLS, N_FC2), 84.0), fc3_b=rnd(ks[9], (N_CLS,), 84.0),
    )


def to_kernel_params(p):
    """One-time host-side re-layout of torch-style params into kernel operands."""
    # Conv weights: (OC, IC, kh, kw) -> (OC, 25*IC), column 3*t+ic / 6*t+ic.
    w1 = jnp.transpose(p["conv1_w"], (0, 2, 3, 1)).reshape(C1, K * K * C_IN)
    w2 = jnp.transpose(p["conv2_w"], (0, 2, 3, 1)).reshape(C2, K * K * C1)
    # fc1: kernel flatten row 16*t + c  <->  torch column c*25 + t.
    m = jnp.arange(16 * K * K)
    t, c = m // 16, m % 16
    wfc1 = p["fc1_w"][:, c * (K * K) + t]
    # fc3 zero-padded to 128 output rows for a lane-friendly final block.
    wfc3 = jnp.zeros((N_CLS_PAD, N_FC2), jnp.float32).at[:N_CLS].set(p["fc3_w"])
    bfc3 = jnp.zeros((N_CLS_PAD, 1), jnp.float32).at[:N_CLS, 0].set(p["fc3_b"])
    return dict(
        w1=w1.astype(jnp.bfloat16), b1=p["conv1_b"].reshape(C1, 1),
        w2=w2.astype(jnp.bfloat16), b2=p["conv2_b"].reshape(C2, 1),
        wfc1=wfc1, bfc1=p["fc1_b"].reshape(N_FC1, 1),
        wfc2=p["fc2_w"], bfc2=p["fc2_b"].reshape(N_FC2, 1),
        wfc3=wfc3, bfc3=bfc3,
    )


# ----------------------- pure-JAX reference (for checking) ------------------

def reference_forward(x, p):
    dn = ("NCHW", "OIHW", "NCHW")
    hp = jax.lax.Precision.HIGHEST
    y = jax.lax.conv_general_dilated(x, p["conv1_w"], (1, 1), "VALID",
                                     dimension_numbers=dn, precision=hp)
    y = jnp.maximum(y + p["conv1_b"].reshape(1, C1, 1, 1), 0.0)
    y = jax.lax.reduce_window(y, -jnp.inf, jax.lax.max,
                              (1, 1, 2, 2), (1, 1, 2, 2), "VALID")
    y = jax.lax.conv_general_dilated(y, p["conv2_w"], (1, 1), "VALID",
                                     dimension_numbers=dn, precision=hp)
    y = jnp.maximum(y + p["conv2_b"].reshape(1, C2, 1, 1), 0.0)
    y = jax.lax.reduce_window(y, -jnp.inf, jax.lax.max,
                              (1, 1, 2, 2), (1, 1, 2, 2), "VALID")
    f = y.reshape(y.shape[0], 400)                     # torch.flatten(x, 1) on NCHW
    h = jnp.maximum(jnp.dot(f, p["fc1_w"].T, precision=hp) + p["fc1_b"], 0.0)
    h = jnp.maximum(jnp.dot(h, p["fc2_w"].T, precision=hp) + p["fc2_b"], 0.0)
    return jnp.dot(h, p["fc3_w"].T, precision=hp) + p["fc3_b"]


if __name__ == "__main__":
    key = jax.random.PRNGKey(0)
    k_params, k_x = jax.random.split(key)
    params = init_params(k_params)
    kparams = to_kernel_params(params)
    x = jax.random.normal(k_x, (2, 3, 32, 32), dtype=jnp.float32)

    out = jax.jit(net_forward)(x, kparams)
    out = jax.block_until_ready(out)
    assert out.shape == (2, N_CLS) and out.dtype == jnp.float32

    ref = reference_forward(x, params)
    err = float(jnp.max(jnp.abs(out - ref)))
    tol = 2e-2 * max(1.0, float(jnp.max(jnp.abs(ref))))
    assert err < tol, f"kernel/reference mismatch: max abs err {err} (tol {tol})"
    print("KERNEL_OK")
</pallas_src>

<mosaic_0001>
module attributes {stable_mosaic.version = 11 : i64} {
  func.func @kernel(%arg0: i32, %arg1: memref<3x2048xf32, #tpu.memory_space<vmem>>, %arg2: memref<6x75xbf16, #tpu.memory_space<vmem>>, %arg3: memref<6x1xf32, #tpu.memory_space<vmem>>, %arg4: memref<16x150xbf16, #tpu.memory_space<vmem>>, %arg5: memref<16x1xf32, #tpu.memory_space<vmem>>, %arg6: memref<1553x50xbf16, #tpu.memory_space<vmem>>, %arg7: memref<120x400xf32, #tpu.memory_space<vmem>>, %arg8: memref<120x1xf32, #tpu.memory_space<vmem>>, %arg9: memref<84x120xf32, #tpu.memory_space<vmem>>, %arg10: memref<84x1xf32, #tpu.memory_space<vmem>>, %arg11: memref<128x84xf32, #tpu.memory_space<vmem>>, %arg12: memref<128x1xf32, #tpu.memory_space<vmem>>, %arg13: memref<1x128x2xf32, #tpu.memory_space<vmem>>) attributes {dimension_semantics = [#tpu.dimension_semantics<parallel>], iteration_bounds = array<i64: 1>, scalar_prefetch = 0 : i64, scratch_operands = 0 : i64, tpu.core_type = #tpu.core_type<tc>, window_params = [{transform_indices = @transform_0, window_bounds = array<i64: 3, 2048>}, {pipeline_mode = #tpu.pipeline_mode<synchronous>, transform_indices = @transform_1, window_bounds = array<i64: 6, 75>}, {pipeline_mode = #tpu.pipeline_mode<synchronous>, transform_indices = @transform_2, window_bounds = array<i64: 6, 1>}, {pipeline_mode = #tpu.pipeline_mode<synchronous>, transform_indices = @transform_3, window_bounds = array<i64: 16, 150>}, {pipeline_mode = #tpu.pipeline_mode<synchronous>, transform_indices = @transform_4, window_bounds = array<i64: 16, 1>}, {pipeline_mode = #tpu.pipeline_mode<synchronous>, transform_indices = @transform_5, window_bounds = array<i64: 1553, 50>}, {pipeline_mode = #tpu.pipeline_mode<synchronous>, transform_indices = @transform_6, window_bounds = array<i64: 120, 400>}, {pipeline_mode = #tpu.pipeline_mode<synchronous>, transform_indices = @transform_7, window_bounds = array<i64: 120, 1>}, {pipeline_mode = #tpu.pipeline_mode<synchronous>, transform_indices = @transform_8, window_bounds = array<i64: 84, 120>}, {pipeline_mode = #tpu.pipeline_mode<synchronous>, transform_indices = @transform_9, window_bounds = array<i64: 84, 1>}, {pipeline_mode = #tpu.pipeline_mode<synchronous>, transform_indices = @transform_10, window_bounds = array<i64: 128, 84>}, {pipeline_mode = #tpu.pipeline_mode<synchronous>, transform_indices = @transform_11, window_bounds = array<i64: 128, 1>}, {transform_indices = @transform_12, window_bounds = array<i64: 1, 128, 2>}]} {
    %c0 = arith.constant 0 : index
    %c0_0 = arith.constant 0 : index
    %0 = vector.load %arg1[%c0, %c0_0] : memref<3x2048xf32, #tpu.memory_space<vmem>>, vector<3x2048xf32>
    %1 = arith.truncf %0 : vector<3x2048xf32> to vector<3x2048xbf16>
    %2 = vector.extract_strided_slice %1 {offsets = [0, 0], sizes = [3, 1916], strides = [1, 1]} : vector<3x2048xbf16> to vector<3x1916xbf16>
    %3 = vector.extract_strided_slice %1 {offsets = [0, 1], sizes = [3, 1916], strides = [1, 1]} : vector<3x2048xbf16> to vector<3x1916xbf16>
    %4 = vector.extract_strided_slice %1 {offsets = [0, 2], sizes = [3, 1916], strides = [1, 1]} : vector<3x2048xbf16> to vector<3x1916xbf16>
    %5 = vector.extract_strided_slice %1 {offsets = [0, 3], sizes = [3, 1916], strides = [1, 1]} : vector<3x2048xbf16> to vector<3x1916xbf16>
    %6 = vector.extract_strided_slice %1 {offsets = [0, 4], sizes = [3, 1916], strides = [1, 1]} : vector<3x2048xbf16> to vector<3x1916xbf16>
    %7 = vector.extract_strided_slice %1 {offsets = [0, 32], sizes = [3, 1916], strides = [1, 1]} : vector<3x2048xbf16> to vector<3x1916xbf16>
    %8 = vector.extract_strided_slice %1 {offsets = [0, 33], sizes = [3, 1916], strides = [1, 1]} : vector<3x2048xbf16> to vector<3x1916xbf16>
    %9 = vector.extract_strided_slice %1 {offsets = [0, 34], sizes = [3, 1916], strides = [1, 1]} : vector<3x2048xbf16> to vector<3x1916xbf16>
    %10 = vector.extract_strided_slice %1 {offsets = [0, 35], sizes = [3, 1916], strides = [1, 1]} : vector<3x2048xbf16> to vector<3x1916xbf16>
    %11 = vector.extract_strided_slice %1 {offsets = [0, 36], sizes = [3, 1916], strides = [1, 1]} : vector<3x2048xbf16> to vector<3x1916xbf16>
    %12 = vector.extract_strided_slice %1 {offsets = [0, 64], sizes = [3, 1916], strides = [1, 1]} : vector<3x2048xbf16> to vector<3x1916xbf16>
    %13 = vector.extract_strided_slice %1 {offsets = [0, 65], sizes = [3, 1916], strides = [1, 1]} : vector<3x2048xbf16> to vector<3x1916xbf16>
    %14 = vector.extract_strided_slice %1 {offsets = [0, 66], sizes = [3, 1916], strides = [1, 1]} : vector<3x2048xbf16> to vector<3x1916xbf16>
    %15 = vector.extract_strided_slice %1 {offsets = [0, 67], sizes = [3, 1916], strides = [1, 1]} : vector<3x2048xbf16> to vector<3x1916xbf16>
    %16 = vector.extract_strided_slice %1 {offsets = [0, 68], sizes = [3, 1916], strides = [1, 1]} : vector<3x2048xbf16> to vector<3x1916xbf16>
    %17 = vector.extract_strided_slice %1 {offsets = [0, 96], sizes = [3, 1916], strides = [1, 1]} : vector<3x2048xbf16> to vector<3x1916xbf16>
    %18 = vector.extract_strided_slice %1 {offsets = [0, 97], sizes = [3, 1916], strides = [1, 1]} : vector<3x2048xbf16> to vector<3x1916xbf16>
    %19 = vector.extract_strided_slice %1 {offsets = [0, 98], sizes = [3, 1916], strides = [1, 1]} : vector<3x2048xbf16> to vector<3x1916xbf16>
    %20 = vector.extract_strided_slice %1 {offsets = [0, 99], sizes = [3, 1916], strides = [1, 1]} : vector<3x2048xbf16> to vector<3x1916xbf16>
    %21 = vector.extract_strided_slice %1 {offsets = [0, 100], sizes = [3, 1916], strides = [1, 1]} : vector<3x2048xbf16> to vector<3x1916xbf16>
    %22 = vector.extract_strided_slice %1 {offsets = [0, 128], sizes = [3, 1916], strides = [1, 1]} : vector<3x2048xbf16> to vector<3x1916xbf16>
    %23 = vector.extract_strided_slice %1 {offsets = [0, 129], sizes = [3, 1916], strides = [1, 1]} : vector<3x2048xbf16> to vector<3x1916xbf16>
    %24 = vector.extract_strided_slice %1 {offsets = [0, 130], sizes = [3, 1916], strides = [1, 1]} : vector<3x2048xbf16> to vector<3x1916xbf16>
    %25 = vector.extract_strided_slice %1 {offsets = [0, 131], sizes = [3, 1916], strides = [1, 1]} : vector<3x2048xbf16> to vector<3x1916xbf16>
    %26 = vector.extract_strided_slice %1 {offsets = [0, 132], sizes = [3, 1916], strides = [1, 1]} : vector<3x2048xbf16> to vector<3x1916xbf16>
    %27 = tpu.concatenate %2, %3, %4, %5, %6, %7, %8, %9, %10, %11, %12, %13, %14, %15, %16, %17 in 0 : vector<3x1916xbf16>, vector<3x1916xbf16>, vector<3x1916xbf16>, vector<3x1916xbf16>, vector<3x1916xbf16>, vector<3x1916xbf16>, vector<3x1916xbf16>, vector<3x1916xbf16>, vector<3x1916xbf16>, vector<3x1916xbf16>, vector<3x1916xbf16>, vector<3x1916xbf16>, vector<3x1916xbf16>, vector<3x1916xbf16>, vector<3x1916xbf16>, vector<3x1916xbf16> -> vector<48x1916xbf16>
    %28 = tpu.concatenate %18, %19, %20, %21, %22, %23, %24, %25, %26 in 0 : vector<3x1916xbf16>, vector<3x1916xbf16>, vector<3x1916xbf16>, vector<3x1916xbf16>, vector<3x1916xbf16>, vector<3x1916xbf16>, vector<3x1916xbf16>, vector<3x1916xbf16>, vector<3x1916xbf16> -> vector<27x1916xbf16>
    %29 = tpu.concatenate %27, %28 in 0 : vector<48x1916xbf16>, vector<27x1916xbf16> -> vector<75x1916xbf16>
    %c0_1 = arith.constant 0 : index
    %c0_2 = arith.constant 0 : index
    %30 = vector.load %arg2[%c0_1, %c0_2] : memref<6x75xbf16, #tpu.memory_space<vmem>>, vector<6x75xbf16>
    %cst = arith.constant dense<0.000000e+00> : vector<6x1916xf32>
    %31 = tpu.matmul %30, %29, %cst {dimension_numbers = #tpu.dot_dimension_numbers<[1], [0], [0], [1], [0, 0, 1, 1], [], []>} : vector<6x75xbf16>, vector<75x1916xbf16>, vector<6x1916xf32> -> vector<6x1916xf32>
    %c0_3 = arith.constant 0 : index
    %c0_4 = arith.constant 0 : index
    %32 = vector.load %arg3[%c0_3, %c0_4] : memref<6x1xf32, #tpu.memory_space<vmem>>, vector<6x1xf32>
    %33 = vector.broadcast %32 : vector<6x1xf32> to vector<6x1916xf32>
    %34 = arith.addf %31, %33 : vector<6x1916xf32>
    %cst_5 = arith.constant 0.000000e+00 : f32
    %35 = vector.broadcast %cst_5 : f32 to vector<6x1916xf32>
    %36 = arith.maximumf %34, %35 : vector<6x1916xf32>
    %37 = vector.extract_strided_slice %36 {offsets = [0, 0], sizes = [6, 1883], strides = [1, 1]} : vector<6x1916xf32> to vector<6x1883xf32>
    %38 = vector.extract_strided_slice %36 {offsets = [0, 1], sizes = [6, 1883], strides = [1, 1]} : vector<6x1916xf32> to vector<6x1883xf32>
    %39 = arith.maximumf %37, %38 : vector<6x1883xf32>
    %40 = vector.extract_strided_slice %36 {offsets = [0, 32], sizes = [6, 1883], strides = [1, 1]} : vector<6x1916xf32> to vector<6x1883xf32>
    %41 = vector.extract_strided_slice %36 {offsets = [0, 33], sizes = [6, 1883], strides = [1, 1]} : vector<6x1916xf32> to vector<6x1883xf32>
    %42 = arith.maximumf %40, %41 : vector<6x1883xf32>
    %43 = arith.maximumf %39, %42 : vector<6x1883xf32>
    %44 = arith.truncf %43 : vector<6x1883xf32> to vector<6x1883xbf16>
    %45 = vector.extract_strided_slice %44 {offsets = [0, 0], sizes = [6, 1619], strides = [1, 1]} : vector<6x1883xbf16> to vector<6x1619xbf16>
    %46 = vector.extract_strided_slice %44 {offsets = [0, 2], sizes = [6, 1619], strides = [1, 1]} : vector<6x1883xbf16> to vector<6x1619xbf16>
    %47 = vector.extract_strided_slice %44 {offsets = [0, 4], sizes = [6, 1619], strides = [1, 1]} : vector<6x1883xbf16> to vector<6x1619xbf16>
    %48 = vector.extract_strided_slice %44 {offsets = [0, 6], sizes = [6, 1619], strides = [1, 1]} : vector<6x1883xbf16> to vector<6x1619xbf16>
    %49 = vector.extract_strided_slice %44 {offsets = [0, 8], sizes = [6, 1619], strides = [1, 1]} : vector<6x1883xbf16> to vector<6x1619xbf16>
    %50 = vector.extract_strided_slice %44 {offsets = [0, 64], sizes = [6, 1619], strides = [1, 1]} : vector<6x1883xbf16> to vector<6x1619xbf16>
    %51 = vector.extract_strided_slice %44 {offsets = [0, 66], sizes = [6, 1619], strides = [1, 1]} : vector<6x1883xbf16> to vector<6x1619xbf16>
    %52 = vector.extract_strided_slice %44 {offsets = [0, 68], sizes = [6, 1619], strides = [1, 1]} : vector<6x1883xbf16> to vector<6x1619xbf16>
    %53 = vector.extract_strided_slice %44 {offsets = [0, 70], sizes = [6, 1619], strides = [1, 1]} : vector<6x1883xbf16> to vector<6x1619xbf16>
    %54 = vector.extract_strided_slice %44 {offsets = [0, 72], sizes = [6, 1619], strides = [1, 1]} : vector<6x1883xbf16> to vector<6x1619xbf16>
    %55 = vector.extract_strided_slice %44 {offsets = [0, 128], sizes = [6, 1619], strides = [1, 1]} : vector<6x1883xbf16> to vector<6x1619xbf16>
    %56 = vector.extract_strided_slice %44 {offsets = [0, 130], sizes = [6, 1619], strides = [1, 1]} : vector<6x1883xbf16> to vector<6x1619xbf16>
    %57 = vector.extract_strided_slice %44 {offsets = [0, 132], sizes = [6, 1619], strides = [1, 1]} : vector<6x1883xbf16> to vector<6x1619xbf16>
    %58 = vector.extract_strided_slice %44 {offsets = [0, 134], sizes = [6, 1619], strides = [1, 1]} : vector<6x1883xbf16> to vector<6x1619xbf16>
    %59 = vector.extract_strided_slice %44 {offsets = [0, 136], sizes = [6, 1619], strides = [1, 1]} : vector<6x1883xbf16> to vector<6x1619xbf16>
    %60 = vector.extract_strided_slice %44 {offsets = [0, 192], sizes = [6, 1619], strides = [1, 1]} : vector<6x1883xbf16> to vector<6x1619xbf16>
    %61 = vector.extract_strided_slice %44 {offsets = [0, 194], sizes = [6, 1619], strides = [1, 1]} : vector<6x1883xbf16> to vector<6x1619xbf16>
    %62 = vector.extract_strided_slice %44 {offsets = [0, 196], sizes = [6, 1619], strides = [1, 1]} : vector<6x1883xbf16> to vector<6x1619xbf16>
    %63 = vector.extract_strided_slice %44 {offsets = [0, 198], sizes = [6, 1619], strides = [1, 1]} : vector<6x1883xbf16> to vector<6x1619xbf16>
    %64 = vector.extract_strided_slice %44 {offsets = [0, 200], sizes = [6, 1619], strides = [1, 1]} : vector<6x1883xbf16> to vector<6x1619xbf16>
    %65 = vector.extract_strided_slice %44 {offsets = [0, 256], sizes = [6, 1619], strides = [1, 1]} : vector<6x1883xbf16> to vector<6x1619xbf16>
    %66 = vector.extract_strided_slice %44 {offsets = [0, 258], sizes = [6, 1619], strides = [1, 1]} : vector<6x1883xbf16> to vector<6x1619xbf16>
    %67 = vector.extract_strided_slice %44 {offsets = [0, 260], sizes = [6, 1619], strides = [1, 1]} : vector<6x1883xbf16> to vector<6x1619xbf16>
    %68 = vector.extract_strided_slice %44 {offsets = [0, 262], sizes = [6, 1619], strides = [1, 1]} : vector<6x1883xbf16> to vector<6x1619xbf16>
    %69 = vector.extract_strided_slice %44 {offsets = [0, 264], sizes = [6, 1619], strides = [1, 1]} : vector<6x1883xbf16> to vector<6x1619xbf16>
    %70 = tpu.concatenate %45, %46, %47, %48, %49, %50, %51, %52, %53, %54, %55, %56, %57, %58, %59, %60 in 0 : vector<6x1619xbf16>, vector<6x1619xbf16>, vector<6x1619xbf16>, vector<6x1619xbf16>, vector<6x1619xbf16>, vector<6x1619xbf16>, vector<6x1619xbf16>, vector<6x1619xbf16>, vector<6x1619xbf16>, vector<6x1619xbf16>, vector<6x1619xbf16>, vector<6x1619xbf16>, vector<6x1619xbf16>, vector<6x1619xbf16>, vector<6x1619xbf16>, vector<6x1619xbf16> -> vector<96x1619xbf16>
    %71 = tpu.concatenate %61, %62, %63, %64, %65, %66, %67, %68, %69 in 0 : vector<6x1619xbf16>, vector<6x1619xbf16>, vector<6x1619xbf16>, vector<6x1619xbf16>, vector<6x1619xbf16>, vector<6x1619xbf16>, vector<6x1619xbf16>, vector<6x1619xbf16>, vector<6x1619xbf16> -> vector<54x1619xbf16>
    %72 = tpu.concatenate %70, %71 in 0 : vector<96x1619xbf16>, vector<54x1619xbf16> -> vector<150x1619xbf16>
    %c0_6 = arith.constant 0 : index
    %c0_7 = arith.constant 0 : index
    %73 = vector.load %arg4[%c0_6, %c0_7] : memref<16x150xbf16, #tpu.memory_space<vmem>>, vector<16x150xbf16>
    %cst_8 = arith.constant dense<0.000000e+00> : vector<16x1619xf32>
    %74 = tpu.matmul %73, %72, %cst_8 {dimension_numbers = #tpu.dot_dimension_numbers<[1], [0], [0], [1], [0, 0, 1, 1], [], []>} : vector<16x150xbf16>, vector<150x1619xbf16>, vector<16x1619xf32> -> vector<16x1619xf32>
    %c0_9 = arith.constant 0 : index
    %c0_10 = arith.constant 0 : index
    %75 = vector.load %arg5[%c0_9, %c0_10] : memref<16x1xf32, #tpu.memory_space<vmem>>, vector<16x1xf32>
    %76 = vector.broadcast %75 : vector<16x1xf32> to vector<16x1619xf32>
    %77 = arith.addf %74, %76 : vector<16x1619xf32>
    %cst_11 = arith.constant 0.000000e+00 : f32
    %78 = vector.broadcast %cst_11 : f32 to vector<16x1619xf32>
    %79 = arith.maximumf %77, %78 : vector<16x1619xf32>
    %80 = vector.extract_strided_slice %79 {offsets = [0, 0], sizes = [16, 1553], strides = [1, 1]} : vector<16x1619xf32> to vector<16x1553xf32>
    %81 = vector.extract_strided_slice %79 {offsets = [0, 2], sizes = [16, 1553], strides = [1, 1]} : vector<16x1619xf32> to vector<16x1553xf32>
    %82 = arith.maximumf %80, %81 : vector<16x1553xf32>
    %83 = vector.extract_strided_slice %79 {offsets = [0, 64], sizes = [16, 1553], strides = [1, 1]} : vector<16x1619xf32> to vector<16x1553xf32>
    %84 = vector.extract_strided_slice %79 {offsets = [0, 66], sizes = [16, 1553], strides = [1, 1]} : vector<16x1619xf32> to vector<16x1553xf32>
    %85 = arith.maximumf %83, %84 : vector<16x1553xf32>
    %86 = arith.maximumf %82, %85 : vector<16x1553xf32>
    %87 = arith.truncf %86 : vector<16x1553xf32> to vector<16x1553xbf16>
    %c0_12 = arith.constant 0 : index
    %c0_13 = arith.constant 0 : index
    %88 = vector.load %arg6[%c0_12, %c0_13] : memref<1553x50xbf16, #tpu.memory_space<vmem>>, vector<1553x50xbf16>
    %cst_14 = arith.constant dense<0.000000e+00> : vector<16x50xf32>
    %89 = tpu.matmul %87, %88, %cst_14 {dimension_numbers = #tpu.dot_dimension_numbers<[1], [0], [0], [1], [0, 0, 1, 1], [], []>} : vector<16x1553xbf16>, vector<1553x50xbf16>, vector<16x50xf32> -> vector<16x50xf32>
    %90 = vector.extract_strided_slice %89 {offsets = [0, 0], sizes = [16, 2], strides = [1, 1]} : vector<16x50xf32> to vector<16x2xf32>
    %91 = vector.extract_strided_slice %89 {offsets = [0, 2], sizes = [16, 2], strides = [1, 1]} : vector<16x50xf32> to vector<16x2xf32>
    %92 = vector.extract_strided_slice %89 {offsets = [0, 4], sizes = [16, 2], strides = [1, 1]} : vector<16x50xf32> to vector<16x2xf32>
    %93 = vector.extract_strided_slice %89 {offsets = [0, 6], sizes = [16, 2], strides = [1, 1]} : vector<16x50xf32> to vector<16x2xf32>
    %94 = vector.extract_strided_slice %89 {offsets = [0, 8], sizes = [16, 2], strides = [1, 1]} : vector<16x50xf32> to vector<16x2xf32>
    %95 = vector.extract_strided_slice %89 {offsets = [0, 10], sizes = [16, 2], strides = [1, 1]} : vector<16x50xf32> to vector<16x2xf32>
    %96 = vector.extract_strided_slice %89 {offsets = [0, 12], sizes = [16, 2], strides = [1, 1]} : vector<16x50xf32> to vector<16x2xf32>
    %97 = vector.extract_strided_slice %89 {offsets = [0, 14], sizes = [16, 2], strides = [1, 1]} : vector<16x50xf32> to vector<16x2xf32>
    %98 = vector.extract_strided_slice %89 {offsets = [0, 16], sizes = [16, 2], strides = [1, 1]} : vector<16x50xf32> to vector<16x2xf32>
    %99 = vector.extract_strided_slice %89 {offsets = [0, 18], sizes = [16, 2], strides = [1, 1]} : vector<16x50xf32> to vector<16x2xf32>
    %100 = vector.extract_strided_slice %89 {offsets = [0, 20], sizes = [16, 2], strides = [1, 1]} : vector<16x50xf32> to vector<16x2xf32>
    %101 = vector.extract_strided_slice %89 {offsets = [0, 22], sizes = [16, 2], strides = [1, 1]} : vector<16x50xf32> to vector<16x2xf32>
    %102 = vector.extract_strided_slice %89 {offsets = [0, 24], sizes = [16, 2], strides = [1, 1]} : vector<16x50xf32> to vector<16x2xf32>
    %103 = vector.extract_strided_slice %89 {offsets = [0, 26], sizes = [16, 2], strides = [1, 1]} : vector<16x50xf32> to vector<16x2xf32>
    %104 = vector.extract_strided_slice %89 {offsets = [0, 28], sizes = [16, 2], strides = [1, 1]} : vector<16x50xf32> to vector<16x2xf32>
    %105 = vector.extract_strided_slice %89 {offsets = [0, 30], sizes = [16, 2], strides = [1, 1]} : vector<16x50xf32> to vector<16x2xf32>
    %106 = vector.extract_strided_slice %89 {offsets = [0, 32], sizes = [16, 2], strides = [1, 1]} : vector<16x50xf32> to vector<16x2xf32>
    %107 = vector.extract_strided_slice %89 {offsets = [0, 34], sizes = [16, 2], strides = [1, 1]} : vector<16x50xf32> to vector<16x2xf32>
    %108 = vector.extract_strided_slice %89 {offsets = [0, 36], sizes = [16, 2], strides = [1, 1]} : vector<16x50xf32> to vector<16x2xf32>
    %109 = vector.extract_strided_slice %89 {offsets = [0, 38], sizes = [16, 2], strides = [1, 1]} : vector<16x50xf32> to vector<16x2xf32>
    %110 = vector.extract_strided_slice %89 {offsets = [0, 40], sizes = [16, 2], strides = [1, 1]} : vector<16x50xf32> to vector<16x2xf32>
    %111 = vector.extract_strided_slice %89 {offsets = [0, 42], sizes = [16, 2], strides = [1, 1]} : vector<16x50xf32> to vector<16x2xf32>
    %112 = vector.extract_strided_slice %89 {offsets = [0, 44], sizes = [16, 2], strides = [1, 1]} : vector<16x50xf32> to vector<16x2xf32>
    %113 = vector.extract_strided_slice %89 {offsets = [0, 46], sizes = [16, 2], strides = [1, 1]} : vector<16x50xf32> to vector<16x2xf32>
    %114 = vector.extract_strided_slice %89 {offsets = [0, 48], sizes = [16, 2], strides = [1, 1]} : vector<16x50xf32> to vector<16x2xf32>
    %115 = tpu.concatenate %90, %91, %92, %93, %94, %95, %96, %97, %98, %99, %100, %101, %102, %103, %104, %105 in 0 : vector<16x2xf32>, vector<16x2xf32>, vector<16x2xf32>, vector<16x2xf32>, vector<16x2xf32>, vector<16x2xf32>, vector<16x2xf32>, vector<16x2xf32>, vector<16x2xf32>, vector<16x2xf32>, vector<16x2xf32>, vector<16x2xf32>, vector<16x2xf32>, vector<16x2xf32>, vector<16x2xf32>, vector<16x2xf32> -> vector<256x2xf32>
    %116 = tpu.concatenate %106, %107, %108, %109, %110, %111, %112, %113, %114 in 0 : vector<16x2xf32>, vector<16x2xf32>, vector<16x2xf32>, vector<16x2xf32>, vector<16x2xf32>, vector<16x2xf32>, vector<16x2xf32>, vector<16x2xf32>, vector<16x2xf32> -> vector<144x2xf32>
    %117 = tpu.concatenate %115, %116 in 0 : vector<256x2xf32>, vector<144x2xf32> -> vector<400x2xf32>
    %c0_15 = arith.constant 0 : index
    %c0_16 = arith.constant 0 : index
    %118 = vector.load %arg7[%c0_15, %c0_16] : memref<120x400xf32, #tpu.memory_space<vmem>>, vector<120x400xf32>
    %cst_17 = arith.constant dense<0.000000e+00> : vector<120x2xf32>
    %119 = tpu.matmul %118, %117, %cst_17 {dimension_numbers = #tpu.dot_dimension_numbers<[1], [0], [0], [1], [0, 0, 1, 1], [], []>} : vector<120x400xf32>, vector<400x2xf32>, vector<120x2xf32> -> vector<120x2xf32>
    %c0_18 = arith.constant 0 : index
    %c0_19 = arith.constant 0 : index
    %120 = vector.load %arg8[%c0_18, %c0_19] : memref<120x1xf32, #tpu.memory_space<vmem>>, vector<120x1xf32>
    %121 = vector.broadcast %120 : vector<120x1xf32> to vector<120x2xf32>
    %122 = arith.addf %119, %121 : vector<120x2xf32>
    %cst_20 = arith.constant 0.000000e+00 : f32
    %123 = vector.broadcast %cst_20 : f32 to vector<120x2xf32>
    %124 = arith.maximumf %122, %123 : vector<120x2xf32>
    %c0_21 = arith.constant 0 : index
    %c0_22 = arith.constant 0 : index
    %125 = vector.load %arg9[%c0_21, %c0_22] : memref<84x120xf32, #tpu.memory_space<vmem>>, vector<84x120xf32>
    %cst_23 = arith.constant dense<0.000000e+00> : vector<84x2xf32>
    %126 = tpu.matmul %125, %124, %cst_23 {dimension_numbers = #tpu.dot_dimension_numbers<[1], [0], [0], [1], [0, 0, 1, 1], [], []>} : vector<84x120xf32>, vector<120x2xf32>, vector<84x2xf32> -> vector<84x2xf32>
    %c0_24 = arith.constant 0 : index
    %c0_25 = arith.constant 0 : index
    %127 = vector.load %arg10[%c0_24, %c0_25] : memref<84x1xf32, #tpu.memory_space<vmem>>, vector<84x1xf32>
    %128 = vector.broadcast %127 : vector<84x1xf32> to vector<84x2xf32>
    %129 = arith.addf %126, %128 : vector<84x2xf32>
    %cst_26 = arith.constant 0.000000e+00 : f32
    %130 = vector.broadcast %cst_26 : f32 to vector<84x2xf32>
    %131 = arith.maximumf %129, %130 : vector<84x2xf32>
    %c0_27 = arith.constant 0 : index
    %c0_28 = arith.constant 0 : index
    %132 = vector.load %arg11[%c0_27, %c0_28] : memref<128x84xf32, #tpu.memory_space<vmem>>, vector<128x84xf32>
    %cst_29 = arith.constant dense<0.000000e+00> : vector<128x2xf32>
    %133 = tpu.matmul %132, %131, %cst_29 {dimension_numbers = #tpu.dot_dimension_numbers<[1], [0], [0], [1], [0, 0, 1, 1], [], []>} : vector<128x84xf32>, vector<84x2xf32>, vector<128x2xf32> -> vector<128x2xf32>
    %c0_30 = arith.constant 0 : index
    %c0_31 = arith.constant 0 : index
    %134 = vector.load %arg12[%c0_30, %c0_31] : memref<128x1xf32, #tpu.memory_space<vmem>>, vector<128x1xf32>
    %135 = vector.broadcast %134 : vector<128x1xf32> to vector<128x2xf32>
    %136 = arith.addf %133, %135 : vector<128x2xf32>
    %c0_32 = arith.constant 0 : index
    %c0_33 = arith.constant 0 : index
    %c0_34 = arith.constant 0 : index
    %137 = vector.load %arg13[%c0_32, %c0_33, %c0_34] : memref<1x128x2xf32, #tpu.memory_space<vmem>>, vector<1x128x2xf32>
    %138 = vector.shape_cast %137 : vector<1x128x2xf32> to vector<128x2xf32>
    %139 = vector.shape_cast %136 : vector<128x2xf32> to vector<1x128x2xf32>
    tpu.vector_store %arg13[%c0_32, %c0_33, %c0_34], %139 {strides = array<i32>} : memref<1x128x2xf32, #tpu.memory_space<vmem>>, vector<1x128x2xf32>,
    return
  }
  func.func @transform_0(%arg0: i32) -> (i32, i32) {
    %c0_i32 = arith.constant 0 : i32
    %c0_i32_0 = arith.constant 0 : i32
    return %c0_i32, %arg0 : i32, i32
  }
  func.func @transform_1(%arg0: i32) -> (i32, i32) {
    %c0_i32 = arith.constant 0 : i32
    %c0_i32_0 = arith.constant 0 : i32
    %c0_i32_1 = arith.constant 0 : i32
    return %c0_i32, %c0_i32_0 : i32, i32
  }
  func.func @transform_2(%arg0: i32) -> (i32, i32) {
    %c0_i32 = arith.constant 0 : i32
    %c0_i32_0 = arith.constant 0 : i32
    %c0_i32_1 = arith.constant 0 : i32
    return %c0_i32, %c0_i32_0 : i32, i32
  }
  func.func @transform_3(%arg0: i32) -> (i32, i32) {
    %c0_i32 = arith.constant 0 : i32
    %c0_i32_0 = arith.constant 0 : i32
    %c0_i32_1 = arith.constant 0 : i32
    return %c0_i32, %c0_i32_0 : i32, i32
  }
  func.func @transform_4(%arg0: i32) -> (i32, i32) {
    %c0_i32 = arith.constant 0 : i32
    %c0_i32_0 = arith.constant 0 : i32
    %c0_i32_1 = arith.constant 0 : i32
    return %c0_i32, %c0_i32_0 : i32, i32
  }
  func.func @transform_5(%arg0: i32) -> (i32, i32) {
    %c0_i32 = arith.constant 0 : i32
    %c0_i32_0 = arith.constant 0 : i32
    %c0_i32_1 = arith.constant 0 : i32
    return %c0_i32, %c0_i32_0 : i32, i32
  }
  func.func @transform_6(%arg0: i32) -> (i32, i32) {
    %c0_i32 = arith.constant 0 : i32
    %c0_i32_0 = arith.constant 0 : i32
    %c0_i32_1 = arith.constant 0 : i32
    return %c0_i32, %c0_i32_0 : i32, i32
  }
  func.func @transform_7(%arg0: i32) -> (i32, i32) {
    %c0_i32 = arith.constant 0 : i32
    %c0_i32_0 = arith.constant 0 : i32
    %c0_i32_1 = arith.constant 0 : i32
    return %c0_i32, %c0_i32_0 : i32, i32
  }
  func.func @transform_8(%arg0: i32) -> (i32, i32) {
    %c0_i32 = arith.constant 0 : i32
    %c0_i32_0 = arith.constant 0 : i32
    %c0_i32_1 = arith.constant 0 : i32
    return %c0_i32, %c0_i32_0 : i32, i32
  }
  func.func @transform_9(%arg0: i32) -> (i32, i32) {
    %c0_i32 = arith.constant 0 : i32
    %c0_i32_0 = arith.constant 0 : i32
    %c0_i32_1 = arith.constant 0 : i32
    return %c0_i32, %c0_i32_0 : i32, i32
  }
  func.func @transform_10(%arg0: i32) -> (i32, i32) {
    %c0_i32 = arith.constant 0 : i32
    %c0_i32_0 = arith.constant 0 : i32
    %c0_i32_1 = arith.constant 0 : i32
    return %c0_i32, %c0_i32_0 : i32, i32
  }
  func.func @transform_11(%arg0: i32) -> (i32, i32) {
    %c0_i32 = arith.constant 0 : i32
    %c0_i32_0 = arith.constant 0 : i32
    %c0_i32_1 = arith.constant 0 : i32
    return %c0_i32, %c0_i32_0 : i32, i32
  }
  func.func @transform_12(%arg0: i32) -> (i32, i32, i32) {
    %c0_i32 = arith.constant 0 : i32
    %c0_i32_0 = arith.constant 0 : i32
    %c0_i32_1 = arith.constant 0 : i32
    return %arg0, %c0_i32, %c0_i32_0 : i32, i32, i32
  }
}

</mosaic_0001>

<bundles_post_ra>
// kernel: net_forward.1
= control target key start
LH: loop header
LB: loop body
LE: loop exit
PB: predicated region body
PF: predicated region fallthrough
CT: control target
= control target key end

     0   :  { %s8727_s27 = smov 127   ;;  %s8728_s28 = smov 126   ;;  %vm15558_vm0 = vcmask 1039360   ;;  %vm15515_vm1 = vcmask 1041408   ;;  %vm1533_vm2 = vsmask.f32 1280  ;;  %s15393_s0 = inlined_call_operand.vmem [shape: f32[3,2048], index: 0, kind: input, shape index: {}]   ;;  %s15394_s1 = inlined_call_operand.vmem [shape: bf16[6,75], index: 1, kind: input, shape index: {}]   ;;  %s15395_s2 = inlined_call_operand.vmem [shape: f32[6,1], index: 2, kind: input, shape index: {}]   ;;  %s15396_s3 = inlined_call_operand.vmem [shape: bf16[16,150], index: 3, kind: input, shape index: {}]   ;;  %s15397_s4 = inlined_call_operand.vmem [shape: f32[16,1], index: 4, kind: input, shape index: {}]   ;;  %s15398_s5 = inlined_call_operand.vmem [shape: bf16[1553,50], index: 5, kind: input, shape index: {}]   ;;  %s15399_s6 = inlined_call_operand.vmem [shape: f32[120,400], index: 6, kind: input, shape index: {}]   ;;  %s15400_s7 = inlined_call_operand.vmem [shape: f32[120,1], index: 7, kind: input, shape index: {}]   ;;  %s15401_s9 = inlined_call_operand.vmem [shape: f32[84,1], index: 9, kind: input, shape index: {}]   ;;  %s15402_s11 = inlined_call_operand.vmem [shape: f32[128,1], index: 11, kind: input, shape index: {}]   ;;  %s15403_s8 = inlined_call_operand.vmem [shape: f32[84,120], index: 8, kind: input, shape index: {}]   ;;  %s15404_s10 = inlined_call_operand.vmem [shape: f32[128,84], index: 10, kind: input, shape index: {}]   ;;  %s15405_s12 = inlined_call_operand.vmem [shape: f32[1,128,2], index: 12, kind: output, shape index: {}]  }
   0x1   :  { %v43_v0 = vld [vmem:[%s15393_s0 + $0x8] sm:$0x77]  ;;  %v42_v1 = vld [vmem:[%s15393_s0] sm:$0x77]  ;;  %v44_v2 = vld [vmem:[%s15393_s0 + $0x10] sm:$0x77] }
   0x2   :  { %v8839_v3 = vpack.c.bf16 %v43_v0, %v43_v0  ;;  %v59_v4 = vcombine.high %v43_v0, %v43_v0  ;;  %v8841_v5 = vpack.c.bf16 %v42_v1, %v42_v1  ;;  %v8843_v6 = vpack.c.bf16 %v44_v2, %v44_v2  ;;  %s8729_s29 = smov 125   ;;  %s8730_s30 = smov 97   ;;  %vm9534_vm7 = vmand %vm15515_vm1, %vm1533_vm2 }
   0x3   :  { %v58_v7 = vcombine.high %v42_v1, %v42_v1  ;;  %v60_v8 = vcombine.high %v44_v2, %v44_v2  ;;  %s8731_s13 = smov 96   ;;  %s8732_s16 = smov 95   ;;  %vm15559_vm3 = vcmask 1031168   ;;  %vm15520_vm4 = vcmask 1042432  }
   0x4   :  { %v8846_v9 = vshrl.u32 %v8839_v3, 16  ;;  %v8849_v10 = vshll.u32 %v8839_v3, 16  ;;  %v8852_v11 = vshrl.u32 %v8841_v5, 16  ;;  %v8855_v12 = vshll.u32 %v8841_v5, 16  ;;  %s8733_s17 = smov 94   ;;  %s8734_s20 = smov 93  }
   0x5   :  { %v8858_v13 = vshrl.u32 %v8843_v6, 16  ;;  %v8861_v14 = vshll.u32 %v8843_v6, 16  ;;  %v8863_v15 = vpack.c.bf16 %v59_v4, %v59_v4  ;;  %v8877_v26 = vpack.c.bf16 %v58_v7, %v58_v7  ;;  %s8735_s23 = smov 124   ;;  %s8736_s24 = smov 92  }
   0x6   :  { %v109_v16 = vrot.slane %v8846_v9, 6  ;;  %v112_v17 = vrot.slane %v8849_v10, 7  ;;  %v93_v18 = vrot.slane %v8852_v11, 6  ;;  %v96_v19 = vrot.slane %v8855_v12, 7  ;;  %s8737_s25 = smov 64   ;;  %s8738_s26 = smov 63  }
   0x7   :  { %v125_v20 = vrot.slane %v8858_v13, 6  ;;  %v128_v21 = vrot.slane %v8861_v14, 7  ;;  %v8872_v22 = vshrl.u32 %v8863_v15, 16  ;;  %v8875_v23 = vshll.u32 %v8863_v15, 16  ;;  %s8739_s14 = smov 62   ;;  %s8740_s15 = smov 61  }
   0x8   :  { %v113_v24 = vor.u32 %v112_v17, %v109_v16  ;;  %v97_v25 = vor.u32 %v96_v19, %v93_v18  ;;  %v8879_v27 = vpack.c.bf16 %v60_v8, %v60_v8  ;;  %v287_v28 = vrot.slane %v8839_v3, 5  ;;  %s8741_s18 = smov 60   ;;  %s15570_s22 = smov 32  }
   0x9   :  { %v117_v29 = vrot.slane %v8872_v22, 6  ;;  %v120_v30 = vrot.slane %v8875_v23, 7  ;;  %v129_v31 = vor.u32 %v128_v21, %v125_v20  ;;  %v8893_v34 = vshrl.u32 %v8877_v26, 16  ;;  %s8743_s19 = smov 31   ;;  %s8762_s21 = smov 102  }
   0xa   :  { %15769 = vst [vmem:[#allocation2_spill] sm:$0xff] %v8879_v27  ;;  %214 = vrot.lane.b32.xlu0 %v113_v24, %s8727_s27  ;;  %210 = vrot.lane.b32.xlu1 %v97_v25, %s8727_s27  ;;  %v8887_v32 = vshrl.u32 %v8879_v27, 16  ;;  %v8890_v33 = vshll.u32 %v8879_v27, 16  ;;  %v8896_v35 = vshll.u32 %v8877_v26, 16  ;;  %v286_v37 = vrot.slane %v8877_v26, 5 }
   0xb   :  { %v121_v36 = vor.u32 %v120_v30, %v117_v29  ;;  %v101_v40 = vrot.slane %v8893_v34, 6  ;;  %v285_v44 = vrot.slane %v8841_v5, 5  ;;  %v288_v45 = vrot.slane %v8863_v15, 5  ;;  %v45_v24 = vld [vmem:[%s15393_s0 + $0x18] sm:$0x77] }
   0xc   :  { %15770 = vst [vmem:[#allocation3_spill] sm:$0xff] %v8887_v32  ;;  %15771 = vst [vmem:[#allocation4_spill] sm:$0xff] %v8890_v33  ;;  %v133_v38 = vrot.slane %v8887_v32, 6  ;;  %v136_v39 = vrot.slane %v8890_v33, 7  ;;  %v104_v41 = vrot.slane %v8896_v35, 7  ;;  %v290_v46 = vrot.slane %v8879_v27, 5 }
   0xd   :  { %v289_v47 = vrot.slane %v8843_v6, 5  ;;  %v351_v48 = vrot.slane %v8846_v9, 3  ;;  %v352_v49 = vrot.slane %v8849_v10, 4  ;;  %v348_v50 = vrot.slane %v8893_v34, 3 }
   0xe   :  { %218 = vrot.lane.b32.xlu0 %v129_v31, %s8727_s27  ;;  %304 = vrot.lane.b32.xlu1 %v287_v28, %s8728_s28  ;;  %v137_v42 = vor.u32 %v136_v39, %v133_v38  ;;  %v105_v43 = vor.u32 %v104_v41, %v101_v40  ;;  %v349_v51 = vrot.slane %v8896_v35, 4  ;;  %v345_v52 = vrot.slane %v8852_v11, 3 }
   0xf   :  { %v346_v53 = vrot.slane %v8855_v12, 4  ;;  %v353_v54 = vor.u32 %v352_v49, %v351_v48  ;;  %v354_v56 = vrot.slane %v8872_v22, 3  ;;  %v355_v57 = vrot.slane %v8875_v23, 4 }
  0x10   :  { %v350_v55 = vor.u32 %v349_v51, %v348_v50  ;;  %v360_v59 = vrot.slane %v8887_v32, 3  ;;  %v361_v61 = vrot.slane %v8890_v33, 4  ;;  %v357_v62 = vrot.slane %v8858_v13, 3 }
  0x11   :  { %v347_v58 = vor.u32 %v346_v53, %v345_v52  ;;  %v356_v60 = vor.u32 %v355_v57, %v354_v56  ;;  %v358_v63 = vrot.slane %v8861_v14, 4  ;;  %v15413_v2 = vrot.slane %v8839_v3, 2 }
  0x12   :  { %216 = vrot.lane.b32.xlu1 %v121_v36, %s8727_s27  ;;  %302 = vrot.lane.b32.xlu0 %v286_v37, %s8728_s28  ;;  %v362_v0 = vor.u32 %v361_v61, %v360_v59  ;;  %v15414_v4 = vrot.slane %v8877_v26, 2  ;;  %v511_v7 = vrot.slane %v8896_v35, 1  ;;  %v512_v8 = vrot.slane %v8849_v10, 1 }
  0x13   :  { %v359_v1 = vor.u32 %v358_v63, %v357_v62  ;;  %v15411_v17 = vrot.slane %v8863_v15, 2  ;;  %v513_v18 = vrot.slane %v8875_v23, 1  ;;  %v514_v19 = vrot.slane %v8861_v14, 1  ;;  %v46_v62 = vld [vmem:[%s15393_s0 + $0x20] sm:$0x77] }
  0x14   :  { %v8253_v16 = vpack.i.bf16 %v512_v8, %v511_v7  ;;  %v530_v20 = vor.u32 %v511_v7, %v8893_v34  ;;  %v531_v28 = vor.u32 %v512_v8, %v8846_v9  ;;  %v8960_v29 = vpack.c.bf16 %v45_v24, %v45_v24 }
  0x15   :  { %v8258_v21 = vpack.i.bf16 %v514_v19, %v513_v18  ;;  %v532_v25 = vor.u32 %v513_v18, %v8872_v22  ;;  %v660_v30 = vrot.slane %v8839_v3, 7  ;;  %v659_v31 = vrot.slane %v8877_v26, 7 }
  0x16   :  { %220 = vrot.lane.b32.xlu1 %v137_v42, %s8727_s27  ;;  %212 = vrot.lane.b32.xlu0 %v105_v43, %s8727_s27  ;;  %15772 = vst [vmem:[#allocation5_spill] sm:$0xff] %v8960_v29  ;;  %v8967_v36 = vshll.u32 %v8960_v29, 16  ;;  %v15412_v37 = vrot.slane %v8843_v6, 2  ;;  %v661_v38 = vrot.slane %v8863_v15, 7  ;;  %v515_v39 = vrot.slane %v8890_v33, 1 }
  0x17   :  { %v15409_v42 = vrot.slane %v8879_v27, 2  ;;  %v729_v48 = vrot.slane %v8849_v10, 6  ;;  %v725_v49 = vrot.slane %v8893_v34, 5  ;;  %v726_v50 = vrot.slane %v8896_v35, 6 }
  0x18   :  { %15773 = vst [vmem:[#allocation6_spill] sm:$0xff] %v8967_v36  ;;  %v516_v40 = vrot.slane %v8967_v36, 1  ;;  %v534_v43 = vor.u32 %v515_v39, %v8887_v32  ;;  %v734_v51 = vrot.slane %v8858_v13, 5  ;;  %v735_v52 = vrot.slane %v8861_v14, 6 }
  0x19   :  { %v732_v56 = vrot.slane %v8875_v23, 6  ;;  %v61_v57 = vcombine.high %v45_v24, %v45_v24  ;;  %v738_v61 = vrot.slane %v8890_v33, 6  ;;  %v834_v63 = vrot.slane %v8877_v26, 4 }
  0x1a   :  { %300 = vrot.lane.b32.xlu1 %v285_v44, %s8728_s28  ;;  %306 = vrot.lane.b32.xlu0 %v288_v45, %s8728_s28  ;;  %v8263_v41 = vpack.i.bf16 %v516_v40, %v515_v39  ;;  %v533_v44 = vor.u32 %v514_v19, %v8858_v13  ;;  %v663_v45 = vrot.slane %v8879_v27, 7  ;;  %v62_v7 = vcombine.high %v46_v62, %v46_v62 }
  0x1b   :  { %v836_v8 = vrot.slane %v8863_v15, 4  ;;  %v9018_v18 = vpack.c.bf16 %v46_v62, %v46_v62  ;;  %v835_v19 = vrot.slane %v8839_v3, 4  ;;  %vm15521_vm5 = vcmask 1022976  }
  0x1c   :  { %v9029_v24 = vpack.c.bf16 %v62_v7, %v62_v7  ;;  %vm15514_vm6 = vcmask 1044480   ;;  %vm1612_vm8 = vsmask.f32 4352  ;;  %vm15519_vm9 = vcmask 793600  }
  0x1d   :  { %15776 = vst [vmem:[#allocation9_spill] sm:$0xff] %v9018_v18  ;;  %v9039_v39 = vshll.u32 %v9018_v18, 16  ;;  %vm15562_vm10 = vcmask 785408   ;;  %vm1690_vm11 = vcmask 1047552   ;;  %vm1691_vm12 = vsmask.f32 7424  ;;  %vm9552_vm13 = vmand %vm15514_vm6, %vm1612_vm8 }
  0x1e   :  { %310 = vrot.lane.b32.xlu1 %v290_v46, %s8728_s28  ;;  %308 = vrot.lane.b32.xlu0 %v289_v47, %s8728_s28  ;;  %v662_v46 = vrot.slane %v8843_v6, 7  ;;  %v728_v47 = vrot.slane %v8846_v9, 5  ;;  %15779 = vst [vmem:[#allocation12_spill] sm:$0xff] %v9029_v24  ;;  %vm15563_vm14 = vcmask 1045504   ;;  %vm9580_vm15 = vmand %vm1690_vm11, %vm1691_vm12  ;;  %vm15513_vm2 = vcmask 1014784  }
  0x1f   :  { %15781 = vst [vmem:[#allocation14_spill] sm:$0xff] %v9039_v39  ;;  %vm15522_vm8 = vcmask 777216   ;;  %vm1770_vm11 = vsmask.f32 2304  ;;  %vm15523_vm12 = vcmask 769024   ;;  %vm15564_vm6 = vcmask 1040384  }
  0x20   :  { %v730_v53 = vor.u32 %v729_v48, %v728_v47  ;;  %vm9763_vm1 = vmand %vm15520_vm4, %vm1770_vm11  ;;  %vm15565_vm11 = vcmask 1043456  }
  0x22   :  { %394 = vrot.lane.b32.xlu1 %v353_v54, %s8729_s29  ;;  %392 = vrot.lane.b32.xlu0 %v350_v55, %s8729_s29  ;;  %v727_v54 = vor.u32 %v726_v50, %v725_v49  ;;  %v731_v55 = vrot.slane %v8872_v22, 5 }
  0x24   :  { %v733_v59 = vor.u32 %v732_v56, %v731_v55  ;;  %v291_v55 = vrot.slane %v8960_v29, 5 }
  0x26   :  { %390 = vrot.lane.b32.xlu1 %v347_v58, %s8729_s29  ;;  %396 = vrot.lane.b32.xlu0 %v356_v60, %s8729_s29  ;;  %v736_v58 = vor.u32 %v735_v52, %v734_v51  ;;  %v737_v60 = vrot.slane %v8887_v32, 5  ;;  %v160_v51 = vrot.slane %v9039_v39, 7  ;;  %v510_v32 = vrot.slane %v8855_v12, 1 }
  0x2a   :  { %400 = vrot.lane.b32.xlu1 %v362_v0, %s8729_s29  ;;  %398 = vrot.lane.b32.xlu0 %v359_v1, %s8729_s29  ;;  %v739_v0 = vor.u32 %v738_v61, %v737_v60  ;;  %v9012_v1 = vpack.c.bf16 %v61_v57, %v61_v57  ;;  %v364_v61 = vrot.slane %v8967_v36, 4 }
  0x2c   :  { %15774 = vst [vmem:[#allocation7_spill] sm:$0xff] %v9012_v1 }
  0x2e   :  { %2126 = vrot.lane.b32.xlu1 %v15413_v2, %s8730_s30  ;;  %2124 = vrot.lane.b32.xlu0 %v15414_v4, %s8730_s30 }
  0x32   :  { %8254 = vrot.lane.b32.xlu1 %v8253_v16, %s8731_s13  ;;  %2128 = vrot.lane.b32.xlu0 %v15411_v17, %s8730_s30  ;;  %v9016_v16 = vshrl.u32 %v8960_v29, 16 }
  0x34   :  { %15775 = vst [vmem:[#allocation8_spill] sm:$0xff] %v9016_v16  ;;  %v363_v60 = vrot.slane %v9016_v16, 3 }
  0x36   :  { %581 = vrot.lane.b32.xlu1 %v530_v20, %s8731_s13  ;;  %8259 = vrot.lane.b32.xlu0 %v8258_v21, %s8731_s13  ;;  %v9024_v20 = vshrl.u32 %v9012_v1, 16  ;;  %v9027_v21 = vshll.u32 %v9012_v1, 16 }
  0x38   :  { %15777 = vst [vmem:[#allocation10_spill] sm:$0xff] %v9024_v20  ;;  %15778 = vst [vmem:[#allocation11_spill] sm:$0xff] %v9027_v21  ;;  %v366_v56 = vrot.slane %v9024_v20, 3  ;;  %v367_v57 = vrot.slane %v9027_v21, 4 }
  0x3a   :  { %585 = vrot.lane.b32.xlu1 %v532_v25, %s8731_s13  ;;  %583 = vrot.lane.b32.xlu0 %v531_v28, %s8731_s13  ;;  %v838_v25 = vrot.slane %v8879_v27, 4  ;;  %v837_v28 = vrot.slane %v8843_v6, 4  ;;  %v368_v62 = vor.u32 %v367_v57, %v366_v56 }
  0x3e   :  { %678 = vrot.lane.b32.xlu1 %v660_v30, %s8732_s16  ;;  %676 = vrot.lane.b32.xlu0 %v659_v31, %s8732_s16  ;;  %v141_v30 = vrot.slane %v9016_v16, 6  ;;  %v144_v31 = vrot.slane %v8967_v36, 7 }
  0x42   :  { %2130 = vrot.lane.b32.xlu1 %v15412_v37, %s8730_s30  ;;  %680 = vrot.lane.b32.xlu0 %v661_v38, %s8732_s16  ;;  %v9036_v38 = vshrl.u32 %v9018_v18, 16 }
  0x44   :  { %15780 = vst [vmem:[#allocation13_spill] sm:$0xff] %v9036_v38  ;;  %v157_v47 = vrot.slane %v9036_v38, 6 }
  0x46   :  { %8264 = vrot.lane.b32.xlu1 %v8263_v41, %s8731_s13  ;;  %2132 = vrot.lane.b32.xlu0 %v15409_v42, %s8730_s30  ;;  %v149_v41 = vrot.slane %v9024_v20, 6 }
  0x4a   :  { %589 = vrot.lane.b32.xlu1 %v534_v43, %s8731_s13  ;;  %587 = vrot.lane.b32.xlu0 %v533_v44, %s8731_s13  ;;  %v152_v43 = vrot.slane %v9027_v21, 7  ;;  %v9046_v44 = vshrl.u32 %v9029_v24, 16 }
  0x4c   :  { %15782 = vst [vmem:[#allocation15_spill] sm:$0xff] %v9046_v44  ;;  %v153_v48 = vor.u32 %v152_v43, %v149_v41  ;;  %v165_v49 = vrot.slane %v9046_v44, 6  ;;  %v517_v41 = vrot.slane %v9027_v21, 1  ;;  %v518_v43 = vrot.slane %v9039_v39, 1 }
  0x4e   :  { %684 = vrot.lane.b32.xlu1 %v663_v45, %s8732_s16  ;;  %682 = vrot.lane.b32.xlu0 %v662_v46, %s8732_s16  ;;  %v9049_v45 = vshll.u32 %v9029_v24, 16  ;;  %v145_v46 = vor.u32 %v144_v31, %v141_v30  ;;  %v15407_v30 = vrot.slane %v9012_v1, 2  ;;  %v15410_v31 = vrot.slane %v8960_v29, 2 }
  0x50   :  { %15783 = vst [vmem:[#allocation16_spill] sm:$0xff] %v9049_v45  ;;  %v168_v50 = vrot.slane %v9049_v45, 7  ;;  %v373_v7 = vrot.slane %v9049_v45, 4 }
  0x52   :  { %774 = vrot.lane.b32.xlu1 %v730_v53, %s8733_s17  ;;  %772 = vrot.lane.b32.xlu0 %v727_v54, %s8733_s17  ;;  %v169_v52 = vor.u32 %v168_v50, %v165_v49  ;;  %v161_v53 = vor.u32 %v160_v51, %v157_v47  ;;  %v292_v54 = vrot.slane %v9012_v1, 5  ;;  %v535_v49 = vor.u32 %v516_v40, %v9016_v16 }
  0x53   :  { %v8268_v50 = vpack.i.bf16 %v518_v43, %v517_v41 }
  0x56   :  { %778 = vrot.lane.b32.xlu1 %v736_v58, %s8733_s17  ;;  %776 = vrot.lane.b32.xlu0 %v733_v59, %s8733_s17  ;;  %v294_v58 = vrot.slane %v9029_v24, 5  ;;  %v293_v59 = vrot.slane %v9018_v18, 5 }
  0x5a   :  { %851 = vrot.lane.b32.xlu1 %v834_v63, %s8734_s20  ;;  %780 = vrot.lane.b32.xlu0 %v739_v0, %s8733_s17  ;;  %v372_v63 = vrot.slane %v9046_v44, 3  ;;  %v365_v0 = vor.u32 %v364_v61, %v363_v60  ;;  %v519_v60 = vrot.slane %v9049_v45, 1 }
  0x5e   :  { %855 = vrot.lane.b32.xlu1 %v836_v8, %s8734_s20  ;;  %853 = vrot.lane.b32.xlu0 %v835_v19, %s8734_s20  ;;  %v369_v8 = vrot.slane %v9036_v38, 3  ;;  %v370_v19 = vrot.slane %v9039_v39, 4 }
  0x62   :  { %859 = vrot.lane.b32.xlu1 %v838_v25, %s8734_s20  ;;  %857 = vrot.lane.b32.xlu0 %v837_v28, %s8734_s20  ;;  %v374_v25 = vor.u32 %v373_v7, %v372_v63  ;;  %v371_v28 = vor.u32 %v370_v19, %v369_v8  ;;  %v15406_v7 = vrot.slane %v9029_v24, 2 }
  0x66   :  { %224 = vrot.lane.b32.xlu1 %v153_v48, %s8727_s27  ;;  %222 = vrot.lane.b32.xlu0 %v145_v46, %s8727_s27  ;;  %v47_v46 = vld [vmem:[%s15393_s0 + $0x28] sm:$0x77] }
  0x67   :  { %v9101_v51 = vpack.c.bf16 %v47_v46, %v47_v46  ;;  %v63_v17 = vcombine.high %v47_v46, %v47_v46  ;;  %v839_v46 = vrot.slane %v8960_v29, 4 }
  0x69   :  { %15784 = vst [vmem:[#allocation17_spill] sm:$0xff] %v9101_v51  ;;  %v9112_v56 = vshll.u32 %v9101_v51, 16  ;;  %v15443_v33 = vrot.slane %v9101_v51, 2 }
  0x6a   :  { %228 = vrot.lane.b32.xlu1 %v169_v52, %s8727_s27  ;;  %226 = vrot.lane.b32.xlu0 %v161_v53, %s8727_s27 }
  0x6b   :  { %15785 = vst [vmem:[#allocation18_spill] sm:$0xff] %v9112_v56  ;;  %v15415_v61 = vrot.slane %v9112_v56, 1 }
  0x6e   :  { %314 = vrot.lane.b32.xlu1 %v292_v54, %s8728_s28  ;;  %312 = vrot.lane.b32.xlu0 %v291_v55, %s8728_s28  ;;  %v664_v54 = vrot.slane %v8960_v29, 7  ;;  %v536_v55 = vor.u32 %v517_v41, %v9024_v20 }
  0x72   :  { %318 = vrot.lane.b32.xlu1 %v294_v58, %s8728_s28  ;;  %316 = vrot.lane.b32.xlu0 %v293_v59, %s8728_s28  ;;  %v15408_v58 = vrot.slane %v9018_v18, 2  ;;  %v665_v59 = vrot.slane %v9012_v1, 7 }
  0x76   :  { %404 = vrot.lane.b32.xlu1 %v368_v62, %s8729_s29  ;;  %402 = vrot.lane.b32.xlu0 %v365_v0, %s8729_s29  ;;  %v8273_v0 = vpack.i.bf16 %v15415_v61, %v519_v60 }
  0x7a   :  { %408 = vrot.lane.b32.xlu1 %v374_v25, %s8729_s29  ;;  %406 = vrot.lane.b32.xlu0 %v371_v28, %s8729_s29  ;;  %v538_v25 = vor.u32 %v519_v60, %v9046_v44  ;;  %v537_v28 = vor.u32 %v518_v43, %v9036_v38  ;;  %v740_v60 = vrot.slane %v9016_v16, 5  ;;  %v741_v43 = vrot.slane %v8967_v36, 6 }
  0x7c   :  { %v9088_v47 = vpop.permute.xlu0 %214  ;;  %v9090_v48 = vpop.permute.xlu1 %210  ;;  %v742_v42 = vor.u32 %v741_v43, %v740_v60 }
  0x7e   :  { %2136 = vrot.lane.b32.xlu1 %v15407_v30, %s8730_s30  ;;  %2134 = vrot.lane.b32.xlu0 %v15410_v31, %s8730_s30  ;;  %v749_v30 = vrot.slane %v9046_v44, 5  ;;  %v747_v31 = vrot.slane %v9039_v39, 6 }
  0x80   :  { %v9103_v52 = vpop.permute.xlu0 %218  ;;  %v9105_v53 = vpop.permute.xlu1 %304 }
  0x82   :  { %591 = vrot.lane.b32.xlu1 %v535_v49, %s8731_s13  ;;  %8269 = vrot.lane.b32.xlu0 %v8268_v50, %s8731_s13  ;;  %v667_v50 = vrot.slane %v9029_v24, 7 }
  0x84   :  { %v9114_v57 = vpop.permute.xlu1 %216  ;;  %v9116_v40 = vpop.permute.xlu0 %302 }
  0x86   :  { %686 = vrot.lane.b32.xlu1 %v664_v54, %s8732_s16  ;;  %593 = vrot.lane.b32.xlu0 %v536_v55, %s8731_s13  ;;  %v666_v54 = vrot.slane %v9018_v18, 7  ;;  %v743_v55 = vrot.slane %v9024_v20, 5 }
  0x88   :  { %v9124_v62 = vpop.permute.xlu1 %220  ;;  %v9126_v63 = vpop.permute.xlu0 %212 }
  0x8a   :  { %2138 = vrot.lane.b32.xlu1 %v15408_v58, %s8730_s30  ;;  %688 = vrot.lane.b32.xlu0 %v665_v59, %s8732_s16  ;;  %v744_v59 = vrot.slane %v9027_v21, 6  ;;  %v750_v58 = vrot.slane %v9049_v45, 6  ;;  %v9173_v45 = vpack.c.bf16 %v63_v17, %v63_v17  ;;  %v9190_v17 = vshrl.u32 %v9101_v51, 16 }
  0x8b   :  { %v376_v21 = vrot.slane %v9112_v56, 4 }
  0x8c   :  { %v9135_v8 = vpop.permute.xlu1 %300  ;;  %v9137_v19 = vpop.permute.xlu0 %306  ;;  %v751_v4 = vor.u32 %v750_v58, %v749_v30  ;;  %15786 = vst [vmem:[#allocation19_spill] sm:$0xff] %v9173_v45  ;;  %15789 = vst [vmem:[#allocation22_spill] sm:$0xff] %v9190_v17  ;;  %v842_v58 = vrot.slane %v9029_v24, 4  ;;  %v173_v43 = vrot.slane %v9190_v17, 6  ;;  %v296_v20 = vrot.slane %v9173_v45, 5 }
  0x8d   :  { %v752_v36 = vrot.slane %v9190_v17, 5 }
  0x8e   :  { %8274 = vrot.lane.b32.xlu1 %v8273_v0, %s8731_s13  ;;  %2140 = vrot.lane.b32.xlu0 %v15406_v7, %s8730_s30 }
  0x90   :  { %v9145_v41 = vpop.permute.xlu1 %310  ;;  %v9147_v49 = vpop.permute.xlu0 %308 }
  0x92   :  { %597 = vrot.lane.b32.xlu1 %v538_v25, %s8731_s13  ;;  %595 = vrot.lane.b32.xlu0 %v537_v28, %s8731_s13  ;;  %v746_v25 = vrot.slane %v9036_v38, 5  ;;  %v745_v28 = vor.u32 %v744_v59, %v743_v55  ;;  %v840_v55 = vrot.slane %v9012_v1, 4  ;;  %v9184_v59 = vshrl.u32 %v9173_v45, 16 }
  0x93   :  { %v15440_v38 = vrot.slane %v9173_v45, 2 }
  0x94   :  { %v9157_v0 = vpop.permute.xlu1 %394  ;;  %v9159_v7 = vpop.permute.xlu0 %392  ;;  %v748_v61 = vor.u32 %v747_v31, %v746_v25  ;;  %15787 = vst [vmem:[#allocation20_spill] sm:$0xff] %v9184_v59  ;;  %v176_v25 = vrot.slane %v9112_v56, 7 }
  0x96   :  { %692 = vrot.lane.b32.xlu1 %v667_v50, %s8732_s16  ;;  %690 = vrot.lane.b32.xlu0 %v666_v54, %s8732_s16 }
  0x98   :  { %v9167_v37 = vpop.permute.xlu1 %390  ;;  %v9169_v2 = vpop.permute.xlu0 %396 }
  0x9a   :  { %784 = vrot.lane.b32.xlu1 %v745_v28, %s8733_s17  ;;  %782 = vrot.lane.b32.xlu0 %v742_v42, %s8733_s17  ;;  %v9187_v42 = vshll.u32 %v9173_v45, 16 }
  0x9c   :  { %v9175_v50 = vpop.permute.xlu1 %400  ;;  %v9177_v54 = vpop.permute.xlu0 %398  ;;  %15788 = vst [vmem:[#allocation21_spill] sm:$0xff] %v9187_v42  ;;  %v184_v60 = vrot.slane %v9187_v42, 7 }
  0x9e   :  { %788 = vrot.lane.b32.xlu1 %v751_v4, %s8733_s17  ;;  %786 = vrot.lane.b32.xlu0 %v748_v61, %s8733_s17  ;;  %v841_v4 = vrot.slane %v9018_v18, 4  ;;  %v181_v61 = vrot.slane %v9184_v59, 6  ;;  %v295_v18 = vrot.slane %v9101_v51, 5 }
  0xa0   :  { %v9192_v30 = vpop.permute.xlu1 %2126  ;;  %v9194_v31 = vpop.permute.xlu0 %2124  ;;  %v185_v24 = vor.u32 %v184_v60, %v181_v61  ;;  %v375_v61 = vrot.slane %v9190_v17, 3 }
  0xa2   :  { %863 = vrot.lane.b32.xlu1 %v840_v55, %s8734_s20  ;;  %861 = vrot.lane.b32.xlu0 %v839_v46, %s8734_s20  ;;  %v177_v55 = vor.u32 %v176_v25, %v173_v43 }
  0xa4   :  { %v9204_v28 = vpop.permute.xlu1 %8254  ;;  %v9206_v44 = vpop.permute.xlu0 %2128 }
  0xa6   :  { %867 = vrot.lane.b32.xlu1 %v842_v58, %s8734_s20  ;;  %865 = vrot.lane.b32.xlu0 %v841_v4, %s8734_s20  ;;  %v378_v58 = vrot.slane %v9184_v59, 3  ;;  %v379_v4 = vrot.slane %v9187_v42, 4 }
  0xa8   :  { %v9210_v1 = vpop.permute.xlu1 %581  ;;  %v9212_v46 = vpop.permute.xlu0 %8259  ;;  %v380_v25 = vor.u32 %v379_v4, %v378_v58 }
  0xaa   :  { %232 = vrot.lane.b32.xlu1 %v185_v24, %s8727_s27  ;;  %230 = vrot.lane.b32.xlu0 %v177_v55, %s8727_s27  ;;  %v377_v24 = vor.u32 %v376_v21, %v375_v61  ;;  %v15792_v21 = vrot.slane %v9112_v56, 1 }
  0xac   :  { %v9222_v60 = vpop.permute.xlu1 %585  ;;  %v9224_v43 = vpop.permute.xlu0 %583  ;;  %v539_v58 = vor.u32 %v15792_v21, %v9190_v17  ;;  %v669_v21 = vrot.slane %v9173_v45, 7 }
  0xad   :  { %15790 = vst [vmem:[#allocation23_spill] sm:$0xff] %v9222_v60 }
  0xae   :  { %322 = vrot.lane.b32.xlu1 %v296_v20, %s8728_s28  ;;  %320 = vrot.lane.b32.xlu0 %v295_v18, %s8728_s28  ;;  %v521_v20 = vrot.slane %v9187_v42, 1 }
  0xb0   :  { %v9228_v39 = vpop.permute.xlu1 %678  ;;  %v9230_v55 = vpop.permute.xlu0 %676  ;;  %v8278_v4 = vpack.i.bf16 %v510_v32, %v521_v20 }
  0xb2   :  { %412 = vrot.lane.b32.xlu1 %v380_v25, %s8729_s29  ;;  %410 = vrot.lane.b32.xlu0 %v377_v24, %s8729_s29  ;;  %v668_v24 = vrot.slane %v9101_v51, 7 }
  0xb4   :  { %v9238_v27 = vpop.permute.xlu1 %2130  ;;  %v9240_v18 = vpop.permute.xlu0 %680 }
  0xb5   :  { %15791 = vst [vmem:[#allocation24_spill] sm:$0xff] %v9240_v18  ;;  %v906_v18 = vrot.slane %v8872_v22, 2 }
  0xb6   :  { %2144 = vrot.lane.b32.xlu1 %v15440_v38, %s8730_s30  ;;  %2142 = vrot.lane.b32.xlu0 %v15443_v33, %s8730_s30  ;;  %v540_v38 = vor.u32 %v521_v20, %v9184_v59  ;;  %v15797_v20 = vrot.slane %v8877_v26, 2 }
  0xb8   :  { %v9251_v61 = vpop.permute.xlu1 %8264  ;;  %v9253_v25 = vpop.permute.xlu0 %2132 }
  0xba   :  { %599 = vrot.lane.b32.xlu1 %v539_v58, %s8731_s13  ;;  %8279 = vrot.lane.b32.xlu0 %v8278_v4, %s8731_s13  ;;  %v753_v58 = vrot.slane %v9112_v56, 6  ;;  %v15798_v56 = vrot.slane %v8839_v3, 2 }
  0xbc   :  { %v9259_v29 = vpop.permute.xlu1 %589  ;;  %v9261_v33 = vpop.permute.xlu0 %587 }
  0xbd   :  { %15793 = vst [vmem:[#allocation25_spill] sm:$0xff] %v9259_v29  ;;  %15794 = vst [vmem:[#allocation26_spill] sm:$0xff] %v9261_v33  ;;  %v756_v29 = vrot.slane %v9187_v42, 6 }
  0xbe   :  { %694 = vrot.lane.b32.xlu1 %v668_v24, %s8732_s16  ;;  %601 = vrot.lane.b32.xlu0 %v540_v38, %s8731_s13  ;;  %v754_v24 = vor.u32 %v753_v58, %v752_v36  ;;  %v755_v38 = vrot.slane %v9184_v59, 5  ;;  %v722_v59 = vrot.slane %v8852_v11, 5 }
  0xc0   :  { %v9268_v16 = vpop.permute.xlu1 %684  ;;  %v9270_v4 = vpop.permute.xlu0 %682 }
  0xc1   :  { %15795 = vst [vmem:[#allocation27_spill] sm:$0xff] %v9268_v16  ;;  %15796 = vst [vmem:[#allocation28_spill] sm:$0xff] %v9270_v4  ;;  %v450_v16 = vrot.slane %v8841_v5, 2 }
  0xc2   :  { %467 = vrot.lane.b32.xlu1 %v15797_v20, %s8735_s23  ;;  %696 = vrot.lane.b32.xlu0 %v669_v21, %s8732_s16  ;;  %v757_v20 = vor.u32 %v756_v29, %v755_v38  ;;  %v844_v29 = vrot.slane %v9173_v45, 4  ;;  %v843_v38 = vrot.slane %v9101_v51, 4  ;;  %v903_v51 = vrot.slane %v8846_v9, 2 }
  0xc4   :  { %v9278_v33 = vpop.permute.xlu1 %774  ;;  %v9280_v17 = vpop.permute.xlu0 %772 }
  0xc6   :  { %790 = vrot.lane.b32.xlu1 %v754_v24, %s8733_s17  ;;  %469 = vrot.lane.b32.xlu0 %v15798_v56, %s8735_s23  ;;  %v15803_v24 = vrot.slane %v8843_v6, 2  ;;  %v15804_v56 = vrot.slane %v8863_v15, 2 }
  0xc8   :  { %v9287_v4 = vpop.permute.xlu1 %778  ;;  %v9289_v36 = vpop.permute.xlu0 %776 }
  0xc9   :  { %15799 = vst [vmem:[#allocation29_spill] sm:$0xff] %v9287_v4  ;;  %15800 = vst [vmem:[#allocation30_spill] sm:$0xff] %v9289_v36  ;;  %v904_v4 = vrot.slane %v8849_v10, 3 }
  0xca   :  { %465 = vrot.lane.b32.xlu1 %v450_v16, %s8735_s23  ;;  %792 = vrot.lane.b32.xlu0 %v757_v20, %s8733_s17  ;;  %v658_v20 = vrot.slane %v8841_v5, 7 }
  0xcc   :  { %v9293_v21 = vpop.permute.xlu1 %851  ;;  %v9295_v58 = vpop.permute.xlu0 %780 }
  0xcd   :  { %15801 = vst [vmem:[#allocation31_spill] sm:$0xff] %v9293_v21  ;;  %15802 = vst [vmem:[#allocation32_spill] sm:$0xff] %v9295_v58  ;;  %v907_v21 = vrot.slane %v8875_v23, 3 }
  0xce   :  { %473 = vrot.lane.b32.xlu1 %v15803_v24, %s8735_s23  ;;  %471 = vrot.lane.b32.xlu0 %v15804_v56, %s8735_s23  ;;  %v529_v24 = vor.u32 %v510_v32, %v8852_v11  ;;  %v723_v56 = vrot.slane %v8855_v12, 6  ;;  %v833_v32 = vrot.slane %v8841_v5, 4 }
  0xd0   :  { %v9305_v42 = vpop.permute.xlu1 %855  ;;  %v9307_v16 = vpop.permute.xlu0 %853 }
  0xd1   :  { %15805 = vst [vmem:[#allocation33_spill] sm:$0xff] %v9305_v42  ;;  %15806 = vst [vmem:[#allocation34_spill] sm:$0xff] %v9307_v16  ;;  %v724_v42 = vor.u32 %v723_v56, %v722_v59  ;;  %v910_v56 = vrot.slane %v8861_v14, 3 }
  0xd2   :  { %871 = vrot.lane.b32.xlu1 %v844_v29, %s8734_s20  ;;  %869 = vrot.lane.b32.xlu0 %v843_v38, %s8734_s20  ;;  %v900_v29 = vrot.slane %v8893_v34, 2  ;;  %v901_v38 = vrot.slane %v8896_v35, 3 }
  0xd4   :  { %v9315_v58 = vpop.permute.xlu1 %859  ;;  %v9317_v45 = vpop.permute.xlu0 %857  ;;  %v902_v36 = vor.u32 %v901_v38, %v900_v29 }
  0xd5   :  { %15807 = vst [vmem:[#allocation35_spill] sm:$0xff] %v9315_v58  ;;  %15808 = vst [vmem:[#allocation36_spill] sm:$0xff] %v9317_v45  ;;  %v905_v45 = vor.u32 %v904_v4, %v903_v51  ;;  %v908_v51 = vor.u32 %v907_v21, %v906_v18 }
  0xd6   :  { %674 = vrot.lane.b32.xlu1 %v658_v20, %s8732_s16  ;;  %579 = vrot.lane.b32.xlu0 %v529_v24, %s8731_s13  ;;  %v897_v20 = vrot.slane %v8852_v11, 2  ;;  %v898_v24 = vrot.slane %v8855_v12, 3 }
  0xd8   :  { %v9326_v60 = vpop.permute.xlu1 %224  ;;  %v9328_v58 = vpop.permute.xlu0 %222  ;;  %v899_v4 = vor.u32 %v898_v24, %v897_v20  ;;  %v1010_v20 = vrot.slane %v8839_v3, 1  ;;  %v1091_v24 = vrot.slane %v8846_v9, 7 }
  0xd9   :  { %15809 = vst [vmem:[#allocation37_spill] sm:$0xff] %v9326_v60 }
  0xda   :  { %849 = vrot.lane.b32.xlu1 %v833_v32, %s8734_s20  ;;  %770 = vrot.lane.b32.xlu0 %v724_v42, %s8733_s17  ;;  %v909_v42 = vrot.slane %v8858_v13, 2  ;;  %v1009_v32 = vrot.slane %v8877_v26, 1 }
  0xdc   :  { %v9336_v16 = vpop.permute.xlu1 %228  ;;  %v9338_v59 = vpop.permute.xlu0 %226 }
  0xdd   :  { %15810 = vst [vmem:[#allocation38_spill] sm:$0xff] %v9336_v16  ;;  %15811 = vst [vmem:[#allocation39_spill] sm:$0xff] %v9338_v59  ;;  %v911_v16 = vor.u32 %v910_v56, %v909_v42  ;;  %v1008_v42 = vrot.slane %v8841_v5, 1  ;;  %v1092_v56 = vor.u32 %v1091_v24, %v8849_v10 }
  0xde   :  { %949 = vrot.lane.b32.xlu1 %v905_v45, %s8736_s24  ;;  %947 = vrot.lane.b32.xlu0 %v902_v36, %s8736_s24  ;;  %v1089_v45 = vrot.slane %v8893_v34, 7 }
  0xe0   :  { %v9344_v29 = vpop.permute.xlu1 %314  ;;  %v9346_v38 = vpop.permute.xlu0 %312  ;;  %v1090_v21 = vor.u32 %v1089_v45, %v8896_v35  ;;  %v1012_v45 = vrot.slane %v8843_v6, 1 }
  0xe1   :  { %15812 = vst [vmem:[#allocation40_spill] sm:$0xff] %v9344_v29  ;;  %15813 = vst [vmem:[#allocation41_spill] sm:$0xff] %v9346_v38  ;;  %v1255_v29 = vrot.slane %v8872_v22, 4  ;;  %v1247_v38 = vrot.slane %v8855_v12, 5 }
  0xe2   :  { %951 = vrot.lane.b32.xlu1 %v908_v51, %s8736_s24  ;;  %945 = vrot.lane.b32.xlu0 %v899_v4, %s8736_s24 }
  0xe4   :  { %v9352_v36 = vpop.permute.xlu1 %318  ;;  %v9354_v18 = vpop.permute.xlu0 %316 }
  0xe5   :  { %15814 = vst [vmem:[#allocation42_spill] sm:$0xff] %v9352_v36  ;;  %15815 = vst [vmem:[#allocation43_spill] sm:$0xff] %v9354_v18 }
  0xe6   :  { %1026 = vrot.lane.b32.xlu1 %v1009_v32, %s8737_s25  ;;  %953 = vrot.lane.b32.xlu0 %v911_v16, %s8736_s24 }
  0xe8   :  { %v9361_v51 = vpop.permute.xlu1 %404  ;;  %v9363_v4 = vpop.permute.xlu0 %402 }
  0xe9   :  { %15816 = vst [vmem:[#allocation44_spill] sm:$0xff] %v9361_v51  ;;  %15817 = vst [vmem:[#allocation45_spill] sm:$0xff] %v9363_v4  ;;  %v1011_v51 = vrot.slane %v8863_v15, 1 }
  0xea   :  { %1121 = vrot.lane.b32.xlu1 %v1090_v21, %s8738_s26  ;;  %1028 = vrot.lane.b32.xlu0 %v1010_v20, %s8737_s25  ;;  %v1093_v21 = vrot.slane %v8872_v22, 7  ;;  %v1087_v20 = vrot.slane %v8852_v11, 7 }
  0xec   :  { %v9369_v16 = vpop.permute.xlu1 %408  ;;  %v9371_v32 = vpop.permute.xlu0 %406  ;;  %v1094_v24 = vor.u32 %v1093_v21, %v8875_v23  ;;  %v1182_v21 = vrot.slane %v8841_v5, 6 }
  0xed   :  { %15818 = vst [vmem:[#allocation46_spill] sm:$0xff] %v9369_v16  ;;  %15819 = vst [vmem:[#allocation47_spill] sm:$0xff] %v9371_v32 }
  0xee   :  { %1024 = vrot.lane.b32.xlu1 %v1008_v42, %s8737_s25  ;;  %1123 = vrot.lane.b32.xlu0 %v1092_v56, %s8738_s26  ;;  %v1088_v42 = vor.u32 %v1087_v20, %v8855_v12  ;;  %v1095_v56 = vrot.slane %v8858_v13, 7  ;;  %v1184_v20 = vrot.slane %v8839_v3, 6 }
  0xf0   :  { %v9379_v4 = vpop.permute.xlu1 %2136  ;;  %v9381_v36 = vpop.permute.xlu0 %2134 }
  0xf1   :  { %15820 = vst [vmem:[#allocation48_spill] sm:$0xff] %v9379_v4  ;;  %15821 = vst [vmem:[#allocation49_spill] sm:$0xff] %v9381_v36  ;;  %v1183_v4 = vrot.slane %v8877_v26, 6 }
  0xf2   :  { %1032 = vrot.lane.b32.xlu1 %v1012_v45, %s8737_s25  ;;  %1030 = vrot.lane.b32.xlu0 %v1011_v51, %s8737_s25  ;;  %v1096_v45 = vor.u32 %v1095_v56, %v8861_v14  ;;  %v1253_v56 = vrot.slane %v8849_v10, 5 }
  0xf4   :  { %v9388_v16 = vpop.permute.xlu1 %591  ;;  %v9390_v32 = vpop.permute.xlu0 %8269 }
  0xf5   :  { %15822 = vst [vmem:[#allocation50_spill] sm:$0xff] %v9388_v16  ;;  %15823 = vst [vmem:[#allocation51_spill] sm:$0xff] %v9390_v32  ;;  %v1252_v16 = vrot.slane %v8846_v9, 4 }
  0xf6   :  { %1125 = vrot.lane.b32.xlu1 %v1094_v24, %s8738_s26  ;;  %1119 = vrot.lane.b32.xlu0 %v1088_v42, %s8738_s26 }
  0xf8   :  { %v9396_v36 = vpop.permute.xlu1 %686  ;;  %v9398_v51 = vpop.permute.xlu0 %593 }
  0xf9   :  { %15824 = vst [vmem:[#allocation52_spill] sm:$0xff] %v9396_v36  ;;  %15825 = vst [vmem:[#allocation53_spill] sm:$0xff] %v9398_v51  ;;  %v1249_v36 = vrot.slane %v8893_v34, 4  ;;  %v1250_v51 = vrot.slane %v8896_v35, 5 }
  0xfa   :  { %1200 = vrot.lane.b32.xlu1 %v1183_v4, %s8739_s14  ;;  %1127 = vrot.lane.b32.xlu0 %v1096_v45, %s8738_s26  ;;  %v1186_v4 = vrot.slane %v8843_v6, 6  ;;  %v1185_v45 = vrot.slane %v8863_v15, 6 }
  0xfb   :  { %v1251_v18 = vor.u32 %v1250_v51, %v1249_v36  ;;  %v1258_v51 = vrot.slane %v8858_v13, 4 }
  0xfc   :  { %v9404_v24 = vpop.permute.xlu1 %2138  ;;  %v9406_v42 = vpop.permute.xlu0 %688 }
  0xfd   :  { %15826 = vst [vmem:[#allocation54_spill] sm:$0xff] %v9404_v24  ;;  %15827 = vst [vmem:[#allocation55_spill] sm:$0xff] %v9406_v42  ;;  %v1254_v42 = vor.u32 %v1253_v56, %v1252_v16  ;;  %v1259_v56 = vrot.slane %v8861_v14, 5 }
  0xfe   :  { %1198 = vrot.lane.b32.xlu1 %v1182_v21, %s8739_s14  ;;  %1202 = vrot.lane.b32.xlu0 %v1184_v20, %s8739_s14  ;;  %v1256_v21 = vrot.slane %v8875_v23, 5  ;;  %v1246_v20 = vrot.slane %v8852_v11, 4 }
 0x100   :  { %v9416_v32 = vpop.permute.xlu1 %8274  ;;  %v9418_v24 = vpop.permute.xlu0 %2140  ;;  %v1257_v36 = vor.u32 %v1256_v21, %v1255_v29  ;;  %v1248_v16 = vor.u32 %v1247_v38, %v1246_v20  ;;  %v1357_v29 = vrot.slane %v8841_v5, 3  ;;  %v1359_v38 = vrot.slane %v8839_v3, 3  ;;  %v48_v21 = vld [vmem:[%s15393_s0 + $0x30] sm:$0x77] }
 0x101   :  { %15828 = vst [vmem:[#allocation56_spill] sm:$0xff] %v9418_v24  ;;  %v1421_v24 = vrot.slane %v8852_v11, 1 }
 0x102   :  { %1206 = vrot.lane.b32.xlu1 %v1186_v4, %s8739_s14  ;;  %1204 = vrot.lane.b32.xlu0 %v1185_v45, %s8739_s14 }
 0x104   :  { %v9426_v59 = vpop.permute.xlu1 %597  ;;  %v9428_v60 = vpop.permute.xlu0 %595 }
 0x105   :  { %15829 = vst [vmem:[#allocation57_spill] sm:$0xff] %v9426_v59  ;;  %15830 = vst [vmem:[#allocation58_spill] sm:$0xff] %v9428_v60  ;;  %v1358_v59 = vrot.slane %v8877_v26, 3  ;;  %v1260_v60 = vor.u32 %v1259_v56, %v1258_v51  ;;  %v1360_v51 = vrot.slane %v8863_v15, 3  ;;  %v9459_v56 = vpack.c.bf16 %v48_v21, %v48_v21 }
 0x106   :  { %1298 = vrot.lane.b32.xlu1 %v1254_v42, %s8740_s15  ;;  %1296 = vrot.lane.b32.xlu0 %v1251_v18, %s8740_s15 }
 0x107   :  { %15837 = vst [vmem:[#allocation65_spill] sm:$0xff] %v9459_v56 }
 0x108   :  { %v9434_v4 = vpop.permute.xlu1 %692  ;;  %v9436_v45 = vpop.permute.xlu0 %690 }
 0x109   :  { %15831 = vst [vmem:[#allocation59_spill] sm:$0xff] %v9434_v4  ;;  %15832 = vst [vmem:[#allocation60_spill] sm:$0xff] %v9436_v45  ;;  %v1424_v4 = vrot.slane %v8893_v34, 1  ;;  %v64_v45 = vcombine.high %v48_v21, %v48_v21 }
 0x10a   :  { %1300 = vrot.lane.b32.xlu1 %v1257_v36, %s8740_s15  ;;  %1294 = vrot.lane.b32.xlu0 %v1248_v16, %s8740_s15  ;;  %v1361_v16 = vrot.slane %v8843_v6, 3 }
 0x10b   :  { %v9482_v21 = vpack.c.bf16 %v64_v45, %v64_v45  ;;  %v1434_v45 = vrot.slane %v8861_v14, 2 }
 0x10c   :  { %v9441_v42 = vpop.permute.xlu1 %784  ;;  %v9443_v18 = vpop.permute.xlu0 %782 }
 0x10d   :  { %15833 = vst [vmem:[#allocation61_spill] sm:$0xff] %v9441_v42  ;;  %15834 = vst [vmem:[#allocation62_spill] sm:$0xff] %v9443_v18  ;;  %v1430_v18 = vrot.slane %v8872_v22, 1 }
 0x10e   :  { %1375 = vrot.lane.b32.xlu1 %v1358_v59, %s8741_s18  ;;  %1302 = vrot.lane.b32.xlu0 %v1260_v60, %s8740_s15  ;;  %v1427_v59 = vrot.slane %v8846_v9, 1  ;;  %v1428_v60 = vrot.slane %v8849_v10, 2  ;;  %v1431_v9 = vrot.slane %v8875_v23, 2  ;;  %15842 = vst [vmem:[#allocation70_spill] sm:$0xff] %v9482_v21 }
 0x110   :  { %v9452_v20 = vpop.permute.xlu1 %788  ;;  %v9454_v36 = vpop.permute.xlu0 %786  ;;  %v1429_v10 = vor.u32 %v1428_v60, %v1427_v59  ;;  %v1432_v11 = vor.u32 %v1431_v9, %v1430_v18 }
 0x111   :  { %15835 = vst [vmem:[#allocation63_spill] sm:$0xff] %v9452_v20  ;;  %15836 = vst [vmem:[#allocation64_spill] sm:$0xff] %v9454_v36  ;;  %v1425_v20 = vrot.slane %v8896_v35, 2  ;;  %v9480_v35 = vshll.u32 %v9459_v56, 16 }
 0x112   :  { %1373 = vrot.lane.b32.xlu1 %v1357_v29, %s8741_s18  ;;  %1377 = vrot.lane.b32.xlu0 %v1359_v38, %s8741_s18  ;;  %v1422_v29 = vrot.slane %v8855_v12, 2  ;;  %v9475_v38 = vshrl.u32 %v9459_v56, 16 }
 0x113   :  { %v1426_v34 = vor.u32 %v1425_v20, %v1424_v4  ;;  %15841 = vst [vmem:[#allocation69_spill] sm:$0xff] %v9480_v35  ;;  %v192_v4 = vrot.slane %v9480_v35, 7  ;;  %v9495_v20 = vshrl.u32 %v9482_v21, 16 }
 0x114   :  { %v9466_v36 = vpop.permute.xlu1 %863  ;;  %v9468_v42 = vpop.permute.xlu0 %861  ;;  %15840 = vst [vmem:[#allocation68_spill] sm:$0xff] %v9475_v38  ;;  %v1423_v12 = vor.u32 %v1422_v29, %v1421_v24  ;;  %v297_v29 = vrot.slane %v9459_v56, 5 }
 0x115   :  { %15838 = vst [vmem:[#allocation66_spill] sm:$0xff] %v9466_v36  ;;  %15839 = vst [vmem:[#allocation67_spill] sm:$0xff] %v9468_v42  ;;  %v189_v36 = vrot.slane %v9475_v38, 6  ;;  %v1433_v42 = vrot.slane %v8858_v13, 1  ;;  %v197_v59 = vrot.slane %v9495_v20, 6 }
 0x116   :  { %1381 = vrot.lane.b32.xlu1 %v1361_v16, %s8741_s18  ;;  %1379 = vrot.lane.b32.xlu0 %v1360_v51, %s8741_s18  ;;  %15845 = vst [vmem:[#allocation73_spill] sm:$0xff] %v9495_v20  ;;  %v9498_v16 = vshll.u32 %v9482_v21, 16 }
 0x117   :  { %v193_v13 = vor.u32 %v192_v4, %v189_v36  ;;  %v1435_v51 = vor.u32 %v1434_v45, %v1433_v42  ;;  %v382_v36 = vrot.slane %v9480_v35, 4  ;;  %v298_v4 = vrot.slane %v9482_v21, 5 }
 0x118   :  { %v9484_v22 = vpop.permute.xlu1 %867  ;;  %v9486_v23 = vpop.permute.xlu0 %865  ;;  %15846 = vst [vmem:[#allocation74_spill] sm:$0xff] %v9498_v16  ;;  %v200_v14 = vrot.slane %v9498_v16, 7  ;;  %v384_v45 = vrot.slane %v9495_v20, 3 }
 0x119   :  { %15843 = vst [vmem:[#allocation71_spill] sm:$0xff] %v9484_v22  ;;  %15844 = vst [vmem:[#allocation72_spill] sm:$0xff] %v9486_v23  ;;  %v15926_v23 = vld [vmem:[#allocation42_spill] sm:$0xff] }
 0x11a   :  { %1473 = vrot.lane.b32.xlu1 %v1429_v10, %s15570_s22  ;;  %1471 = vrot.lane.b32.xlu0 %v1426_v34, %s15570_s22  ;;  %v201_v10 = vor.u32 %v200_v14, %v197_v59  ;;  %v381_v34 = vrot.slane %v9475_v38, 3 }
 0x11c   :  { %v9500_v24 = vpop.permute.xlu1 %232  ;;  %v9502_v18 = vpop.permute.xlu0 %230 }
 0x11d   :  { %15847 = vst [vmem:[#allocation75_spill] sm:$0xff] %v9500_v24  ;;  %15848 = vst [vmem:[#allocation76_spill] sm:$0xff] %v9502_v18  ;;  %v333_v24 = vsel %vm15559_vm3, %v9105_v53, %v9137_v19 }
 0x11e   :  { %1475 = vrot.lane.b32.xlu1 %v1432_v11, %s15570_s22  ;;  %1469 = vrot.lane.b32.xlu0 %v1423_v12, %s15570_s22  ;;  %v383_v12 = vor.u32 %v382_v36, %v381_v34  ;;  %v9540_v34 = vunpack.i.l.bf16 %v9204_v28 }
 0x120   :  { %v9508_v60 = vpop.permute.xlu1 %322  ;;  %v9510_v9 = vpop.permute.xlu0 %320 }
 0x121   :  { %15849 = vst [vmem:[#allocation77_spill] sm:$0xff] %v9508_v60  ;;  %15850 = vst [vmem:[#allocation78_spill] sm:$0xff] %v9510_v9  ;;  %v332_v60 = vsel %vm15559_vm3, %v9116_v40, %v9105_v53  ;;  %v2156_v53 = vsel %vm15519_vm9, %v9192_v30, %v9206_v44 }
 0x122   :  { %234 = vrot.lane.b32.xlu1 %v193_v13, %s8727_s27  ;;  %1477 = vrot.lane.b32.xlu0 %v1435_v51, %s15570_s22  ;;  %v385_v13 = vrot.slane %v9498_v16, 4  ;;  %v242_v51 = vsel %vm15558_vm0, %v9126_v63, %v9088_v47 }
 0x123   :  { %v1536_v36 = vsel %vm9534_vm7, %v8877_v26, %v242_v51  ;;  %v422_v26 = vsel %vm15521_vm5, %v9159_v7, %v9157_v0  ;;  %v2155_v51 = vsel %vm15519_vm9, %v9194_v31, %v9192_v30 }
 0x124   :  { %v9517_v42 = vpop.permute.xlu1 %412  ;;  %v9519_v11 = vpop.permute.xlu0 %410 }
 0x125   :  { %15851 = vst [vmem:[#allocation79_spill] sm:$0xff] %v9517_v42  ;;  %15852 = vst [vmem:[#allocation80_spill] sm:$0xff] %v9519_v11  ;;  %v386_v42 = vor.u32 %v385_v13, %v384_v45  ;;  %v243_v45 = vsel %vm15558_vm0, %v9088_v47, %v9114_v57  ;;  %v1557_v13 = vsel %vm15520_vm4, %v1536_v36, %v332_v60  ;;  %v15863_v47 = vmov 0 }
 0x126   :  { %324 = vrot.lane.b32.xlu1 %v297_v29, %s8728_s28  ;;  %236 = vrot.lane.b32.xlu0 %v201_v10, %s8727_s27  ;;  %v15855_v29 = vmov 0  ;;  %v8257_v10 = vunpack.i.h.bf16 %v9204_v28  ;;  %v15864_v47 = vsel %vm9580_vm15, 4294967295, %v15863_v47  ;;  %v522_v36 = vrot.slane %v9480_v35, 1 }
 0x127   :  { %v15856_v29 = vsel %vm9534_vm7, 4294967295, %v15855_v29  ;;  %15865 = vst [vmem:[#allocation86_spill] sm:$0xff] %v15864_v47  ;;  %v1537_v18 = vsel %vm9534_vm7, %v8839_v3, %v243_v45  ;;  %v15869_v3 = vunpack.i.l.bf16 %v9212_v46 }
 0x128   :  { %v9529_v59 = vpop.permute.xlu1 %2144  ;;  %v9531_v14 = vpop.permute.xlu0 %2142  ;;  %15857 = vst [vmem:[#allocation83_spill] sm:$0xff] %v15856_v29 }
 0x129   :  { %15853 = vst [vmem:[#allocation81_spill] sm:$0xff] %v9529_v59  ;;  %15854 = vst [vmem:[#allocation82_spill] sm:$0xff] %v9531_v14  ;;  %v9572_v59 = vsel %vm15562_vm10, %v9540_v34, %v8257_v10  ;;  %v523_v14 = vrot.slane %v9498_v16, 1  ;;  %v9617_v45 = vsel %vm15562_vm10, %v8257_v10, %v15869_v3  ;;  %v245_v10 = vsel %vm15558_vm0, %v9103_v52, %v9124_v62 }
 0x12a   :  { %414 = vrot.lane.b32.xlu1 %v383_v12, %s8729_s29  ;;  %326 = vrot.lane.b32.xlu0 %v298_v4, %s8728_s28 }
 0x12c   :  { %v9559_v12 = vpop.permute.xlu1 %599  ;;  %v9561_v4 = vpop.permute.xlu0 %8279 }
 0x12d   :  { %15860 = vst [vmem:[#allocation84_spill] sm:$0xff] %v9559_v12  ;;  %15861 = vst [vmem:[#allocation85_spill] sm:$0xff] %v9561_v4  ;;  %v15862_v12 = vrot.slane %v9459_v56, 2  ;;  %v8282_v3 = vunpack.i.h.bf16 %v9561_v4 }
 0x12e   :  { %416 = vrot.lane.b32.xlu0 %v386_v42, %s8729_s29  ;;  %v423_v42 = vsel %vm15521_vm5, %v9157_v0, %v9169_v2  ;;  %v1561_v0 = vsel %vm15520_vm4, %v1537_v18, %v333_v24  ;;  %v241_v24 = vsel %vm15558_vm0, %v9090_v48, %v9126_v63  ;;  %v334_v63 = vsel %vm15559_vm3, %v9137_v19, %v9147_v49 }
 0x12f   :  { %2146 = vrot.lane.b32.xlu1 %v15862_v12, %s8730_s30  ;;  %v1615_v12 = vsel %vm9552_vm13, %v1557_v13, %v422_v26  ;;  %v15868_v13 = vrot.slane %v9482_v21, 2  ;;  %v9621_v30 = vsel %vm9552_vm13, %v1561_v0, %v423_v42  ;;  %v331_v42 = vsel %vm15559_vm3, %v9135_v8, %v9116_v40 }
 0x130   :  { %v9595_v11 = vpop.permute.xlu1 %694  ;;  %v9597_v9 = vpop.permute.xlu0 %601  ;;  %v2189_v60 = vsel %vm15563_vm14, %v1615_v12, %v2155_v51  ;;  %v8283_v51 = vpack.i.bf16 %v523_v14, %v522_v36  ;;  %v1535_v40 = vsel %vm9534_vm7, %v8841_v5, %v241_v24  ;;  %v1539_v19 = vsel %vm9534_vm7, %v8843_v6, %v245_v10 }
 0x131   :  { %15866 = vst [vmem:[#allocation87_spill] sm:$0xff] %v9595_v11  ;;  %15867 = vst [vmem:[#allocation88_spill] sm:$0xff] %v9597_v9  ;;  %v2236_v26 = vsel %vm9580_vm15, %v2189_v60, %v9572_v59  ;;  %v421_v5 = vsel %vm15521_vm5, %v9167_v37, %v9159_v7  ;;  %v2157_v6 = vsel %vm15519_vm9, %v9206_v44, %v9238_v27  ;;  %v671_v24 = vrot.slane %v9482_v21, 7  ;;  %v15915_v11 = vld [vmem:[#allocation7_spill] sm:$0xff] }
 0x132   :  { %2148 = vrot.lane.b32.xlu0 %v15868_v13, %s8730_s30  ;;  %v244_v13 = vsel %vm15558_vm0, %v9114_v57, %v9103_v52  ;;  %v542_v57 = vor.u32 %v523_v14, %v9495_v20  ;;  %v541_v52 = vor.u32 %v522_v36, %v9475_v38  ;;  %v424_v14 = vsel %vm15521_vm5, %v9169_v2, %v9177_v54 }
 0x133   :  { %2301 = vrot.lane.b32.xlu1 %v2236_v26, %s8743_s19  ;;  %v2192_v26 = vsel %vm15563_vm14, %v9621_v30, %v2156_v53  ;;  %v1538_v8 = vsel %vm9534_vm7, %v8863_v15, %v244_v13  ;;  %v1553_v53 = vsel %vm15520_vm4, %v1535_v40, %v331_v42  ;;  %v335_v37 = vsel %vm15559_vm3, %v9147_v49, %v9145_v41 }
 0x134   :  { %v468_v18 = vpop.permute.xlu1 %467  ;;  %v9626_v60 = vpop.permute.xlu0 %696  ;;  %v2237_v48 = vsel %vm9580_vm15, %v2192_v26, %v9617_v45  ;;  %v670_v26 = vrot.slane %v9459_v56, 7  ;;  %v8262_v7 = vunpack.i.h.bf16 %v9212_v46  ;;  %v425_v10 = vsel %vm15521_vm5, %v9177_v54, %v9175_v50 }
 0x135   :  { %15870 = vst [vmem:[#allocation89_spill] sm:$0xff] %v9626_v60  ;;  %v15518_v42 = vunpack.i.l.bf16 %v9251_v61  ;;  %v759_v40 = vrot.slane %v9480_v35, 6  ;;  %v1569_v54 = vsel %vm15520_vm4, %v1539_v19, %v335_v37  ;;  %vm15557_vm5 = vcmask 523264  }
 0x136   :  { %2303 = vrot.lane.b32.xlu0 %v2237_v48, %s8743_s19  ;;  %v15916_v4 = vrot.slane %v15915_v11, 2 }
 0x137   :  { %8284 = vrot.lane.b32.xlu1 %v8283_v51, %s8731_s13  ;;  %v1565_v51 = vsel %vm15520_vm4, %v1538_v8, %v334_v63  ;;  %v612_v8 = vsel %vm15562_vm10, %v8282_v3, %v9540_v34  ;;  %vm1849_vm4 = vsmask.f32 5376 }
 0x138   :  { %v9662_v0 = vpop.permute.xlu1 %790  ;;  %v470_v36 = vpop.permute.xlu0 %469  ;;  %v1617_v44 = vsel %vm9552_vm13, %v1565_v51, %v424_v14  ;;  %v15874_v14 = vunpack.i.l.bf16 %v9212_v46 }
 0x139   :  { %15871 = vst [vmem:[#allocation90_spill] sm:$0xff] %v9662_v0  ;;  %v497_v15 = vsel %vm15513_vm2, %v468_v18, %v470_v36  ;;  %v2195_v63 = vsel %vm15563_vm14, %v1617_v44, %v2157_v6 }
 0x13a   :  { %603 = vrot.lane.b32.xlu0 %v541_v52, %s8731_s13  ;;  %v1636_v2 = vsel %vm15563_vm14, %v1615_v12, %v497_v15  ;;  %v1614_v12 = vsel %vm9552_vm13, %v1553_v53, %v421_v5  ;;  %v758_v52 = vrot.slane %v9475_v38, 5  ;;  %v615_v51 = vsel %vm15562_vm10, %v15874_v14, %v8262_v7  ;;  %v15910_v38 = vld [vmem:[#allocation14_spill] sm:$0xff] }
 0x13b   :  { %605 = vrot.lane.b32.xlu1 %v542_v57, %s8731_s13  ;;  %v1694_v13 = vsel %vm9580_vm15, %v1636_v2, %v9572_v59  ;;  %v2158_v57 = vsel %vm15519_vm9, %v9238_v27, %v9253_v25  ;;  %v9710_v27 = vsel %vm9552_vm13, %v1569_v54, %v425_v10  ;;  %v2238_v15 = vsel %vm9580_vm15, %v2195_v63, %v615_v51 }
 0x13c   :  { %v466_v48 = vpop.permute.xlu1 %465  ;;  %2467 = vmatprep.subr.bf16.mxu0 %v1694_v13  ;;  %v9693_v49 = vpop.permute.xlu0 %792  ;;  %15873 = vst [vmem:[#allocation92_spill] sm:$0xff] %v9710_v27  ;;  %v762_v13 = vrot.slane %v9498_v16, 6  ;;  %vm15560_vm9 = vcmask 752640  }
 0x13d   :  { %15872 = vst [vmem:[#allocation91_spill] sm:$0xff] %v9693_v49  ;;  %v496_v59 = vsel %vm15513_vm2, %v466_v48, %v468_v18  ;;  %v2186_v18 = vsel %vm15563_vm14, %v1614_v12, %v9194_v31  ;;  %v2198_v31 = vsel %vm15563_vm14, %v9710_v27, %v2158_v57  ;;  %v804_v48 = vsel %vm15523_vm12, %v9280_v17, %v9278_v33  ;;  %v15912_v49 = vld [vmem:[#allocation11_spill] sm:$0xff] }
 0x13e   :  { %698 = vrot.lane.b32.xlu0 %v670_v26, %s8732_s16  ;;  %v1632_v53 = vsel %vm15563_vm14, %v1614_v12, %v496_v59  ;;  %v2235_v3 = vsel %vm9580_vm15, %v2186_v18, %v9540_v34  ;;  %v9734_v26 = vsel %vm15562_vm10, %v8262_v7, %v15518_v42  ;;  %v628_v57 = vsel %vm15562_vm10, %v9210_v1, %v9224_v43  ;;  %v15882_v59 = vld [vmem:[#allocation34_spill] sm:$0xff] }
 0x13f   :  { %700 = vrot.lane.b32.xlu1 %v671_v24, %s8732_s16  ;;  %v1693_v19 = vsel %vm9580_vm15, %v1632_v53, %v612_v8  ;;  %v760_v24 = vor.u32 %v759_v40, %v758_v52  ;;  %15876 = vst [vmem:[#allocation94_spill] sm:$0xff] %v9734_v26  ;;  %v2239_v63 = vsel %vm9580_vm15, %v2198_v31, %v9734_v26  ;;  %v15883_v52 = vld [vmem:[#allocation31_spill] sm:$0xff]  ;;  %v15884_v53 = vld [vmem:[#allocation24_spill] sm:$0xff]  ;;  %v919_v9 = vrot.slane %v15912_v49, 3 }
 0x140   :  { %v9719_v5 = vpop.permute.xlu1 %473  ;;  %v472_v6 = vpop.permute.xlu0 %471  ;;  %2468 = vmatpush1.bf16.msra.mxu0 %v1693_v19  ;;  %v709_v18 = vsel %vm15522_vm8, %v9228_v39, %v15884_v53  ;;  %v15886_v31 = vld [vmem:[#allocation23_spill] sm:$0xff]  ;;  %v1268_v27 = vrot.slane %v15912_v49, 5 }
 0x141   :  { %15875 = vst [vmem:[#allocation93_spill] sm:$0xff] %v9719_v5  ;;  %v498_v2 = vsel %vm15513_vm2, %v470_v36, %v472_v6  ;;  %v499_v46 = vsel %vm15513_vm2, %v472_v6, %v9719_v5  ;;  %v761_v36 = vrot.slane %v9495_v20, 5  ;;  %vm15561_vm2 = vcmask 760832   ;;  %v15885_v6 = vld [vmem:[#allocation30_spill] sm:$0xff] }
 0x142   :  { %2299 = vrot.lane.b32.xlu0 %v2235_v3, %s8743_s19  ;;  %v1644_v34 = vsel %vm15563_vm14, %v1617_v44, %v499_v46  ;;  %v1640_v37 = vsel %vm15563_vm14, %v9621_v30, %v498_v2  ;;  %v708_v44 = vsel %vm15522_vm8, %v9230_v55, %v9228_v39  ;;  %v883_v40 = vsel %vm15561_vm2, %v15883_v52, %v15882_v59  ;;  %v15887_v46 = vld [vmem:[#allocation33_spill] sm:$0xff]  ;;  %v15920_v5 = vld [vmem:[#allocation38_spill] sm:$0xff] }
 0x143   :  { %2305 = vrot.lane.b32.xlu1 %v2238_v15, %s8743_s19  ;;  %v1696_v12 = vsel %vm9580_vm15, %v1644_v34, %v615_v51  ;;  %v1695_v7 = vsel %vm9580_vm15, %v1640_v37, %v9617_v45  ;;  %v15879_v45 = vmov 0  ;;  %v763_v54 = vor.u32 %v762_v13, %v761_v36 }
 0x144   :  { %v9751_v10 = vpop.permute.xlu1 %871  ;;  %v9753_v30 = vpop.permute.xlu0 %869  ;;  %2508 = vmatprep.subr.bf16.mxu1 %v1696_v12  ;;  %v15880_v45 = vsel %vm9763_vm1, 4294967295, %v15879_v45  ;;  %v1715_v8 = vsel %vm15564_vm6, %v628_v57, %v708_v44  ;;  %v805_v15 = vsel %vm15523_vm12, %v9278_v33, %v15885_v6  ;;  %v629_v2 = vsel %vm15562_vm10, %v9224_v43, %v15886_v31  ;;  %v15888_v44 = vld [vmem:[#allocation28_spill] sm:$0xff] }
 0x145   :  { %15877 = vst [vmem:[#allocation95_spill] sm:$0xff] %v9751_v10  ;;  %15878 = vst [vmem:[#allocation96_spill] sm:$0xff] %v9753_v30  ;;  %2509 = vmatpush1.bf16.msra.mxu1 %v1695_v7  ;;  %v1773_v51 = vsel %vm9763_vm1, %v1715_v8, %v804_v48  ;;  %v884_v39 = vsel %vm15561_vm2, %v15882_v59, %v15887_v46  ;;  %v1719_v33 = vsel %vm15564_vm6, %v629_v2, %v709_v18  ;;  %v15516_v7 = vmov 0   ;;  %v15890_v8 = vld [vmem:[#allocation26_spill] sm:$0xff]  ;;  %v15913_v30 = vld [vmem:[#allocation9_spill] sm:$0xff] }
 0x146   :  { %15881 = vst [vmem:[#allocation97_spill] sm:$0xff] %v15880_v45  ;;  %2307 = vrot.lane.b32.xlu0 %v2239_v63, %s8743_s19  ;;  %v9785_v3 = vsel %vm15565_vm11, %v1773_v51, %v883_v40  ;;  %v1774_v36 = vsel %vm9763_vm1, %v1719_v33, %v805_v15  ;;  %v846_v13 = vrot.slane %v9482_v21, 4  ;;  %v2253_v12 = vsel %vm15564_vm6, %v9210_v1, %v9230_v55  ;;  %v15889_v63 = vld [vmem:[#allocation27_spill] sm:$0xff]  ;;  %v15892_v15 = vld [vmem:[#allocation32_spill] sm:$0xff]  ;;  %v15909_v21 = vld [vmem:[#allocation13_spill] sm:$0xff] }
 0x147   :  { %794 = vrot.lane.b32.xlu1 %v760_v24, %s8733_s17  ;;  %v845_v24 = vrot.slane %v9459_v56, 4  ;;  %v9803_v43 = vsel %vm15565_vm11, %v1774_v36, %v884_v39  ;;  %2499 = vmatprep.mubr.bf16.mxu0 %v15516_v7  ;;  %v710_v48 = vsel %vm15522_vm8, %v15884_v53, %v15888_v44  ;;  %v711_v57 = vsel %vm15522_vm8, %v15888_v44, %v15889_v63  ;;  %v15891_v53 = vld [vmem:[#allocation29_spill] sm:$0xff]  ;;  %v15894_v36 = vld [vmem:[#allocation36_spill] sm:$0xff]  ;;  %v15911_v56 = vld [vmem:[#allocation10_spill] sm:$0xff] }
 0x148   :  { %v675_v19 = vpop.permute.xlu1 %674  ;;  %v580_v14 = vpop.permute.xlu0 %579  ;;  %2540 = vmatprep.mubr.bf16.mxu1 %v15516_v7  ;;  %8293 = vset.pattern.permute.xlu0 %v15516_v7  ;;  %v630_v18 = vsel %vm15562_vm10, %v15886_v31, %v15890_v8  ;;  %v806_v51 = vsel %vm15523_vm12, %v15885_v6, %v15891_v53  ;;  %v807_v2 = vsel %vm15523_vm12, %v15891_v53, %v15892_v15  ;;  %v15895_v31 = vld [vmem:[#allocation35_spill] sm:$0xff]  ;;  %v921_v16 = vrot.slane %v15909_v21, 2  ;;  %v15927_v45 = vld [vmem:[#allocation45_spill] sm:$0xff] }
 0x149   :  { %8364 = vset.pattern.permute.xlu1 %v15516_v7  ;;  %v886_v44 = vsel %vm15561_vm2, %v15894_v36, %v15895_v31  ;;  %v1723_v6 = vsel %vm15564_vm6, %v630_v18, %v710_v48  ;;  %v918_v10 = vrot.slane %v15911_v56, 2  ;;  %v15914_v0 = vrot.slane %v15913_v30, 2 }
 0x14a   :  { %796 = vrot.lane.b32.xlu0 %v763_v54, %s8733_s17  ;;  %v2259_v54 = vsel %vm9763_vm1, %v2253_v12, %v9280_v17  ;;  %v885_v12 = vsel %vm15561_vm2, %v15887_v46, %v15894_v36  ;;  %v1775_v46 = vsel %vm9763_vm1, %v1723_v6, %v806_v51  ;;  %v15900_v6 = vld [vmem:[#allocation5_spill] sm:$0xff]  ;;  %v1267_v26 = vrot.slane %v15911_v56, 4 }
 0x14b   :  { %2333 = vrot.lane.b32.xlu1 %v9785_v3, %s8743_s19  ;;  %v2263_v39 = vsel %vm15565_vm11, %v2259_v54, %v15883_v52  ;;  %v9859_v36 = vsel %vm15565_vm11, %v1775_v46, %v885_v12 }
 0x14c   :  { %v9798_v34 = vpop.permute.xlu1 %849  ;;  %v771_v37 = vpop.permute.xlu0 %770  ;;  %v1269_v15 = vor.u32 %v1268_v27, %v1267_v26 }
 0x14d   :  { %v803_v12 = vsel %vm15523_vm12, %v771_v37, %v9280_v17  ;;  %vm15623_vm12 = vcmask 1046528   ;;  %v882_v60 = vsel %vm15561_vm2, %v9798_v34, %v15883_v52 }
 0x14e   :  { %2335 = vrot.lane.b32.xlu0 %v9803_v43, %s8743_s19 }
 0x14f   :  { %873 = vrot.lane.b32.xlu1 %v845_v24, %s8734_s20  ;;  %v15893_v24 = vld [vmem:[#allocation25_spill] sm:$0xff] }
 0x150   :  { %v9820_v59 = vpop.permute.xlu1 %949  ;;  %v948_v40 = vpop.permute.xlu0 %947  ;;  %v631_v33 = vsel %vm15562_vm10, %v15890_v8, %v15893_v24 }
 0x151   :  { %v1727_v54 = vsel %vm15564_vm6, %v631_v33, %v711_v57  ;;  %v15898_v57 = vld [vmem:[#allocation6_spill] sm:$0xff]  ;;  %v627_v33 = vsel %vm15562_vm10, %v580_v14, %v9210_v1  ;;  %v15907_v1 = vld [vmem:[#allocation3_spill] sm:$0xff]  ;;  %v15908_v14 = vld [vmem:[#allocation4_spill] sm:$0xff] }
 0x152   :  { %875 = vrot.lane.b32.xlu0 %v846_v13, %s8734_s20  ;;  %v1776_v8 = vsel %vm9763_vm1, %v1727_v54, %v807_v2  ;;  %v15897_v13 = vld [vmem:[#allocation8_spill] sm:$0xff]  ;;  %v916_v18 = vrot.slane %v15898_v57, 3  ;;  %v15901_v54 = vrot.slane %v15900_v6, 2  ;;  %v913_v17 = vrot.slane %v15908_v14, 3 }
 0x153   :  { %2331 = vrot.lane.b32.xlu1 %v2263_v39, %s8743_s19  ;;  %v9856_v42 = vsel %vm15565_vm11, %v1776_v8, %v886_v44  ;;  %v915_v48 = vrot.slane %v15897_v13, 2  ;;  %v707_v39 = vsel %vm15522_vm8, %v675_v19, %v9230_v55  ;;  %v979_v44 = vsel %vm15560_vm9, %v948_v40, %v9820_v59  ;;  %v15902_v8 = vld [vmem:[#allocation2_spill] sm:$0xff]  ;;  %vm9884_vm8 = vmand %vm15563_vm14, %vm1849_vm4 }
 0x154   :  { %v952_v53 = vpop.permute.xlu1 %951  ;;  %v946_v7 = vpop.permute.xlu0 %945  ;;  %15896 = vst [vmem:[#allocation34_spill] sm:$0xff] %v9856_v42  ;;  %v15903_v46 = vrot.slane %v15902_v8, 2  ;;  %v15904_v55 = vmov 0  ;;  %v912_v19 = vrot.slane %v15907_v1, 2  ;;  %v1711_v20 = vsel %vm15564_vm6, %v627_v33, %v707_v39 }
 0x155   :  { %v15905_v55 = vsel %vm9884_vm8, 4294967295, %v15904_v55  ;;  %v917_v37 = vor.u32 %v916_v18, %v915_v48  ;;  %v1772_v48 = vsel %vm9763_vm1, %v1711_v20, %v803_v12  ;;  %v1852_v39 = vsel %vm9884_vm8, %v9785_v3, %v979_v44 }
 0x156   :  { %2337 = vrot.lane.b32.xlu0 %v9859_v36, %s8743_s19  ;;  %15906 = vst [vmem:[#allocation24_spill] sm:$0xff] %v15905_v55  ;;  %v978_v33 = vsel %vm15560_vm9, %v946_v7, %v948_v40  ;;  %v914_v52 = vor.u32 %v913_v17, %v912_v19  ;;  %v1790_v3 = vsel %vm15565_vm11, %v1772_v48, %v882_v60  ;;  %v1099_v48 = vrot.slane %v15897_v13, 7  ;;  %v15919_v55 = vld [vmem:[#allocation39_spill] sm:$0xff] }
 0x157   :  { %2339 = vrot.lane.b32.xlu1 %v9856_v42, %s8743_s19  ;;  %v920_v44 = vor.u32 %v919_v9, %v918_v10  ;;  %v1013_v9 = vrot.slane %v15902_v8, 1  ;;  %v15918_v42 = vld [vmem:[#allocation37_spill] sm:$0xff]  ;;  %vm15928_vm4 = vcmask 1022976   ;;  %vm2007_vm14 = vsmask.f32 3328 }
 0x158   :  { %v1027_v2 = vpop.permute.xlu1 %1026  ;;  %v9867_v51 = vpop.permute.xlu0 %953 }
 0x159   :  { %15899 = vst [vmem:[#allocation31_spill] sm:$0xff] %v9867_v51  ;;  %v981_v19 = vsel %vm15560_vm9, %v952_v53, %v9867_v51 }
 0x15a   :  { %475 = vrot.lane.b32.xlu0 %v15903_v46, %s8735_s23  ;;  %v922_v46 = vrot.slane %v15910_v38, 3 }
 0x15b   :  { %477 = vrot.lane.b32.xlu1 %v15901_v54, %s8735_s23 }
 0x15c   :  { %v9892_v54 = vpop.permute.xlu1 %1121  ;;  %v1029_v35 = vpop.permute.xlu0 %1028  ;;  %v923_v40 = vor.u32 %v922_v46, %v921_v16  ;;  %v1014_v16 = vrot.slane %v15900_v6, 1 }
 0x15d   :  { %v9903_v18 = vsel %vm15557_vm5, %v1027_v2, %v1029_v35 }
 0x15e   :  { %479 = vrot.lane.b32.xlu0 %v15916_v4, %s8735_s23  ;;  %v1873_v20 = vsel %vm15623_vm12, %v1852_v39, %v9903_v18  ;;  %v980_v4 = vsel %vm15560_vm9, %v9820_v59, %v952_v53  ;;  %v1854_v53 = vsel %vm9884_vm8, %v9859_v36, %v981_v19  ;;  %v1097_v39 = vrot.slane %v15907_v1, 7 }
 0x15f   :  { %481 = vrot.lane.b32.xlu1 %v15914_v0, %s8735_s23  ;;  %2469 = vmatprep.subr.bf16.mxu0 %v1873_v20  ;;  %v1851_v0 = vsel %vm9884_vm8, %v1790_v3, %v978_v33  ;;  %v1016_v3 = vrot.slane %v15913_v30, 1  ;;  %vm1928_vm9 = vsmask.f32 256 }
 0x160   :  { %v1025_v34 = vpop.permute.xlu1 %1024  ;;  %v9917_v12 = vpop.permute.xlu0 %1123  ;;  %v1098_v20 = vor.u32 %v1097_v39, %v15908_v14  ;;  %v1265_v39 = vrot.slane %v15898_v57, 5 }
 0x161   :  { %v9921_v7 = vsel %vm15557_vm5, %v1025_v34, %v1027_v2 }
 0x162   :  { %955 = vrot.lane.b32.xlu0 %v914_v52, %s8736_s24  ;;  %v1869_v60 = vsel %vm15623_vm12, %v1851_v0, %v9921_v7  ;;  %v1015_v0 = vrot.slane %v15915_v11, 1 }
 0x163   :  { %957 = vrot.lane.b32.xlu1 %v917_v37, %s8736_s24  ;;  %2470 = vmatpush1.bf16.msra.mxu0 %v1869_v60  ;;  %v1853_v37 = vsel %vm9884_vm8, %v9803_v43, %v980_v4  ;;  %v1100_v43 = vor.u32 %v1099_v48, %v15898_v57  ;;  %v1264_v48 = vrot.slane %v15897_v13, 4 }
 0x164   :  { %v9933_v2 = vpop.permute.xlu1 %1032  ;;  %v1031_v17 = vpop.permute.xlu0 %1030 }
 0x165   :  { %15917 = vst [vmem:[#allocation30_spill] sm:$0xff] %v9933_v2  ;;  %v9938_v10 = vsel %vm15557_vm5, %v1029_v35, %v1031_v17  ;;  %v9942_v59 = vsel %vm15557_vm5, %v1031_v17, %v9933_v2  ;;  %v1266_v2 = vor.u32 %v1265_v39, %v1264_v48  ;;  %v15922_v48 = vunpack.i.l.bf16 %v9251_v61 }
 0x166   :  { %959 = vrot.lane.b32.xlu0 %v920_v44, %s8736_s24  ;;  %v1881_v35 = vsel %vm15623_vm12, %v1854_v53, %v9942_v59  ;;  %v1877_v46 = vsel %vm15623_vm12, %v1853_v37, %v9938_v10  ;;  %v1101_v44 = vrot.slane %v15911_v56, 7  ;;  %v1188_v53 = vrot.slane %v15900_v6, 6 }
 0x167   :  { %961 = vrot.lane.b32.xlu1 %v923_v40, %s8736_s24  ;;  %2510 = vmatprep.subr.bf16.mxu1 %v1881_v35  ;;  %v1103_v40 = vrot.slane %v15909_v21, 7  ;;  %v1187_v37 = vrot.slane %v15902_v8, 6  ;;  %vm15929_vm5 = vcmask 1042432  }
 0x168   :  { %v9958_v36 = vpop.permute.xlu1 %1125  ;;  %v9960_v33 = vpop.permute.xlu0 %1119  ;;  %2511 = vmatpush1.bf16.msra.mxu1 %v1877_v46  ;;  %v1102_v17 = vor.u32 %v1101_v44, %v15912_v49  ;;  %v246_v44 = vsel %vm15558_vm0, %v9124_v62, %v9328_v58  ;;  %v1270_v62 = vrot.slane %v15909_v21, 4 }
 0x169   :  { %v1104_v60 = vor.u32 %v1103_v40, %v15910_v38  ;;  %v1271_v40 = vrot.slane %v15910_v38, 5 }
 0x16a   :  { %1034 = vrot.lane.b32.xlu0 %v1013_v9, %s8737_s25 }
 0x16b   :  { %1036 = vrot.lane.b32.xlu1 %v1014_v16, %s8737_s25 }
 0x16c   :  { %v9966_v52 = vpop.permute.xlu1 %1200  ;;  %v9968_v34 = vpop.permute.xlu0 %1127 }
 0x16e   :  { %1129 = vrot.lane.b32.xlu0 %v1098_v20, %s8738_s26  ;;  %v1262_v20 = vrot.slane %v15908_v14, 5 }
 0x16f   :  { %1131 = vrot.lane.b32.xlu1 %v1100_v43, %s8738_s26  ;;  %v1261_v43 = vrot.slane %v15907_v1, 4 }
 0x170   :  { %v9976_v4 = vpop.permute.xlu1 %1198  ;;  %v9978_v19 = vpop.permute.xlu0 %1202 }
 0x171   :  { %v1263_v51 = vor.u32 %v1262_v20, %v1261_v43  ;;  %v1540_v43 = vsel %vm9534_vm7, %v15902_v8, %v246_v44 }
 0x172   :  { %1038 = vrot.lane.b32.xlu0 %v1015_v0, %s8737_s25  ;;  %v1189_v0 = vrot.slane %v15915_v11, 6 }
 0x173   :  { %1040 = vrot.lane.b32.xlu1 %v1016_v3, %s8737_s25  ;;  %v1190_v3 = vrot.slane %v15913_v30, 6 }
 0x174   :  { %v9984_v16 = vpop.permute.xlu1 %1206  ;;  %v9986_v9 = vpop.permute.xlu0 %1204 }
 0x176   :  { %1133 = vrot.lane.b32.xlu0 %v1102_v17, %s8738_s26 }
 0x177   :  { %1135 = vrot.lane.b32.xlu1 %v1104_v60, %s8738_s26 }
 0x178   :  { %v9992_v35 = vpop.permute.xlu1 %1298  ;;  %v9994_v46 = vpop.permute.xlu0 %1296 }
 0x17a   :  { %1208 = vrot.lane.b32.xlu0 %v1187_v37, %s8739_s14  ;;  %v248_v37 = vsel %vm15558_vm0, %v15918_v42, %v15919_v55 }
 0x17b   :  { %1210 = vrot.lane.b32.xlu1 %v1188_v53, %s8739_s14  ;;  %v247_v53 = vsel %vm15558_vm0, %v9328_v58, %v15918_v42  ;;  %v249_v58 = vsel %vm15558_vm0, %v15919_v55, %v15920_v5  ;;  %v15921_v42 = vunpack.i.h.bf16 %v9251_v61  ;;  %v15924_v55 = vld [vmem:[#allocation40_spill] sm:$0xff]  ;;  %v1542_v44 = vsel %vm9534_vm7, %v15915_v11, %v248_v37  ;;  %vm15930_vm0 = vmmov %vm15929_vm5 }
 0x17c   :  { %v10008_v60 = vpop.permute.xlu1 %1300  ;;  %v10010_v17 = vpop.permute.xlu0 %1294  ;;  %v1541_v20 = vsel %vm9534_vm7, %v15900_v6, %v247_v53  ;;  %v1543_v31 = vsel %vm9534_vm7, %v15913_v30, %v249_v58  ;;  %v1272_v37 = vor.u32 %v1271_v40, %v1270_v62  ;;  %vm15931_vm2 = vmmov %vm15930_vm0  ;;  %v15933_v58 = vld [vmem:[#allocation44_spill] sm:$0xff]  ;;  %v15937_v62 = vld [vmem:[#allocation46_spill] sm:$0xff] }
 0x17d   :  { %v10032_v39 = vsel %vm15562_vm10, %v15922_v48, %v15921_v42  ;;  %v15925_v48 = vld [vmem:[#allocation43_spill] sm:$0xff]  ;;  %vm15934_vm10 = vcmask 1022976  }
 0x17e   :  { %1212 = vrot.lane.b32.xlu0 %v1189_v0, %s8739_s14  ;;  %v338_v53 = vsel %vm15559_vm3, %v15924_v55, %v15925_v48 }
 0x17f   :  { %1214 = vrot.lane.b32.xlu1 %v1190_v3, %s8739_s14  ;;  %v15923_v3 = vld [vmem:[#allocation41_spill] sm:$0xff] }
 0x180   :  { %v336_v0 = vsel %vm15559_vm3, %v9145_v41, %v15923_v3  ;;  %v337_v5 = vsel %vm15559_vm3, %v15923_v3, %v15924_v55  ;;  %v10046_v22 = vpop.permute.xlu1 %1375  ;;  %v10048_v42 = vpop.permute.xlu0 %1302  ;;  %v339_v41 = vsel %vm15559_vm3, %v15925_v48, %v15926_v23  ;;  %v426_v3 = vsel %vm15928_vm4, %v9175_v50, %v15927_v45  ;;  %vm15932_vm4 = vmmov %vm15930_vm0 }
 0x181   :  { %v1573_v55 = vsel %vm15929_vm5, %v1540_v43, %v336_v0  ;;  %v10069_v24 = vsel %vm15930_vm0, %v1541_v20, %v337_v5  ;;  %vm15622_vm3 = vcmask 515072   ;;  %v10072_v48 = vsel %vm15931_vm2, %v1542_v44, %v338_v53  ;;  %vm15936_vm0 = vmmov %vm15934_vm10  ;;  %v15939_v43 = vld [vmem:[#allocation49_spill] sm:$0xff] }
 0x182   :  { %1304 = vrot.lane.b32.xlu0 %v1263_v51, %s8740_s15  ;;  %v10075_v50 = vsel %vm15932_vm4, %v1543_v31, %v339_v41  ;;  %v10084_v27 = vsel %vm9552_vm13, %v1573_v55, %v426_v3  ;;  %v15935_v51 = vld [vmem:[#allocation47_spill] sm:$0xff]  ;;  %vm15938_vm5 = vmmov %vm15936_vm0  ;;  %vm15573_vm2 = vcmask 506880   ;;  %vm15568_vm4 = vcmask 498688  }
 0x183   :  { %1306 = vrot.lane.b32.xlu1 %v1266_v2, %s8740_s15  ;;  %v10080_v2 = vsel %vm15934_vm10, %v15927_v45, %v15933_v58  ;;  %v10091_v40 = vsel %vm15936_vm0, %v15933_v58, %v15935_v51  ;;  %v10096_v31 = vsel %vm15938_vm5, %v15935_v51, %v15937_v62  ;;  %vm15940_vm10 = vcmask 793600   ;;  %vm10109_vm0 = vmand %vm15564_vm6, %vm1928_vm9 }
 0x184   :  { %v1374_v26 = vpop.permute.xlu1 %1373  ;;  %v10086_v5 = vpop.permute.xlu0 %1377  ;;  %v10101_v45 = vsel %vm15940_vm10, %v9253_v25, %v15939_v43  ;;  %v1363_v20 = vrot.slane %v15900_v6, 3  ;;  %v1362_v0 = vrot.slane %v15902_v8, 3  ;;  %v1153_v25 = vsel %vm15622_vm3, %v9892_v54, %v9917_v12  ;;  %vm10127_vm9 = vmand %vm15565_vm11, %vm2007_vm14 }
 0x185   :  { %vm15569_vm5 = vcmask 490496   ;;  %vm2086_vm10 = vsmask.f32 6400  ;;  %v1439_v53 = vrot.slane %v15897_v13, 1  ;;  %v1440_v41 = vrot.slane %v15898_v57, 2 }
 0x186   :  { %1308 = vrot.lane.b32.xlu0 %v1269_v15, %s8740_s15  ;;  %v1232_v15 = vsel %vm15573_vm2, %v9966_v52, %v9978_v19  ;;  %v1436_v3 = vrot.slane %v15907_v1, 1  ;;  %v1328_v13 = vsel %vm15568_vm4, %v9994_v46, %v9992_v35  ;;  %vm15572_vm6 = vcmask 261120   ;;  %vm10152_vm11 = vmand %vm15623_vm12, %vm2086_vm10 }
 0x187   :  { %1310 = vrot.lane.b32.xlu1 %v1272_v37, %s8740_s15  ;;  %v1437_v37 = vrot.slane %v15908_v14, 2  ;;  %v1365_v58 = vrot.slane %v15913_v30, 3  ;;  %v1364_v51 = vrot.slane %v15915_v11, 3  ;;  %v1931_v57 = vsel %vm10109_vm0, %v9903_v18, %v1153_v25 }
 0x188   :  { %v10120_v6 = vpop.permute.xlu1 %1381  ;;  %v1380_v8 = vpop.permute.xlu0 %1379  ;;  %v1407_v1 = vsel %vm15569_vm5, %v10046_v22, %v10086_v5  ;;  %v1445_v14 = vrot.slane %v15909_v21, 1  ;;  %v1446_v62 = vrot.slane %v15910_v38, 2  ;;  %v1152_v11 = vsel %vm15622_vm3, %v9960_v33, %v9892_v54 }
 0x189   :  { %vm15945_vm14 = vcmask 1041408   ;;  %v1231_v38 = vsel %vm15573_vm2, %v9976_v4, %v9966_v52  ;;  %v1441_v25 = vor.u32 %v1440_v41, %v1439_v53  ;;  %vm15948_vm10 = vcmask 1044480   ;;  %v15949_v41 = vld [vmem:[#allocation51_spill] sm:$0xff] }
 0x18a   :  { %1383 = vrot.lane.b32.xlu0 %v1362_v0, %s8741_s18  ;;  %v1952_v30 = vsel %vm15945_vm14, %v1931_v57, %v1232_v15  ;;  %v1443_v0 = vrot.slane %v15912_v49, 2  ;;  %v1438_v15 = vor.u32 %v1437_v37, %v1436_v3  ;;  %v1155_v57 = vsel %vm15622_vm3, %v9958_v36, %v9968_v34 }
 0x18b   :  { %1385 = vrot.lane.b32.xlu1 %v1363_v20, %s8741_s18  ;;  %v1442_v20 = vrot.slane %v15911_v56, 1  ;;  %v2010_v21 = vsel %vm10127_vm9, %v1952_v30, %v1328_v13  ;;  %v1327_v56 = vsel %vm15568_vm4, %v10010_v17, %v9994_v46  ;;  %v1930_v52 = vsel %vm10109_vm0, %v9921_v7, %v1152_v11 }
 0x18c   :  { %v1474_v54 = vpop.permute.xlu1 %1473  ;;  %v1472_v33 = vpop.permute.xlu0 %1471  ;;  %v2031_v29 = vsel %vm15948_vm10, %v2010_v21, %v1407_v1  ;;  %v1406_v4 = vsel %vm15569_vm5, %v1374_v26, %v10046_v22  ;;  %v8271_v46 = vunpack.i.l.bf16 %v15949_v41  ;;  %v1948_v17 = vsel %vm15945_vm14, %v1930_v52, %v1231_v38  ;;  %v15961_v52 = vld [vmem:[#allocation56_spill] sm:$0xff] }
 0x18d   :  { %v1503_v49 = vsel %vm15572_vm6, %v1472_v33, %v1474_v54  ;;  %v1447_v3 = vor.u32 %v1446_v62, %v1445_v14  ;;  %v1444_v37 = vor.u32 %v1443_v0, %v1442_v20  ;;  %v1154_v7 = vsel %vm15622_vm3, %v9917_v12, %v9958_v36 }
 0x18e   :  { %1387 = vrot.lane.b32.xlu0 %v1364_v51, %s8741_s18  ;;  %v2089_v53 = vsel %vm10152_vm11, %v2031_v29, %v1503_v49  ;;  %v1933_v22 = vsel %vm10109_vm0, %v9942_v59, %v1155_v57  ;;  %v1234_v26 = vsel %vm15573_vm2, %v9986_v9, %v9984_v16  ;;  %v2009_v29 = vsel %vm10127_vm9, %v1948_v17, %v1327_v56  ;;  %v49_v17 = vld [vmem:[%s15393_s0 + $0x38] sm:$0x77] }
 0x18f   :  { %1389 = vrot.lane.b32.xlu1 %v1365_v58, %s8741_s18  ;;  %2471 = vmatprep.subr.bf16.mxu0 %v2089_v53  ;;  %v1233_v62 = vsel %vm15573_vm2, %v9978_v19, %v9986_v9  ;;  %v1330_v12 = vsel %vm15568_vm4, %v10008_v60, %v10048_v42  ;;  %v2027_v59 = vsel %vm15948_vm10, %v2009_v29, %v1406_v4  ;;  %v15950_v9 = vld [vmem:[#allocation48_spill] sm:$0xff]  ;;  %vm15951_vm14 = vcmask 793600  }
 0x190   :  { %v1476_v13 = vpop.permute.xlu1 %1475  ;;  %v1470_v58 = vpop.permute.xlu0 %1469  ;;  %v1329_v51 = vsel %vm15568_vm4, %v9992_v35, %v10008_v60  ;;  %v1409_v1 = vsel %vm15569_vm5, %v1380_v8, %v10120_v6  ;;  %v2160_v14 = vsel %vm15951_vm14, %v15939_v43, %v15950_v9  ;;  %v1932_v11 = vsel %vm10109_vm0, %v9938_v10, %v1154_v7 }
 0x191   :  { %v1502_v36 = vsel %vm15572_vm6, %v1470_v58, %v1472_v33  ;;  %vm15952_vm10 = vcmask 1041408   ;;  %v1408_v60 = vsel %vm15569_vm5, %v10086_v5, %v1380_v8  ;;  %v1504_v0 = vsel %vm15572_vm6, %v1474_v54, %v1476_v13 }
 0x192   :  { %1479 = vrot.lane.b32.xlu0 %v1438_v15, %s15570_s22  ;;  %v2088_v19 = vsel %vm10152_vm11, %v2027_v59, %v1502_v36  ;;  %v1960_v35 = vsel %vm15952_vm10, %v1933_v22, %v1234_v26  ;;  %vm15953_vm4 = vmmov %vm15952_vm10  ;;  %vm15954_vm14 = vcmask 1045504   ;;  %v15956_v54 = vunpack.i.h.bf16 %v9251_v61  ;;  %v15966_v26 = vld [vmem:[#allocation55_spill] sm:$0xff]  ;;  %v15975_v59 = vld [vmem:[#allocation53_spill] sm:$0xff] }
 0x193   :  { %1481 = vrot.lane.b32.xlu1 %v1441_v25, %s15570_s22  ;;  %2472 = vmatpush1.bf16.msra.mxu0 %v2088_v19  ;;  %v1956_v30 = vsel %vm15953_vm4, %v1932_v11, %v1233_v62  ;;  %v2012_v20 = vsel %vm10127_vm9, %v1960_v35, %v1330_v12  ;;  %v2201_v10 = vsel %vm15954_vm14, %v10084_v27, %v10101_v45  ;;  %vm15955_vm4 = vcmask 1044480   ;;  %v15958_v25 = vld [vmem:[#allocation54_spill] sm:$0xff]  ;;  %v15973_v12 = vld [vmem:[#allocation25_spill] sm:$0xff] }
 0x194   :  { %v10223_v38 = vpop.permute.xlu1 %234  ;;  %v10225_v43 = vpop.permute.xlu0 %1477  ;;  %v2011_v21 = vsel %vm10127_vm9, %v1956_v30, %v1329_v51  ;;  %v2039_v8 = vsel %vm15955_vm4, %v2012_v20, %v1409_v1  ;;  %vm15957_vm10 = vcmask 785408   ;;  %vm15959_vm5 = vcmask 793600   ;;  %vm15960_vm14 = vmmov %vm15955_vm4  ;;  %v15972_v62 = vld [vmem:[#allocation50_spill] sm:$0xff]  ;;  %v15981_v30 = vld [vmem:[#allocation32_spill] sm:$0xff] }
 0x195   :  { %v1505_v5 = vsel %vm15572_vm6, %v1476_v13, %v10225_v43  ;;  %v10240_v33 = vsel %vm15957_vm10, %v15956_v54, %v8271_v46  ;;  %v2161_v15 = vsel %vm15959_vm5, %v15950_v9, %v15958_v25  ;;  %v15574_v45 = vunpack.i.l.bf16 %v9416_v32 }
 0x196   :  { %1483 = vrot.lane.b32.xlu0 %v1444_v37, %s15570_s22  ;;  %v2091_v57 = vsel %vm10152_vm11, %v2039_v8, %v1505_v5  ;;  %v2035_v56 = vsel %vm15960_vm14, %v2011_v21, %v1408_v60  ;;  %v10255_v61 = vsel %vm9552_vm13, %v10069_v24, %v10080_v2  ;;  %v8272_v49 = vunpack.i.h.bf16 %v15949_v41  ;;  %v15980_v60 = vld [vmem:[#allocation62_spill] sm:$0xff]  ;;  %v15983_v41 = vld [vmem:[#allocation61_spill] sm:$0xff] }
 0x197   :  { %1485 = vrot.lane.b32.xlu1 %v1447_v3, %s15570_s22  ;;  %v2162_v4 = vsel %vm15959_vm5, %v15958_v25, %v15961_v52  ;;  %2512 = vmatprep.subr.bf16.mxu1 %v2091_v57  ;;  %v2090_v53 = vsel %vm10152_vm11, %v2035_v56, %v1504_v0  ;;  %v10270_v24 = vsel %vm9552_vm13, %v10072_v48, %v10091_v40  ;;  %vm15963_vm4 = vcmask 1045504   ;;  %v15964_v48 = vld [vmem:[#allocation52_spill] sm:$0xff]  ;;  %v15985_v0 = vld [vmem:[#allocation67_spill] sm:$0xff]  ;;  %v15988_v8 = vld [vmem:[#allocation66_spill] sm:$0xff]  ;;  %s8756_s22 = smov 112  }
 0x198   :  { %v10276_v2 = vsel %vm9552_vm13, %v10075_v50, %v10096_v31  ;;  %v10278_v3 = vpop.permute.xlu1 %324  ;;  %v10280_v37 = vpop.permute.xlu0 %236  ;;  %2513 = vmatpush1.bf16.msra.mxu1 %v2090_v53  ;;  %v2204_v7 = vsel %vm15963_vm4, %v10255_v61, %v2160_v14  ;;  %v2240_v22 = vsel %vm9580_vm15, %v2201_v10, %v10032_v39  ;;  %vm15965_vm10 = vcmask 777216   ;;  %vm15968_vm5 = vmmov %vm15963_vm4  ;;  %v15986_v10 = vld [vmem:[#allocation35_spill] sm:$0xff]  ;;  %v15992_v57 = vld [vmem:[#allocation58_spill] sm:$0xff] }
 0x199   :  { %15962 = vst [vmem:[#allocation23_spill] sm:$0xff] %v10276_v2  ;;  %v712_v40 = vsel %vm15965_vm10, %v15889_v63, %v15964_v48  ;;  %vm15967_vm14 = vmmov %vm15965_vm10  ;;  %v2241_v31 = vsel %vm9580_vm15, %v2204_v7, %v10240_v33  ;;  %v2207_v29 = vsel %vm15968_vm5, %v10270_v24, %v2161_v15  ;;  %vm15969_vm4 = vcmask 785408   ;;  %v15995_v53 = vld [vmem:[#allocation60_spill] sm:$0xff] }
 0x19a   :  { %v713_v50 = vsel %vm15967_vm14, %v15964_v48, %v15966_v26  ;;  %2309 = vrot.lane.b32.xlu0 %v2240_v22, %s8743_s19  ;;  %v10303_v13 = vsel %vm15969_vm4, %v8272_v49, %v15574_v45  ;;  %vm15971_vm10 = vmmov %vm15968_vm5  ;;  %v65_v58 = vcombine.high %v49_v17, %v49_v17  ;;  %vm15978_vm2 = vcmask 1040384   ;;  %v15997_v22 = vld [vmem:[#allocation59_spill] sm:$0xff] }
 0x19b   :  { %2311 = vrot.lane.b32.xlu1 %v2241_v31, %s8743_s19  ;;  %15970 = vst [vmem:[#allocation33_spill] sm:$0xff] %v10303_v13  ;;  %v2210_v63 = vsel %vm15971_vm10, %v10276_v2, %v2162_v4  ;;  %vm15974_vm14 = vmmov %vm15969_vm4  ;;  %vm15982_vm10 = vcmask 769024   ;;  %v10344_v25 = vpack.c.bf16 %v49_v17, %v49_v17  ;;  %v15999_v17 = vld [vmem:[#allocation64_spill] sm:$0xff]  ;;  %v16030_v2 = vld [vmem:[#allocation22_spill] sm:$0xff] }
 0x19c   :  { %v632_v36 = vsel %vm15974_vm14, %v15973_v12, %v15972_v62  ;;  %vm15976_vm5 = vmmov %vm15969_vm4  ;;  %v10320_v14 = vpop.permute.xlu1 %414  ;;  %v10322_v11 = vpop.permute.xlu0 %326  ;;  %v808_v20 = vsel %vm15982_vm10, %v15981_v30, %v15980_v60  ;;  %v2243_v5 = vsel %vm9580_vm15, %v2210_v63, %v10303_v13  ;;  %v10346_v15 = vpack.c.bf16 %v65_v58, %v65_v58  ;;  %v16005_v12 = vld [vmem:[#allocation72_spill] sm:$0xff] }
 0x19d   :  { %v633_v51 = vsel %vm15976_vm5, %v15972_v62, %v15975_v59  ;;  %vm15977_vm6 = vmmov %vm15969_vm4  ;;  %v1731_v19 = vsel %vm15978_vm2, %v632_v36, %v712_v40  ;;  %15990 = vst [vmem:[#allocation28_spill] sm:$0xff] %v10344_v25  ;;  %v634_v56 = vsel %vm15976_vm5, %v15975_v59, %v15992_v57  ;;  %v16007_v59 = vld [vmem:[#allocation71_spill] sm:$0xff]  ;;  %v10397_v30 = vshrl.u32 %v10344_v25, 16 }
 0x19e   :  { %v10316_v1 = vsel %vm15977_vm6, %v8271_v46, %v8272_v49  ;;  %vm15979_vm4 = vmmov %vm15978_vm2  ;;  %vm15987_vm2 = vcmask 760832   ;;  %15991 = vst [vmem:[#allocation27_spill] sm:$0xff] %v10346_v15  ;;  %v15993_v49 = vld [vmem:[#allocation57_spill] sm:$0xff] }
 0x19f   :  { %v1735_v9 = vsel %vm15979_vm4, %v633_v51, %v713_v50  ;;  %v2242_v35 = vsel %vm9580_vm15, %v2207_v29, %v10316_v1  ;;  %vm15984_vm6 = vmmov %vm15982_vm10  ;;  %v887_v21 = vsel %vm15987_vm2, %v15986_v10, %v15985_v0  ;;  %2315 = vrot.lane.b32.xlu1 %v2243_v5, %s8743_s19  ;;  %vm15996_vm10 = vcmask 777216   ;;  %v16001_v50 = vld [vmem:[#allocation63_spill] sm:$0xff]  ;;  %16013 = vst [vmem:[#allocation8_spill] sm:$0xff] %v10397_v30 }
 0x1a0   :  { %v809_v46 = vsel %vm15984_vm6, %v15980_v60, %v15983_v41  ;;  %vm15989_vm14 = vmmov %vm15987_vm2  ;;  %2313 = vrot.lane.b32.xlu0 %v2242_v35, %s8743_s19  ;;  %v714_v7 = vsel %vm15996_vm10, %v15966_v26, %v15995_v53  ;;  %vm16000_vm2 = vcmask 769024   ;;  %v10368_v63 = vpop.permute.xlu0 %416  ;;  %v1777_v26 = vsel %vm9763_vm1, %v1731_v19, %v808_v20 }
 0x1a1   :  { %v888_v54 = vsel %vm15989_vm14, %v15985_v0, %v15988_v8  ;;  %vm15994_vm4 = vmmov %vm15976_vm5  ;;  %v810_v40 = vsel %vm16000_vm2, %v15983_v41, %v15999_v17  ;;  %v10366_v29 = vpop.permute.xlu1 %2146  ;;  %16003 = vst [vmem:[#allocation26_spill] sm:$0xff] %v10368_v63  ;;  %v1778_v62 = vsel %vm9763_vm1, %v1735_v9, %v809_v46  ;;  %vm16006_vm5 = vcmask 760832  }
 0x1a2   :  { %v635_v4 = vsel %vm15994_vm4, %v15992_v57, %v15993_v49  ;;  %vm15998_vm6 = vmmov %vm15996_vm10  ;;  %v889_v36 = vsel %vm16006_vm5, %v15988_v8, %v16005_v12  ;;  %vm16009_vm10 = vcmask 1043456   ;;  %v10391_v19 = vshll.u32 %v10346_v15, 16 }
 0x1a3   :  { %v715_v48 = vsel %vm15998_vm6, %v15995_v53, %v15997_v22  ;;  %vm16002_vm14 = vmmov %vm16000_vm2  ;;  %v10381_v35 = vsel %vm16009_vm10, %v1778_v62, %v888_v54  ;;  %v10394_v9 = vshrl.u32 %v10346_v15, 16  ;;  %v10400_v20 = vshll.u32 %v10344_v25, 16  ;;  %v16023_v62 = vld [vmem:[#allocation12_spill] sm:$0xff] }
 0x1a4   :  { %v811_v31 = vsel %vm16002_vm14, %v15999_v17, %v16001_v50  ;;  %vm16008_vm4 = vmmov %vm16006_vm5  ;;  %2343 = vrot.lane.b32.xlu1 %v10381_v35, %s8743_s19  ;;  %16011 = vst [vmem:[#allocation29_spill] sm:$0xff] %v10391_v19  ;;  %vm16015_vm2 = vcmask 1040384   ;;  %v10404_v10 = vpop.permute.xlu0 %2148 }
 0x1a5   :  { %v890_v51 = vsel %vm16008_vm4, %v16005_v12, %v16007_v59  ;;  %vm16010_vm6 = vmmov %vm16009_vm10  ;;  %16012 = vst [vmem:[#allocation36_spill] sm:$0xff] %v10394_v9  ;;  %v1739_v41 = vsel %vm16015_vm2, %v634_v56, %v714_v7  ;;  %v2302_v0 = vpop.permute.xlu1 %2301  ;;  %vm15624_vm10 = vcmask 252928   ;;  %v2103_v57 = vrot.slane %v10394_v9, 6 }
 0x1a6   :  { %v10384_v60 = vsel %vm16010_vm6, %v1777_v26, %v887_v21  ;;  %16014 = vst [vmem:[#allocation6_spill] sm:$0xff] %v10400_v20  ;;  %vm16016_vm14 = vmmov %vm16015_vm2  ;;  %v1779_v5 = vsel %vm9763_vm1, %v1739_v41, %v810_v40  ;;  %v2104_v56 = vrot.slane %v10391_v19, 7  ;;  %v208_v53 = vrot.slane %v10400_v20, 7  ;;  %v16021_v40 = vld [vmem:[#allocation17_spill] sm:$0xff] }
 0x1a7   :  { %2341 = vrot.lane.b32.xlu0 %v10384_v60, %s8743_s19  ;;  %v1743_v46 = vsel %vm16016_vm14, %v635_v4, %v715_v48  ;;  %16017 = vst [vmem:[#allocation5_spill] sm:$0xff] %v10404_v10  ;;  %vm16018_vm5 = vmmov %vm16010_vm6  ;;  %v205_v4 = vrot.slane %v10397_v30, 6  ;;  %v16024_v26 = vrot.slane %v16023_v62, 2  ;;  %v388_v13 = vrot.slane %v10400_v20, 4 }
 0x1a8   :  { %v1780_v21 = vsel %vm9763_vm1, %v1743_v46, %v811_v31  ;;  %vm16020_vm4 = vmmov %vm16018_vm5  ;;  %v2304_v48 = vpop.permute.xlu0 %2303  ;;  %v16022_v31 = vrot.slane %v16021_v40, 2  ;;  %v2105_v12 = vor.u32 %v2104_v56, %v2103_v57  ;;  %v16027_v46 = vld [vmem:[#allocation15_spill] sm:$0xff]  ;;  %v2111_v57 = vrot.slane %v10346_v15, 5 }
 0x1a9   :  { %v10411_v8 = vsel %vm16018_vm5, %v1780_v21, %v890_v51  ;;  %v10414_v54 = vsel %vm16020_vm4, %v1779_v5, %v889_v36  ;;  %v10424_v7 = vpop.permute.xlu1 %8284  ;;  %v2365_v17 = vsel %vm15624_vm10, %v2302_v0, %v2304_v48  ;;  %v209_v36 = vor.u32 %v208_v53, %v205_v4  ;;  %v16028_v5 = vld [vmem:[#allocation16_spill] sm:$0xff] }
 0x1aa   :  { %16019 = vst [vmem:[#allocation2_spill] sm:$0xff] %v10411_v8  ;;  %2347 = vrot.lane.b32.xlu1 %v10411_v8, %s8743_s19  ;;  %2473 = vmatprep.subr.bf16.mxu0 %v2365_v17  ;;  %v924_v21 = vrot.slane %v16027_v46, 2  ;;  %v925_v45 = vrot.slane %v16028_v5, 3  ;;  %v387_v8 = vrot.slane %v10397_v30, 3  ;;  %v299_v56 = vrot.slane %v10344_v25, 5 }
 0x1ab   :  { %2345 = vrot.lane.b32.xlu0 %v10414_v54, %s8743_s19  ;;  %vm16034_vm6 = vcmask 1044480   ;;  %vm16035_vm2 = vcmask 1045504   ;;  %vm15602_vm14 = vcmask 613376   ;;  %vm16043_vm5 = vcmask 1014784  }
 0x1ac   :  { %v10435_v41 = vpop.permute.xlu0 %603  ;;  %v926_v17 = vor.u32 %v925_v45, %v924_v21  ;;  %vm16044_vm4 = vmmov %vm16043_vm5 }
 0x1ad   :  { %v10433_v51 = vpop.permute.xlu1 %605  ;;  %16026 = vst [vmem:[#allocation4_spill] sm:$0xff] %v10435_v41 }
 0x1ae   :  { %485 = vrot.lane.b32.xlu1 %v16022_v31, %s8735_s23  ;;  %16025 = vst [vmem:[#allocation3_spill] sm:$0xff] %v10433_v51  ;;  %v389_v31 = vor.u32 %v388_v13, %v387_v8  ;;  %v16031_v51 = vld [vmem:[#allocation18_spill] sm:$0xff] }
 0x1af   :  { %483 = vrot.lane.b32.xlu0 %v16024_v26, %s8735_s23  ;;  %v2115_v26 = vrot.slane %v10394_v9, 3  ;;  %v928_v41 = vrot.slane %v16031_v51, 3 }
 0x1b0   :  { %v10447_v53 = vpop.permute.xlu0 %698 }
 0x1b1   :  { %v10445_v4 = vpop.permute.xlu1 %700 }
 0x1b2   :  { %2106 = vrot.lane.b32.xlu1 %v2105_v12, %s8727_s27  ;;  %16029 = vst [vmem:[#allocation13_spill] sm:$0xff] %v10445_v4  ;;  %v2116_v12 = vrot.slane %v10391_v19, 4 }
 0x1b3   :  { %238 = vrot.lane.b32.xlu0 %v209_v36, %s8727_s27  ;;  %v927_v36 = vrot.slane %v16030_v2, 2 }
 0x1b4   :  { %v2300_v63 = vpop.permute.xlu0 %2299  ;;  %v2117_v45 = vor.u32 %v2116_v12, %v2115_v26  ;;  %v8745_v26 = vmov 65535  }
 0x1b5   :  { %v2306_v10 = vpop.permute.xlu1 %2305  ;;  %v2364_v4 = vsel %vm15624_vm10, %v2300_v63, %v2302_v0  ;;  %v929_v13 = vor.u32 %v928_v41, %v927_v36  ;;  %v1018_v63 = vrot.slane %v16021_v40, 1  ;;  %v1017_v0 = vrot.slane %v16023_v62, 1 }
 0x1b6   :  { %2112 = vrot.lane.b32.xlu1 %v2111_v57, %s8728_s28  ;;  %2474 = vmatpush1.bf16.msra.mxu0 %v2364_v4  ;;  %v1105_v41 = vrot.slane %v16027_v46, 7  ;;  %v2366_v4 = vsel %vm15624_vm10, %v2304_v48, %v2306_v10  ;;  %v2420_v12 = vsel %vm16034_vm6, 4294967295, %v8745_v26  ;;  %vm16045_vm6 = vmmov %vm16035_vm2 }
 0x1b7   :  { %328 = vrot.lane.b32.xlu0 %v299_v56, %s8728_s28  ;;  %v1107_v56 = vrot.slane %v16030_v2, 7 }
 0x1b8   :  { %v10460_v21 = vpop.permute.xlu0 %2307 }
 0x1b9   :  { %v10458_v8 = vpop.permute.xlu1 %794  ;;  %v2367_v57 = vsel %vm15624_vm10, %v2306_v10, %v10460_v21  ;;  %v1108_v36 = vor.u32 %v1107_v56, %v16031_v51  ;;  %v524_v56 = vrot.slane %v10400_v20, 1 }
 0x1ba   :  { %963 = vrot.lane.b32.xlu1 %v926_v17, %s8736_s24  ;;  %16032 = vst [vmem:[#allocation14_spill] sm:$0xff] %v10458_v8  ;;  %2514 = vmatprep.subr.bf16.mxu1 %v2367_v57 }
 0x1bb   :  { %418 = vrot.lane.b32.xlu0 %v389_v31, %s8729_s29  ;;  %2515 = vmatpush1.bf16.msra.mxu1 %v2366_v4  ;;  %v2123_v4 = vrot.slane %v10346_v15, 2 }
 0x1bc   :  { %v10471_v31 = vpop.permute.xlu0 %796 }
 0x1bd   :  { %v2334_v17 = vpop.permute.xlu1 %2333  ;;  %16033 = vst [vmem:[#allocation10_spill] sm:$0xff] %v10471_v31 }
 0x1be   :  { %2118 = vrot.lane.b32.xlu1 %v2117_v45, %s8729_s29  ;;  %v1106_v45 = vor.u32 %v1105_v41, %v16028_v5  ;;  %v528_v41 = vrot.slane %v10391_v19, 1  ;;  %s8764_s29 = smov 98  }
 0x1bf   :  { %965 = vrot.lane.b32.xlu0 %v929_v13, %s8736_s24  ;;  %v10479_v13 = vsel %vm16035_vm2, %v2420_v12, 0 }
 0x1c0   :  { %16036 = vst [vmem:[#allocation11_spill] sm:$0xff] %v10479_v13  ;;  %v2336_v10 = vpop.permute.xlu0 %2335 }
 0x1c1   :  { %v10481_v57 = vpop.permute.xlu1 %873  ;;  %v2380_v48 = vsel %vm15624_vm10, %v2334_v17, %v2336_v10 }
 0x1c2   :  { %1044 = vrot.lane.b32.xlu1 %v1018_v63, %s8737_s25  ;;  %16037 = vst [vmem:[#allocation9_spill] sm:$0xff] %v10481_v57  ;;  %v2426_v63 = vand.u32 %v10479_v13, %v2380_v48 }
 0x1c3   :  { %1042 = vrot.lane.b32.xlu0 %v1017_v0, %s8737_s25  ;;  %v15586_v0 = vrot.slane %v10344_v25, 2 }
 0x1c4   :  { %2475 = vmatprep.subr.bf16.mxu0 %v2426_v63  ;;  %v10491_v12 = vpop.permute.xlu0 %875  ;;  %v10505_v63 = vld [vmem:[%s15394_s1] sm:$0x7] }
 0x1c5   :  { %v2332_v26 = vpop.permute.xlu1 %2331  ;;  %16038 = vst [vmem:[#allocation7_spill] sm:$0xff] %v10491_v12  ;;  %16040 = vst [vmem:[#allocation39_spill] sm:$0xff] %v10505_v63  ;;  %v16041_v12 = vmov 0  }
 0x1c6   :  { %1139 = vrot.lane.b32.xlu1 %v1108_v36, %s8738_s26  ;;  %v2379_v31 = vsel %vm15624_vm10, %v2332_v26, %v2334_v17  ;;  %v543_v36 = vor.u32 %v524_v56, %v10397_v30  ;;  %v546_v26 = vor.u32 %v10394_v9, %v528_v41 }
 0x1c7   :  { %1137 = vrot.lane.b32.xlu0 %v1106_v45, %s8738_s26  ;;  %v2423_v57 = vand.u32 %v10479_v13, %v2379_v31  ;;  %v8288_v45 = vpack.i.bf16 %v528_v41, %v524_v56  ;;  %v672_v56 = vrot.slane %v10344_v25, 7 }
 0x1c8   :  { %v2338_v8 = vpop.permute.xlu0 %2337 }
 0x1c9   :  { %v10500_v48 = vpop.permute.xlu1 %2339  ;;  %2476 = vmatpush1.bf16.msra.mxu0 %v2423_v57  ;;  %v2381_v17 = vsel %vm15624_vm10, %v2336_v10, %v2338_v8 }
 0x1ca   :  { %2152 = vrot.lane.b32.xlu1 %v2123_v4, %s8730_s30  ;;  %16039 = vst [vmem:[#allocation37_spill] sm:$0xff] %v10500_v48  ;;  %v2382_v31 = vsel %vm15624_vm10, %v2338_v8, %v10500_v48  ;;  %v2429_v57 = vand.u32 %v10479_v13, %v2381_v17  ;;  %v764_v8 = vrot.slane %v10397_v30, 5 }
 0x1cb   :  { %2150 = vrot.lane.b32.xlu0 %v15586_v0, %s8730_s30  ;;  %v2432_v4 = vand.u32 %v10479_v13, %v2382_v31  ;;  %v673_v13 = vrot.slane %v10346_v15, 7  ;;  %s16082_s30 = smov 32  }
 0x1cc   :  { %7536 = vmatmul.mubr.msk.bf16.vlgmr.msra.gmra.mrb[0].mxu0 %vm15602_vm14, %v10505_v63  ;;  %v476_v10 = vpop.permute.xlu0 %475 }
 0x1cd   :  { %v478_v0 = vpop.permute.xlu1 %477  ;;  %2516 = vmatprep.subr.bf16.mxu1 %v2432_v4  ;;  %2581 = vmatprep.mubr.bf16.mxu0 %v16041_v12  ;;  %v16046_v4 = vld [vmem:[#allocation92_spill] sm:$0xff] }
 0x1ce   :  { %607 = vrot.lane.b32.xlu1 %v543_v36, %s8731_s13  ;;  %v765_v36 = vrot.slane %v10400_v20, 6  ;;  %v501_v17 = vsel %vm16044_vm4, %v476_v10, %v478_v0  ;;  %2517 = vmatpush1.bf16.msra.mxu1 %v2429_v57  ;;  %v1191_v20 = vrot.slane %v16023_v62, 6 }
 0x1cf   :  { %8289 = vrot.lane.b32.xlu0 %v8288_v45, %s8731_s13  ;;  %v16042_v45 = vld [vmem:[#allocation93_spill] sm:$0xff]  ;;  %v1652_v41 = vsel %vm16045_vm6, %v10084_v27, %v501_v17  ;;  %vm16050_vm6 = vmmov %vm16035_vm2 }
 0x1d0   :  { %v500_v31 = vsel %vm16043_vm5, %v16042_v45, %v476_v10  ;;  %v1698_v45 = vsel %vm9580_vm15, %v1652_v41, %v10032_v39  ;;  %v16047_v10 = vld [vmem:[#allocation94_spill] sm:$0xff]  ;;  %v766_v27 = vor.u32 %v765_v36, %v764_v8  ;;  %vm16049_vm5 = vmmov %vm16044_vm4  ;;  %v1273_v39 = vrot.slane %v16027_v46, 4 }
 0x1d1   :  { %v1648_v30 = vsel %vm16035_vm2, %v16046_v4, %v500_v31  ;;  %2549 = vmatprep.subr.bf16.mxu0 %v1698_v45  ;;  %7537 = vmatmul.mubr.msk.bf16.vlgmr.msra.gmra.mrb[0].mxu1 %vm15602_vm14, %v10505_v63  ;;  %v1192_v31 = vrot.slane %v16021_v40, 6  ;;  %v767_v36 = vrot.slane %v10394_v9, 5  ;;  %v768_v41 = vrot.slane %v10391_v19, 6  ;;  %v16064_v19 = vld [vmem:[#allocation34_spill] sm:$0xff] }
 0x1d2   :  { %702 = vrot.lane.b32.xlu1 %v672_v56, %s8732_s16  ;;  %v1697_v57 = vsel %vm9580_vm15, %v1648_v30, %v16047_v10  ;;  %v10538_v56 = vpop.permute.xlu1 %481  ;;  %v1274_v30 = vrot.slane %v16028_v5, 5  ;;  %2622 = vmatprep.mubr.bf16.mxu1 %v16041_v12  ;;  %v16070_v9 = vld [vmem:[#allocation82_spill] sm:$0xff] }
 0x1d3   :  { %609 = vrot.lane.b32.xlu0 %v546_v26, %s8731_s13  ;;  %16048 = vst [vmem:[#allocation41_spill] sm:$0xff] %v10538_v56  ;;  %v480_v26 = vpop.permute.xlu0 %479  ;;  %2550 = vmatpush1.bf16.msra.mxu0 %v1697_v57  ;;  %v1276_v57 = vrot.slane %v16030_v2, 4 }
 0x1d4   :  { %v502_v17 = vsel %vm16049_vm5, %v478_v0, %v480_v26  ;;  %v503_v4 = vsel %vm16044_vm4, %v480_v26, %v10538_v56  ;;  %v1277_v26 = vrot.slane %v16031_v51, 5  ;;  %vm16053_vm5 = vcmask 752640   ;;  %v16124_v56 = vld [vmem:[#allocation69_spill] sm:$0xff] }
 0x1d5   :  { %v1660_v8 = vsel %vm16050_vm6, %v10270_v24, %v503_v4  ;;  %v1656_v0 = vsel %vm16035_vm2, %v10255_v61, %v502_v17  ;;  %v1275_v61 = vor.u32 %v1274_v30, %v1273_v39  ;;  %v769_v24 = vor.u32 %v768_v41, %v767_v36  ;;  %v16052_v4 = vld [vmem:[#allocation31_spill] sm:$0xff]  ;;  %vm16054_vm4 = vmmov %vm16053_vm5  ;;  %v16055_v39 = vld [vmem:[#allocation76_spill] sm:$0xff] }
 0x1d6   :  { %1216 = vrot.lane.b32.xlu1 %v1191_v20, %s8739_s14  ;;  %v1700_v45 = vsel %vm9580_vm15, %v1660_v8, %v10316_v1  ;;  %v1699_v20 = vsel %vm9580_vm15, %v1656_v0, %v10240_v33  ;;  %v958_v10 = vpop.permute.xlu1 %957  ;;  %v16056_v30 = vld [vmem:[#allocation38_spill] sm:$0xff]  ;;  %vm16057_vm6 = vcmask 1039360   ;;  %vm16059_vm2 = vcmask 1031168  }
 0x1d7   :  { %704 = vrot.lane.b32.xlu0 %v673_v13, %s8732_s16  ;;  %v956_v13 = vpop.permute.xlu0 %955  ;;  %2590 = vmatprep.subr.bf16.mxu1 %v1700_v45  ;;  %v250_v0 = vsel %vm16057_vm6, %v16056_v30, %v16055_v39  ;;  %v16058_v36 = vld [vmem:[#allocation78_spill] sm:$0xff]  ;;  %vm16068_vm6 = vcmask 1022976   ;;  %v934_v63 = vrot.slane %v16124_v56, 3 }
 0x1d8   :  { %2591 = vmatpush1.bf16.msra.mxu1 %v1699_v20  ;;  %v982_v33 = vsel %vm16053_vm5, %v16052_v4, %v956_v13  ;;  %v983_v8 = vsel %vm16054_vm4, %v956_v13, %v958_v10  ;;  %v340_v41 = vsel %vm16059_vm2, %v15926_v23, %v16058_v36  ;;  %v1448_v4 = vrot.slane %v16027_v46, 1 }
 0x1d9   :  { %v1449_v13 = vrot.slane %v16028_v5, 2  ;;  %vm16061_vm5 = vcmask 523264   ;;  %v1856_v30 = vsel %vm9884_vm8, %v10384_v60, %v983_v8  ;;  %v1855_v23 = vsel %vm9884_vm8, %v16064_v19, %v982_v33  ;;  %v16066_v19 = vld [vmem:[#allocation80_spill] sm:$0xff]  ;;  %v16067_v33 = vld [vmem:[#allocation46_spill] sm:$0xff] }
 0x1da   :  { %798 = vrot.lane.b32.xlu1 %v766_v27, %s8733_s17  ;;  %v10567_v17 = vpop.permute.xlu1 %961  ;;  %v847_v27 = vrot.slane %v10344_v25, 4  ;;  %vm16062_vm4 = vmmov %vm16061_vm5  ;;  %v1544_v8 = vsel %vm9534_vm7, %v16023_v62, %v250_v0  ;;  %vm16069_vm2 = vcmask 1042432   ;;  %v1367_v25 = vrot.slane %v16021_v40, 3 }
 0x1db   :  { %1218 = vrot.lane.b32.xlu0 %v1192_v31, %s8739_s14  ;;  %16051 = vst [vmem:[#allocation40_spill] sm:$0xff] %v10567_v17  ;;  %v960_v1 = vpop.permute.xlu0 %959  ;;  %v1278_v31 = vor.u32 %v1277_v26, %v1276_v57 }
 0x1de   :  { %1312 = vrot.lane.b32.xlu1 %v1275_v61, %s8740_s15  ;;  %v1037_v45 = vpop.permute.xlu1 %1036  ;;  %v16060_v61 = vld [vmem:[#allocation30_spill] sm:$0xff] }
 0x1df   :  { %800 = vrot.lane.b32.xlu0 %v769_v24, %s8733_s17  ;;  %v1035_v20 = vpop.permute.xlu0 %1034 }
 0x1e0   :  { %v10585_v24 = vsel %vm16061_vm5, %v16060_v61, %v1035_v20  ;;  %v10588_v57 = vsel %vm16062_vm4, %v1035_v20, %v1037_v45  ;;  %v1366_v20 = vrot.slane %v16023_v62, 3  ;;  %v848_v61 = vrot.slane %v10346_v15, 4 }
 0x1e1   :  { %v1889_v46 = vsel %vm15623_vm12, %v1856_v30, %v10588_v57  ;;  %v1885_v5 = vsel %vm15623_vm12, %v1855_v23, %v10585_v24  ;;  %v1589_v23 = vsel %vm16069_vm2, %v1544_v8, %v340_v41  ;;  %vm16071_vm5 = vcmask 793600  }
 0x1e2   :  { %877 = vrot.lane.b32.xlu1 %v847_v27, %s8734_s20  ;;  %2551 = vmatprep.subr.bf16.mxu0 %v1889_v46  ;;  %v430_v27 = vsel %vm16068_vm6, %v16067_v33, %v16066_v19  ;;  %v2163_v15 = vsel %vm16071_vm5, %v15961_v52, %v16070_v9  ;;  %v1450_v46 = vor.u32 %v1449_v13, %v1448_v4  ;;  %vm16072_vm4 = vcmask 752640   ;;  %v16075_v4 = vld [vmem:[#allocation75_spill] sm:$0xff]  ;;  %v16081_v33 = vld [vmem:[#allocation85_spill] sm:$0xff] }
 0x1e3   :  { %1314 = vrot.lane.b32.xlu0 %v1278_v31, %s8740_s15  ;;  %v10610_v31 = vpop.permute.xlu1 %1131  ;;  %2552 = vmatpush1.bf16.msra.mxu0 %v1885_v5  ;;  %v10612_v30 = vpop.permute.xlu0 %1129  ;;  %v984_v62 = vsel %vm16072_vm4, %v958_v10, %v960_v1  ;;  %vm16073_vm14 = vmmov %vm16072_vm4  ;;  %v1451_v5 = vrot.slane %v16030_v2, 1  ;;  %v1452_v41 = vrot.slane %v16031_v51, 2  ;;  %v10628_v8 = vsel %vm9552_vm13, %v1589_v23, %v430_v27 }
 0x1e4   :  { %v985_v0 = vsel %vm16073_vm14, %v960_v1, %v10567_v17  ;;  %16074 = vst [vmem:[#allocation43_spill] sm:$0xff] %v10628_v8  ;;  %v8277_v52 = vunpack.i.h.bf16 %v9416_v32  ;;  %vm16076_vm6 = vcmask 1039360   ;;  %vm16078_vm14 = vcmask 1045504   ;;  %v16115_v17 = vld [vmem:[#allocation91_spill] sm:$0xff] }
 0x1e5   :  { %v251_v10 = vsel %vm16076_vm6, %v16055_v39, %v16075_v4  ;;  %vm16079_vm2 = vcmask 523264   ;;  %v1857_v39 = vsel %vm9884_vm8, %v10381_v35, %v984_v62  ;;  %v15603_v27 = vunpack.i.l.bf16 %v16081_v33 }
 0x1e6   :  { %1391 = vrot.lane.b32.xlu1 %v1366_v20, %s8741_s18  ;;  %v2213_v20 = vsel %vm16078_vm14, %v10628_v8, %v2163_v15  ;;  %vm16080_vm5 = vmmov %vm16079_vm2  ;;  %v1453_v23 = vor.u32 %v1452_v41, %v1451_v5  ;;  %vm16084_vm4 = vcmask 1031168   ;;  %vm16086_vm6 = vcmask 1022976  }
 0x1e7   :  { %879 = vrot.lane.b32.xlu0 %v848_v61, %s8734_s20  ;;  %v10634_v13 = vpop.permute.xlu1 %1040  ;;  %v1039_v1 = vpop.permute.xlu0 %1038  ;;  %v1858_v61 = vsel %vm9884_vm8, %v10414_v54, %v985_v0  ;;  %v16085_v0 = vld [vmem:[#allocation79_spill] sm:$0xff]  ;;  %vm16089_vm14 = vcmask 785408   ;;  %v1545_v5 = vsel %vm9534_vm7, %v16021_v40, %v251_v10 }
 0x1e8   :  { %16077 = vst [vmem:[#allocation42_spill] sm:$0xff] %v10634_v13  ;;  %v10639_v2 = vsel %vm16079_vm2, %v1037_v45, %v1039_v1  ;;  %v10643_v51 = vsel %vm16080_vm5, %v1039_v1, %v10634_v13  ;;  %v16083_v1 = vld [vmem:[#allocation77_spill] sm:$0xff]  ;;  %v431_v35 = vsel %vm16086_vm6, %v16066_v19, %v16085_v0  ;;  %vm16092_vm2 = vcmask 793600  }
 0x1e9   :  { %v1897_v15 = vsel %vm15623_vm12, %v1858_v61, %v10643_v51  ;;  %v1893_v45 = vsel %vm15623_vm12, %v1857_v39, %v10639_v2  ;;  %v341_v54 = vsel %vm16084_vm4, %v16058_v36, %v16083_v1  ;;  %v16091_v36 = vld [vmem:[#allocation81_spill] sm:$0xff]  ;;  %vm16093_vm5 = vcmask 1042432   ;;  %vm16094_vm4 = vmmov %vm16089_vm14 }
 0x1ea   :  { %1487 = vrot.lane.b32.xlu1 %v1450_v46, %s16082_s30  ;;  %2592 = vmatprep.subr.bf16.mxu1 %v1897_v15  ;;  %v2164_v41 = vsel %vm16092_vm2, %v16070_v9, %v16091_v36  ;;  %v1593_v39 = vsel %vm16093_vm5, %v1545_v5, %v341_v54  ;;  %v16097_v9 = vld [vmem:[#allocation87_spill] sm:$0xff]  ;;  %vm16098_vm6 = vcmask 777216   ;;  %vm16101_vm2 = vcmask 769024   ;;  %vm16103_vm5 = vmmov %vm16094_vm4  ;;  %v16104_v5 = vld [vmem:[#allocation96_spill] sm:$0xff] }
 0x1eb   :  { %1393 = vrot.lane.b32.xlu0 %v1367_v25, %s8741_s18  ;;  %v10664_v62 = vpop.permute.xlu1 %1135  ;;  %v10666_v46 = vpop.permute.xlu0 %1133  ;;  %2593 = vmatpush1.bf16.msra.mxu1 %v1893_v45  ;;  %v16088_v25 = vunpack.i.l.bf16 %v9416_v32  ;;  %v10688_v32 = vsel %vm16094_vm4, %v8277_v52, %v15603_v27  ;;  %v10692_v40 = vsel %vm9552_vm13, %v1593_v39, %v431_v35  ;;  %v716_v10 = vsel %vm16098_vm6, %v15997_v22, %v16097_v9  ;;  %v16102_v35 = vld [vmem:[#allocation84_spill] sm:$0xff]  ;;  %v16109_v27 = vld [vmem:[#allocation21_spill] sm:$0xff] }
 0x1ec   :  { %16087 = vst [vmem:[#allocation45_spill] sm:$0xff] %v10664_v62  ;;  %16095 = vst [vmem:[#allocation47_spill] sm:$0xff] %v10688_v32  ;;  %vm16105_vm4 = vcmask 760832   ;;  %vm16110_vm6 = vcmask 1040384   ;;  %v1158_v58 = vsel %vm15622_vm3, %v10610_v31, %v10666_v46 }
 0x1ed   :  { %v10671_v61 = vsel %vm16089_vm14, %v16088_v25, %v8277_v52  ;;  %16096 = vst [vmem:[#allocation49_spill] sm:$0xff] %v10692_v40  ;;  %vm16099_vm14 = vcmask 1045504   ;;  %v636_v25 = vsel %vm16103_vm5, %v15993_v49, %v16102_v35  ;;  %v891_v22 = vsel %vm16105_vm4, %v16007_v59, %v16104_v5 }
 0x1ee   :  { %16090 = vst [vmem:[#allocation44_spill] sm:$0xff] %v10671_v61  ;;  %v2244_v19 = vsel %vm9580_vm15, %v2213_v20, %v10671_v61  ;;  %v2216_v45 = vsel %vm16099_vm14, %v10692_v40, %v2164_v41  ;;  %v16108_v41 = vld [vmem:[#allocation20_spill] sm:$0xff]  ;;  %v931_v40 = vrot.slane %v16109_v27, 3  ;;  %vm16112_vm14 = vcmask 777216  }
 0x1ef   :  { %2317 = vrot.lane.b32.xlu1 %v2244_v19, %s8743_s19  ;;  %1489 = vrot.lane.b32.xlu0 %v1453_v23, %s16082_s30  ;;  %v10697_v20 = vpop.permute.xlu1 %1210  ;;  %v1209_v15 = vpop.permute.xlu0 %1208  ;;  %v16100_v23 = vld [vmem:[#allocation90_spill] sm:$0xff]  ;;  %v2245_v52 = vsel %vm9580_vm15, %v2216_v45, %v10688_v32  ;;  %v16106_v19 = vld [vmem:[#allocation19_spill] sm:$0xff]  ;;  %v1747_v45 = vsel %vm16110_vm6, %v636_v25, %v716_v10  ;;  %v16111_v32 = vld [vmem:[#allocation89_spill] sm:$0xff]  ;;  %vm16117_vm4 = vcmask 1043456   ;;  %vm16120_vm6 = vcmask 760832  }
 0x1f0   :  { %v812_v54 = vsel %vm16101_vm2, %v16001_v50, %v16100_v23  ;;  %v16107_v39 = vrot.slane %v16106_v19, 2  ;;  %v930_v50 = vrot.slane %v16108_v41, 2  ;;  %v717_v49 = vsel %vm16112_vm14, %v16097_v9, %v16111_v32  ;;  %vm16114_vm2 = vmmov %vm16103_vm5  ;;  %v16119_v25 = vld [vmem:[#allocation95_spill] sm:$0xff] }
 0x1f1   :  { %v1781_v59 = vsel %vm9763_vm1, %v1747_v45, %v812_v54  ;;  %vm16116_vm5 = vcmask 769024   ;;  %v892_v9 = vsel %vm16120_vm6, %v16104_v5, %v16119_v25  ;;  %v16121_v54 = vld [vmem:[#allocation65_spill] sm:$0xff]  ;;  %vm16125_vm14 = vcmask 1040384  }
 0x1f2   :  { %v813_v61 = vsel %vm16116_vm5, %v16100_v23, %v16115_v17  ;;  %v10736_v10 = vsel %vm16117_vm4, %v1781_v59, %v891_v22  ;;  %v16122_v45 = vrot.slane %v16121_v54, 2  ;;  %v932_v8 = vor.u32 %v931_v40, %v930_v50 }
 0x1f3   :  { %487 = vrot.lane.b32.xlu1 %v16107_v39, %s8735_s23  ;;  %2319 = vrot.lane.b32.xlu0 %v2245_v52, %s8743_s19  ;;  %v10723_v26 = vpop.permute.xlu1 %1214  ;;  %v10725_v13 = vpop.permute.xlu0 %1212  ;;  %v16113_v39 = vld [vmem:[#allocation88_spill] sm:$0xff]  ;;  %16118 = vst [vmem:[#allocation51_spill] sm:$0xff] %v10736_v10  ;;  %v1019_v40 = vrot.slane %v16106_v19, 1  ;;  %v1193_v25 = vrot.slane %v16106_v19, 6  ;;  %vm16128_vm5 = vcmask 506880   ;;  %vm16130_vm6 = vcmask 498688  }
 0x1f4   :  { %v637_v52 = vsel %vm16114_vm2, %v16102_v35, %v16113_v39  ;;  %v16123_v35 = vld [vmem:[#allocation68_spill] sm:$0xff]  ;;  %vm16126_vm2 = vmmov %vm16117_vm4 }
 0x1f5   :  { %v933_v12 = vrot.slane %v16123_v35, 2  ;;  %v1751_v23 = vsel %vm16125_vm14, %v637_v52, %v717_v49  ;;  %v1111_v52 = vrot.slane %v16123_v35, 7  ;;  %vm16129_vm4 = vmmov %vm16128_vm5 }
 0x1f6   :  { %v1782_v48 = vsel %vm9763_vm1, %v1751_v23, %v813_v61  ;;  %v1279_v61 = vrot.slane %v16108_v41, 4  ;;  %vm16131_vm14 = vmmov %vm16130_vm6 }
 0x1f7   :  { %2349 = vrot.lane.b32.xlu1 %v10736_v10, %s8743_s19  ;;  %489 = vrot.lane.b32.xlu0 %v16122_v45, %s8735_s23  ;;  %v1307_v22 = vpop.permute.xlu1 %1306  ;;  %v1305_v59 = vpop.permute.xlu0 %1304  ;;  %v10752_v5 = vsel %vm16126_vm2, %v1782_v48, %v892_v9  ;;  %v935_v50 = vor.u32 %v934_v63, %v933_v12  ;;  %v1109_v45 = vrot.slane %v16108_v41, 7  ;;  %v1280_v9 = vrot.slane %v16109_v27, 5 }
 0x1f8   :  { %16127 = vst [vmem:[#allocation48_spill] sm:$0xff] %v10752_v5  ;;  %v1282_v12 = vrot.slane %v16123_v35, 4  ;;  %v1283_v63 = vrot.slane %v16124_v56, 5  ;;  %vm16132_vm2 = vcmask 490496  }
 0x1f9   :  { %v1110_v48 = vor.u32 %v1109_v45, %v16109_v27  ;;  %v1157_v45 = vsel %vm15622_vm3, %v10612_v30, %v10610_v31  ;;  %v1281_v39 = vor.u32 %v1280_v9, %v1279_v61 }
 0x1fa   :  { %v1284_v47 = vor.u32 %v1283_v63, %v1282_v12  ;;  %v1936_v12 = vsel %vm10109_vm0, %v10639_v2, %v1158_v58  ;;  %v1455_v58 = vrot.slane %v16109_v27, 2 }
 0x1fb   :  { %967 = vrot.lane.b32.xlu1 %v932_v8, %s8736_s24  ;;  %2351 = vrot.lane.b32.xlu0 %v10752_v5, %s8743_s19  ;;  %v10759_v10 = vpop.permute.xlu1 %1310  ;;  %v1309_v49 = vpop.permute.xlu0 %1308  ;;  %v1020_v8 = vrot.slane %v16121_v54, 1 }
 0x1ff   :  { %1046 = vrot.lane.b32.xlu1 %v1019_v40, %s8737_s25  ;;  %969 = vrot.lane.b32.xlu0 %v935_v50, %s8736_s24  ;;  %v1386_v23 = vpop.permute.xlu1 %1385  ;;  %v1384_v5 = vpop.permute.xlu0 %1383  ;;  %v1156_v40 = vsel %vm15622_vm3, %v9968_v34, %v10612_v30  ;;  %v1112_v50 = vor.u32 %v1111_v52, %v16124_v56  ;;  %v1159_v34 = vsel %vm15622_vm3, %v10666_v46, %v10664_v62  ;;  %v1194_v30 = vrot.slane %v16121_v54, 6 }
 0x200   :  { %v1236_v52 = vsel %vm16128_vm5, %v1209_v15, %v10697_v20  ;;  %v1934_v31 = vsel %vm10109_vm0, %v10585_v24, %v1156_v40  ;;  %v1454_v46 = vrot.slane %v16108_v41, 1  ;;  %v1935_v62 = vsel %vm10109_vm0, %v10588_v57, %v1157_v45 }
 0x201   :  { %v1331_v24 = vsel %vm16131_vm14, %v10048_v42, %v1305_v59  ;;  %vm16133_vm5 = vcmask 1041408   ;;  %vm16136_vm14 = vcmask 506880   ;;  %vm16142_vm3 = vcmask 261120  }
 0x202   :  { %v1968_v63 = vsel %vm16133_vm5, %v1935_v62, %v1236_v52  ;;  %v1237_v42 = vsel %vm16136_vm14, %v10697_v20, %v10725_v13  ;;  %v1456_v52 = vor.u32 %v1455_v58, %v1454_v46 }
 0x203   :  { %1141 = vrot.lane.b32.xlu1 %v1110_v48, %s8738_s26  ;;  %1048 = vrot.lane.b32.xlu0 %v1020_v8, %s8737_s25  ;;  %v1235_v48 = vsel %vm16129_vm4, %v9984_v16, %v1209_v15  ;;  %v1332_v8 = vsel %vm16130_vm6, %v1305_v59, %v1307_v22  ;;  %v10795_v61 = vpop.permute.xlu1 %1389  ;;  %v1388_v9 = vpop.permute.xlu0 %1387  ;;  %v1411_v16 = vsel %vm16132_vm2, %v1384_v5, %v1386_v23  ;;  %vm16134_vm4 = vmmov %vm16132_vm2 }
 0x204   :  { %v1937_v15 = vsel %vm10109_vm0, %v10643_v51, %v1159_v34  ;;  %v1410_v41 = vsel %vm16134_vm4, %v10120_v6, %v1384_v5  ;;  %vm16135_vm6 = vmmov %vm16133_vm5  ;;  %v2014_v51 = vsel %vm10127_vm9, %v1968_v63, %v1332_v8  ;;  %vm16138_vm5 = vcmask 498688  }
 0x205   :  { %v1964_v57 = vsel %vm16135_vm6, %v1934_v31, %v1235_v48  ;;  %vm16137_vm2 = vmmov %vm16136_vm14  ;;  %v1333_v62 = vsel %vm16138_vm5, %v1307_v22, %v1309_v49  ;;  %vm16140_vm6 = vcmask 1044480   ;;  %vm16141_vm14 = vcmask 490496  }
 0x206   :  { %v1238_v2 = vsel %vm16137_vm2, %v10725_v13, %v10723_v26  ;;  %v2013_v6 = vsel %vm10127_vm9, %v1964_v57, %v1331_v24  ;;  %vm16139_vm4 = vmmov %vm16138_vm5  ;;  %v2047_v5 = vsel %vm16140_vm6, %v2014_v51, %v1411_v16  ;;  %v1412_v20 = vsel %vm16141_vm14, %v1386_v23, %v1388_v9 }
 0x207   :  { %1220 = vrot.lane.b32.xlu1 %v1193_v25, %s8739_s14  ;;  %1143 = vrot.lane.b32.xlu0 %v1112_v50, %s8738_s26  ;;  %v1334_v27 = vsel %vm16139_vm4, %v1309_v49, %v10759_v10  ;;  %v1482_v25 = vpop.permute.xlu1 %1481  ;;  %v1480_v59 = vpop.permute.xlu0 %1479  ;;  %vm16143_vm2 = vmmov %vm16142_vm3  ;;  %v1368_v23 = vrot.slane %v16106_v19, 3  ;;  %v1369_v31 = vrot.slane %v16121_v54, 3 }
 0x208   :  { %v1506_v13 = vsel %vm16142_vm3, %v10225_v43, %v1480_v59  ;;  %v1507_v40 = vsel %vm16143_vm2, %v1480_v59, %v1482_v25  ;;  %vm16144_vm12 = vmmov %vm16140_vm6  ;;  %vm16146_vm3 = vcmask 1041408   ;;  %v16164_v59 = vld [vmem:[#allocation26_spill] sm:$0xff] }
 0x209   :  { %v2043_v50 = vsel %vm16144_vm12, %v2013_v6, %v1410_v41  ;;  %vm16145_vm10 = vmmov %vm16141_vm14  ;;  %v2093_v22 = vsel %vm10152_vm11, %v2047_v5, %v1507_v40  ;;  %v1972_v43 = vsel %vm16146_vm3, %v1936_v12, %v1237_v42  ;;  %v1458_v12 = vrot.slane %v16124_v56, 2 }
 0x20a   :  { %v1413_v45 = vsel %vm16145_vm10, %v1388_v9, %v10795_v61  ;;  %v2092_v49 = vsel %vm10152_vm11, %v2043_v50, %v1506_v13  ;;  %vm16147_vm5 = vmmov %vm16146_vm3  ;;  %2553 = vmatprep.subr.bf16.mxu0 %v2093_v22  ;;  %v1457_v9 = vrot.slane %v16123_v35, 1  ;;  %vm16152_vm14 = vcmask 1039360  }
 0x20b   :  { %1316 = vrot.lane.b32.xlu1 %v1281_v39, %s8740_s15  ;;  %1222 = vrot.lane.b32.xlu0 %v1194_v30, %s8739_s14  ;;  %v1976_v34 = vsel %vm16147_vm5, %v1937_v15, %v1238_v2  ;;  %v2015_v39 = vsel %vm10127_vm9, %v1972_v43, %v1333_v62  ;;  %v10852_v48 = vpop.permute.xlu1 %1485  ;;  %v1484_v8 = vpop.permute.xlu0 %1483  ;;  %vm16148_vm12 = vmmov %vm16143_vm2  ;;  %v252_v63 = vsel %vm16152_vm14, %v16075_v4, %v10223_v38  ;;  %v8286_v41 = vunpack.i.l.bf16 %v10424_v7 }
 0x20c   :  { %v2016_v30 = vsel %vm10127_vm9, %v1976_v34, %v1334_v27  ;;  %2554 = vmatpush1.bf16.msra.mxu0 %v2092_v49  ;;  %v1508_v24 = vsel %vm16148_vm12, %v1482_v25, %v1484_v8  ;;  %vm16149_vm10 = vmmov %vm16143_vm2  ;;  %vm16153_vm2 = vcmask 1031168   ;;  %vm16155_vm5 = vcmask 1022976   ;;  %v16177_v34 = vld [vmem:[#allocation4_spill] sm:$0xff] }
 0x20d   :  { %v1509_v46 = vsel %vm16149_vm10, %v1484_v8, %v10852_v48  ;;  %vm16150_vm4 = vmmov %vm16140_vm6  ;;  %v342_v58 = vsel %vm16153_vm2, %v16083_v1, %v10278_v3  ;;  %v432_v57 = vsel %vm16155_vm5, %v16085_v0, %v10320_v14  ;;  %v15625_v42 = vunpack.i.h.bf16 %v10424_v7 }
 0x20e   :  { %v2055_v16 = vsel %vm16150_vm4, %v2016_v30, %v1413_v45  ;;  %vm16151_vm6 = vmmov %vm16150_vm4  ;;  %v1459_v6 = vor.u32 %v1458_v12, %v1457_v9  ;;  %v1546_v1 = vsel %vm9534_vm7, %v16106_v19, %v252_v63  ;;  %vm16157_vm10 = vcmask 793600   ;;  %v16171_v45 = vld [vmem:[#allocation14_spill] sm:$0xff]  ;;  %v16181_v30 = vld [vmem:[#allocation95_spill] sm:$0xff] }
 0x20f   :  { %v2051_v15 = vsel %vm16151_vm6, %v2015_v39, %v1412_v20  ;;  %1395 = vrot.lane.b32.xlu1 %v1368_v23, %s8741_s18  ;;  %1318 = vrot.lane.b32.xlu0 %v1284_v47, %s8740_s15  ;;  %v2095_v56 = vsel %vm10152_vm11, %v2055_v16, %v1509_v46  ;;  %vm16154_vm3 = vmmov %vm16152_vm14  ;;  %v2312_v2 = vpop.permute.xlu1 %2311  ;;  %v2310_v51 = vpop.permute.xlu0 %2309  ;;  %vm16158_vm4 = vcmask 252928   ;;  %vm16160_vm14 = vcmask 1042432   ;;  %v16180_v39 = vld [vmem:[#allocation9_spill] sm:$0xff]  ;;  %v16185_v46 = vld [vmem:[#allocation74_spill] sm:$0xff] }
 0x210   :  { %v2094_v35 = vsel %vm10152_vm11, %v2051_v15, %v1508_v24  ;;  %v253_v4 = vsel %vm16154_vm3, %v10223_v38, %v10280_v37  ;;  %2594 = vmatprep.subr.bf16.mxu1 %v2095_v56  ;;  %vm16156_vm12 = vmmov %vm16153_vm2  ;;  %v2165_v38 = vsel %vm16157_vm10, %v16091_v36, %v10366_v29  ;;  %v2369_v0 = vsel %vm16158_vm4, %v2310_v51, %v2312_v2  ;;  %v16184_v12 = vld [vmem:[#allocation73_spill] sm:$0xff]  ;;  %v16186_v15 = vld [vmem:[#allocation3_spill] sm:$0xff] }
 0x211   :  { %v343_v47 = vsel %vm16156_vm12, %v10278_v3, %v10322_v11  ;;  %2595 = vmatpush1.bf16.msra.mxu1 %v2094_v35  ;;  %vm16159_vm6 = vmmov %vm16158_vm4  ;;  %v1597_v3 = vsel %vm16160_vm14, %v1546_v1, %v342_v58  ;;  %v1547_v27 = vsel %vm9534_vm7, %v16121_v54, %v253_v4  ;;  %v16161_v19 = vunpack.i.l.bf16 %v16081_v33  ;;  %2555 = vmatprep.subr.bf16.mxu0 %v2369_v0  ;;  %v16165_v54 = vld [vmem:[#allocation5_spill] sm:$0xff]  ;;  %v16196_v0 = vld [vmem:[#allocation7_spill] sm:$0xff] }
 0x212   :  { %v2368_v62 = vsel %vm16159_vm6, %v10460_v21, %v2310_v51  ;;  %vm16162_vm2 = vcmask 785408   ;;  %v10906_v36 = vsel %vm9552_vm13, %v1597_v3, %v432_v57  ;;  %vm16163_vm3 = vmmov %vm16160_vm14  ;;  %v433_v5 = vsel %vm16155_vm5, %v10320_v14, %v16164_v59  ;;  %v16198_v3 = vld [vmem:[#allocation11_spill] sm:$0xff] }
 0x213   :  { %1491 = vrot.lane.b32.xlu1 %v1456_v52, %s16082_s30  ;;  %1397 = vrot.lane.b32.xlu0 %v1369_v31, %s8741_s18  ;;  %v10902_v25 = vsel %vm16162_vm2, %v16161_v19, %v8286_v41  ;;  %v1601_v21 = vsel %vm16163_vm3, %v1547_v27, %v343_v47  ;;  %vm16166_vm12 = vmmov %vm16157_vm10  ;;  %vm16167_vm10 = vcmask 777216   ;;  %v10918_v13 = vpop.permute.xlu1 %2315  ;;  %v2314_v40 = vpop.permute.xlu0 %2313  ;;  %vm16168_vm4 = vcmask 1045504   ;;  %v16178_v52 = vld [vmem:[#allocation88_spill] sm:$0xff] }
 0x214   :  { %v2166_v20 = vsel %vm16166_vm12, %v10366_v29, %v16165_v54  ;;  %v718_v33 = vsel %vm16167_vm10, %v16111_v32, %v10447_v53  ;;  %2556 = vmatpush1.bf16.msra.mxu0 %v2368_v62  ;;  %v2219_v50 = vsel %vm16168_vm4, %v10906_v36, %v2165_v38  ;;  %vm16169_vm6 = vmmov %vm16162_vm2  ;;  %vm16172_vm14 = vcmask 769024  }
 0x215   :  { %v10925_v14 = vsel %vm16169_vm6, %v8286_v41, %v15625_v42  ;;  %v814_v29 = vsel %vm16172_vm14, %v16115_v17, %v16171_v45  ;;  %v2246_v32 = vsel %vm9580_vm15, %v2219_v50, %v10902_v25  ;;  %vm16174_vm2 = vcmask 252928   ;;  %vm16179_vm5 = vmmov %vm16169_vm6  ;;  %v16188_v41 = vld [vmem:[#allocation13_spill] sm:$0xff]  ;;  %v16228_v42 = vld [vmem:[#allocation42_spill] sm:$0xff] }
 0x216   :  { %16170 = vst [vmem:[#allocation54_spill] sm:$0xff] %v10925_v14  ;;  %v2371_v49 = vsel %vm16174_vm2, %v2314_v40, %v10918_v13  ;;  %vm16175_vm3 = vmmov %vm16174_vm2  ;;  %v10938_v43 = vsel %vm9552_vm13, %v1601_v21, %v433_v5  ;;  %v638_v31 = vsel %vm16179_vm5, %v16178_v52, %v16177_v34  ;;  %vm16182_vm12 = vcmask 760832   ;;  %v16206_v52 = vld [vmem:[#allocation8_spill] sm:$0xff] }
 0x217   :  { %v2370_v23 = vsel %vm16175_vm3, %v2312_v2, %v2314_v40  ;;  %16176 = vst [vmem:[#allocation56_spill] sm:$0xff] %v10938_v43  ;;  %v893_v17 = vsel %vm16182_vm12, %v16181_v30, %v16180_v39  ;;  %2321 = vrot.lane.b32.xlu1 %v2246_v32, %s8743_s19  ;;  %1493 = vrot.lane.b32.xlu0 %v1459_v6, %s16082_s30  ;;  %vm16183_vm10 = vcmask 1040384   ;;  %v936_v24 = vrot.slane %v16184_v12, 2  ;;  %vm16187_vm6 = vmmov %vm16179_vm5  ;;  %v2344_v35 = vpop.permute.xlu1 %2343  ;;  %v16191_v2 = vld [vmem:[#allocation10_spill] sm:$0xff]  ;;  %v16193_v6 = vld [vmem:[#allocation37_spill] sm:$0xff] }
 0x218   :  { %v1755_v8 = vsel %vm16183_vm10, %v638_v31, %v718_v33  ;;  %2596 = vmatprep.subr.bf16.mxu1 %v2371_v49  ;;  %v2222_v9 = vsel %vm16168_vm4, %v10938_v43, %v2166_v20  ;;  %v937_v16 = vrot.slane %v16185_v46, 3  ;;  %v639_v63 = vsel %vm16187_vm6, %v16177_v34, %v16186_v15  ;;  %vm16194_vm5 = vmmov %vm16175_vm3  ;;  %v16204_v49 = vld [vmem:[#allocation70_spill] sm:$0xff] }
 0x219   :  { %vm16189_vm14 = vcmask 777216   ;;  %2597 = vmatpush1.bf16.msra.mxu1 %v2370_v23  ;;  %v2342_v58 = vpop.permute.xlu0 %2341  ;;  %v1783_v57 = vsel %vm9763_vm1, %v1755_v8, %v814_v29  ;;  %v2247_v47 = vsel %vm9580_vm15, %v2222_v9, %v10925_v14  ;;  %vm16192_vm2 = vcmask 769024   ;;  %vm16200_vm6 = vmmov %vm16175_vm3  ;;  %v16208_v8 = vld [vmem:[#allocation39_spill] sm:$0xff] }
 0x21a   :  { %v719_v56 = vsel %vm16189_vm14, %v10447_v53, %v16188_v41  ;;  %v815_v51 = vsel %vm16192_vm2, %v16171_v45, %v16191_v2  ;;  %v2383_v1 = vsel %vm16175_vm3, %v16193_v6, %v2342_v58  ;;  %v2384_v38 = vsel %vm16194_vm5, %v2342_v58, %v2344_v35  ;;  %vm16201_vm14 = vmmov %vm16175_vm3  ;;  %v16214_v58 = vld [vmem:[#allocation28_spill] sm:$0xff]  ;;  %v16218_v6 = vld [vmem:[#allocation23_spill] sm:$0xff] }
 0x21b   :  { %vm16195_vm12 = vcmask 1043456   ;;  %vm16197_vm10 = vcmask 760832   ;;  %v2435_v27 = vand.u32 %v16198_v3, %v2383_v1  ;;  %2323 = vrot.lane.b32.xlu0 %v2247_v47, %s8743_s19  ;;  %v2438_v19 = vand.u32 %v16198_v3, %v2384_v38  ;;  %v16216_v47 = vld [vmem:[#allocation43_spill] sm:$0xff] }
 0x21c   :  { %v10971_v53 = vsel %vm16195_vm12, %v1783_v57, %v893_v17  ;;  %v894_v62 = vsel %vm16197_vm10, %v16180_v39, %v16196_v0  ;;  %vm16199_vm4 = vcmask 1040384   ;;  %v10982_v5 = vpop.permute.xlu1 %2347  ;;  %vm16202_vm2 = vmmov %vm16195_vm12  ;;  %v938_v29 = vor.u32 %v937_v16, %v936_v24  ;;  %v16207_v39 = vld [vmem:[#allocation6_spill] sm:$0xff]  ;;  %v16210_v24 = vld [vmem:[#allocation41_spill] sm:$0xff] }
 0x21d   :  { %2353 = vrot.lane.b32.xlu1 %v10971_v53, %s8743_s19  ;;  %v1759_v21 = vsel %vm16199_vm4, %v639_v63, %v719_v56  ;;  %2557 = vmatprep.subr.bf16.mxu0 %v2438_v19  ;;  %v2346_v20 = vpop.permute.xlu0 %2345  ;;  %v16205_v23 = vrot.slane %v16204_v49, 2  ;;  %v939_v31 = vrot.slane %v16206_v52, 2  ;;  %v940_v30 = vrot.slane %v16207_v39, 3 }
 0x21e   :  { %v1784_v33 = vsel %vm9763_vm1, %v1759_v21, %v815_v51  ;;  %v2385_v40 = vsel %vm16200_vm6, %v2344_v35, %v2346_v20  ;;  %v2386_v50 = vsel %vm16201_vm14, %v2346_v20, %v10982_v5  ;;  %2558 = vmatpush1.bf16.msra.mxu0 %v2435_v27  ;;  %vm16209_vm3 = vcmask 613376   ;;  %v16220_v27 = vld [vmem:[#allocation44_spill] sm:$0xff]  ;;  %v16221_v21 = vld [vmem:[#allocation33_spill] sm:$0xff] }
 0x21f   :  { %v10990_v45 = vsel %vm16202_vm2, %v1784_v33, %v894_v62  ;;  %v2441_v32 = vand.u32 %v16198_v3, %v2385_v40  ;;  %v2444_v34 = vand.u32 %v16198_v3, %v2386_v50  ;;  %vm16211_vm5 = vcmask 1014784   ;;  %vm16222_vm6 = vmmov %vm16209_vm3 }
 0x220   :  { %16203 = vst [vmem:[#allocation52_spill] sm:$0xff] %v10990_v45  ;;  %2355 = vrot.lane.b32.xlu0 %v10990_v45, %s8743_s19  ;;  %v11001_v17 = vpop.permute.xlu1 %485  ;;  %vm16212_vm12 = vmmov %vm16211_vm5  ;;  %v1021_v56 = vrot.slane %v16204_v49, 1  ;;  %v16213_v35 = vmov 0   ;;  %v16215_v57 = vrot.slane %v16214_v58, 2  ;;  %vm16217_vm10 = vcmask 1045504   ;;  %v16233_v45 = vld [vmem:[#allocation2_spill] sm:$0xff] }
 0x221   :  { %491 = vrot.lane.b32.xlu1 %v16205_v23, %s8735_s23  ;;  %7538 = vmatmul.mubr.msk.bf16.vlgmr.msra.gmra.mrb[4].mxu0 %vm16209_vm3, %v16208_v8  ;;  %v484_v9 = vpop.permute.xlu0 %483  ;;  %vm16219_vm4 = vmmov %vm16217_vm10  ;;  %v941_v38 = vor.u32 %v940_v30, %v939_v31  ;;  %v1113_v62 = vrot.slane %v16184_v12, 7  ;;  %v1195_v31 = vrot.slane %v16204_v49, 6  ;;  %vm16226_vm14 = vcmask 752640  }
 0x222   :  { %2598 = vmatprep.subr.bf16.mxu1 %v2444_v34  ;;  %v504_v16 = vsel %vm16211_vm5, %v16210_v24, %v484_v9  ;;  %v505_v63 = vsel %vm16212_vm12, %v484_v9, %v11001_v17  ;;  %2663 = vmatprep.mubr.bf16.mxu0 %v16213_v35  ;;  %v1286_v9 = vrot.slane %v16185_v46, 5  ;;  %vm16227_vm2 = vmmov %vm16226_vm14  ;;  %vm16229_vm3 = vcmask 523264  }
 0x223   :  { %2599 = vmatpush1.bf16.msra.mxu1 %v2441_v32  ;;  %v1668_v51 = vsel %vm16217_vm10, %v16216_v47, %v505_v63  ;;  %v1664_v1 = vsel %vm16219_vm4, %v16218_v6, %v504_v16  ;;  %v1114_v50 = vor.u32 %v1113_v62, %v16185_v46  ;;  %v1115_v32 = vrot.slane %v16206_v52, 7  ;;  %v16224_v62 = vld [vmem:[#allocation29_spill] sm:$0xff]  ;;  %vm16230_vm5 = vmmov %vm16229_vm3 }
 0x224   :  { %493 = vrot.lane.b32.xlu0 %v16215_v57, %s8735_s23  ;;  %v1702_v19 = vsel %vm9580_vm15, %v1668_v51, %v16220_v27  ;;  %v1701_v20 = vsel %vm9580_vm15, %v1664_v1, %v16221_v21  ;;  %v11026_v33 = vpop.permute.xlu1 %2106  ;;  %v1288_v57 = vrot.slane %v16206_v52, 4  ;;  %v1289_v47 = vrot.slane %v16207_v39, 5  ;;  %v16223_v1 = vld [vmem:[#allocation36_spill] sm:$0xff] }
 0x225   :  { %971 = vrot.lane.b32.xlu1 %v938_v29, %s8736_s24  ;;  %2631 = vmatprep.subr.bf16.mxu0 %v1702_v19  ;;  %v11028_v40 = vpop.permute.xlu0 %238  ;;  %v1022_v29 = vrot.slane %v16214_v58, 1  ;;  %v1116_v30 = vor.u32 %v1115_v32, %v16207_v39  ;;  %v943_v27 = vrot.slane %v16224_v62, 3  ;;  %v16225_v19 = vld [vmem:[#allocation40_spill] sm:$0xff]  ;;  %vm16234_vm12 = vcmask 1046528  }
 0x226   :  { %7539 = vmatmul.mubr.msk.bf16.vlgmr.msra.gmra.mrb[4].mxu1 %vm16222_vm6, %v16208_v8  ;;  %2632 = vmatpush1.bf16.msra.mxu0 %v1701_v20  ;;  %v1285_v8 = vrot.slane %v16184_v12, 4  ;;  %vm16235_vm10 = vmmov %vm16234_vm12  ;;  %vm16237_vm4 = vcmask 1039360   ;;  %v16248_v43 = vunpack.i.h.bf16 %v10424_v7 }
 0x227   :  { %2704 = vmatprep.mubr.bf16.mxu1 %v16213_v35  ;;  %vm16238_vm6 = vmmov %vm16237_vm4 }
 0x228   :  { %973 = vrot.lane.b32.xlu0 %v941_v38, %s8736_s24  ;;  %v11038_v23 = vpop.permute.xlu1 %2112  ;;  %v1287_v63 = vor.u32 %v1286_v9, %v1285_v8  ;;  %v942_v38 = vrot.slane %v16223_v1, 2  ;;  %v1371_v8 = vrot.slane %v16214_v58, 3  ;;  %v1463_v9 = vrot.slane %v16206_v52, 1 }
 0x229   :  { %1050 = vrot.lane.b32.xlu1 %v1021_v56, %s8737_s25  ;;  %v11040_v34 = vpop.permute.xlu0 %328  ;;  %v1196_v56 = vrot.slane %v16214_v58, 6 }
 0x22c   :  { %1052 = vrot.lane.b32.xlu0 %v1022_v29, %s8737_s25  ;;  %v964_v24 = vpop.permute.xlu1 %963  ;;  %v1290_v29 = vor.u32 %v1289_v47, %v1288_v57 }
 0x22d   :  { %1145 = vrot.lane.b32.xlu1 %v1114_v50, %s8738_s26  ;;  %v11048_v16 = vpop.permute.xlu0 %418  ;;  %v986_v21 = vsel %vm16226_vm14, %v16225_v19, %v964_v24  ;;  %v1370_v50 = vrot.slane %v16204_v49, 3  ;;  %v1464_v19 = vrot.slane %v16207_v39, 2  ;;  %v1460_v39 = vrot.slane %v16184_v12, 1 }
 0x22e   :  { %vm16239_vm14 = vcmask 1031168  }
 0x230   :  { %1147 = vrot.lane.b32.xlu0 %v1116_v30, %s8738_s26  ;;  %v11055_v51 = vpop.permute.xlu1 %2118  ;;  %v944_v30 = vor.u32 %v943_v27, %v942_v38  ;;  %v1859_v38 = vsel %vm9884_vm8, %v16233_v45, %v986_v21  ;;  %v1461_v27 = vrot.slane %v16185_v46, 2  ;;  %v1465_v45 = vor.u32 %v1464_v19, %v1463_v9  ;;  %v16236_v46 = vld [vmem:[#allocation27_spill] sm:$0xff] }
 0x231   :  { %1224 = vrot.lane.b32.xlu1 %v1195_v31, %s8739_s14  ;;  %v11057_v6 = vpop.permute.xlu0 %965  ;;  %v1466_v19 = vrot.slane %v16223_v1, 1  ;;  %v1372_v14 = vrot.slane %v16236_v46, 3 }
 0x232   :  { %v987_v20 = vsel %vm16227_vm2, %v964_v24, %v11057_v6  ;;  %v1462_v21 = vor.u32 %v1461_v27, %v1460_v39  ;;  %v1197_v39 = vrot.slane %v16236_v46, 6  ;;  %vm16240_vm2 = vmmov %vm16239_vm14 }
 0x234   :  { %1226 = vrot.lane.b32.xlu0 %v1196_v56, %s8739_s14  ;;  %v11068_v32 = vpop.permute.xlu1 %1044  ;;  %v16231_v56 = vld [vmem:[#allocation51_spill] sm:$0xff] }
 0x235   :  { %1320 = vrot.lane.b32.xlu1 %v1287_v63, %s8740_s15  ;;  %v1043_v31 = vpop.permute.xlu0 %1042  ;;  %v1860_v47 = vsel %vm9884_vm8, %v16231_v56, %v987_v20 }
 0x236   :  { %v11075_v24 = vsel %vm16229_vm3, %v16228_v42, %v1043_v31  ;;  %v11079_v63 = vsel %vm16230_vm5, %v1043_v31, %v11068_v32  ;;  %vm16241_vm3 = vcmask 1022976  }
 0x237   :  { %v1905_v42 = vsel %vm16234_vm12, %v1860_v47, %v11079_v63  ;;  %v1901_v52 = vsel %vm16235_vm10, %v1859_v38, %v11075_v24  ;;  %v1023_v47 = vrot.slane %v16236_v46, 1  ;;  %v1291_v38 = vrot.slane %v16223_v1, 4  ;;  %vm16242_vm5 = vmmov %vm16241_vm3 }
 0x238   :  { %1322 = vrot.lane.b32.xlu0 %v1290_v29, %s8740_s15  ;;  %2633 = vmatprep.subr.bf16.mxu0 %v1905_v42  ;;  %v11095_v20 = vpop.permute.xlu1 %1139  ;;  %v1467_v42 = vrot.slane %v16224_v62, 2  ;;  %vm16243_vm12 = vcmask 1042432   ;;  %vm16244_vm10 = vcmask 793600  }
 0x239   :  { %1399 = vrot.lane.b32.xlu1 %v1370_v50, %s8741_s18  ;;  %2634 = vmatpush1.bf16.msra.mxu0 %v1901_v52  ;;  %v11097_v31 = vpop.permute.xlu0 %1137  ;;  %v1117_v50 = vrot.slane %v16223_v1, 7  ;;  %v2108_v1 = vsel %vm16238_vm6, %v11028_v40, %v11026_v33  ;;  %vm16246_vm6 = vmmov %vm16243_vm12 }
 0x23b   :  { %v1118_v12 = vor.u32 %v1117_v50, %v16224_v62  ;;  %v1468_v50 = vor.u32 %v1467_v42, %v1466_v19  ;;  %v2173_v42 = vsel %vm9534_vm7, %v16214_v58, %v2108_v1 }
 0x23c   :  { %1401 = vrot.lane.b32.xlu0 %v1371_v8, %s8741_s18  ;;  %v11102_v29 = vpop.permute.xlu1 %2152 }
 0x23d   :  { %975 = vrot.lane.b32.xlu1 %v944_v30, %s8736_s24  ;;  %v2151_v56 = vpop.permute.xlu0 %2150  ;;  %v1292_v30 = vrot.slane %v16224_v62, 5  ;;  %v344_v62 = vsel %vm16239_vm14, %v10322_v11, %v11040_v34  ;;  %v434_v11 = vsel %vm16241_vm3, %v16164_v59, %v11048_v16  ;;  %vm16247_vm14 = vcmask 785408   ;;  %s8750_s24 = smov 122  }
 0x23e   :  { %vm16250_vm3 = vcmask 1045504  }
 0x23f   :  { %v1293_v52 = vor.u32 %v1292_v30, %v1291_v38  ;;  %v2120_v30 = vsel %vm16242_vm5, %v11048_v16, %v11055_v51  ;;  %vm16251_vm5 = vmmov %vm16250_vm3 }
 0x240   :  { %1495 = vrot.lane.b32.xlu0 %v1462_v21, %s16082_s30  ;;  %v608_v8 = vpop.permute.xlu1 %607  ;;  %v254_v21 = vsel %vm16237_vm4, %v10280_v37, %v11028_v40  ;;  %v2114_v37 = vsel %vm16240_vm2, %v11040_v34, %v11038_v23  ;;  %vm16245_vm4 = vmmov %vm16244_vm10 }
 0x241   :  { %1497 = vrot.lane.b32.xlu1 %v1465_v45, %s16082_s30  ;;  %v11110_v9 = vpop.permute.xlu0 %8289  ;;  %v1548_v38 = vsel %vm9534_vm7, %v16204_v49, %v254_v21  ;;  %v2168_v49 = vsel %vm16245_vm4, %v2151_v56, %v11102_v29  ;;  %v2177_v59 = vsel %vm16246_vm6, %v2173_v42, %v2114_v37  ;;  %vm16249_vm2 = vmmov %vm16247_vm14  ;;  %vm16255_vm6 = vcmask 1040384  }
 0x242   :  { %vm16254_vm4 = vmmov %vm16249_vm2 }
 0x243   :  { %v640_v42 = vsel %vm16254_vm4, %v16186_v15, %v608_v8 }
 0x244   :  { %1054 = vrot.lane.b32.xlu0 %v1023_v47, %s8737_s25  ;;  %v703_v27 = vpop.permute.xlu1 %702  ;;  %v8291_v47 = vunpack.i.l.bf16 %v11110_v9 }
 0x245   :  { %1149 = vrot.lane.b32.xlu1 %v1118_v12, %s8738_s26  ;;  %v11117_v45 = vpop.permute.xlu0 %609  ;;  %v8292_v12 = vunpack.i.h.bf16 %v11110_v9  ;;  %s8751_s26 = smov 56  }
 0x246   :  { %v11162_v1 = vsel %vm16249_vm2, %v16248_v43, %v8291_v47  ;;  %vm16257_vm2 = vcmask 760832  }
 0x247   :  { %v11157_v21 = vsel %vm16247_vm14, %v8291_v47, %v8292_v12 }
 0x248   :  { %1228 = vrot.lane.b32.xlu0 %v1197_v39, %s8739_s14  ;;  %v1217_v9 = vpop.permute.xlu1 %1216  ;;  %v2167_v39 = vsel %vm16244_vm10, %v16165_v54, %v2151_v56  ;;  %v2183_v54 = vsel %vm9552_vm13, %v2177_v59, %v2120_v30  ;;  %vm16253_vm10 = vcmask 769024  }
 0x249   :  { %1324 = vrot.lane.b32.xlu1 %v1293_v52, %s8740_s15  ;;  %v705_v19 = vpop.permute.xlu0 %704  ;;  %v1605_v52 = vsel %vm16243_vm12, %v1548_v38, %v344_v62  ;;  %vm16252_vm12 = vcmask 777216   ;;  %s8752_s15 = smov 66  }
 0x24a   :  { %v11168_v56 = vsel %vm9552_vm13, %v1605_v52, %v434_v11  ;;  %v720_v11 = vsel %vm16252_vm12, %v16188_v41, %v703_v27  ;;  %v2174_v52 = vsel %vm9534_vm7, %v16236_v46, %v11026_v33  ;;  %vm16256_vm14 = vmmov %vm16252_vm12  ;;  %vm16260_vm12 = vcmask 1042432  }
 0x24b   :  { %v2181_v33 = vsel %vm16260_vm12, %v2174_v52, %v11038_v23 }
 0x24c   :  { %1403 = vrot.lane.b32.xlu0 %v1372_v14, %s8741_s18  ;;  %v799_v62 = vpop.permute.xlu1 %798  ;;  %v2229_v14 = vsel %vm16250_vm3, %v2183_v54, %v2168_v49  ;;  %v721_v54 = vsel %vm16256_vm14, %v703_v27, %v705_v19  ;;  %vm16258_vm3 = vmmov %vm16253_vm10 }
 0x24d   :  { %1499 = vrot.lane.b32.xlu1 %v1468_v50, %s16082_s30  ;;  %v11170_v37 = vpop.permute.xlu0 %1218  ;;  %v2225_v50 = vsel %vm16251_vm5, %v11168_v56, %v2167_v39  ;;  %v2249_v7 = vsel %vm9580_vm15, %v2229_v14, %v11157_v21  ;;  %v816_v30 = vsel %vm16253_vm10, %v16191_v2, %v799_v62  ;;  %v1763_v39 = vsel %vm16255_vm6, %v640_v42, %v720_v11  ;;  %vm16261_vm10 = vmmov %vm16254_vm4 }
 0x24e   :  { %v2248_v43 = vsel %vm9580_vm15, %v2225_v50, %v11162_v1  ;;  %v1785_v2 = vsel %vm9763_vm1, %v1763_v39, %v816_v30  ;;  %vm16259_vm5 = vcmask 1043456   ;;  %v641_v46 = vsel %vm16261_vm10, %v608_v8, %v11117_v45  ;;  %vm16262_vm4 = vmmov %vm16255_vm6 }
 0x24f   :  { %v1767_v27 = vsel %vm16262_vm4, %v641_v46, %v721_v54  ;;  %vm16263_vm6 = vcmask 1045504   ;;  %vm16264_vm14 = vmmov %vm16257_vm2  ;;  %vm16270_vm10 = vcmask 506880  }
 0x250   :  { %2325 = vrot.lane.b32.xlu0 %v2248_v43, %s8743_s19  ;;  %v1313_v47 = vpop.permute.xlu1 %1312  ;;  %vm16269_vm12 = vmmov %vm16262_vm4  ;;  %v1240_v52 = vsel %vm16270_vm10, %v1217_v9, %v11170_v37 }
 0x251   :  { %2327 = vrot.lane.b32.xlu1 %v2249_v7, %s8743_s19  ;;  %v801_v38 = vpop.permute.xlu0 %800  ;;  %v2257_v42 = vsel %vm16269_vm12, %v11117_v45, %v705_v19  ;;  %vm16271_vm4 = vmmov %vm16270_vm10  ;;  %vm16279_vm10 = vcmask 261120  }
 0x252   :  { %v817_v15 = vsel %vm16258_vm3, %v799_v62, %v801_v38  ;;  %vm16266_vm3 = vcmask 515072   ;;  %v1239_v54 = vsel %vm16271_vm4, %v10723_v26, %v1217_v9  ;;  %vm16280_vm4 = vmmov %vm16279_vm10 }
 0x253   :  { %v1786_v23 = vsel %vm9763_vm1, %v1767_v27, %v817_v15 }
 0x254   :  { %v878_v49 = vpop.permute.xlu1 %877 }
 0x255   :  { %v11194_v59 = vpop.permute.xlu0 %1314  ;;  %v895_v41 = vsel %vm16257_vm2, %v16196_v0, %v878_v49  ;;  %v2184_v0 = vsel %vm9552_vm13, %v2181_v33, %v11055_v51  ;;  %vm16265_vm2 = vmmov %vm16259_vm5  ;;  %v1161_v51 = vsel %vm16266_vm3, %v11097_v31, %v11095_v20 }
 0x256   :  { %v11203_v14 = vsel %vm16259_vm5, %v1785_v2, %v895_v41  ;;  %v2233_v7 = vsel %vm16263_vm6, %v2184_v0, %v11102_v29  ;;  %v16267_v29 = vld [vmem:[#allocation45_spill] sm:$0xff]  ;;  %vm16268_vm5 = vmmov %vm16266_vm3  ;;  %v2260_v41 = vsel %vm9763_vm1, %v2257_v42, %v801_v38  ;;  %vm16272_vm6 = vcmask 498688  }
 0x257   :  { %2357 = vrot.lane.b32.xlu0 %v11203_v14, %s8743_s19  ;;  %v2250_v11 = vsel %vm9580_vm15, %v2233_v7, %v8292_v12  ;;  %v1160_v30 = vsel %vm16268_vm5, %v16267_v29, %v11097_v31  ;;  %v1336_v31 = vsel %vm16272_vm6, %v1313_v47, %v11194_v59  ;;  %v1939_v45 = vsel %vm10109_vm0, %v11079_v63, %v1161_v51 }
 0x258   :  { %v1392_v50 = vpop.permute.xlu1 %1391  ;;  %vm16275_vm3 = vcmask 1043456   ;;  %v1938_v26 = vsel %vm10109_vm0, %v11075_v24, %v1160_v30  ;;  %vm16276_vm1 = vcmask 1041408   ;;  %v16287_v30 = vld [vmem:[#allocation49_spill] sm:$0xff] }
 0x259   :  { %v880_v62 = vpop.permute.xlu0 %879  ;;  %v1984_v4 = vsel %vm16276_vm1, %v1939_v45, %v1240_v52  ;;  %vm16278_vm12 = vmmov %vm16276_vm1 }
 0x25a   :  { %v896_v43 = vsel %vm16264_vm14, %v878_v49, %v880_v62  ;;  %v2410_v49 = vld [vmem:[%s15395_s2] sm:$0x3f]  ;;  %vm16273_vm14 = vmmov %vm16272_vm6  ;;  %v2266_v15 = vsel %vm16275_vm3, %v2260_v41, %v880_v62  ;;  %v1980_v63 = vsel %vm16278_vm12, %v1938_v26, %v1239_v54  ;;  %vm16281_vm6 = vcmask 1044480   ;;  %v16291_v54 = vld [vmem:[#allocation47_spill] sm:$0xff] }
 0x25b   :  { %v11221_v8 = vsel %vm16265_vm2, %v1786_v23, %v896_v43  ;;  %2329 = vrot.lane.b32.xlu0 %v2250_v11, %s8743_s19  ;;  %v1335_v19 = vsel %vm16273_vm14, %v10759_v10, %v1313_v47  ;;  %vm16274_vm2 = vcmask 490496   ;;  %v2018_v10 = vsel %vm10127_vm9, %v1984_v4, %v1336_v31  ;;  %vm16282_vm14 = vmmov %vm16281_vm6  ;;  %v11322_v4 = vld [vmem:[%s15394_s1] sm:$0x7]  ;;  %s8748_s1 = smov 58  }
 0x25c   :  { %2359 = vrot.lane.b32.xlu1 %v11221_v8, %s8743_s19  ;;  %v1488_v12 = vpop.permute.xlu1 %1487  ;;  %vm16277_vm5 = vmmov %vm16274_vm2  ;;  %v2017_v24 = vsel %vm10127_vm9, %v1980_v63, %v1335_v19  ;;  %vm16284_vm3 = vcmask 1014784   ;;  %vm16288_vm12 = vcmask 1045504  }
 0x25d   :  { %v11238_v39 = vpop.permute.xlu0 %1393  ;;  %v1414_v9 = vsel %vm16277_vm5, %v10795_v61, %v1392_v50  ;;  %v1510_v47 = vsel %vm16279_vm10, %v10852_v48, %v1488_v12  ;;  %vm16286_vm5 = vmmov %vm16284_vm3 }
 0x25e   :  { %v1415_v2 = vsel %vm16274_vm2, %v1392_v50, %v11238_v39  ;;  %v2059_v27 = vsel %vm16282_vm14, %v2017_v24, %v1414_v9  ;;  %vm16283_vm2 = vcmask 252928   ;;  %vm16289_vm10 = vmmov %vm16288_vm12  ;;  %vm16293_vm14 = vcmask 752640  }
 0x25f   :  { %2413 = vperm.xlu0 %8293, %v2410_v49   ;;  %v2063_v46 = vsel %vm16281_vm6, %v2018_v10, %v1415_v2  ;;  %v2096_v48 = vsel %vm10152_vm11, %v2059_v27, %v1510_v47  ;;  %vm16285_vm1 = vmmov %vm16283_vm2  ;;  %v16299_v10 = vld [vmem:[#allocation48_spill] sm:$0xff] }
 0x260   :  { %2361 = vrot.lane.b32.xlu1 %v2266_v15, %s8743_s19  ;;  %vm16292_vm6 = vmmov %vm16285_vm1  ;;  %s8757_s19 = smov 114  }
 0x261   :  { %v2318_v38 = vpop.permute.xlu1 %2317  ;;  %v11269_v33 = vpop.permute.xlu0 %1489 }
 0x262   :  { %v1511_v61 = vsel %vm16280_vm4, %v1488_v12, %v11269_v33  ;;  %v2372_v23 = vsel %vm16285_vm1, %v10918_v13, %v2318_v38  ;;  %vm16290_vm4 = vmmov %vm16285_vm1  ;;  %vm16296_vm1 = vcmask 613376  }
 0x263   :  { %v2097_v0 = vsel %vm10152_vm11, %v2063_v46, %v1511_v61 }
 0x264   :  { %2635 = vmatprep.subr.bf16.mxu0 %v2097_v0 }
 0x265   :  { %v488_v50 = vpop.permute.xlu1 %487  ;;  %2636 = vmatpush1.bf16.msra.mxu0 %v2096_v48  ;;  %v11281_v62 = vpop.permute.xlu0 %2319 }
 0x266   :  { %v2373_v7 = vsel %vm16283_vm2, %v2318_v38, %v11281_v62  ;;  %v506_v43 = vsel %vm16284_vm3, %v11001_v17, %v488_v50  ;;  %vm16294_vm2 = vmmov %vm16293_vm14  ;;  %vm16295_vm3 = vcmask 523264  }
 0x267   :  { %2637 = vmatprep.subr.bf16.mxu0 %v2373_v7  ;;  %v1672_v42 = vsel %vm16288_vm12, %v16287_v30, %v506_v43  ;;  %vm16298_vm12 = vcmask 1046528  }
 0x268   :  { %v1703_v41 = vsel %vm9580_vm15, %v1672_v42, %v16291_v54 }
 0x269   :  { %v2350_v11 = vpop.permute.xlu1 %2349  ;;  %2638 = vmatpush1.bf16.msra.mxu0 %v2372_v23  ;;  %v11289_v51 = vpop.permute.xlu0 %489 }
 0x26a   :  { %v507_v29 = vsel %vm16286_vm5, %v488_v50, %v11289_v51  ;;  %v2387_v13 = vsel %vm16290_vm4, %v10982_v5, %v2350_v11  ;;  %vm16297_vm5 = vmmov %vm16295_vm3  ;;  %vm16301_vm4 = vcmask 515072  }
 0x26b   :  { %v1676_v52 = vsel %vm16289_vm10, %v10906_v36, %v507_v29  ;;  %v2447_v45 = vand.u32 %v16198_v3, %v2387_v13  ;;  %vm16300_vm10 = vmmov %vm16298_vm12 }
 0x26c   :  { %v1704_v17 = vsel %vm9580_vm15, %v1676_v52, %v10902_v25 }
 0x26d   :  { %v968_v12 = vpop.permute.xlu1 %967  ;;  %v11302_v49 = vpop.permute.xlu0 %2351  ;;  %2672 = vmatprep.subr.bf16.mxu1 %v1704_v17 }
 0x26e   :  { %v2388_v31 = vsel %vm16292_vm6, %v2350_v11, %v11302_v49  ;;  %2673 = vmatpush1.bf16.msra.mxu1 %v1703_v41  ;;  %v988_v2 = vsel %vm16294_vm2, %v11057_v6, %v968_v12  ;;  %vm16302_vm6 = vcmask 506880   ;;  %vm16304_vm2 = vcmask 498688  }
 0x26f   :  { %v2450_v36 = vand.u32 %v16198_v3, %v2388_v31  ;;  %v1861_v47 = vsel %vm9884_vm8, %v16299_v10, %v988_v2 }
 0x271   :  { %v1047_v25 = vpop.permute.xlu1 %1046  ;;  %2639 = vmatprep.subr.bf16.mxu0 %v2450_v36  ;;  %v11311_v19 = vpop.permute.xlu0 %969 }
 0x272   :  { %2640 = vmatpush1.bf16.msra.mxu0 %v2447_v45  ;;  %v989_v5 = vsel %vm16293_vm14, %v968_v12, %v11311_v19  ;;  %v1067_v15 = vsel %vm16295_vm3, %v11068_v32, %v1047_v25  ;;  %vm16303_vm14 = vcmask 1041408   ;;  %vm16305_vm3 = vmmov %vm16301_vm4 }
 0x273   :  { %v1862_v6 = vsel %vm9884_vm8, %v10971_v53, %v989_v5  ;;  %v1909_v38 = vsel %vm16300_vm10, %v1861_v47, %v1067_v15  ;;  %v1549_v47 = vsel %vm9534_vm7, %v16214_v58, %v11028_v40  ;;  %vm16322_vm7 = vcmask 1045504   ;;  %v16323_v40 = vld [vmem:[#allocation56_spill] sm:$0xff] }
 0x275   :  { %v1142_v26 = vpop.permute.xlu1 %1141  ;;  %7540 = vmatmul.mubr.msk.bf16.vlgmr.msra.gmra.mrb[8].mxu0 %vm16296_vm1, %v11322_v4  ;;  %v11326_v9 = vpop.permute.xlu0 %1048  ;;  %vm16306_vm1 = vmmov %vm16302_vm6 }
 0x276   :  { %v1068_v63 = vsel %vm16297_vm5, %v1047_v25, %v11326_v9  ;;  %2745 = vmatprep.mubr.bf16.mxu0 %v16213_v35  ;;  %v1162_v11 = vsel %vm16305_vm3, %v11095_v20, %v1142_v26  ;;  %vm16307_vm5 = vcmask 490496  }
 0x277   :  { %v1913_v32 = vsel %vm16298_vm12, %v1862_v6, %v1068_v63  ;;  %vm16308_vm12 = vmmov %vm16304_vm2  ;;  %v1940_v12 = vsel %vm10109_vm0, %v1067_v15, %v1162_v11 }
 0x278   :  { %2674 = vmatprep.subr.bf16.mxu1 %v1913_v32  ;;  %vm16309_vm10 = vmmov %vm16307_vm5 }
 0x279   :  { %v1221_v24 = vpop.permute.xlu1 %1220  ;;  %v11339_v61 = vpop.permute.xlu0 %1143  ;;  %2675 = vmatpush1.bf16.msra.mxu1 %v1909_v38 }
 0x27a   :  { %v1163_v46 = vsel %vm16301_vm4, %v1142_v26, %v11339_v61  ;;  %v1241_v52 = vsel %vm16306_vm1, %v11170_v37, %v1221_v24  ;;  %vm16310_vm4 = vcmask 1044480   ;;  %vm16315_vm1 = vcmask 252928  }
 0x27b   :  { %v1941_v27 = vsel %vm10109_vm0, %v1068_v63, %v1163_v46  ;;  %vm16314_vm3 = vmmov %vm16310_vm4 }
 0x27d   :  { %v1317_v0 = vpop.permute.xlu1 %1316  ;;  %v11343_v53 = vpop.permute.xlu0 %1222 }
 0x27e   :  { %v1242_v48 = vsel %vm16302_vm6, %v1221_v24, %v11343_v53  ;;  %v1337_v13 = vsel %vm16308_vm12, %v11194_v59, %v1317_v0  ;;  %vm16311_vm6 = vmmov %vm16303_vm14 }
 0x27f   :  { %v1992_v43 = vsel %vm16303_vm14, %v1941_v27, %v1242_v48  ;;  %v1988_v41 = vsel %vm16311_vm6, %v1940_v12, %v1241_v52  ;;  %vm16312_vm14 = vcmask 261120   ;;  %vm16317_vm12 = vmmov %vm16315_vm1  ;;  %vm16320_vm6 = vcmask 1042432  }
 0x280   :  { %v2019_v45 = vsel %vm10127_vm9, %v1988_v41, %v1337_v13  ;;  %v15629_v48 = vmov 0.0   ;;  %v16333_v13 = vld [vmem:[#allocation52_spill] sm:$0xff] }
 0x281   :  { %v1396_v50 = vpop.permute.xlu1 %1395  ;;  %v11349_v7 = vpop.permute.xlu0 %1318 }
 0x282   :  { %v1338_v23 = vsel %vm16304_vm2, %v1317_v0, %v11349_v7  ;;  %v1416_v20 = vsel %vm16309_vm10, %v11238_v39, %v1396_v50  ;;  %vm16313_vm2 = vmmov %vm16312_vm14 }
 0x283   :  { %v2020_v29 = vsel %vm10127_vm9, %v1992_v43, %v1338_v23  ;;  %v2067_v39 = vsel %vm16314_vm3, %v2019_v45, %v1416_v20  ;;  %vm16318_vm10 = vmmov %vm16315_vm1  ;;  %v16327_v43 = vld [vmem:[#allocation54_spill] sm:$0xff] }
 0x285   :  { %v1492_v30 = vpop.permute.xlu1 %1491  ;;  %v11358_v42 = vpop.permute.xlu0 %1397 }
 0x286   :  { %v1417_v17 = vsel %vm16307_vm5, %v1396_v50, %v11358_v42  ;;  %v1512_v31 = vsel %vm16312_vm14, %v11269_v33, %v1492_v30  ;;  %vm16316_vm5 = vmmov %vm16315_vm1 }
 0x287   :  { %v2071_v54 = vsel %vm16310_vm4, %v2020_v29, %v1417_v17  ;;  %v2098_v5 = vsel %vm10152_vm11, %v2067_v39, %v1512_v31  ;;  %vm16319_vm4 = vcmask 1014784  }
 0x288   :  { %vm16321_vm14 = vmmov %vm16319_vm4 }
 0x289   :  { %v2322_v37 = vpop.permute.xlu1 %2321  ;;  %v11374_v36 = vpop.permute.xlu0 %1493 }
 0x28a   :  { %v1513_v59 = vsel %vm16313_vm2, %v1492_v30, %v11374_v36  ;;  %v2374_v26 = vsel %vm16316_vm5, %v11281_v62, %v2322_v37  ;;  %vm16324_vm2 = vmmov %vm16322_vm7  ;;  %vm8747_vm5 = vmmov 0  }
 0x28b   :  { %v2099_v25 = vsel %vm10152_vm11, %v2071_v54, %v1513_v59  ;;  %vm16325_vm3 = vmmov %vm16324_vm2 }
 0x28c   :  { %2676 = vmatprep.subr.bf16.mxu1 %v2099_v25 }
 0x28d   :  { %v11385_v33 = vpop.permute.xlu0 %2323  ;;  %2677 = vmatpush1.bf16.msra.mxu1 %v2098_v5 }
 0x28e   :  { %v2375_v15 = vsel %vm16315_vm1, %v2322_v37, %v11385_v33  ;;  %vm16328_vm1 = vcmask 752640  }
 0x28f   :  { %v2354_v2 = vpop.permute.xlu1 %2353  ;;  %2678 = vmatprep.subr.bf16.mxu1 %v2375_v15 }
 0x290   :  { %v2389_v63 = vsel %vm16317_vm12, %v11302_v49, %v2354_v2  ;;  %v1609_v49 = vsel %vm16320_vm6, %v1549_v47, %v11040_v34  ;;  %vm16329_vm12 = vmmov %vm16328_vm1 }
 0x291   :  { %2679 = vmatpush1.bf16.msra.mxu1 %v2374_v26  ;;  %v2453_v24 = vand.u32 %v16198_v3, %v2389_v63  ;;  %v1628_v0 = vsel %vm9552_vm13, %v1609_v49, %v11048_v16  ;;  %vm16326_vm13 = vcmask 613376  }
 0x292   :  { %v11393_v32 = vpop.permute.xlu0 %2355 }
 0x293   :  { %v492_v6 = vpop.permute.xlu1 %491  ;;  %v2390_v10 = vsel %vm16318_vm10, %v2354_v2, %v11393_v32  ;;  %vm16330_vm10 = vcmask 523264  }
 0x294   :  { %v508_v38 = vsel %vm16319_vm4, %v11289_v51, %v492_v6  ;;  %v2456_v62 = vand.u32 %v16198_v3, %v2390_v10  ;;  %vm16331_vm4 = vmmov %vm16330_vm10 }
 0x295   :  { %v1680_v51 = vsel %vm16324_vm2, %v16323_v40, %v508_v38  ;;  %vm16337_vm2 = vcmask 1041408  }
 0x296   :  { %v494_v27 = vpop.permute.xlu0 %493  ;;  %2680 = vmatprep.subr.bf16.mxu1 %v2456_v62  ;;  %v1705_v23 = vsel %vm9580_vm15, %v1680_v51, %v16327_v43 }
 0x297   :  { %v972_v46 = vpop.permute.xlu1 %971  ;;  %v509_v60 = vsel %vm16321_vm14, %v492_v6, %v494_v27  ;;  %v1688_v58 = vsel %vm16322_vm7, %v1628_v0, %v494_v27  ;;  %2681 = vmatpush1.bf16.msra.mxu1 %v2453_v24  ;;  %vm16335_vm14 = vcmask 515072   ;;  %vm16336_vm7 = vcmask 506880  }
 0x298   :  { %v1684_v34 = vsel %vm16325_vm3, %v11168_v56, %v509_v60  ;;  %7972 = vmatprep.subr.bf16.mxu1 %v15629_v48  ;;  %v1707_v56 = vsel %vm9580_vm15, %v1688_v58, %v11157_v21  ;;  %vm16338_vm3 = vcmask 498688  }
 0x299   :  { %v1706_v28 = vsel %vm9580_vm15, %v1684_v34, %v11162_v1  ;;  %v990_v1 = vsel %vm16329_vm12, %v11311_v19, %v972_v46  ;;  %vm16332_vm15 = vcmask 1046528   ;;  %vm16341_vm12 = vmmov %vm16338_vm3 }
 0x29a   :  { %v974_v50 = vpop.permute.xlu0 %973  ;;  %7541 = vmatmul.mubr.msk.bf16.vlgmr.msra.gmra.mrb[8].mxu1 %vm16326_vm13, %v11322_v4  ;;  %2713 = vmatprep.subr.bf16.mxu0 %v1706_v28  ;;  %v1863_v12 = vsel %vm9884_vm8, %v16333_v13, %v990_v1  ;;  %vm16334_vm6 = vmmov %vm16332_vm15 }
 0x29b   :  { %v1051_v16 = vpop.permute.xlu1 %1050  ;;  %2714 = vmatpush1.bf16.msra.mxu0 %v1705_v23  ;;  %7973 = vmatpush3.bf16.msra.mxu1 %v1707_v56  ;;  %v991_v11 = vsel %vm16328_vm1, %v972_v46, %v974_v50  ;;  %vm16339_vm13 = vmmov %vm16335_vm14 }
 0x29c   :  { %7974 = vmatprep.subr.bf16.mxu1 %v15629_v48  ;;  %7982 = vmatprep.mubr.msk.bf16.mxu1 %vm8747_vm5, %v15629_v48  ;;  %v1069_v29 = vsel %vm16330_vm10, %v11326_v9, %v1051_v16  ;;  %v1864_v21 = vsel %vm9884_vm8, %v11203_v14, %v991_v11  ;;  %vm16340_vm1 = vmmov %vm16336_vm7  ;;  %vm16342_vm10 = vcmask 490496  }
 0x29d   :  { %v1917_v19 = vsel %vm16334_vm6, %v1863_v12, %v1069_v29  ;;  %vm16345_vm6 = vcmask 1044480  }
 0x29e   :  { %v1053_v52 = vpop.permute.xlu0 %1052 }
 0x29f   :  { %v1146_v30 = vpop.permute.xlu1 %1145  ;;  %v1070_v22 = vsel %vm16331_vm4, %v1051_v16, %v1053_v52  ;;  %v11445_v9 = vpop.f32.mrb[0].mxu0  ;;  %vm16343_vm4 = vmmov %vm16342_vm10 }
 0x2a0   :  { %v1921_v17 = vsel %vm16332_vm15, %v1864_v21, %v1070_v22  ;;  %v11448_v31 = vpop.f32.mrb[1].mxu0  ;;  %v1164_v47 = vsel %vm16339_vm13, %v11339_v61, %v1146_v30  ;;  %vm16344_vm15 = vmmov %vm16337_vm2  ;;  %vm16350_vm13 = vcmask 523264  }
 0x2a1   :  { %2715 = vmatprep.subr.bf16.mxu0 %v1921_v17  ;;  %v2505_v45 = vpop.f32.mrb[2].mxu0  ;;  %v1942_v60 = vsel %vm10109_vm0, %v1069_v29, %v1164_v47 }
 0x2a2   :  { %v1148_v54 = vpop.permute.xlu0 %1147  ;;  %2716 = vmatpush1.bf16.msra.mxu0 %v1917_v19  ;;  %v2506_v39 = vpop.f32.mrb[3].mxu0 }
 0x2a3   :  { %v1225_v20 = vpop.permute.xlu1 %1224  ;;  %v1165_v41 = vsel %vm16335_vm14, %v1146_v30, %v1148_v54  ;;  %vm16346_vm14 = vcmask 261120  }
 0x2a4   :  { %v1943_v59 = vsel %vm10109_vm0, %v1070_v22, %v1165_v41  ;;  %v11453_v5 = vpop.f32.mrb[0].mxu1  ;;  %v1243_v62 = vsel %vm16340_vm1, %v11343_v53, %v1225_v20  ;;  %vm16351_vm1 = vcmask 515072  }
 0x2a5   :  { %v11457_v6 = vpop.f32.mrb[1].mxu1  ;;  %v1996_v58 = vsel %vm16344_vm15, %v1942_v60, %v1243_v62 }
 0x2a6   :  { %v1227_v14 = vpop.permute.xlu0 %1226  ;;  %v2546_v10 = vpop.f32.mrb[2].mxu1 }
 0x2a7   :  { %v1321_v37 = vpop.permute.xlu1 %1320  ;;  %v1244_v25 = vsel %vm16336_vm7, %v1225_v20, %v1227_v14  ;;  %v2547_v38 = vpop.f32.mrb[3].mxu1  ;;  %vm16347_vm7 = vmmov %vm16346_vm14 }
 0x2a8   :  { %v2000_v26 = vsel %vm16337_vm2, %v1943_v59, %v1244_v25  ;;  %v1339_v0 = vsel %vm16341_vm12, %v11349_v7, %v1321_v37  ;;  %vm16348_vm2 = vmmov %vm16345_vm6  ;;  %vm16352_vm12 = vcmask 1046528  }
 0x2a9   :  { %v2021_v40 = vsel %vm10127_vm9, %v1996_v58, %v1339_v0 }
 0x2aa   :  { %v1323_v15 = vpop.permute.xlu0 %1322 }
 0x2ab   :  { %v1400_v2 = vpop.permute.xlu1 %1399  ;;  %v1340_v63 = vsel %vm16338_vm3, %v1321_v37, %v1323_v15  ;;  %vm16349_vm3 = vcmask 752640  }
 0x2ac   :  { %v2022_v49 = vsel %vm10127_vm9, %v2000_v26, %v1340_v63  ;;  %v1418_v61 = vsel %vm16343_vm4, %v11358_v42, %v1400_v2  ;;  %vm16354_vm4 = vcmask 498688  }
 0x2ad   :  { %v2075_v16 = vsel %vm16348_vm2, %v2021_v40, %v1418_v61 }
 0x2ae   :  { %v1402_v46 = vpop.permute.xlu0 %1401 }
 0x2af   :  { %v976_v24 = vpop.permute.xlu1 %975  ;;  %v1419_v27 = vsel %vm16342_vm10, %v1400_v2, %v1402_v46  ;;  %vm16353_vm10 = vcmask 506880  }
 0x2b0   :  { %v2079_v53 = vsel %vm16345_vm6, %v2022_v49, %v1419_v27  ;;  %v992_v43 = vsel %vm16349_vm3, %v974_v50, %v976_v24  ;;  %vm16356_vm6 = vcmask 490496  }
 0x2b2   :  { %v1496_v34 = vpop.permute.xlu0 %1495 }
 0x2b3   :  { %v1498_v51 = vpop.permute.xlu1 %1497  ;;  %v1514_v7 = vsel %vm16346_vm14, %v11374_v36, %v1496_v34  ;;  %v1865_v36 = vsel %vm9884_vm8, %v11221_v8, %v992_v43  ;;  %vm16355_vm8 = vmmov %vm16347_vm7 }
 0x2b4   :  { %v1515_v28 = vsel %vm16347_vm7, %v1496_v34, %v1498_v51  ;;  %v2100_v23 = vsel %vm10152_vm11, %v2075_v16, %v1514_v7  ;;  %vm16357_vm14 = vmmov %vm16348_vm2 }
 0x2b5   :  { %v2101_v42 = vsel %vm10152_vm11, %v2079_v53, %v1515_v28 }
 0x2b6   :  { %2717 = vmatprep.subr.bf16.mxu0 %v2101_v42  ;;  %v1055_v11 = vpop.permute.xlu0 %1054 }
 0x2b7   :  { %v1150_v56 = vpop.permute.xlu1 %1149  ;;  %2718 = vmatpush1.bf16.msra.mxu0 %v2100_v23  ;;  %v1071_v1 = vsel %vm16350_vm13, %v1053_v52, %v1055_v11  ;;  %vm16364_vm13 = vcmask 613376  }
 0x2b8   :  { %v1166_v29 = vsel %vm16351_vm1, %v1148_v54, %v1150_v56  ;;  %v1925_v50 = vsel %vm16352_vm12, %v1865_v36, %v1071_v1  ;;  %vm16365_vm1 = vmmov %vm16364_vm13  ;;  %vm16366_vm12 = vcmask 1039360  }
 0x2b9   :  { %7975 = vmatpush3.bf16.msra.mxu1 %v1925_v50  ;;  %v1944_v21 = vsel %vm10109_vm0, %v1071_v1, %v1166_v29  ;;  %vm16358_vm0 = vcmask 252928  }
 0x2ba   :  { %v1229_v22 = vpop.permute.xlu0 %1228  ;;  %7976 = vmatprep.subr.bf16.mxu1 %v15629_v48  ;;  %vm16359_vm7 = vmmov %vm16358_vm0 }
 0x2bb   :  { %v1325_v30 = vpop.permute.xlu1 %1324  ;;  %v1245_v17 = vsel %vm16353_vm10, %v1227_v14, %v1229_v22  ;;  %vm16361_vm2 = vmmov %vm16358_vm0 }
 0x2bc   :  { %v1341_v13 = vsel %vm16354_vm4, %v1323_v15, %v1325_v30  ;;  %v2004_v57 = vsel %vm16344_vm15, %v1944_v21, %v1245_v17  ;;  %vm16363_vm3 = vmmov %vm16358_vm0 }
 0x2bd   :  { %v2023_v19 = vsel %vm10127_vm9, %v2004_v57, %v1341_v13  ;;  %vm16360_vm9 = vmmov %vm16358_vm0 }
 0x2be   :  { %v1404_v52 = vpop.permute.xlu0 %1403  ;;  %vm16367_vm10 = vmmov %vm16366_vm12 }
 0x2bf   :  { %v1500_v8 = vpop.permute.xlu1 %1499  ;;  %v1420_v20 = vsel %vm16356_vm6, %v1402_v46, %v1404_v52  ;;  %vm16368_vm4 = vmmov %vm16367_vm10 }
 0x2c0   :  { %v1516_v12 = vsel %vm16355_vm8, %v1498_v51, %v1500_v8  ;;  %v2083_v54 = vsel %vm16357_vm14, %v2023_v19, %v1420_v20  ;;  %vm16369_vm15 = vmmov %vm16368_vm4 }
 0x2c1   :  { %v2102_v44 = vsel %vm10152_vm11, %v2083_v54, %v1516_v12  ;;  %vm16362_vm11 = vmmov %vm16358_vm0 }
 0x2c2   :  { %v2326_v37 = vpop.permute.xlu0 %2325  ;;  %7977 = vmatpush3.bf16.msra.mxu1 %v2102_v44  ;;  %vm16370_vm8 = vmmov %vm16368_vm4 }
 0x2c3   :  { %v2328_v41 = vpop.permute.xlu1 %2327  ;;  %v2376_v45 = vsel %vm16359_vm7, %v11385_v33, %v2326_v37  ;;  %7978 = vmatprep.subr.bf16.mxu1 %v15629_v48  ;;  %vm16371_vm6 = vmmov %vm16368_vm4 }
 0x2c4   :  { %v2377_v14 = vsel %vm16358_vm0, %v2326_v37, %v2328_v41  ;;  %vm16372_vm14 = vmmov %vm16368_vm4 }
 0x2c5   :  { %2719 = vmatprep.subr.bf16.mxu0 %v2377_v14  ;;  %vm16373_vm0 = vmmov %vm16368_vm4 }
 0x2c6   :  { %2720 = vmatpush1.bf16.msra.mxu0 %v2376_v45  ;;  %vm16374_vm7 = vmmov %vm16373_vm0 }
 0x2c9   :  { %v2358_v55 = vpop.permute.xlu0 %2357 }
 0x2ca   :  { %v2391_v59 = vsel %vm16360_vm9, %v11393_v32, %v2358_v55  ;;  %vm16375_vm9 = vmmov %vm16373_vm0 }
 0x2cb   :  { %v2459_v26 = vand.u32 %v16198_v3, %v2391_v59 }
 0x2cd   :  { %v2330_v39 = vpop.permute.xlu0 %2329 }
 0x2ce   :  { %v2360_v25 = vpop.permute.xlu1 %2359  ;;  %v2378_v2 = vsel %vm16362_vm11, %v2328_v41, %v2330_v39  ;;  %vm16377_vm11 = vmmov %vm16373_vm0 }
 0x2cf   :  { %v2392_v18 = vsel %vm16361_vm2, %v2358_v55, %v2360_v25  ;;  %7979 = vmatpush3.bf16.msra.mxu1 %v2378_v2  ;;  %vm16376_vm2 = vmmov %vm16373_vm0 }
 0x2d0   :  { %v2462_v15 = vand.u32 %v16198_v3, %v2392_v18  ;;  %7980 = vmatprep.subr.bf16.mxu1 %v15629_v48 }
 0x2d2   :  { %v2362_v33 = vpop.permute.xlu1 %2361  ;;  %2721 = vmatprep.subr.bf16.mxu0 %v2462_v15 }
 0x2d3   :  { %v2393_v63 = vsel %vm16363_vm3, %v2360_v25, %v2362_v33  ;;  %2722 = vmatpush1.bf16.msra.mxu0 %v2459_v26  ;;  %vm16378_vm3 = vmmov %vm16373_vm0 }
 0x2d4   :  { %v2465_v32 = vand.u32 %v16198_v3, %v2393_v63 }
 0x2d6   :  { %7542 = vmatmul.mubr.msk.bf16.vlgmr.msra.gmra.mrb[12].mxu0 %vm16364_vm13, %v11322_v4  ;;  %7981 = vmatpush3.bf16.msra.mxu1 %v2465_v32  ;;  %vm16379_vm13 = vmmov %vm16373_vm0 }
 0x2d9   :  { %7983 = vmatmul.mubr.msk.bf16.vlgmr.msra.gmra.mrb[12].mxu1 %vm16365_vm1, %v11322_v4  ;;  %vm16381_vm1 = vcmask 785408  }
 0x2de   :  { %v11521_v10 = vpop.permute.xlu0 %2413 }
 0x2df   :  { %v11525_v47 = vadd.f32 %v11453_v5, %v11521_v10  ;;  %v11529_v38 = vadd.f32 %v11457_v6, %v11521_v10  ;;  %v11540_v5 = vadd.f32 %v11448_v31, %v11521_v10  ;;  %v11570_v42 = vadd.f32 %v11445_v9, %v11521_v10 }
 0x2e1   :  { %v2796_v62 = vmax.f32 %v11525_v47, 0.0  ;;  %v2797_v3 = vmax.f32 %v11529_v38, 0.0  ;;  %v2795_v53 = vmax.f32 %v11540_v5, 0.0  ;;  %v2794_v22 = vmax.f32 %v11570_v42, 0.0 }
 0x2e3   :  { %v8294_v49 = vpack.i.bf16 %v2797_v3, %v2796_v62 }
 0x2e5   :  { %8295 = vrot.lane.b32.xlu1 %v8294_v49, %s8727_s27 }
 0x2f4   :  { %v2583_v4 = vpop.f32.mrb[4].mxu0 }
 0x2f5   :  { %v11543_v24 = vadd.f32 %v2583_v4, %v11521_v10  ;;  %v2585_v6 = vpop.f32.mrb[5].mxu0 }
 0x2f6   :  { %v11546_v46 = vadd.f32 %v2585_v6, %v11521_v10  ;;  %v2587_v0 = vpop.f32.mrb[6].mxu0 }
 0x2f7   :  { %v2798_v27 = vmax.f32 %v11543_v24, 0.0  ;;  %v2588_v60 = vpop.f32.mrb[7].mxu0 }
 0x2f8   :  { %v2799_v61 = vmax.f32 %v11546_v46, 0.0 }
 0x2f9   :  { %v2624_v58 = vpop.f32.mrb[4].mxu1 }
 0x2fa   :  { %v11552_v40 = vadd.f32 %v2624_v58, %v11521_v10  ;;  %v2626_v31 = vpop.f32.mrb[5].mxu1  ;;  %v8299_v51 = vpack.i.bf16 %v2799_v61, %v2798_v27 }
 0x2fb   :  { %v2628_v34 = vpop.f32.mrb[6].mxu1  ;;  %v11566_v43 = vadd.f32 %v2626_v31, %v11521_v10 }
 0x2fc   :  { %v2800_v7 = vmax.f32 %v11552_v40, 0.0  ;;  %v2629_v28 = vpop.f32.mrb[7].mxu1  ;;  %8300 = vrot.lane.b32.xlu1 %v8299_v51, %s8727_s27 }
 0x2fd   :  { %v2801_v29 = vmax.f32 %v11566_v43, 0.0 }
 0x2fe   :  { %v8304_v16 = vpack.i.bf16 %v2795_v53, %v2800_v7 }
 0x300   :  { %8305 = vrot.lane.b32.xlu0 %v8304_v16, %s8727_s27 }
 0x348   :  { %v2665_v23 = vpop.f32.mrb[8].mxu0 }
 0x349   :  { %v11573_v56 = vadd.f32 %v2665_v23, %v11521_v10  ;;  %v2667_v11 = vpop.f32.mrb[9].mxu0 }
 0x34a   :  { %v11576_v36 = vadd.f32 %v2667_v11, %v11521_v10  ;;  %v2669_v1 = vpop.f32.mrb[10].mxu0 }
 0x34b   :  { %v2802_v50 = vmax.f32 %v11573_v56, 0.0  ;;  %v2670_v30 = vpop.f32.mrb[11].mxu0 }
 0x34c   :  { %v2803_v21 = vmax.f32 %v11576_v36, 0.0 }
 0x34d   :  { %v8309_v9 = vpack.i.bf16 %v2802_v50, %v2801_v29 }
 0x34e   :  { %v8314_v17 = vpack.i.bf16 %v2803_v21, %v2794_v22 }
 0x34f   :  { %8310 = vrot.lane.b32.xlu1 %v8309_v9, %s8727_s27 }
 0x350   :  { %8315 = vrot.lane.b32.xlu0 %v8314_v17, %s8727_s27 }
 0x357   :  { %v8296_v41 = vpop.permute.xlu1 %8295 }
 0x358   :  { %v8298_v25 = vunpack.i.h.bf16 %v8296_v41  ;;  %v8297_v39 = vunpack.i.l.bf16 %v8296_v41 }
 0x35a   :  { %v2857_v31 = vsel %vm16368_vm4, %v8297_v39, %v8298_v25  ;;  %vm16384_vm4 = vmmov %vm16381_vm1 }
 0x36d   :  { %v2706_v13 = vpop.f32.mrb[8].mxu1 }
 0x36e   :  { %v11593_v57 = vadd.f32 %v2706_v13, %v11521_v10  ;;  %v2708_v8 = vpop.f32.mrb[9].mxu1  ;;  %v8301_v37 = vpop.permute.xlu1 %8300 }
 0x36f   :  { %v11596_v52 = vadd.f32 %v2708_v8, %v11521_v10  ;;  %v2710_v12 = vpop.f32.mrb[10].mxu1  ;;  %v8302_v45 = vunpack.i.l.bf16 %v8301_v37  ;;  %v8303_v18 = vunpack.i.h.bf16 %v8301_v37 }
 0x370   :  { %v2804_v19 = vmax.f32 %v11593_v57, 0.0  ;;  %v2711_v20 = vpop.f32.mrb[11].mxu1 }
 0x371   :  { %v2805_v54 = vmax.f32 %v11596_v52, 0.0  ;;  %v2858_v63 = vsel %vm16366_vm12, %v8298_v25, %v8302_v45  ;;  %v2859_v51 = vsel %vm16369_vm15, %v8302_v45, %v8303_v18  ;;  %vm16382_vm12 = vmmov %vm16381_vm1 }
 0x372   :  { %v8306_v14 = vpop.permute.xlu0 %8305  ;;  %v11622_v28 = vmax.f32 %v2797_v3, %v2858_v63  ;;  %v11635_v30 = vmax.f32 %v2798_v27, %v2859_v51  ;;  %vm16385_vm15 = vmmov %vm16381_vm1 }
 0x373   :  { %v8319_v44 = vpack.i.bf16 %v2805_v54, %v2804_v19  ;;  %v8307_v55 = vunpack.i.l.bf16 %v8306_v14  ;;  %v8308_v47 = vunpack.i.h.bf16 %v8306_v14 }
 0x375   :  { %8320 = vrot.lane.b32.xlu1 %v8319_v44, %s8727_s27  ;;  %v2860_v32 = vsel %vm16367_vm10, %v8303_v18, %v8307_v55  ;;  %v2856_v24 = vsel %vm16370_vm8, %v8308_v47, %v8297_v39  ;;  %vm16383_vm10 = vmmov %vm16381_vm1 }
 0x376   :  { %v11626_v16 = vmax.f32 %v2799_v61, %v2860_v32  ;;  %v2885_v8 = vmax.f32 %v2795_v53, %v2856_v24  ;;  %vm16386_vm8 = vmmov %vm16381_vm1 }
 0x378   :  { %v8334_v38 = vpack.i.bf16 %v11626_v16, %v11635_v30 }
 0x3a9   :  { %v2747_v59 = vpop.f32.mrb[12].mxu0 }
 0x3aa   :  { %v11606_v2 = vadd.f32 %v2747_v59, %v11521_v10  ;;  %v2749_v15 = vpop.f32.mrb[13].mxu0 }
 0x3ab   :  { %v11609_v26 = vadd.f32 %v2749_v15, %v11521_v10  ;;  %v2751_v33 = vpop.f32.mrb[14].mxu0 }
 0x3ac   :  { %v2806_v49 = vmax.f32 %v11606_v2, 0.0  ;;  %v2788_v4 = vpop.f32.mrb[12].mxu1  ;;  %v2752_v6 = vpop.f32.mrb[15].mxu0 }
 0x3ad   :  { %v2807_v0 = vmax.f32 %v11609_v26, 0.0  ;;  %v11616_v60 = vadd.f32 %v2788_v4, %v11521_v10  ;;  %v7984_v58 = vpop.f32.mrb[13].mxu1  ;;  %v11631_v10 = vmax.f32 %v2796_v62, %v2857_v31 }
 0x3ae   :  { %v2791_v34 = vpop.f32.mrb[14].mxu1 }
 0x3af   :  { %v8324_v23 = vpack.i.bf16 %v2807_v0, %v2806_v49  ;;  %v2808_v11 = vmax.f32 %v11616_v60, 0.0  ;;  %v7985_v1 = vpop.f32.mrb[15].mxu1  ;;  %v8329_v3 = vpack.i.bf16 %v11622_v28, %v11631_v10 }
 0x3b1   :  { %2852 = vrot.lane.b32.xlu0 %v2808_v11, %s8727_s27  ;;  %8325 = vrot.lane.b32.xlu1 %v8324_v23, %s8727_s27  ;;  %s8749_s27 = smov 120  }
 0x3b5   :  { %8335 = vrot.lane.b32.xlu1 %v8334_v38, %s8731_s13  ;;  %8330 = vrot.lane.b32.xlu0 %v8329_v3, %s8731_s13 }
 0x3c1   :  { %v8311_v62 = vpop.permute.xlu1 %8310 }
 0x3c2   :  { %v8313_v46 = vunpack.i.h.bf16 %v8311_v62  ;;  %v8312_v27 = vunpack.i.l.bf16 %v8311_v62  ;;  %v8316_v61 = vpop.permute.xlu0 %8315 }
 0x3c3   :  { %v8317_v9 = vunpack.i.l.bf16 %v8316_v61  ;;  %v8318_v5 = vunpack.i.h.bf16 %v8316_v61 }
 0x3c4   :  { %v2861_v17 = vsel %vm16371_vm6, %v8307_v55, %v8312_v27  ;;  %v2862_v13 = vsel %vm16372_vm14, %v8312_v27, %v8313_v46  ;;  %vm16387_vm6 = vmmov %vm16381_vm1 }
 0x3c5   :  { %v11654_v12 = vmax.f32 %v2800_v7, %v2861_v17  ;;  %v11658_v20 = vmax.f32 %v2801_v29, %v2862_v13  ;;  %v2855_v44 = vsel %vm16373_vm0, %v8317_v9, %v8308_v47  ;;  %v2863_v40 = vsel %vm16374_vm7, %v8313_v46, %v8318_v5  ;;  %vm16390_vm14 = vmmov %vm16381_vm1 }
 0x3c6   :  { %v2884_v41 = vmax.f32 %v2794_v22, %v2855_v44  ;;  %v11671_v29 = vmax.f32 %v2802_v50, %v2863_v40  ;;  %vm16391_vm0 = vmmov %vm16381_vm1  ;;  %vm16398_vm7 = vcmask 1031168  }
 0x3c7   :  { %v8339_v37 = vpack.i.bf16 %v11654_v12, %v2885_v8 }
 0x3c8   :  { %v8344_v14 = vpack.i.bf16 %v2884_v41, %v11658_v20 }
 0x3c9   :  { %8340 = vrot.lane.b32.xlu0 %v8339_v37, %s8731_s13 }
 0x3ca   :  { %8345 = vrot.lane.b32.xlu1 %v8344_v14, %s8731_s13 }
 0x3e7   :  { %v8321_v53 = vpop.permute.xlu1 %8320 }
 0x3e8   :  { %v8322_v7 = vunpack.i.l.bf16 %v8321_v53  ;;  %v8323_v45 = vunpack.i.h.bf16 %v8321_v53 }
 0x3ea   :  { %v2864_v43 = vsel %vm16375_vm9, %v8318_v5, %v8322_v7  ;;  %v2865_v59 = vsel %vm16376_vm2, %v8322_v7, %v8323_v45  ;;  %vm16399_vm9 = vmmov %vm16398_vm7  ;;  %vm16400_vm2 = vcmask 1042432  }
 0x3eb   :  { %v11675_v42 = vmax.f32 %v2803_v21, %v2864_v43  ;;  %v11689_v21 = vmax.f32 %v2804_v19, %v2865_v59 }
 0x3ed   :  { %v8349_v22 = vpack.i.bf16 %v11675_v42, %v11671_v29 }
 0x3ef   :  { %8350 = vrot.lane.b32.xlu0 %v8349_v22, %s8731_s13 }
 0x423   :  { %v8326_v55 = vpop.permute.xlu1 %8325  ;;  %v11681_v18 = vpop.permute.xlu0 %2852 }
 0x424   :  { %v8328_v25 = vunpack.i.h.bf16 %v8326_v55  ;;  %v8327_v39 = vunpack.i.l.bf16 %v8326_v55 }
 0x426   :  { %v2868_v56 = vsel %vm16377_vm11, %v8328_v25, %v11681_v18  ;;  %v2866_v36 = vsel %vm16378_vm3, %v8323_v45, %v8327_v39  ;;  %v2867_v50 = vsel %vm16379_vm13, %v8327_v39, %v8328_v25  ;;  %vm16401_vm11 = vcmask 1014784   ;;  %vm16403_vm3 = vmmov %vm16400_vm2 }
 0x427   :  { %v11693_v2 = vmax.f32 %v2805_v54, %v2866_v36  ;;  %v11695_v15 = vmax.f32 %v2807_v0, %v2868_v56  ;;  %v11697_v26 = vmax.f32 %v2806_v49, %v2867_v50  ;;  %v8331_v57 = vpop.permute.xlu0 %8330  ;;  %v8336_v19 = vpop.permute.xlu1 %8335  ;;  %vm16404_vm13 = vmmov %vm16401_vm11 }
 0x428   :  { %v8332_v52 = vunpack.i.l.bf16 %v8331_v57  ;;  %v8337_v61 = vunpack.i.l.bf16 %v8336_v19  ;;  %v8333_v9 = vunpack.i.h.bf16 %v8331_v57  ;;  %v8338_v53 = vunpack.i.h.bf16 %v8336_v19 }
 0x429   :  { %16380 = vst [vmem:[#allocation55_spill] sm:$0xff] %v11695_v15  ;;  %v8354_v33 = vpack.i.bf16 %v11693_v2, %v11689_v21  ;;  %v8359_v63 = vpack.i.bf16 %v11695_v15, %v11697_v26 }
 0x42a   :  { %v2947_v44 = vsel %vm16384_vm4, %v8332_v52, %v8333_v9  ;;  %vm3210_vm4 = vcmask 982016  }
 0x42b   :  { %8355 = vrot.lane.b32.xlu1 %v8354_v33, %s8731_s13  ;;  %v2976_v14 = vmax.f32 %v11631_v10, %v2947_v44 }
 0x42d   :  { %v11765_v7 = vpack.c.bf16 %v2976_v14, %v2976_v14 }
 0x42f   :  { %8360 = vrot.lane.b32.xlu1 %v8359_v63, %s8731_s13  ;;  %v3019_v22 = vrot.slane %v11765_v7, 5  ;;  %v11784_v59 = vrot.slane %v11765_v7, 2  ;;  %v11802_v36 = vrot.slane %v11765_v7, 4  ;;  %v15660_v50 = vrot.slane %v11765_v7, 6 }
 0x430   :  { %v15653_v33 = vrot.slane %v11765_v7, 3 }
 0x43b   :  { %v11705_v32 = vpop.permute.xlu0 %8340 }
 0x43c   :  { %v8342_v54 = vunpack.i.l.bf16 %v11705_v32  ;;  %v11708_v4 = vpop.permute.xlu1 %8345  ;;  %v8343_v10 = vunpack.i.h.bf16 %v11705_v32 }
 0x43d   :  { %v8348_v49 = vunpack.i.h.bf16 %v11708_v4 }
 0x43e   :  { %v2946_v6 = vsel %vm16381_vm1, %v8342_v54, %v8332_v52  ;;  %v2950_v55 = vsel %vm16386_vm8, %v8338_v53, %v8343_v10  ;;  %vm16405_vm1 = vcmask 1045504   ;;  %vm16410_vm8 = vcmask 1040384  }
 0x43f   :  { %v2975_v0 = vmax.f32 %v2885_v8, %v2946_v6  ;;  %v2945_v58 = vsel %vm16382_vm12, %v8348_v49, %v8342_v54  ;;  %v2948_v8 = vsel %vm16383_vm10, %v8333_v9, %v8337_v61  ;;  %v2979_v39 = vmax.f32 %v11626_v16, %v2950_v55  ;;  %vm16406_vm12 = vmmov %vm16405_vm1 }
 0x440   :  { %v2974_v31 = vmax.f32 %v2884_v41, %v2945_v58  ;;  %v2977_v37 = vmax.f32 %v11622_v28, %v2948_v8  ;;  %v2949_v28 = vsel %vm16385_vm15, %v8337_v61, %v8338_v53  ;;  %v15664_v16 = vrot.slane %v11765_v7, 1 }
 0x441   :  { %v11713_v51 = vpack.c.bf16 %v2975_v0, %v2975_v0  ;;  %v2978_v45 = vmax.f32 %v11635_v30, %v2949_v28  ;;  %v3121_v30 = vrot.slane %v11765_v7, 7  ;;  %v11794_v56 = vpack.c.bf16 %v2979_v39, %v2979_v39 }
 0x442   :  { %v11715_v34 = vpack.c.bf16 %v2974_v31, %v2974_v31  ;;  %v11763_v40 = vpack.c.bf16 %v2977_v37, %v2977_v37  ;;  %v8347_v0 = vunpack.i.l.bf16 %v11708_v4  ;;  %vm3158_vm10 = vcmask 998400  }
 0x443   :  { %3391 = vrot.lane.b32.xlu0 %v11713_v51, %s8748_s1  ;;  %v3018_v1 = vrot.slane %v11713_v51, 5  ;;  %v3172_v38 = vrot.slane %v11713_v51, 4  ;;  %v11725_v3 = vrot.slane %v11713_v51, 2  ;;  %v3120_v62 = vrot.slane %v11713_v51, 7 }
 0x444   :  { %v3068_v23 = vrot.slane %v11715_v34, 2  ;;  %v3171_v47 = vrot.slane %v11715_v34, 4  ;;  %v3224_v24 = vrot.slane %v11715_v34, 1  ;;  %v3017_v46 = vrot.slane %v11715_v34, 5 }
 0x445   :  { %v3279_v27 = vrot.slane %v11715_v34, 6  ;;  %v3119_v17 = vrot.slane %v11715_v34, 7  ;;  %v3334_v13 = vrot.slane %v11715_v34, 3  ;;  %v15663_v41 = vrot.slane %v11713_v51, 1 }
 0x446   :  { %3081 = vrot.lane.b32.xlu1 %v3068_v23, %s8735_s23  ;;  %v15659_v5 = vrot.slane %v11713_v51, 6  ;;  %v15652_v43 = vrot.slane %v11713_v51, 3  ;;  %v11786_v25 = vpack.c.bf16 %v2978_v45, %v2978_v45  ;;  %v15648_v19 = vrot.slane %v11763_v40, 5 }
 0x447   :  { %3032 = vrot.lane.b32.xlu0 %v3018_v1, %s8728_s28  ;;  %v11835_v52 = vrot.slane %v11763_v40, 2  ;;  %v3122_v49 = vrot.slane %v11763_v40, 7  ;;  %v3227_v6 = vrot.slane %v11763_v40, 1  ;;  %v11854_v58 = vrot.slane %v11763_v40, 4 }
 0x448   :  { %v15650_v63 = vrot.slane %v11786_v25, 5  ;;  %v11825_v57 = vrot.slane %v11786_v25, 2  ;;  %v15649_v32 = vrot.slane %v11786_v25, 7  ;;  %v11843_v54 = vrot.slane %v11786_v25, 4 }
 0x449   :  { %v15642_v31 = vrot.slane %v11786_v25, 6  ;;  %v2951_v23 = vsel %vm16387_vm6, %v8343_v10, %v8347_v0  ;;  %v15638_v61 = vrot.slane %v11786_v25, 3  ;;  %v15636_v9 = vrot.slane %v11794_v56, 5 }
 0x44a   :  { %3186 = vrot.lane.b32.xlu1 %v3172_v38, %s8749_s27  ;;  %v2980_v4 = vmax.f32 %v11654_v12, %v2951_v23  ;;  %v15645_v44 = vrot.slane %v11794_v56, 7  ;;  %v11920_v28 = vrot.slane %v11794_v56, 4  ;;  %v15643_v39 = vrot.slane %v11794_v56, 1 }
 0x44b   :  { %3083 = vrot.lane.b32.xlu0 %v11725_v3, %s8735_s23  ;;  %vm16409_vm15 = vcmask 506880   ;;  %vm16411_vm6 = vcmask 523264  }
 0x44e   :  { %3184 = vrot.lane.b32.xlu1 %v3171_v47, %s8749_s27  ;;  %v15655_v47 = vrot.slane %v11763_v40, 3 }
 0x44f   :  { %3134 = vrot.lane.b32.xlu0 %v3120_v62, %s8750_s24 }
 0x452   :  { %3238 = vrot.lane.b32.xlu1 %v3224_v24, %s8737_s25  ;;  %v15658_v24 = vrot.slane %v11763_v40, 6 }
 0x453   :  { %3030 = vrot.lane.b32.xlu0 %v3017_v46, %s8728_s28 }
 0x456   :  { %3293 = vrot.lane.b32.xlu1 %v3279_v27, %s8739_s14  ;;  %v11879_v27 = vpack.c.bf16 %v2980_v4, %v2980_v4 }
 0x457   :  { %3132 = vrot.lane.b32.xlu0 %v3119_v17, %s8750_s24 }
 0x458   :  { %v15632_v12 = vrot.slane %v11879_v27, 5  ;;  %v11896_v17 = vrot.slane %v11879_v27, 2  ;;  %v15631_v8 = vrot.slane %v11879_v27, 7  ;;  %v11916_v14 = vrot.slane %v11879_v27, 4 }
 0x459   :  { %v15634_v45 = vrot.slane %v11879_v27, 1  ;;  %v15633_v48 = vrot.slane %v11879_v27, 6 }
 0x45a   :  { %3348 = vrot.lane.b32.xlu1 %v3334_v13, %s8741_s18  ;;  %16388 = vst [vmem:[#allocation50_spill] sm:$0xff] %v11896_v17  ;;  %v11899_v13 = vrot.slane %v11794_v56, 2 }
 0x45b   :  { %3240 = vrot.lane.b32.xlu0 %v15663_v41, %s8737_s25 }
 0x45c   :  { %16389 = vst [vmem:[#allocation25_spill] sm:$0xff] %v11899_v13 }
 0x45e   :  { %3434 = vrot.lane.b32.xlu1 %v3018_v1, %s8751_s26  ;;  %v15644_v1 = vrot.slane %v11786_v25, 1 }
 0x45f   :  { %3295 = vrot.lane.b32.xlu0 %v15659_v5, %s8739_s14 }
 0x461   :  { %v11907_v37 = vpop.permute.xlu0 %8350 }
 0x462   :  { %3395 = vrot.lane.b32.xlu1 %v11763_v40, %s8748_s1  ;;  %v8352_v53 = vunpack.i.l.bf16 %v11907_v37  ;;  %v15651_v10 = vunpack.i.h.bf16 %v11907_v37 }
 0x463   :  { %3350 = vrot.lane.b32.xlu0 %v15652_v43, %s8741_s18 }
 0x464   :  { %v2952_v55 = vsel %vm16390_vm14, %v8347_v0, %v8352_v53  ;;  %v2953_v23 = vsel %vm16391_vm0, %v8352_v53, %v15651_v10  ;;  %vm16412_vm14 = vmmov %vm16410_vm8 }
 0x465   :  { %v2981_v4 = vmax.f32 %v11658_v20, %v2952_v55  ;;  %v2982_v0 = vmax.f32 %v11671_v29, %v2953_v23  ;;  %v15635_v20 = vrot.slane %v11879_v27, 3  ;;  %v15637_v29 = vrot.slane %v11794_v56, 3  ;;  %vm16414_vm0 = vmmov %vm16411_vm6 }
 0x466   :  { %3034 = vrot.lane.b32.xlu1 %v3019_v22, %s8728_s28 }
 0x467   :  { %3393 = vrot.lane.b32.xlu0 %v11765_v7, %s8748_s1  ;;  %v11951_v53 = vpack.c.bf16 %v2981_v4, %v2981_v4  ;;  %v11954_v55 = vpack.c.bf16 %v2982_v0, %v2982_v0 }
 0x469   :  { %16392 = vst [vmem:[#allocation53_spill] sm:$0xff] %v11954_v55  ;;  %v15657_v10 = vrot.slane %v11951_v53, 6 }
 0x46a   :  { %3085 = vrot.lane.b32.xlu1 %v11784_v59, %s8735_s23 }
 0x46b   :  { %3397 = vrot.lane.b32.xlu0 %v11786_v25, %s8748_s1 }
 0x46e   :  { %3136 = vrot.lane.b32.xlu1 %v3121_v30, %s8750_s24 }
 0x46f   :  { %3399 = vrot.lane.b32.xlu0 %v11794_v56, %s8748_s1 }
 0x472   :  { %4162 = vrot.lane.b32.xlu1 %v11802_v36, %s8752_s15 }
 0x473   :  { %3242 = vrot.lane.b32.xlu0 %v15664_v16, %s8737_s25 }
 0x476   :  { %3297 = vrot.lane.b32.xlu1 %v15660_v50, %s8739_s14  ;;  %v15665_v50 = vrot.slane %v11954_v55, 3 }
 0x477   :  { %3352 = vrot.lane.b32.xlu0 %v15653_v33, %s8741_s18 }
 0x47a   :  { %3038 = vrot.lane.b32.xlu1 %v15650_v63, %s8728_s28 }
 0x47b   :  { %3188 = vrot.lane.b32.xlu0 %v11802_v36, %s8749_s27 }
 0x47e   :  { %3089 = vrot.lane.b32.xlu1 %v11825_v57, %s8735_s23 }
 0x47f   :  { %3036 = vrot.lane.b32.xlu0 %v15648_v19, %s8728_s28 }
 0x482   :  { %3140 = vrot.lane.b32.xlu1 %v15649_v32, %s8750_s24  ;;  %v15656_v32 = vrot.slane %v11954_v55, 1 }
 0x483   :  { %3087 = vrot.lane.b32.xlu0 %v11835_v52, %s8735_s23 }
 0x486   :  { %4166 = vrot.lane.b32.xlu1 %v11843_v54, %s8752_s15 }
 0x487   :  { %3138 = vrot.lane.b32.xlu0 %v3122_v49, %s8750_s24 }
 0x48a   :  { %3244 = vrot.lane.b32.xlu1 %v3227_v6, %s8737_s25 }
 0x48b   :  { %4164 = vrot.lane.b32.xlu0 %v11854_v58, %s8752_s15 }
 0x48e   :  { %3301 = vrot.lane.b32.xlu1 %v15642_v31, %s8739_s14 }
 0x48f   :  { %3246 = vrot.lane.b32.xlu0 %v15644_v1, %s8737_s25 }
 0x492   :  { %3354 = vrot.lane.b32.xlu1 %v15655_v47, %s8741_s18  ;;  %v15661_v47 = vrot.slane %v11954_v55, 6 }
 0x493   :  { %3299 = vrot.lane.b32.xlu0 %v15658_v24, %s8739_s14 }
 0x496   :  { %3401 = vrot.lane.b32.xlu1 %v11879_v27, %s8748_s1 }
 0x497   :  { %3356 = vrot.lane.b32.xlu0 %v15638_v61, %s8741_s18 }
 0x49a   :  { %3042 = vrot.lane.b32.xlu1 %v15632_v12, %s8728_s28 }
 0x49b   :  { %3040 = vrot.lane.b32.xlu0 %v15636_v9, %s8728_s28 }
 0x49d   :  { %v11943_v12 = vpop.permute.xlu1 %8355 }
 0x49e   :  { %3093 = vrot.lane.b32.xlu1 %v11896_v17, %s8735_s23 }
 0x49f   :  { %3091 = vrot.lane.b32.xlu0 %v11899_v13, %s8735_s23 }
 0x4a1   :  { %v11963_v23 = vpop.permute.xlu1 %8360 }
 0x4a2   :  { %3144 = vrot.lane.b32.xlu1 %v15631_v8, %s8750_s24  ;;  %v15640_v8 = vrot.slane %v11794_v56, 6  ;;  %16393 = vst [vmem:[#allocation62_spill] sm:$0xff] %v11963_v23 }
 0x4a3   :  { %3142 = vrot.lane.b32.xlu0 %v15645_v44, %s8750_s24  ;;  %v12003_v44 = vrot.slane %v11954_v55, 4 }
 0x4a5   :  { %16396 = vst [vmem:[#allocation67_spill] sm:$0xff] %v12003_v44 }
 0x4a6   :  { %4170 = vrot.lane.b32.xlu1 %v11916_v14, %s8752_s15 }
 0x4a7   :  { %4168 = vrot.lane.b32.xlu0 %v11920_v28, %s8752_s15 }
 0x4aa   :  { %3250 = vrot.lane.b32.xlu1 %v15634_v45, %s8737_s25  ;;  %v15641_v45 = vrot.slane %v11954_v55, 5 }
 0x4ab   :  { %3248 = vrot.lane.b32.xlu0 %v15643_v39, %s8737_s25  ;;  %v11998_v39 = vrot.slane %v11951_v53, 4 }
 0x4ae   :  { %3305 = vrot.lane.b32.xlu1 %v15633_v48, %s8739_s14  ;;  %v15639_v48 = vrot.slane %v11951_v53, 5 }
 0x4af   :  { %3303 = vrot.lane.b32.xlu0 %v15640_v8, %s8739_s14 }
 0x4b2   :  { %3360 = vrot.lane.b32.xlu1 %v15635_v20, %s8741_s18  ;;  %v11976_v20 = vrot.slane %v11951_v53, 2 }
 0x4b3   :  { %3358 = vrot.lane.b32.xlu0 %v15637_v29, %s8741_s18  ;;  %v11979_v29 = vrot.slane %v11954_v55, 2 }
 0x4b4   :  { %16394 = vst [vmem:[#allocation32_spill] sm:$0xff] %v11976_v20 }
 0x4b5   :  { %v11966_v4 = vpop.permute.xlu0 %3391  ;;  %16395 = vst [vmem:[#allocation61_spill] sm:$0xff] %v11979_v29 }
 0x4b6   :  { %3044 = vrot.lane.b32.xlu1 %v15639_v48, %s8728_s28  ;;  %v15646_v48 = vrot.slane %v11954_v55, 7 }
 0x4b7   :  { %3046 = vrot.lane.b32.xlu0 %v15641_v45, %s8728_s28  ;;  %v15647_v45 = vrot.slane %v11951_v53, 7 }
 0x4b8   :  { %v3082_v0 = vpop.permute.xlu1 %3081 }
 0x4b9   :  { %v3033_v9 = vpop.permute.xlu0 %3032 }
 0x4ba   :  { %3095 = vrot.lane.b32.xlu1 %v11976_v20, %s8735_s23 }
 0x4bb   :  { %3097 = vrot.lane.b32.xlu0 %v11979_v29, %s8735_s23 }
 0x4bc   :  { %v11985_v61 = vpop.permute.xlu1 %3186 }
 0x4bd   :  { %v3084_v8 = vpop.permute.xlu0 %3083 }
 0x4be   :  { %3148 = vrot.lane.b32.xlu1 %v15646_v48, %s8750_s24 }
 0x4bf   :  { %3146 = vrot.lane.b32.xlu0 %v15647_v45, %s8750_s24  ;;  %v15654_v45 = vrot.slane %v11951_v53, 1 }
 0x4c0   :  { %v11995_v31 = vpop.permute.xlu1 %3184 }
 0x4c1   :  { %v12000_v1 = vpop.permute.xlu0 %3134 }
 0x4c2   :  { %4172 = vrot.lane.b32.xlu1 %v11998_v39, %s8752_s15 }
 0x4c3   :  { %4174 = vrot.lane.b32.xlu0 %v12003_v44, %s8752_s15 }
 0x4c4   :  { %v12009_v48 = vpop.permute.xlu1 %3238 }
 0x4c5   :  { %v3031_v19 = vpop.permute.xlu0 %3030 }
 0x4c6   :  { %3252 = vrot.lane.b32.xlu1 %v15654_v45, %s8737_s25 }
 0x4c7   :  { %3254 = vrot.lane.b32.xlu0 %v15656_v32, %s8737_s25 }
 0x4c8   :  { %v12019_v63 = vpop.permute.xlu1 %3293 }
 0x4c9   :  { %v3133_v43 = vpop.permute.xlu0 %3132 }
 0x4ca   :  { %3307 = vrot.lane.b32.xlu1 %v15657_v10, %s8739_s14  ;;  %v15662_v10 = vrot.slane %v11951_v53, 3 }
 0x4cb   :  { %3436 = vrot.lane.b32.xlu0 %v3019_v22, %s8751_s26 }
 0x4cc   :  { %v12028_v33 = vpop.permute.xlu1 %3348 }
 0x4cd   :  { %v3241_v45 = vpop.permute.xlu0 %3240 }
 0x4ce   :  { %3389 = vrot.lane.b32.xlu1 %v11715_v34, %s8748_s1  ;;  %v3266_v35 = vsel %vm16411_vm6, %v12009_v48, %v3241_v45 }
 0x4cf   :  { %3309 = vrot.lane.b32.xlu0 %v15661_v47, %s8739_s14  ;;  %v12057_v47 = vmax.f32 %v2808_v11, %v11681_v18 }
 0x4d0   :  { %v12036_v32 = vpop.permute.xlu1 %3434 }
 0x4d1   :  { %v3296_v24 = vpop.permute.xlu0 %3295  ;;  %16397 = vst [vmem:[#allocation35_spill] sm:$0xff] %v12057_v47 }
 0x4d2   :  { %3362 = vrot.lane.b32.xlu1 %v15662_v10, %s8741_s18 }
 0x4d3   :  { %3432 = vrot.lane.b32.xlu0 %v3017_v46, %s8751_s26  ;;  %v3056_v46 = vsel %vm16398_vm7, %v3031_v19, %v3033_v9  ;;  %vm16415_vm7 = vcmask 1043456  }
 0x4d4   :  { %v12045_v22 = vpop.permute.xlu1 %3395 }
 0x4d5   :  { %v3351_v5 = vpop.permute.xlu0 %3350 }
 0x4d6   :  { %3478 = vrot.lane.b32.xlu1 %v3121_v30, %s8728_s28  ;;  %v3674_v30 = vsel %vm16400_vm2, %v11715_v34, %v3056_v46  ;;  %vm16417_vm2 = vcmask 1041408  }
 0x4d7   :  { %3364 = vrot.lane.b32.xlu0 %v15665_v50, %s8741_s18 }
 0x4d8   :  { %v3035_v10 = vpop.permute.xlu1 %3034 }
 0x4d9   :  { %v12060_v41 = vpop.permute.xlu0 %3393  ;;  %v3057_v16 = vsel %vm16399_vm9, %v3033_v9, %v3035_v10  ;;  %v3107_v9 = vsel %vm16404_vm13, %v3082_v0, %v3084_v8  ;;  %vm16416_vm9 = vcmask 490496   ;;  %vm16420_vm13 = vmmov %vm16409_vm15 }
 0x4da   :  { %2942 = vrot.lane.b32.xlu1 %v12057_v47, %s8731_s13  ;;  %v3677_v19 = vsel %vm16403_vm3, %v11713_v51, %v3057_v16  ;;  %v3712_v34 = vsel %vm16406_vm12, %v3674_v30, %v3107_v9  ;;  %vm16419_vm3 = vmmov %vm16415_vm7 }
 0x4db   :  { %3480 = vrot.lane.b32.xlu0 %v3122_v49, %s8728_s28  ;;  %vm16422_vm12 = vmmov %vm16416_vm9 }
 0x4dc   :  { %v3086_v60 = vpop.permute.xlu1 %3085 }
 0x4dd   :  { %v3108_v11 = vsel %vm16401_vm11, %v3084_v8, %v3086_v60  ;;  %v12071_v18 = vpop.permute.xlu0 %3397  ;;  %vm16418_vm11 = vcmask 1046528  }
 0x4de   :  { %16402 = vst [vmem:[#allocation66_spill] sm:$0xff] %v12071_v18  ;;  %3517 = vrot.lane.b32.xlu1 %v11802_v36, %s8735_s23  ;;  %v12079_v50 = vsel %vm16405_vm1, %v3677_v19, %v3108_v11  ;;  %vm16421_vm1 = vmmov %vm16418_vm11 }
 0x4df   :  { %4603 = vmatprep.subr.bf16.mxu0 %v12079_v50  ;;  %3476 = vrot.lane.b32.xlu0 %v3120_v62, %s8728_s28  ;;  %v16407_v62 = vrot.slane %v11765_v7, 1 }
 0x4e0   :  { %v12086_v49 = vpop.permute.xlu1 %3136  ;;  %4604 = vmatpush1.bf16.msra.mxu0 %v3712_v34 }
 0x4e1   :  { %v12088_v16 = vpop.permute.xlu0 %3399  ;;  %v3160_v30 = vsel %vm3158_vm10, %v12000_v1, %v12086_v49 }
 0x4e2   :  { %3515 = vrot.lane.b32.xlu1 %v3172_v38, %s8735_s23  ;;  %v3159_v38 = vsel %vm3158_vm10, %v3133_v43, %v12000_v1  ;;  %v12129_v20 = vsel %vm16412_vm14, %v3108_v11, %v3160_v30  ;;  %vm16428_vm14 = vmmov %vm16417_vm2 }
 0x4e3   :  { %3519 = vrot.lane.b32.xlu0 %v11854_v58, %s8735_s23 }
 0x4e4   :  { %v12095_v36 = vpop.permute.xlu1 %4162 }
 0x4e5   :  { %v12097_v8 = vpop.permute.xlu0 %3242 }
 0x4e6   :  { %3557 = vrot.lane.b32.xlu1 %v3227_v6, %s8750_s24  ;;  %v16408_v6 = vrot.slane %v11713_v51, 1  ;;  %v3267_v29 = vsel %vm16414_vm0, %v3241_v45, %v12097_v8 }
 0x4e7   :  { %3555 = vrot.lane.b32.xlu0 %v16407_v62, %s8750_s24  ;;  %v3751_v62 = vsel %vm16410_vm8, %v3107_v9, %v3159_v38  ;;  %v3211_v9 = vsel %vm3210_vm4, %v11995_v31, %v11985_v61  ;;  %v3321_v31 = vsel %vm16420_vm13, %v12019_v63, %v3296_v24  ;;  %vm16425_vm8 = vcmask 1044480  }
 0x4e8   :  { %v12105_v0 = vpop.permute.xlu1 %3297  ;;  %v3777_v45 = vsel %vm16419_vm3, %v3751_v62, %v3211_v9  ;;  %v16427_v63 = vrot.slane %v11763_v40, 6  ;;  %vm16429_vm0 = vmmov %vm16425_vm8  ;;  %vm16436_vm3 = vcmask 1045504  }
 0x4e9   :  { %v12107_v46 = vpop.permute.xlu0 %3352  ;;  %v3322_v19 = vsel %vm16409_vm15, %v3296_v24, %v12105_v0  ;;  %v3803_v13 = vsel %vm16421_vm1, %v3777_v45, %v3266_v35  ;;  %vm16423_vm15 = vcmask 1031168   ;;  %vm16437_vm13 = vmmov %vm16436_vm3  ;;  %v8357_v45 = vunpack.i.l.bf16 %v11943_v12 }
 0x4ea   :  { %3403 = vrot.lane.b32.xlu1 %v11951_v53, %s8748_s1  ;;  %v3377_v11 = vsel %vm16416_vm9, %v3351_v5, %v12107_v46  ;;  %v3844_v38 = vsel %vm16417_vm2, %v3267_v29, %v3322_v19  ;;  %v16424_v19 = vrot.slane %v11713_v51, 6  ;;  %vm16426_vm6 = vmmov %vm16423_vm15  ;;  %vm16431_vm9 = vcmask 1014784  }
 0x4eb   :  { %3553 = vrot.lane.b32.xlu0 %v16408_v6, %s8750_s24  ;;  %v16413_v6 = vrot.slane %v11765_v7, 6  ;;  %vm16432_vm2 = vmmov %vm16431_vm9  ;;  %vm16440_vm1 = vcmask 785408  }
 0x4ec   :  { %v12121_v34 = vpop.permute.xlu1 %3038 }
 0x4ed   :  { %v12124_v43 = vpop.permute.xlu0 %3188 }
 0x4ee   :  { %v3212_v1 = vsel %vm3210_vm4, %v11985_v61, %v12124_v43  ;;  %3593 = vrot.lane.b32.xlu1 %v16413_v6, %s8749_s27 }
 0x4ef   :  { %3405 = vrot.lane.b32.xlu0 %v11954_v55, %s8748_s1  ;;  %v3779_v48 = vsel %vm16415_vm7, %v12129_v20, %v3212_v1  ;;  %v3376_v1 = vsel %vm16422_vm12, %v12028_v33, %v3351_v5  ;;  %v3842_v5 = vsel %vm16428_vm14, %v3266_v35, %v3321_v31  ;;  %vm16430_vm7 = vcmask 1042432   ;;  %vm16442_vm12 = vmmov %vm16440_vm1 }
 0x4f0   :  { %v12149_v30 = vpop.permute.xlu1 %3089  ;;  %v3806_v6 = vsel %vm16418_vm11, %v3779_v48, %v3267_v29  ;;  %v3871_v29 = vsel %vm16425_vm8, %v3844_v38, %v3377_v11  ;;  %v3868_v9 = vsel %vm16429_vm0, %v3842_v5, %v3376_v1  ;;  %v16433_v11 = vrot.slane %v11763_v40, 3  ;;  %vm16434_vm11 = vmmov %vm16430_vm7 }
 0x4f1   :  { %4605 = vmatprep.subr.bf16.mxu0 %v3806_v6  ;;  %v3037_v61 = vpop.permute.xlu0 %3036  ;;  %v16435_v38 = vrot.slane %v11765_v7, 3  ;;  %v16439_v1 = vunpack.i.h.bf16 %v11907_v37  ;;  %vm16450_vm8 = vmmov %vm16428_vm14  ;;  %vm16452_vm14 = vcmask 1043456  }
 0x4f2   :  { %v3059_v17 = vsel %vm16423_vm15, %v3037_v61, %v12121_v34  ;;  %3591 = vrot.lane.b32.xlu1 %v16424_v19, %s8749_s27  ;;  %4606 = vmatpush1.bf16.msra.mxu0 %v3803_v13  ;;  %v3058_v62 = vsel %vm16426_vm6, %v3035_v10, %v3037_v61  ;;  %vm3417_vm15 = vcmask 474112   ;;  %vm16451_vm6 = vmmov %vm16429_vm0  ;;  %vm16453_vm0 = vcmask 506880  }
 0x4f3   :  { %3595 = vrot.lane.b32.xlu0 %v16427_v63, %s8749_s27  ;;  %4607 = vmatprep.subr.bf16.mxu0 %v3871_v29  ;;  %v3683_v48 = vsel %vm16430_vm7, %v11763_v40, %v3059_v17  ;;  %v3680_v35 = vsel %vm16434_vm11, %v11765_v7, %v3058_v62  ;;  %v16438_v7 = vrot.slane %v11713_v51, 3  ;;  %v2954_v19 = vsel %vm16440_vm1, %v16439_v1, %v8357_v45 }
 0x4f4   :  { %v12168_v24 = vpop.permute.xlu1 %3140  ;;  %v15677_v62 = vunpack.i.h.bf16 %v11943_v12  ;;  %v16441_v63 = vrot.slane %v11786_v25, 5  ;;  %v2983_v51 = vmax.f32 %v11675_v42, %v2954_v19  ;;  %vm16454_vm7 = vcmask 523264  }
 0x4f5   :  { %v3088_v33 = vpop.permute.xlu0 %3087  ;;  %vm16456_vm11 = vcmask 1046528   ;;  %vm16459_vm1 = vmmov %vm16454_vm7 }
 0x4f6   :  { %v12175_v13 = vsel %vm16431_vm9, %v3086_v60, %v3088_v33  ;;  %v12179_v10 = vsel %vm16432_vm2, %v3088_v33, %v12149_v30  ;;  %3635 = vrot.lane.b32.xlu1 %v16433_v11, %s8737_s25  ;;  %4608 = vmatpush1.bf16.msra.mxu0 %v3868_v9  ;;  %v2955_v37 = vsel %vm16442_vm12, %v8357_v45, %v15677_v62  ;;  %v16443_v9 = vrot.slane %v11786_v25, 7  ;;  %vm16455_vm2 = vmmov %vm16453_vm0 }
 0x4f7   :  { %3633 = vrot.lane.b32.xlu0 %v16435_v38, %s8737_s25  ;;  %v3721_v17 = vsel %vm16436_vm3, %v3683_v48, %v12179_v10  ;;  %v12193_v60 = vsel %vm16437_vm13, %v3680_v35, %v12175_v13  ;;  %v16444_v48 = vrot.slane %v11763_v40, 5  ;;  %v12233_v11 = vpack.c.bf16 %v2983_v51, %v2983_v51  ;;  %vm16457_vm3 = vmmov %vm16450_vm8 }
 0x4f8   :  { %v12195_v6 = vpop.permute.xlu1 %4166  ;;  %4646 = vmatprep.subr.bf16.mxu1 %v3721_v17  ;;  %v2984_v42 = vmax.f32 %v11689_v21, %v2955_v37  ;;  %v16445_v38 = vrot.slane %v11794_v56, 7  ;;  %vm4188_vm9 = vcmask 539648   ;;  %vm16458_vm13 = vcmask 490496  }
 0x4f9   :  { %4647 = vmatpush1.bf16.msra.mxu1 %v12193_v60  ;;  %v12199_v31 = vpop.permute.xlu0 %3138  ;;  %v12267_v37 = vrot.slane %v12233_v11, 2  ;;  %vm16460_vm12 = vmmov %vm16458_vm13 }
 0x4fa   :  { %3192 = vrot.lane.b32.xlu1 %v11843_v54, %s8749_s27  ;;  %v12244_v1 = vpack.c.bf16 %v2984_v42, %v2984_v42 }
 0x4fb   :  { %3631 = vrot.lane.b32.xlu0 %v16438_v7, %s8737_s25  ;;  %v15676_v7 = vrot.slane %v12233_v11, 5  ;;  %16448 = vst [vmem:[#allocation57_spill] sm:$0xff] %v12267_v37 }
 0x4fc   :  { %v12206_v61 = vpop.permute.xlu1 %3244  ;;  %v15675_v19 = vrot.slane %v12244_v1, 5 }
 0x4fd   :  { %v12211_v29 = vpop.permute.xlu0 %4164  ;;  %v12323_v47 = vsel %vm16454_vm7, %v12097_v8, %v12206_v61 }
 0x4fe   :  { %3440 = vrot.lane.b32.xlu1 %v16441_v63, %s8751_s26  ;;  %v16447_v63 = vrot.slane %v11786_v25, 1 }
 0x4ff   :  { %3190 = vrot.lane.b32.xlu0 %v11854_v58, %s8749_s27 }
 0x500   :  { %v12220_v5 = vpop.permute.xlu1 %3301 }
 0x501   :  { %v12222_v33 = vpop.permute.xlu0 %3246 }
 0x502   :  { %3482 = vrot.lane.b32.xlu1 %v16443_v9, %s8728_s28 }
 0x503   :  { %3438 = vrot.lane.b32.xlu0 %v16444_v48, %s8751_s26  ;;  %v16449_v48 = vrot.slane %v11794_v56, 1 }
 0x504   :  { %v3355_v58 = vpop.permute.xlu1 %3354 }
 0x505   :  { %v3300_v35 = vpop.permute.xlu0 %3299 }
 0x506   :  { %3521 = vrot.lane.b32.xlu1 %v11843_v54, %s8735_s23 }
 0x507   :  { %3484 = vrot.lane.b32.xlu0 %v16445_v38, %s8728_s28 }
 0x508   :  { %v12241_v45 = vpop.permute.xlu1 %3401 }
 0x509   :  { %16446 = vst [vmem:[#allocation58_spill] sm:$0xff] %v12241_v45  ;;  %v12246_v40 = vpop.permute.xlu0 %3356 }
 0x50a   :  { %3048 = vrot.lane.b32.xlu1 %v15676_v7, %s8728_s28  ;;  %v3379_v45 = vsel %vm16458_vm13, %v3355_v58, %v12246_v40 }
 0x50b   :  { %3523 = vrot.lane.b32.xlu0 %v11920_v28, %s8735_s23 }
 0x50c   :  { %v12253_v21 = vpop.permute.xlu1 %3042 }
 0x50d   :  { %v12255_v54 = vpop.permute.xlu0 %3040 }
 0x50e   :  { %3559 = vrot.lane.b32.xlu1 %v16447_v63, %s8750_s24  ;;  %v12283_v63 = vsel %vm3417_vm15, %v12060_v41, %v12045_v22 }
 0x50f   :  { %3050 = vrot.lane.b32.xlu0 %v15675_v19, %s8728_s28  ;;  %v4281_v19 = vsel %vm16450_vm8, %v12097_v8, %v12105_v0  ;;  %vm16461_vm8 = vmmov %vm16451_vm6 }
 0x510   :  { %v12264_v51 = vpop.permute.xlu1 %3093  ;;  %v4287_v62 = vsel %vm16451_vm6, %v4281_v19, %v12107_v46  ;;  %v4236_v19 = vsel %vm16452_vm14, %v12129_v20, %v12095_v36  ;;  %vm16462_vm6 = vmmov %vm16457_vm3  ;;  %vm16463_vm14 = vcmask 1040384  }
 0x511   :  { %v12269_v9 = vpop.permute.xlu0 %3091  ;;  %v4264_v20 = vsel %vm16456_vm11, %v4236_v19, %v12097_v8  ;;  %v4189_v8 = vsel %vm4188_vm9, %v12095_v36, %v12211_v29  ;;  %vm16465_vm7 = vmmov %vm16463_vm14 }
 0x512   :  { %3099 = vrot.lane.b32.xlu1 %v12267_v37, %s8735_s23  ;;  %v12302_v37 = vsel %vm3417_vm15, %v12045_v22, %v12071_v18 }
 0x513   :  { %3561 = vrot.lane.b32.xlu0 %v16449_v48, %s8750_s24 }
 0x514   :  { %v12276_v42 = vpop.permute.xlu1 %3144 }
 0x515   :  { %v12278_v38 = vpop.permute.xlu0 %3142 }
 0x516   :  { %4420 = vrot.lane.b32.xlu1 %v12283_v63, %s8739_s14 }
 0x517   :  { %4418 = vrot.lane.b32.xlu0 %v12060_v41, %s8739_s14 }
 0x518   :  { %v12292_v48 = vpop.permute.xlu1 %4170 }
 0x519   :  { %v12294_v7 = vpop.permute.xlu0 %4168 }
 0x51a   :  { %4390 = vrot.lane.b32.xlu1 %v4287_v62, %s8739_s14  ;;  %v3323_v62 = vsel %vm16453_vm0, %v12105_v0, %v3300_v35  ;;  %vm16464_vm0 = vmmov %vm16461_vm8 }
 0x51b   :  { %4422 = vrot.lane.b32.xlu0 %v12302_v37, %s8739_s14  ;;  %v3846_v0 = vsel %vm16457_vm3, %v12323_v47, %v3323_v62  ;;  %v4190_v62 = vsel %vm4188_vm9, %v12211_v29, %v12195_v6  ;;  %vm16469_vm3 = vcmask 1046528  }
 0x51c   :  { %v12306_v55 = vpop.permute.xlu1 %3250  ;;  %vm16470_vm13 = vmmov %vm16469_vm3 }
 0x51d   :  { %v12308_v44 = vpop.permute.xlu0 %3248 }
 0x51e   :  { %4334 = vrot.lane.b32.xlu1 %v12079_v50, %s8739_s14  ;;  %v3324_v50 = vsel %vm16455_vm2, %v3300_v35, %v12220_v5  ;;  %v3162_v35 = vsel %vm3158_vm10, %v12199_v31, %v12168_v24  ;;  %vm16466_vm2 = vcmask 1043456  }
 0x51f   :  { %4338 = vrot.lane.b32.xlu0 %v3721_v17, %s8739_s14  ;;  %v3161_v17 = vsel %vm3158_vm10, %v12086_v49, %v12199_v31  ;;  %v3378_v49 = vsel %vm16460_vm12, %v12107_v46, %v3355_v58  ;;  %v12377_v29 = vsel %vm16465_vm7, %v12179_v10, %v3162_v35  ;;  %vm16467_vm11 = vmmov %vm16466_vm2  ;;  %v12399_v35 = vld [vmem:[%s15396_s3 + $0x4] ss:$8 sps:$4 sm:$0xff]   ;;  %vm16474_vm12 = vcmask 785408  }
 0x520   :  { %v12318_v22 = vpop.permute.xlu1 %3305  ;;  %v12362_v31 = vsel %vm16461_vm8, %v3846_v0, %v3378_v49  ;;  %v8362_v0 = vunpack.i.l.bf16 %v11963_v23  ;;  %16471 = vst [vmem:[#allocation59_spill] sm:$0xff] %v12399_v35  ;;  %v15689_v49 = vrot.slane %v12233_v11, 7  ;;  %vm16479_vm8 = vmmov %vm16474_vm12 }
 0x521   :  { %v12325_v15 = vpop.permute.xlu0 %3303 }
 0x522   :  { %4336 = vrot.lane.b32.xlu1 %v12193_v60, %s8739_s14  ;;  %v12350_v60 = vsel %vm16459_vm1, %v12206_v61, %v12222_v33  ;;  %v12368_v61 = vsel %vm16463_vm14, %v12175_v13, %v3161_v17  ;;  %v4240_v13 = vsel %vm16467_vm11, %v12377_v29, %v4190_v62  ;;  %vm4560_vm1 = vcmask 179200  }
 0x523   :  { %4362 = vrot.lane.b32.xlu0 %v4264_v20, %s8739_s14  ;;  %v3848_v36 = vsel %vm16462_vm6, %v12350_v60, %v3324_v50  ;;  %v4238_v58 = vsel %vm16466_vm2, %v12368_v61, %v4189_v8  ;;  %v16473_v62 = vunpack.i.h.bf16 %v11943_v12  ;;  %7547 = vmatprep.mubr.msk.bf16.mxu0 %vm4560_vm1, %v12399_v35  ;;  %vm3460_vm6 = vcmask 457728  }
 0x524   :  { %v12354_v19 = vpop.permute.xlu1 %3360  ;;  %v12373_v46 = vsel %vm16464_vm0, %v3848_v36, %v3379_v45  ;;  %v4266_v45 = vsel %vm16469_vm3, %v4240_v13, %v12350_v60  ;;  %v4265_v10 = vsel %vm16470_vm13, %v4238_v58, %v12323_v47  ;;  %v12410_v58 = vrot.slane %v12244_v1, 2  ;;  %7549 = vmatprep.mubr.msk.bf16.mxu1 %vm4560_vm1, %v12399_v35 }
 0x525   :  { %v12359_v20 = vpop.permute.xlu0 %3358  ;;  %v2956_v36 = vsel %vm16474_vm12, %v16473_v62, %v8362_v0  ;;  %vm16489_vm14 = vcmask 1042432   ;;  %vm16490_vm0 = vcmask 1045504   ;;  %vm16503_vm11 = vcmask 1031168  }
 0x526   :  { %4392 = vrot.lane.b32.xlu1 %v12362_v31, %s8739_s14  ;;  %16476 = vst [vmem:[#allocation72_spill] sm:$0xff] %v12410_v58  ;;  %v2985_v12 = vmax.f32 %v11693_v2, %v2956_v36  ;;  %vm16497_vm7 = vmmov %vm16489_vm14  ;;  %vm16504_vm3 = vcmask 1014784   ;;  %vm16505_vm13 = vcmask 1040384  }
 0x527   :  { %4394 = vrot.lane.b32.xlu0 %v12373_v46, %s8739_s14  ;;  %vm16498_vm2 = vmmov %vm16490_vm0 }
 0x528   :  { %v12383_v50 = vpop.permute.xlu1 %3044  ;;  %vm16507_vm12 = vmmov %vm16503_vm11 }
 0x529   :  { %v12388_v17 = vpop.permute.xlu0 %3046 }
 0x52a   :  { %16468 = vst [vmem:[#allocation60_spill] sm:$0xff] %v12388_v17  ;;  %4366 = vrot.lane.b32.xlu1 %v4266_v45, %s8739_s14  ;;  %v15694_v45 = vunpack.i.h.bf16 %v11963_v23  ;;  %v16482_v23 = vrot.slane %v11786_v25, 6 }
 0x52b   :  { %4364 = vrot.lane.b32.xlu0 %v4265_v10, %s8739_s14 }
 0x52c   :  { %v12401_v8 = vpop.permute.xlu1 %3095  ;;  %v2957_v35 = vsel %vm16479_vm8, %v8362_v0, %v15694_v45  ;;  %vm16508_vm8 = vcmask 1043456  }
 0x52d   :  { %16472 = vst [vmem:[#allocation64_spill] sm:$0xff] %v12401_v8  ;;  %v12407_v13 = vpop.permute.xlu0 %3097  ;;  %v2986_v36 = vmax.f32 %v11697_v26, %v2957_v35  ;;  %v16486_v26 = vrot.slane %v11794_v56, 6 }
 0x52e   :  { %16475 = vst [vmem:[#allocation63_spill] sm:$0xff] %v12407_v13  ;;  %3150 = vrot.lane.b32.xlu1 %v15689_v49, %s8750_s24  ;;  %v15693_v13 = vrot.slane %v12244_v1, 7  ;;  %v12436_v49 = vpack.c.bf16 %v2985_v12, %v2985_v12 }
 0x52f   :  { %3101 = vrot.lane.b32.xlu0 %v12410_v58, %s8735_s23 }
 0x530   :  { %v12423_v10 = vpop.permute.xlu1 %3148  ;;  %v15696_v0 = vrot.slane %v12436_v49, 5 }
 0x531   :  { %16477 = vst [vmem:[#allocation71_spill] sm:$0xff] %v12423_v10  ;;  %v12425_v62 = vpop.permute.xlu0 %3146 }
 0x532   :  { %16478 = vst [vmem:[#allocation17_spill] sm:$0xff] %v12425_v62  ;;  %3194 = vrot.lane.b32.xlu1 %v11920_v28, %s8749_s27 }
 0x533   :  { %3152 = vrot.lane.b32.xlu0 %v15693_v13, %s8750_s24  ;;  %v12451_v13 = vpack.c.bf16 %v2986_v36, %v2986_v36  ;;  %v3419_v36 = vsel %vm3417_vm15, %v11966_v4, %v12060_v41  ;;  %v12482_v41 = vrot.slane %v12233_v11, 4 }
 0x534   :  { %v12438_v2 = vpop.permute.xlu1 %4172 }
 0x535   :  { %16480 = vst [vmem:[#allocation12_spill] sm:$0xff] %v12438_v2  ;;  %v12441_v58 = vpop.permute.xlu0 %4174  ;;  %16484 = vst [vmem:[#allocation22_spill] sm:$0xff] %v12451_v13  ;;  %v15700_v45 = vrot.slane %v12451_v13, 5  ;;  %v12562_v62 = vrot.slane %v12451_v13, 4 }
 0x536   :  { %16481 = vst [vmem:[#allocation15_spill] sm:$0xff] %v12441_v58  ;;  %3597 = vrot.lane.b32.xlu1 %v16482_v23, %s8749_s27  ;;  %16491 = vst [vmem:[#allocation92_spill] sm:$0xff] %v12482_v41 }
 0x537   :  { %3196 = vrot.lane.b32.xlu0 %v11916_v14, %s8749_s27  ;;  %16506 = vst [vmem:[#allocation80_spill] sm:$0xff] %v12562_v62 }
 0x538   :  { %v12448_v28 = vpop.permute.xlu1 %3252 }
 0x539   :  { %16483 = vst [vmem:[#allocation16_spill] sm:$0xff] %v12448_v28  ;;  %v12453_v12 = vpop.permute.xlu0 %3254  ;;  %v15707_v28 = vrot.slane %v12233_v11, 1 }
 0x53a   :  { %16485 = vst [vmem:[#allocation18_spill] sm:$0xff] %v12453_v12  ;;  %3052 = vrot.lane.b32.xlu1 %v15696_v0, %s8728_s28  ;;  %v16488_v0 = vrot.slane %v11786_v25, 3 }
 0x53b   :  { %3599 = vrot.lane.b32.xlu0 %v16486_v26, %s8749_s27 }
 0x53c   :  { %v12461_v23 = vpop.permute.xlu1 %3307 }
 0x53d   :  { %16487 = vst [vmem:[#allocation93_spill] sm:$0xff] %v12461_v23  ;;  %v12463_v35 = vpop.permute.xlu0 %3436 }
 0x53e   :  { %v3462_v12 = vsel %vm3460_vm6, %v12036_v32, %v12463_v35  ;;  %3637 = vrot.lane.b32.xlu1 %v16488_v0, %s8737_s25  ;;  %v16493_v0 = vrot.slane %v11794_v56, 3 }
 0x53f   :  { %3054 = vrot.lane.b32.xlu0 %v15700_v45, %s8728_s28  ;;  %v3911_v26 = vsel %vm16489_vm14, %v3419_v36, %v3462_v12  ;;  %v12494_v12 = vrot.slane %v12436_v49, 2  ;;  %vm16509_vm14 = vmmov %vm16504_vm3 }
 0x540   :  { %v3390_v58 = vpop.permute.xlu1 %3389  ;;  %v3949_v23 = vsel %vm16490_vm0, %v3911_v26, %v11784_v59  ;;  %v12497_v26 = vrot.slane %v12244_v1, 4  ;;  %vm16510_vm0 = vcmask 1046528  }
 0x541   :  { %4609 = vmatprep.subr.bf16.mxu0 %v3949_v23  ;;  %v12484_v10 = vpop.permute.xlu0 %3309  ;;  %16495 = vst [vmem:[#allocation76_spill] sm:$0xff] %v12494_v12  ;;  %v3418_v23 = vsel %vm3417_vm15, %v3390_v58, %v11966_v4  ;;  %v12514_v4 = vrot.slane %v12451_v13, 2  ;;  %v15710_v58 = vrot.slane %v12436_v49, 7 }
 0x542   :  { %16492 = vst [vmem:[#allocation94_spill] sm:$0xff] %v12484_v10  ;;  %4176 = vrot.lane.b32.xlu1 %v12482_v41, %s8752_s15  ;;  %16496 = vst [vmem:[#allocation38_spill] sm:$0xff] %v12497_v26 }
 0x543   :  { %3639 = vrot.lane.b32.xlu0 %v16493_v0, %s8737_s25  ;;  %16500 = vst [vmem:[#allocation30_spill] sm:$0xff] %v12514_v4 }
 0x544   :  { %v12491_v45 = vpop.permute.xlu1 %3362 }
 0x545   :  { %16494 = vst [vmem:[#allocation31_spill] sm:$0xff] %v12491_v45  ;;  %v3433_v36 = vpop.permute.xlu0 %3432 }
 0x546   :  { %v3461_v10 = vsel %vm3460_vm6, %v3433_v36, %v12036_v32  ;;  %3103 = vrot.lane.b32.xlu1 %v12494_v12, %s8735_s23 }
 0x547   :  { %v3908_v0 = vsel %vm16497_vm7, %v3418_v23, %v3461_v10  ;;  %4178 = vrot.lane.b32.xlu0 %v12497_v26, %s8752_s15  ;;  %v15716_v23 = vrot.slane %v12233_v11, 6  ;;  %vm16511_vm7 = vmmov %vm16503_vm11 }
 0x548   :  { %v3479_v41 = vpop.permute.xlu1 %3478  ;;  %v3946_v45 = vsel %vm16498_vm2, %v3908_v0, %v11725_v3  ;;  %vm16512_vm2 = vmmov %vm16505_vm13 }
 0x549   :  { %4610 = vmatpush1.bf16.msra.mxu0 %v3946_v45  ;;  %v12511_v2 = vpop.permute.xlu0 %3364  ;;  %v15713_v45 = vrot.slane %v12244_v1, 1 }
 0x54a   :  { %16499 = vst [vmem:[#allocation78_spill] sm:$0xff] %v12511_v2  ;;  %3256 = vrot.lane.b32.xlu1 %v15707_v28, %s8737_s25  ;;  %v15717_v28 = vrot.slane %v12451_v13, 7  ;;  %v15727_v2 = vrot.slane %v12436_v49, 1 }
 0x54b   :  { %3105 = vrot.lane.b32.xlu0 %v12514_v4, %s8735_s23 }
 0x54c   :  { %v12521_v32 = vpop.permute.xlu1 %2942 }
 0x54d   :  { %16501 = vst [vmem:[#allocation34_spill] sm:$0xff] %v12521_v32  ;;  %v12524_v10 = vpop.permute.xlu0 %3480 }
 0x54e   :  { %3154 = vrot.lane.b32.xlu1 %v15710_v58, %s8750_s24  ;;  %v12542_v58 = vrot.slane %v12436_v49, 4  ;;  %v3503_v26 = vsel %vm16503_vm11, %v3479_v41, %v12524_v10  ;;  %vm16513_vm11 = vmmov %vm16504_vm3 }
 0x54f   :  { %3258 = vrot.lane.b32.xlu0 %v15713_v45, %s8737_s25  ;;  %v15725_v45 = vrot.slane %v12244_v1, 6  ;;  %v3987_v32 = vsel %vm16505_vm13, %v11784_v59, %v3503_v26  ;;  %vm16515_vm13 = vmmov %vm16510_vm0 }
 0x550   :  { %v3518_v36 = vpop.permute.xlu1 %3517  ;;  %16502 = vst [vmem:[#allocation83_spill] sm:$0xff] %v12542_v58 }
 0x551   :  { %v3477_v0 = vpop.permute.xlu0 %3476 }
 0x552   :  { %3311 = vrot.lane.b32.xlu1 %v15716_v23, %s8739_s14 }
 0x553   :  { %3156 = vrot.lane.b32.xlu0 %v15717_v28, %s8750_s24 }
 0x554   :  { %v3516_v12 = vpop.permute.xlu1 %3515 }
 0x555   :  { %v12544_v4 = vpop.permute.xlu0 %3519  ;;  %v3541_v18 = vsel %vm16509_vm14, %v3516_v12, %v3518_v36  ;;  %v15728_v12 = vrot.slane %v12451_v13, 1  ;;  %vm16519_vm14 = vmmov %vm16511_vm7 }
 0x556   :  { %4180 = vrot.lane.b32.xlu1 %v12542_v58, %s8752_s15  ;;  %v3542_v23 = vsel %vm16504_vm3, %v3518_v36, %v12544_v4  ;;  %v3502_v58 = vsel %vm16507_vm12, %v3477_v0, %v3479_v41  ;;  %v15730_v41 = vrot.slane %v12233_v11, 3  ;;  %v3060_v0 = vsel %vm16511_vm7, %v12121_v34, %v12255_v54  ;;  %vm16514_vm3 = vmmov %vm16508_vm8 }
 0x557   :  { %3313 = vrot.lane.b32.xlu0 %v15725_v45, %s8739_s14  ;;  %v4013_v45 = vsel %vm16508_vm8, %v3987_v32, %v3542_v23  ;;  %v3111_v36 = vsel %vm16513_vm11, %v12149_v30, %v12269_v9  ;;  %vm16516_vm12 = vcmask 1042432   ;;  %vm16518_vm8 = vcmask 1045504  }
 0x558   :  { %v12556_v28 = vpop.permute.xlu1 %3557  ;;  %vm16521_vm7 = vmmov %vm16516_vm12 }
 0x559   :  { %v3556_v17 = vpop.permute.xlu0 %3555 }
 0x55a   :  { %v3580_v8 = vsel %vm3158_vm10, %v3556_v17, %v12556_v28  ;;  %3260 = vrot.lane.b32.xlu1 %v15727_v2, %s8737_s25  ;;  %v3985_v2 = vsel %vm16512_vm2, %v11725_v3, %v3502_v58  ;;  %v3686_v58 = vsel %vm16516_vm12, %v11786_v25, %v3060_v0  ;;  %vm16523_vm2 = vmmov %vm16518_vm8 }
 0x55b   :  { %4182 = vrot.lane.b32.xlu0 %v12562_v62, %s8752_s15  ;;  %v4040_v59 = vsel %vm16510_vm0, %v4013_v45, %v3580_v8  ;;  %v4011_v45 = vsel %vm16514_vm3, %v3985_v2, %v3541_v18  ;;  %v12601_v18 = vsel %vm16518_vm8, %v3686_v58, %v3111_v36  ;;  %v3061_v2 = vsel %vm16519_vm14, %v12255_v54, %v12253_v21  ;;  %vm16520_vm0 = vmmov %vm16513_vm11 }
 0x55c   :  { %v12575_v26 = vpop.permute.xlu1 %3403  ;;  %4611 = vmatprep.subr.bf16.mxu0 %v4040_v59  ;;  %v3112_v59 = vsel %vm16520_vm0, %v12269_v9, %v12264_v51  ;;  %v16522_v54 = vrot.slane %v11794_v56, 5  ;;  %v15737_v58 = vrot.slane %v12436_v49, 6  ;;  %vm16525_vm11 = vcmask 523264  }
 0x55d   :  { %v3554_v32 = vpop.permute.xlu0 %3553  ;;  %vm16526_vm3 = vcmask 1041408   ;;  %vm16529_vm12 = vmmov %vm16525_vm11  ;;  %vm16532_vm0 = vcmask 1040384  }
 0x55e   :  { %v3579_v23 = vsel %vm3158_vm10, %v3554_v32, %v3556_v17  ;;  %3366 = vrot.lane.b32.xlu1 %v15730_v41, %s8741_s18  ;;  %v15729_v17 = vrot.slane %v12244_v1, 3  ;;  %v3689_v32 = vsel %vm16521_vm7, %v11794_v56, %v3061_v2  ;;  %v3163_v41 = vsel %vm3158_vm10, %v12168_v24, %v12278_v38  ;;  %vm16530_vm8 = vmmov %vm16526_vm3 }
 0x55f   :  { %3262 = vrot.lane.b32.xlu0 %v15728_v12, %s8737_s25  ;;  %v4037_v3 = vsel %vm16515_vm13, %v4011_v45, %v3579_v23  ;;  %v12623_v45 = vsel %vm16523_vm2, %v3689_v32, %v3112_v59  ;;  %vm16528_vm13 = vcmask 1044480   ;;  %vm16531_vm14 = vmmov %vm16525_vm11  ;;  %vm16534_vm2 = vcmask 1043456  }
 0x560   :  { %v3594_v34 = vpop.permute.xlu1 %3593  ;;  %4612 = vmatpush1.bf16.msra.mxu0 %v4037_v3  ;;  %vm16533_vm7 = vmmov %vm16528_vm13 }
 0x561   :  { %v12598_v30 = vpop.permute.xlu0 %3405 }
 0x562   :  { %16517 = vst [vmem:[#allocation46_spill] sm:$0xff] %v12598_v30  ;;  %4340 = vrot.lane.b32.xlu1 %v12601_v18, %s8739_s14 }
 0x563   :  { %3368 = vrot.lane.b32.xlu0 %v15729_v17, %s8741_s18 }
 0x564   :  { %v3592_v25 = vpop.permute.xlu1 %3591 }
 0x565   :  { %v12615_v0 = vpop.permute.xlu0 %3595  ;;  %v3617_v32 = vsel %vm3210_vm4, %v3592_v25, %v3594_v34  ;;  %v15735_v25 = vrot.slane %v12451_v13, 6 }
 0x566   :  { %3442 = vrot.lane.b32.xlu1 %v16522_v54, %s8751_s26  ;;  %v3618_v9 = vsel %vm3210_vm4, %v3594_v34, %v12615_v0  ;;  %v16527_v54 = vrot.slane %v11879_v27, 5 }
 0x567   :  { %4342 = vrot.lane.b32.xlu0 %v12623_v45, %s8739_s14  ;;  %v4078_v56 = vsel %vm16526_vm3, %v3580_v8, %v3618_v9  ;;  %v4191_v8 = vsel %vm4188_vm9, %v12195_v6, %v12294_v7  ;;  %v12656_v9 = vsel %vm16529_vm12, %v12222_v33, %v12308_v44  ;;  %vm16536_vm3 = vmmov %vm16529_vm12 }
 0x568   :  { %v12629_v3 = vpop.permute.xlu1 %3635  ;;  %vm16538_vm12 = vmmov %vm16534_vm2 }
 0x569   :  { %16524 = vst [vmem:[#allocation82_spill] sm:$0xff] %v12629_v3  ;;  %v3634_v12 = vpop.permute.xlu0 %3633 }
 0x56a   :  { %v3660_v2 = vsel %vm16525_vm11, %v3634_v12, %v12629_v3  ;;  %3315 = vrot.lane.b32.xlu1 %v15737_v58, %s8739_s14  ;;  %v15736_v3 = vrot.slane %v12436_v49, 3  ;;  %vm16535_vm11 = vcmask 1046528   ;;  %v16605_v58 = vld [vmem:[#allocation18_spill] sm:$0xff] }
 0x56b   :  { %3444 = vrot.lane.b32.xlu0 %v16527_v54, %s8751_s26  ;;  %v4105_v17 = vsel %vm16528_vm13, %v4078_v56, %v3660_v2  ;;  %v4076_v2 = vsel %vm16530_vm8, %v3579_v23, %v3617_v32  ;;  %v4192_v32 = vsel %vm4188_vm9, %v12294_v7, %v12292_v48  ;;  %vm16537_vm13 = vmmov %vm16534_vm2 }
 0x56c   :  { %v12646_v62 = vpop.permute.xlu1 %3192  ;;  %4613 = vmatprep.subr.bf16.mxu0 %v4105_v17  ;;  %v12664_v17 = vsel %vm16532_vm0, %v3111_v36, %v3163_v41  ;;  %v15734_v36 = vrot.slane %v12451_v13, 3  ;;  %vm16539_vm8 = vmmov %vm16532_vm0 }
 0x56d   :  { %v3632_v34 = vpop.permute.xlu0 %3631  ;;  %v4242_v33 = vsel %vm16534_vm2, %v12664_v17, %v4191_v8  ;;  %vm16541_vm0 = vmmov %vm16535_vm11 }
 0x56e   :  { %v3659_v24 = vsel %vm16531_vm14, %v3632_v34, %v3634_v12  ;;  %3370 = vrot.lane.b32.xlu1 %v15736_v3, %s8741_s18  ;;  %v3164_v12 = vsel %vm3158_vm10, %v12278_v38, %v12276_v42  ;;  %v4267_v41 = vsel %vm16535_vm11, %v4242_v33, %v12656_v9  ;;  %v12691_v38 = vsel %vm16536_vm3, %v12308_v44, %v12306_v55  ;;  %vm16540_vm14 = vmmov %vm16535_vm11 }
 0x56f   :  { %3317 = vrot.lane.b32.xlu0 %v15735_v25, %s8739_s14  ;;  %v4102_v6 = vsel %vm16533_vm7, %v4076_v2, %v3659_v24  ;;  %v12701_v34 = vsel %vm16539_vm8, %v3112_v59, %v3164_v12  ;;  %vm16542_vm7 = vmmov %vm16534_vm2  ;;  %vm16544_vm11 = vcmask 1042432   ;;  %vm16546_vm3 = vcmask 1045504   ;;  %v16600_v25 = vld [vmem:[#allocation15_spill] sm:$0xff] }
 0x570   :  { %v12670_v56 = vpop.permute.xlu1 %3440  ;;  %4614 = vmatpush1.bf16.msra.mxu0 %v4102_v6  ;;  %v4244_v33 = vsel %vm16542_vm7, %v12701_v34, %v4192_v32  ;;  %vm16543_vm2 = vmmov %vm16541_vm0  ;;  %vm16550_vm8 = vcmask 506880  }
 0x571   :  { %v3191_v23 = vpop.permute.xlu0 %3190 }
 0x572   :  { %v3213_v54 = vsel %vm3210_vm4, %v12124_v43, %v3191_v23  ;;  %v3214_v8 = vsel %vm3210_vm4, %v3191_v23, %v12646_v62  ;;  %4368 = vrot.lane.b32.xlu1 %v4267_v41, %s8739_s14  ;;  %v16545_v23 = vrot.slane %v11879_v27, 7 }
 0x573   :  { %3372 = vrot.lane.b32.xlu0 %v15734_v36, %s8741_s18  ;;  %v3783_v7 = vsel %vm16537_vm13, %v12377_v29, %v3214_v8  ;;  %v3781_v43 = vsel %vm16538_vm12, %v12368_v61, %v3213_v54  ;;  %v4268_v61 = vsel %vm16543_vm2, %v4244_v33, %v12691_v38  ;;  %vm16547_vm13 = vmmov %vm16544_vm11  ;;  %v3325_v54 = vsel %vm16550_vm8, %v12220_v5, %v12325_v15 }
 0x574   :  { %v3483_v2 = vpop.permute.xlu1 %3482  ;;  %v3812_v24 = vsel %vm16540_vm14, %v3783_v7, %v12350_v60  ;;  %v3809_v44 = vsel %vm16541_vm0, %v3781_v43, %v12323_v47  ;;  %vm16548_vm12 = vmmov %vm16546_vm3  ;;  %vm16551_vm14 = vcmask 490496   ;;  %vm16552_vm0 = vcmask 1031168  }
 0x575   :  { %4648 = vmatprep.subr.bf16.mxu1 %v3812_v24  ;;  %v3439_v6 = vpop.permute.xlu0 %3438  ;;  %v3380_v7 = vsel %vm16551_vm14, %v12246_v40, %v12359_v20  ;;  %vm16554_vm7 = vmmov %vm16552_vm0  ;;  %vm16555_vm2 = vcmask 1014784  }
 0x576   :  { %v3464_v29 = vsel %vm3460_vm6, %v3439_v6, %v12670_v56  ;;  %3407 = vrot.lane.b32.xlu1 %v12233_v11, %s8748_s1  ;;  %4649 = vmatpush1.bf16.msra.mxu1 %v3809_v44  ;;  %v3463_v60 = vsel %vm3460_vm6, %v12463_v35, %v3439_v6  ;;  %v3504_v24 = vsel %vm16554_vm7, %v12524_v10, %v3483_v2  ;;  %vm16562_vm7 = vcmask 490496  }
 0x577   :  { %4370 = vrot.lane.b32.xlu0 %v4268_v61, %s8739_s14  ;;  %4650 = vmatprep.subr.bf16.mxu1 %v12373_v46  ;;  %v3917_v47 = vsel %vm16544_vm11, %v12302_v37, %v3464_v29  ;;  %v3914_v35 = vsel %vm16547_vm13, %v12283_v63, %v3463_v60  ;;  %vm16556_vm11 = vmmov %vm16555_vm2  ;;  %vm16558_vm13 = vcmask 1040384  }
 0x578   :  { %v3522_v59 = vpop.permute.xlu1 %3521  ;;  %v3955_v41 = vsel %vm16546_vm3, %v3917_v47, %v11825_v57  ;;  %v3952_v32 = vsel %vm16548_vm12, %v3914_v35, %v11835_v52  ;;  %vm16557_vm3 = vcmask 1041408   ;;  %vm16559_vm12 = vcmask 1044480   ;;  %vm16560_vm14 = vmmov %vm16558_vm13 }
 0x579   :  { %v12721_v12 = vpop.permute.xlu0 %3484  ;;  %v3543_v5 = vsel %vm16556_vm11, %v12544_v4, %v3522_v59  ;;  %v3850_v6 = vsel %vm16557_vm3, %v12656_v9, %v3325_v54  ;;  %v3326_v4 = vsel %vm16550_vm8, %v12325_v15, %v12318_v22  ;;  %v3989_v61 = vsel %vm16560_vm14, %v11835_v52, %v3504_v24 }
 0x57a   :  { %3486 = vrot.lane.b32.xlu1 %v16545_v23, %s8728_s28  ;;  %4651 = vmatpush1.bf16.msra.mxu1 %v12362_v31  ;;  %v16549_v31 = vrot.slane %v11951_v53, 7  ;;  %v3505_v43 = vsel %vm16552_vm0, %v3483_v2, %v12721_v12  ;;  %v12778_v29 = vsel %vm16559_vm12, %v3850_v6, %v3380_v7  ;;  %vm16561_vm0 = vcmask 1043456   ;;  %v16572_v6 = vld [vmem:[#allocation66_spill] sm:$0xff] }
 0x57b   :  { %3409 = vrot.lane.b32.xlu0 %v12244_v1, %s8748_s1  ;;  %4652 = vmatprep.subr.bf16.mxu1 %v3955_v41  ;;  %v3991_v33 = vsel %vm16558_vm13, %v11825_v57, %v3505_v43  ;;  %v16563_v47 = vrot.slane %v11951_v53, 1  ;;  %vm16565_vm11 = vmmov %vm16561_vm0  ;;  %vm16567_vm13 = vcmask 1041408   ;;  %v16569_v43 = vrot.slane %v11879_v27, 3 }
 0x57c   :  { %v12733_v37 = vpop.permute.xlu1 %3048  ;;  %v4015_v52 = vsel %vm16565_vm11, %v3989_v61, %v3543_v5  ;;  %vm16571_vm8 = vcmask 1031168   ;;  %vm16573_vm14 = vcmask 506880  }
 0x57d   :  { %v12735_v46 = vpop.permute.xlu0 %3523  ;;  %vm16581_vm11 = vmmov %vm16571_vm8 }
 0x57e   :  { %3525 = vrot.lane.b32.xlu1 %v11916_v14, %s8735_s23  ;;  %4653 = vmatpush1.bf16.msra.mxu1 %v3952_v32  ;;  %v16553_v14 = vrot.slane %v11879_v27, 1  ;;  %v3544_v44 = vsel %vm16555_vm2, %v3522_v59, %v12735_v46  ;;  %vm16564_vm2 = vcmask 1046528  }
 0x57f   :  { %3488 = vrot.lane.b32.xlu0 %v16549_v31, %s8728_s28  ;;  %v4017_v57 = vsel %vm16561_vm0, %v3991_v33, %v3544_v44  ;;  %vm16566_vm3 = vmmov %vm16564_vm2  ;;  %v3062_v44 = vsel %vm16571_vm8, %v12253_v21, %v12383_v50  ;;  %v12839_v33 = vsel %vm3417_vm15, %v16572_v6, %v12088_v16  ;;  %v16577_v21 = vrot.slane %v11951_v53, 3  ;;  %v16587_v6 = vld [vmem:[#allocation16_spill] sm:$0xff] }
 0x580   :  { %v3560_v63 = vpop.permute.xlu1 %3559  ;;  %vm16574_vm0 = vmmov %vm16573_vm14  ;;  %vm16591_vm8 = vcmask 1040384  }
 0x581   :  { %v12747_v8 = vpop.permute.xlu0 %3050  ;;  %v12773_v10 = vsel %vm3158_vm10, %v12556_v28, %v3560_v63  ;;  %v3381_v28 = vsel %vm16562_vm7, %v12359_v20, %v12354_v19  ;;  %v3852_v20 = vsel %vm16567_vm13, %v12691_v38, %v3326_v4  ;;  %vm16576_vm7 = vcmask 1014784  }
 0x582   :  { %3563 = vrot.lane.b32.xlu1 %v16553_v14, %s8750_s24  ;;  %v4043_v23 = vsel %vm16566_vm3, %v4015_v52, %v12773_v10  ;;  %v12812_v35 = vsel %vm16559_vm12, %v3852_v20, %v3381_v28  ;;  %v16570_v14 = vrot.slane %v11951_v53, 6  ;;  %v16580_v20 = vld [vmem:[#allocation60_spill] sm:$0xff]  ;;  %vm16583_vm3 = vcmask 1045504   ;;  %vm16586_vm13 = vmmov %vm16576_vm7 }
 0x583   :  { %3527 = vrot.lane.b32.xlu0 %v11998_v39, %s8735_s23  ;;  %vm16588_vm12 = vcmask 523264  }
 0x584   :  { %v12765_v40 = vpop.permute.xlu1 %3099 }
 0x585   :  { %v12775_v2 = vpop.permute.xlu0 %3561 }
 0x586   :  { %v12787_v60 = vsel %vm3158_vm10, %v3560_v63, %v12775_v2  ;;  %4396 = vrot.lane.b32.xlu1 %v12778_v29, %s8739_s14  ;;  %v16568_v63 = vrot.slane %v11879_v27, 6 }
 0x587   :  { %3565 = vrot.lane.b32.xlu0 %v16563_v47, %s8750_s24  ;;  %v4046_v15 = vsel %vm16564_vm2, %v4017_v57, %v12787_v60  ;;  %v16575_v57 = vld [vmem:[#allocation64_spill] sm:$0xff]  ;;  %v16578_v47 = vld [vmem:[#allocation17_spill] sm:$0xff]  ;;  %vm16579_vm2 = vcmask 1042432  }
 0x588   :  { %v12801_v59 = vpop.permute.xlu1 %4420  ;;  %4654 = vmatprep.subr.bf16.mxu1 %v4046_v15  ;;  %v3113_v28 = vsel %vm16576_vm7, %v12264_v51, %v16575_v57  ;;  %v3165_v15 = vsel %vm3158_vm10, %v12276_v42, %v16578_v47  ;;  %v3063_v51 = vsel %vm16581_vm11, %v12383_v50, %v16580_v20  ;;  %v16590_v50 = vld [vmem:[#allocation58_spill] sm:$0xff]  ;;  %vm16597_vm7 = vcmask 506880   ;;  %vm16599_vm11 = vmmov %vm16583_vm3 }
 0x589   :  { %4655 = vmatpush1.bf16.msra.mxu1 %v4043_v23  ;;  %v12805_v41 = vpop.permute.xlu0 %4418  ;;  %v3692_v23 = vsel %vm16579_vm2, %v11879_v27, %v3062_v44  ;;  %v12874_v27 = vsel %vm16588_vm12, %v12306_v55, %v16587_v6  ;;  %v12884_v44 = vsel %vm16591_vm8, %v3113_v28, %v3165_v15  ;;  %vm16604_vm12 = vmmov %vm16597_vm7  ;;  %vm16606_vm8 = vcmask 523264  }
 0x58a   :  { %3411 = vrot.lane.b32.xlu1 %v12436_v49, %s8748_s1  ;;  %16589 = vst [vmem:[#allocation85_spill] sm:$0xff] %v12874_v27  ;;  %16592 = vst [vmem:[#allocation77_spill] sm:$0xff] %v12884_v44 }
 0x58b   :  { %4398 = vrot.lane.b32.xlu0 %v12812_v35, %s8739_s14 }
 0x58c   :  { %v12816_v32 = vpop.permute.xlu1 %4390 }
 0x58d   :  { %v12818_v31 = vpop.permute.xlu0 %4422 }
 0x58e   :  { %3601 = vrot.lane.b32.xlu1 %v16568_v63, %s8749_s27  ;;  %v16582_v63 = vld [vmem:[#allocation12_spill] sm:$0xff] }
 0x58f   :  { %3413 = vrot.lane.b32.xlu0 %v12451_v13, %s8748_s1 }
 0x590   :  { %v4335_v54 = vpop.permute.xlu1 %4334 }
 0x591   :  { %v12825_v7 = vpop.permute.xlu0 %4338 }
 0x592   :  { %3641 = vrot.lane.b32.xlu1 %v16569_v43, %s8737_s25 }
 0x593   :  { %3603 = vrot.lane.b32.xlu0 %v16570_v14, %s8749_s27  ;;  %v12866_v14 = vsel %vm16583_vm3, %v3692_v23, %v3113_v28  ;;  %vm16602_vm3 = vcmask 490496  }
 0x594   :  { %v4337_v24 = vpop.permute.xlu1 %4336  ;;  %16584 = vst [vmem:[#allocation75_spill] sm:$0xff] %v12866_v14 }
 0x595   :  { %v4363_v5 = vpop.permute.xlu0 %4362  ;;  %v4447_v4 = vsel %vm16573_vm14, %v4337_v24, %v12825_v7  ;;  %v4446_v61 = vsel %vm16574_vm0, %v4335_v54, %v4337_v24  ;;  %v4193_v54 = vsel %vm4188_vm9, %v12292_v48, %v16582_v63  ;;  %v16585_v24 = vld [vmem:[#allocation63_spill] sm:$0xff]  ;;  %v12881_v48 = vsel %vm3417_vm15, %v12088_v16, %v16590_v50  ;;  %vm16594_vm0 = vmmov %vm16579_vm2  ;;  %v16596_v16 = vld [vmem:[#allocation93_spill] sm:$0xff] }
 0x596   :  { %4424 = vrot.lane.b32.xlu1 %v12839_v33, %s8739_s14  ;;  %4615 = vmatprep.subr.bf16.mxu0 %v4447_v4  ;;  %v3114_v42 = vsel %vm16586_vm13, %v16575_v57, %v16585_v24  ;;  %vm16593_vm14 = vcmask 1043456   ;;  %v16595_v57 = vld [vmem:[#allocation71_spill] sm:$0xff]  ;;  %v3327_v28 = vsel %vm16597_vm7, %v12318_v22, %v16596_v16  ;;  %vm16598_vm2 = vcmask 1046528   ;;  %vm16603_vm13 = vmmov %vm16597_vm7 }
 0x597   :  { %3643 = vrot.lane.b32.xlu0 %v16577_v21, %s8737_s25  ;;  %4616 = vmatpush1.bf16.msra.mxu0 %v4446_v61  ;;  %v4246_v55 = vsel %vm16593_vm14, %v12884_v44, %v4193_v54  ;;  %v3695_v61 = vsel %vm16594_vm0, %v11951_v53, %v3063_v51  ;;  %v3166_v21 = vsel %vm3158_vm10, %v16578_v47, %v16595_v57  ;;  %v16601_v51 = vld [vmem:[#allocation31_spill] sm:$0xff]  ;;  %vm16608_vm14 = vcmask 1040384   ;;  %vm16610_vm0 = vmmov %vm16597_vm7 }
 0x598   :  { %v4393_v52 = vpop.permute.xlu1 %4392  ;;  %v4269_v23 = vsel %vm16598_vm2, %v4246_v55, %v12874_v27  ;;  %v12903_v36 = vsel %vm16599_vm11, %v3695_v61, %v3114_v42  ;;  %v4194_v54 = vsel %vm4188_vm9, %v16582_v63, %v16600_v25  ;;  %v3382_v3 = vsel %vm16602_vm3, %v12354_v19, %v16601_v51 }
 0x599   :  { %v12863_v43 = vpop.permute.xlu0 %4394  ;;  %v12918_v55 = vsel %vm16606_vm8, %v16587_v6, %v16605_v58  ;;  %v12923_v63 = vsel %vm16608_vm14, %v3114_v42, %v3166_v21  ;;  %vm16611_vm7 = vcmask 1041408   ;;  %vm16615_vm2 = vcmask 785408   ;;  %vm16624_vm14 = vmmov %vm16610_vm0 }
 0x59a   :  { %4344 = vrot.lane.b32.xlu1 %v12866_v14, %s8739_s14  ;;  %16607 = vst [vmem:[#allocation79_spill] sm:$0xff] %v12918_v55  ;;  %16609 = vst [vmem:[#allocation81_spill] sm:$0xff] %v12923_v63  ;;  %v4473_v61 = vsel %vm16610_vm0, %v4393_v52, %v12863_v43  ;;  %vm16616_vm11 = vcmask 1044480   ;;  %vm16618_vm3 = vcmask 1043456   ;;  %vm16623_vm8 = vcmask 490496  }
 0x59b   :  { %4426 = vrot.lane.b32.xlu0 %v12881_v48, %s8739_s14  ;;  %v4248_v21 = vsel %vm16618_vm3, %v12923_v63, %v4194_v54  ;;  %v16625_v54 = vld [vmem:[#allocation55_spill] sm:$0xff]  ;;  %vm16630_vm3 = vcmask 1044480  }
 0x59c   :  { %v12888_v4 = vpop.permute.xlu1 %4366 }
 0x59d   :  { %v4365_v15 = vpop.permute.xlu0 %4364 }
 0x59e   :  { %4372 = vrot.lane.b32.xlu1 %v4269_v23, %s8739_s14  ;;  %v4460_v22 = vsel %vm16603_vm13, %v4365_v15, %v12888_v4  ;;  %v4459_v47 = vsel %vm16604_vm12, %v4363_v5, %v4365_v15  ;;  %v3854_v5 = vsel %vm16611_vm7, %v12874_v27, %v3327_v28  ;;  %v16612_v15 = vld [vmem:[#allocation34_spill] sm:$0xff]  ;;  %vm16620_vm13 = vmmov %vm16610_vm0  ;;  %vm16621_vm12 = vcmask 1046528  }
 0x59f   :  { %4346 = vrot.lane.b32.xlu0 %v12903_v36, %s8739_s14  ;;  %4617 = vmatprep.subr.bf16.mxu0 %v4460_v22  ;;  %v16613_v23 = vld [vmem:[#allocation62_spill] sm:$0xff]  ;;  %v12938_v42 = vsel %vm16616_vm11, %v3854_v5, %v3382_v3  ;;  %v4270_v28 = vsel %vm16621_vm12, %v4248_v21, %v12918_v55  ;;  %v4472_v3 = vsel %vm16624_vm14, %v12816_v32, %v4393_v52  ;;  %vm16626_vm7 = vmmov %vm16610_vm0  ;;  %vm16629_vm11 = vcmask 1041408  }
 0x5a0   :  { %v12925_v19 = vpop.permute.xlu1 %3150  ;;  %4618 = vmatpush1.bf16.msra.mxu0 %v4459_v47  ;;  %v16614_v6 = vunpack.i.h.bf16 %v16613_v23  ;;  %16617 = vst [vmem:[#allocation87_spill] sm:$0xff] %v12938_v42  ;;  %v16619_v22 = vld [vmem:[#allocation94_spill] sm:$0xff]  ;;  %v4486_v21 = vsel %vm16626_vm7, %v12801_v59, %v12818_v31  ;;  %v12968_v32 = vsel %vm3417_vm15, %v16590_v50, %v12575_v26  ;;  %vm16637_vm12 = vcmask 1043456  }
 0x5a1   :  { %4619 = vmatprep.subr.bf16.mxu0 %v4473_v61  ;;  %v12935_v44 = vpop.permute.xlu0 %3101  ;;  %v3328_v47 = vsel %vm16620_vm13, %v16596_v16, %v16619_v22  ;;  %v16622_v23 = vld [vmem:[#allocation78_spill] sm:$0xff]  ;;  %v4485_v16 = vsel %vm16610_vm0, %v12805_v41, %v12801_v59  ;;  %16628 = vst [vmem:[#allocation90_spill] sm:$0xff] %v12968_v32  ;;  %vm16639_vm14 = vmmov %vm16637_vm12  ;;  %vm16646_vm7 = vcmask 523264  }
 0x5a2   :  { %v2958_v13 = vsel %vm16615_vm2, %v16614_v6, %v16612_v15  ;;  %4400 = vrot.lane.b32.xlu1 %v12938_v42, %s8739_s14  ;;  %v3383_v61 = vsel %vm16623_vm8, %v16601_v51, %v16622_v23  ;;  %vm16627_vm2 = vcmask 1042432   ;;  %v12983_v52 = vld [vmem:[%s15396_s3] ss:$8 sps:$4 sm:$0xff]   ;;  %vm16638_vm8 = vcmask 1046528  }
 0x5a3   :  { %4374 = vrot.lane.b32.xlu0 %v4270_v28, %s8739_s14  ;;  %v2987_v5 = vmax.f32 %v16625_v54, %v2958_v13  ;;  %v3856_v13 = vsel %vm16629_vm11, %v12918_v55, %v3328_v47  ;;  %vm16632_vm13 = vmmov %vm16627_vm2  ;;  %v16634_v47 = vld [vmem:[#allocation35_spill] sm:$0xff] }
 0x5a4   :  { %v3195_v6 = vpop.permute.xlu1 %3194  ;;  %4620 = vmatpush1.bf16.msra.mxu0 %v4472_v3  ;;  %v12975_v41 = vsel %vm16630_vm3, %v3856_v13, %v3383_v61  ;;  %v4565_v59 = vsel %vm16632_vm13, %v4485_v16, 0  ;;  %v2988_v3 = vmax.f32 %v16634_v47, %v16612_v15  ;;  %vm16643_vm0 = vmmov %vm16638_vm8 }
 0x5a5   :  { %7546 = vmatprep.subr.msk.bf16.mxu0 %vm16627_vm2, %v4486_v21  ;;  %v12963_v51 = vpop.permute.xlu0 %3152  ;;  %16631 = vst [vmem:[#allocation84_spill] sm:$0xff] %v12975_v41  ;;  %v12985_v50 = vpack.c.bf16 %v2987_v5, %v2987_v5  ;;  %v3215_v61 = vsel %vm3210_vm4, %v12646_v62, %v3195_v6  ;;  %v13001_v5 = vsel %vm3417_vm15, %v12575_v26, %v12598_v30  ;;  %vm16647_vm2 = vmmov %vm16646_vm7 }
 0x5a6   :  { %4428 = vrot.lane.b32.xlu1 %v12968_v32, %s8739_s14  ;;  %16636 = vst [vmem:[#allocation20_spill] sm:$0xff] %v13001_v5  ;;  %v3785_v26 = vsel %vm16639_vm14, %v12664_v17, %v3215_v61  ;;  %v13018_v21 = vpack.c.bf16 %v2988_v3, %v2988_v3  ;;  %vm16649_vm13 = vmmov %vm16629_vm11 }
 0x5a7   :  { %4402 = vrot.lane.b32.xlu0 %v12975_v41, %s8739_s14  ;;  %16633 = vst [vmem:[#allocation96_spill] sm:$0xff] %v12985_v50  ;;  %v15742_v15 = vrot.slane %v12985_v50, 5  ;;  %v13030_v17 = vrot.slane %v12985_v50, 2 }
 0x5a8   :  { %v3598_v28 = vpop.permute.xlu1 %3597  ;;  %4622 = vmatpush1.bf16.msra.mxu0 %v4565_v59  ;;  %16641 = vst [vmem:[#allocation21_spill] sm:$0xff] %v13018_v21  ;;  %v4140_v47 = vrot.slane %v13018_v21, 5 }
 0x5a9   :  { %4689 = vmatprep.subr.bf16.mxu0 %v12623_v45  ;;  %v12992_v54 = vpop.permute.xlu0 %3196  ;;  %16644 = vst [vmem:[#allocation89_spill] sm:$0xff] %v13030_v17 }
 0x5aa   :  { %16635 = vst [vmem:[#allocation19_spill] sm:$0xff] %v12992_v54  ;;  %v3216_v16 = vsel %vm3210_vm4, %v3195_v6, %v12992_v54  ;;  %3198 = vrot.lane.b32.xlu1 %v11998_v39, %s8749_s27  ;;  %v16640_v6 = vld [vmem:[#allocation59_spill] sm:$0xff]  ;;  %v16659_v54 = vrot.slane %v12244_v1, 5 }
 0x5ab   :  { %4430 = vrot.lane.b32.xlu0 %v13001_v5, %s8739_s14  ;;  %4636 = vmatmul.mubr.bf16.vlgmr.msra.gmra.mrb[16].mxu0 %v12983_v52  ;;  %v3787_v62 = vsel %vm16637_vm12, %v12701_v34, %v3216_v16  ;;  %vm16650_vm12 = vmmov %vm16630_vm3 }
 0x5ac   :  { %v13008_v45 = vpop.permute.xlu1 %3052  ;;  %4690 = vmatpush1.bf16.msra.mxu0 %v12601_v18  ;;  %v3818_v39 = vsel %vm16638_vm8, %v3787_v62, %v12691_v38  ;;  %7551 = vmatprep.mubr.msk.bf16.mxu0 %vm4560_vm1, %v16640_v6  ;;  %v16642_v18 = vld [vmem:[#allocation67_spill] sm:$0xff]  ;;  %v3815_v38 = vsel %vm16643_vm0, %v3785_v26, %v12656_v9  ;;  %v3619_v9 = vsel %vm3210_vm4, %v12615_v0, %v3598_v28  ;;  %v16648_v6 = vld [vmem:[#allocation92_spill] sm:$0xff]  ;;  %vm16658_vm8 = vcmask 506880  }
 0x5ad   :  { %4691 = vmatprep.subr.bf16.mxu0 %v3818_v39  ;;  %v13020_v13 = vpop.permute.xlu0 %3599  ;;  %v4147_v39 = vrot.slane %v13018_v21, 2  ;;  %vm16660_vm14 = vmmov %vm16658_vm8  ;;  %vm16663_vm0 = vcmask 1042432  }
 0x5ae   :  { %4141 = vrot.lane.b32.xlu1 %v15742_v15, %s8728_s28  ;;  %v3620_v3 = vsel %vm3210_vm4, %v3598_v28, %v13020_v13  ;;  %v4080_v28 = vsel %vm16649_vm13, %v12773_v10, %v3619_v9  ;;  %v15741_v10 = vrot.slane %v12985_v50, 4 }
 0x5af   :  { %3200 = vrot.lane.b32.xlu0 %v16642_v18, %s8749_s27  ;;  %v4082_v0 = vsel %vm16629_vm11, %v12787_v60, %v3620_v3  ;;  %v16651_v60 = vld [vmem:[#allocation38_spill] sm:$0xff] }
 0x5b0   :  { %v3638_v34 = vpop.permute.xlu1 %3637  ;;  %4692 = vmatpush1.bf16.msra.mxu0 %v3815_v38 }
 0x5b1   :  { %4693 = vmatprep.subr.bf16.mxu0 %v12812_v35  ;;  %v13033_v59 = vpop.permute.xlu0 %3054  ;;  %v16645_v35 = vld [vmem:[#allocation82_spill] sm:$0xff] }
 0x5b2   :  { %4148 = vrot.lane.b32.xlu1 %v13030_v17, %s8735_s23  ;;  %v3661_v16 = vsel %vm16646_vm7, %v16645_v35, %v3638_v34  ;;  %vm16664_vm7 = vmmov %vm16663_vm0 }
 0x5b3   :  { %4143 = vrot.lane.b32.xlu0 %v4140_v47, %s8728_s28  ;;  %v4108_v47 = vsel %vm16650_vm12, %v4080_v28, %v3661_v16  ;;  %v4154_v16 = vrot.slane %v13018_v21, 7  ;;  %vm16682_vm12 = vcmask 1031168  }
 0x5b4   :  { %v13043_v61 = vpop.permute.xlu1 %4176  ;;  %4694 = vmatpush1.bf16.msra.mxu0 %v12778_v29 }
 0x5b5   :  { %v13048_v62 = vpop.permute.xlu0 %3639 }
 0x5b6   :  { %v3662_v26 = vsel %vm16647_vm2, %v3638_v34, %v13048_v62  ;;  %3202 = vrot.lane.b32.xlu1 %v16648_v6, %s8749_s27  ;;  %v15743_v34 = vrot.slane %v12985_v50, 7  ;;  %vm16666_vm2 = vcmask 1045504  }
 0x5b7   :  { %4150 = vrot.lane.b32.xlu0 %v4147_v39, %s8735_s23  ;;  %v4111_v29 = vsel %vm16630_vm3, %v4082_v0, %v3662_v26  ;;  %v15746_v26 = vrot.slane %v12985_v50, 1  ;;  %vm16668_vm11 = vmmov %vm16666_vm2 }
 0x5b8   :  { %v13061_v38 = vpop.permute.xlu1 %3103  ;;  %4656 = vmatprep.subr.bf16.mxu1 %v4111_v29  ;;  %v4161_v29 = vrot.slane %v13018_v21, 4  ;;  %vm16674_vm3 = vmmov %vm16658_vm8 }
 0x5b9   :  { %4657 = vmatpush1.bf16.msra.mxu1 %v4108_v47  ;;  %v13065_v35 = vpop.permute.xlu0 %4178  ;;  %vm16675_vm13 = vmmov %vm16674_vm3 }
 0x5ba   :  { %4155 = vrot.lane.b32.xlu1 %v15743_v34, %s8750_s24  ;;  %v15749_v34 = vrot.slane %v12985_v50, 6 }
 0x5bb   :  { %3204 = vrot.lane.b32.xlu0 %v16651_v60, %s8749_s27 }
 0x5bc   :  { %v13072_v3 = vpop.permute.xlu1 %3256 }
 0x5bd   :  { %v13075_v9 = vpop.permute.xlu0 %3105 }
 0x5be   :  { %4184 = vrot.lane.b32.xlu1 %v15741_v10, %s8752_s15  ;;  %v16652_v10 = vrot.slane %v11951_v53, 5  ;;  %v15753_v53 = vrot.slane %v12985_v50, 3 }
 0x5bf   :  { %4157 = vrot.lane.b32.xlu0 %v4154_v16, %s8750_s24  ;;  %v4201_v16 = vrot.slane %v13018_v21, 1 }
 0x5c0   :  { %v13082_v39 = vpop.permute.xlu1 %3154 }
 0x5c1   :  { %v13085_v0 = vpop.permute.xlu0 %3258 }
 0x5c2   :  { %3264 = vrot.lane.b32.xlu1 %v15746_v26, %s8737_s25 }
 0x5c3   :  { %4186 = vrot.lane.b32.xlu0 %v4161_v29, %s8752_s15  ;;  %v16653_v29 = vld [vmem:[#allocation53_spill] sm:$0xff]  ;;  %s8755_s15 = smov 118  }
 0x5c4   :  { %v13092_v28 = vpop.permute.xlu1 %3311  ;;  %v16654_v26 = vrot.slane %v16653_v29, 5  ;;  %v16655_v42 = vrot.slane %v16653_v29, 7  ;;  %v16662_v14 = vrot.slane %v16653_v29, 1 }
 0x5c5   :  { %v13094_v47 = vpop.permute.xlu0 %3156 }
 0x5c6   :  { %3446 = vrot.lane.b32.xlu1 %v16652_v10, %s8751_s26 }
 0x5c7   :  { %4202 = vrot.lane.b32.xlu0 %v4201_v16, %s8737_s25  ;;  %v4205_v16 = vrot.slane %v13018_v21, 6 }
 0x5c8   :  { %v13101_v15 = vpop.permute.xlu1 %4180 }
 0x5c9   :  { %v13104_v17 = vpop.permute.xlu0 %3313 }
 0x5ca   :  { %3319 = vrot.lane.b32.xlu1 %v15749_v34, %s8739_s14 }
 0x5cb   :  { %3448 = vrot.lane.b32.xlu0 %v16654_v26, %s8751_s26  ;;  %v15756_v26 = vrot.slane %v13018_v21, 3 }
 0x5cc   :  { %v13112_v5 = vpop.permute.xlu1 %3260 }
 0x5cd   :  { %v13115_v10 = vpop.permute.xlu0 %4182 }
 0x5ce   :  { %3374 = vrot.lane.b32.xlu1 %v15753_v53, %s8741_s18  ;;  %v16657_v53 = vrot.slane %v12233_v11, 7 }
 0x5cf   :  { %4206 = vrot.lane.b32.xlu0 %v4205_v16, %s8739_s14  ;;  %v16656_v16 = vrot.slane %v12233_v11, 5 }
 0x5d0   :  { %v13122_v32 = vpop.permute.xlu1 %3366 }
 0x5d1   :  { %v13124_v34 = vpop.permute.xlu0 %3262 }
 0x5d2   :  { %3490 = vrot.lane.b32.xlu1 %v16655_v42, %s8728_s28 }
 0x5d3   :  { %4209 = vrot.lane.b32.xlu0 %v15756_v26, %s8741_s18 }
 0x5d4   :  { %v4341_v41 = vpop.permute.xlu1 %4340 }
 0x5d5   :  { %v13133_v27 = vpop.permute.xlu0 %3368 }
 0x5d6   :  { %3450 = vrot.lane.b32.xlu1 %v16656_v16, %s8751_s26 }
 0x5d7   :  { %3492 = vrot.lane.b32.xlu0 %v16657_v53, %s8728_s28  ;;  %v4448_v53 = vsel %vm16660_vm14, %v12825_v7, %v4341_v41  ;;  %vm16685_vm14 = vcmask 1014784  }
 0x5d8   :  { %v3443_v55 = vpop.permute.xlu1 %3442 }
 0x5d9   :  { %v13141_v63 = vpop.permute.xlu0 %4342  ;;  %v3465_v26 = vsel %vm3460_vm6, %v12670_v56, %v3443_v55 }
 0x5da   :  { %3529 = vrot.lane.b32.xlu1 %v16642_v18, %s8735_s23  ;;  %v4449_v42 = vsel %vm16658_vm8, %v4341_v41, %v13141_v63  ;;  %v3920_v56 = vsel %vm16663_vm0, %v12839_v33, %v3465_v26  ;;  %v16669_v33 = vrot.slane %v12233_v11, 1  ;;  %v16670_v26 = vrot.slane %v12436_v49, 7  ;;  %vm16684_vm8 = vmmov %vm16682_vm12 }
 0x5db   :  { %3452 = vrot.lane.b32.xlu0 %v16659_v54, %s8751_s26  ;;  %4658 = vmatprep.subr.bf16.mxu1 %v4449_v42  ;;  %v16665_v54 = vld [vmem:[#allocation50_spill] sm:$0xff]  ;;  %vm16687_vm0 = vmmov %vm16685_vm14 }
 0x5dc   :  { %v13154_v16 = vpop.permute.xlu1 %3315  ;;  %4659 = vmatpush1.bf16.msra.mxu1 %v4448_v53  ;;  %v16667_v53 = vld [vmem:[#allocation25_spill] sm:$0xff] }
 0x5dd   :  { %v13156_v30 = vpop.permute.xlu0 %3444 }
 0x5de   :  { %16661 = vst [vmem:[#allocation91_spill] sm:$0xff] %v13156_v30  ;;  %v3466_v18 = vsel %vm3460_vm6, %v3443_v55, %v13156_v30  ;;  %3567 = vrot.lane.b32.xlu1 %v16662_v14, %s8750_s24  ;;  %v3958_v14 = vsel %vm16668_vm11, %v3920_v56, %v16667_v53  ;;  %vm16691_vm11 = vcmask 1043456  }
 0x5df   :  { %3531 = vrot.lane.b32.xlu0 %v16648_v6, %s8735_s23  ;;  %v3923_v7 = vsel %vm16664_vm7, %v12881_v48, %v3466_v18  ;;  %v16671_v18 = vrot.slane %v12244_v1, 7  ;;  %vm16688_vm7 = vcmask 1040384  }
 0x5e0   :  { %v13169_v41 = vpop.permute.xlu1 %3370  ;;  %v3961_v42 = vsel %vm16666_vm2, %v3923_v7, %v16665_v54  ;;  %vm16689_vm2 = vmmov %vm16688_vm7 }
 0x5e1   :  { %4695 = vmatprep.subr.bf16.mxu0 %v3961_v42  ;;  %v13173_v55 = vpop.permute.xlu0 %3317 }
 0x5e2   :  { %3415 = vrot.lane.b32.xlu1 %v12985_v50, %s8748_s1  ;;  %4696 = vmatpush1.bf16.msra.mxu0 %v3958_v14 }
 0x5e3   :  { %3569 = vrot.lane.b32.xlu0 %v16669_v33, %s8750_s24 }
 0x5e4   :  { %v4369_v48 = vpop.permute.xlu1 %4368 }
 0x5e5   :  { %v13182_v6 = vpop.permute.xlu0 %3372  ;;  %v4461_v14 = vsel %vm16675_vm13, %v12888_v4, %v4369_v48  ;;  %v16681_v4 = vrot.slane %v12233_v11, 6  ;;  %vm16694_vm13 = vmmov %vm16691_vm11 }
 0x5e6   :  { %3496 = vrot.lane.b32.xlu1 %v16670_v26, %s8728_s28 }
 0x5e7   :  { %3494 = vrot.lane.b32.xlu0 %v16671_v18, %s8728_s28  ;;  %v16677_v18 = vrot.slane %v16653_v29, 6 }
 0x5e8   :  { %v13190_v56 = vpop.permute.xlu1 %3407 }
 0x5e9   :  { %16672 = vst [vmem:[#allocation65_spill] sm:$0xff] %v13190_v56  ;;  %v13192_v7 = vpop.permute.xlu0 %4370 }
 0x5ea   :  { %16673 = vst [vmem:[#allocation68_spill] sm:$0xff] %v13192_v7  ;;  %3533 = vrot.lane.b32.xlu1 %v16651_v60, %s8735_s23  ;;  %v4462_v42 = vsel %vm16674_vm3, %v4369_v48, %v13192_v7  ;;  %v16678_v60 = vld [vmem:[#allocation83_spill] sm:$0xff]  ;;  %vm16693_vm3 = vcmask 1046528  }
 0x5eb   :  { %4212 = vrot.lane.b32.xlu0 %v13018_v21, %s8748_s1  ;;  %4660 = vmatprep.subr.bf16.mxu1 %v4462_v42  ;;  %v16680_v42 = vrot.slane %v12244_v1, 1  ;;  %v16683_v21 = vrot.slane %v16653_v29, 3 }
 0x5ec   :  { %v3487_v33 = vpop.permute.xlu1 %3486  ;;  %4661 = vmatpush1.bf16.msra.mxu1 %v4461_v14 }
 0x5ed   :  { %v13202_v26 = vpop.permute.xlu0 %3409 }
 0x5ee   :  { %16676 = vst [vmem:[#allocation69_spill] sm:$0xff] %v13202_v26  ;;  %3605 = vrot.lane.b32.xlu1 %v16677_v18, %s8749_s27  ;;  %v16686_v26 = vrot.slane %v12436_v49, 1 }
 0x5ef   :  { %3535 = vrot.lane.b32.xlu0 %v16678_v60, %s8735_s23  ;;  %v3506_v60 = vsel %vm16684_vm8, %v12721_v12, %v3487_v33 }
 0x5f0   :  { %v3526_v30 = vpop.permute.xlu1 %3525  ;;  %v3993_v12 = vsel %vm16689_vm2, %v16667_v53, %v3506_v60  ;;  %v3064_v60 = vsel %vm16684_vm8, %v16580_v20, %v12733_v37  ;;  %vm16701_vm2 = vcmask 1042432  }
 0x5f1   :  { %v13209_v50 = vpop.permute.xlu0 %3488 }
 0x5f2   :  { %16679 = vst [vmem:[#allocation26_spill] sm:$0xff] %v13209_v50  ;;  %3571 = vrot.lane.b32.xlu1 %v16680_v42, %s8750_s24  ;;  %v3507_v18 = vsel %vm16682_vm12, %v3487_v33, %v13209_v50  ;;  %vm16695_vm12 = vmmov %vm16693_vm3 }
 0x5f3   :  { %3607 = vrot.lane.b32.xlu0 %v16681_v4, %s8749_s27  ;;  %v3545_v4 = vsel %vm16687_vm0, %v12735_v46, %v3526_v30  ;;  %v3995_v50 = vsel %vm16688_vm7, %v16665_v54, %v3507_v18  ;;  %v16692_v46 = vrot.slane %v12233_v11, 3 }
 0x5f4   :  { %v3564_v48 = vpop.permute.xlu1 %3563  ;;  %v4019_v54 = vsel %vm16694_vm13, %v3993_v12, %v3545_v4  ;;  %v16699_v12 = vrot.slane %v12436_v49, 6  ;;  %vm16704_vm13 = vmmov %vm16684_vm8 }
 0x5f5   :  { %v13217_v14 = vpop.permute.xlu0 %3527 }
 0x5f6   :  { %3645 = vrot.lane.b32.xlu1 %v16683_v21, %s8737_s25  ;;  %v3546_v42 = vsel %vm16685_vm14, %v3526_v30, %v13217_v14  ;;  %v13237_v21 = vsel %vm3158_vm10, %v12775_v2, %v3564_v48  ;;  %vm16696_vm14 = vmmov %vm16687_vm0  ;;  %vm16698_vm0 = vcmask 506880  }
 0x5f7   :  { %3573 = vrot.lane.b32.xlu0 %v16686_v26, %s8750_s24  ;;  %v16690_v26 = vrot.slane %v12244_v1, 6  ;;  %v4021_v30 = vsel %vm16691_vm11, %v3995_v50, %v3546_v42  ;;  %v4049_v53 = vsel %vm16695_vm12, %v4019_v54, %v13237_v21  ;;  %v16697_v42 = vrot.slane %v12244_v1, 3  ;;  %vm16700_vm7 = vmmov %vm16698_vm0 }
 0x5f8   :  { %v4397_v56 = vpop.permute.xlu1 %4396  ;;  %vm16702_vm11 = vmmov %vm16684_vm8  ;;  %v3065_v54 = vsel %vm16704_vm13, %v12733_v37, %v12747_v8  ;;  %vm16712_vm13 = vcmask 1040384  }
 0x5f9   :  { %v13239_v7 = vpop.permute.xlu0 %3565  ;;  %v4474_v20 = vsel %vm16700_vm7, %v12863_v43, %v4397_v56  ;;  %vm16705_vm12 = vmmov %vm16696_vm14 }
 0x5fa   :  { %v3584_v33 = vsel %vm3158_vm10, %v3564_v48, %v13239_v7  ;;  %3609 = vrot.lane.b32.xlu1 %v16690_v26, %s8749_s27  ;;  %v3115_v48 = vsel %vm16696_vm14, %v16585_v24, %v12765_v40  ;;  %v3698_v24 = vsel %vm16701_vm2, %v16653_v29, %v3064_v60  ;;  %v3117_v43 = vsel %vm16705_vm12, %v12935_v44, %v13061_v38  ;;  %vm16706_vm8 = vmmov %vm16705_vm12 }
 0x5fb   :  { %3647 = vrot.lane.b32.xlu0 %v16692_v46, %s8737_s25  ;;  %v4052_v2 = vsel %vm16693_vm3, %v4021_v30, %v3584_v33  ;;  %v3066_v30 = vsel %vm16702_vm11, %v12747_v8, %v13008_v45  ;;  %vm16703_vm3 = vcmask 1045504   ;;  %v3116_v29 = vsel %vm16706_vm8, %v12765_v40, %v12935_v44  ;;  %vm16708_vm14 = vmmov %vm16701_vm2 }
 0x5fc   :  { %v13254_v18 = vpop.permute.xlu1 %3411  ;;  %4697 = vmatprep.subr.bf16.mxu0 %v4052_v2  ;;  %v13284_v2 = vsel %vm16703_vm3, %v3698_v24, %v3115_v48  ;;  %v3704_v8 = vsel %vm16708_vm14, %v12244_v1, %v3066_v30  ;;  %v4195_v40 = vsel %vm4188_vm9, %v16600_v25, %v13043_v61  ;;  %vm16710_vm7 = vmmov %vm16703_vm3  ;;  %v4196_v30 = vsel %vm4188_vm9, %v13043_v61, %v13065_v35 }
 0x5fd   :  { %4698 = vmatpush1.bf16.msra.mxu0 %v4049_v53  ;;  %v13261_v50 = vpop.permute.xlu0 %4398  ;;  %v3167_v53 = vsel %vm3158_vm10, %v16595_v57, %v12925_v19  ;;  %v3701_v57 = vsel %vm16701_vm2, %v12233_v11, %v3065_v54  ;;  %vm16713_vm12 = vmmov %vm16706_vm8  ;;  %vm16714_vm8 = vcmask 1043456  }
 0x5fe   :  { %3649 = vrot.lane.b32.xlu1 %v16697_v42, %s8737_s25  ;;  %v4475_v4 = vsel %vm16698_vm0, %v4397_v56, %v13261_v50  ;;  %v16707_v56 = vrot.slane %v12436_v49, 3  ;;  %vm16709_vm0 = vmmov %vm16702_vm11  ;;  %v13314_v42 = vsel %vm16710_vm7, %v3704_v8, %v3117_v43  ;;  %vm16711_vm11 = vcmask 523264  }
 0x5ff   :  { %3611 = vrot.lane.b32.xlu0 %v16699_v12, %s8749_s27  ;;  %4662 = vmatprep.subr.bf16.mxu1 %v4475_v4  ;;  %v3067_v60 = vsel %vm16709_vm0, %v13008_v45, %v13033_v59  ;;  %v13321_v1 = vsel %vm16711_vm11, %v16605_v58, %v13072_v3  ;;  %v13326_v45 = vsel %vm16703_vm3, %v3701_v57, %v3116_v29  ;;  %vm16715_vm14 = vmmov %vm16701_vm2  ;;  %vm16717_vm7 = vcmask 1046528  }
 0x600   :  { %v3602_v26 = vpop.permute.xlu1 %3601  ;;  %4663 = vmatpush1.bf16.msra.mxu1 %v4474_v20  ;;  %v13329_v25 = vsel %vm16712_vm13, %v3115_v48, %v3167_v53  ;;  %v3168_v4 = vsel %vm3158_vm10, %v12925_v19, %v12963_v51  ;;  %v3118_v58 = vsel %vm16713_vm12, %v13061_v38, %v13075_v9  ;;  %v3169_v12 = vsel %vm3158_vm10, %v12963_v51, %v13082_v39  ;;  %vm16716_vm0 = vmmov %vm16711_vm11 }
 0x601   :  { %v13281_v46 = vpop.permute.xlu0 %3413  ;;  %v3621_v48 = vsel %vm3210_vm4, %v13020_v13, %v3602_v26  ;;  %v4250_v19 = vsel %vm16714_vm8, %v13329_v25, %v4195_v40  ;;  %v3707_v24 = vsel %vm16715_vm14, %v12436_v49, %v3067_v60  ;;  %v4197_v38 = vsel %vm4188_vm9, %v13065_v35, %v13101_v15  ;;  %vm16718_vm2 = vmmov %vm16716_vm0 }
 0x602   :  { %4348 = vrot.lane.b32.xlu1 %v13284_v2, %s8739_s14  ;;  %v4271_v13 = vsel %vm16717_vm7, %v4250_v19, %v13321_v1  ;;  %vm16719_vm11 = vmmov %vm16716_vm0  ;;  %v13371_v35 = vsel %vm16703_vm3, %v3707_v24, %v3118_v58  ;;  %vm16720_vm13 = vcmask 1041408   ;;  %vm16721_vm12 = vcmask 1040384  }
 0x603   :  { %3651 = vrot.lane.b32.xlu0 %v16707_v56, %s8737_s25  ;;  %v13375_v56 = vsel %vm16721_vm12, %v3117_v43, %v3169_v12  ;;  %vm16722_vm8 = vmmov %vm16716_vm0  ;;  %vm16723_vm14 = vcmask 1044480   ;;  %vm16728_vm3 = vcmask 1043456  }
 0x604   :  { %v3642_v37 = vpop.permute.xlu1 %3641  ;;  %v13380_v53 = vsel %vm16722_vm8, %v13072_v3, %v13085_v0  ;;  %vm16725_vm7 = vmmov %vm16721_vm12  ;;  %v4254_v3 = vsel %vm16728_vm3, %v13375_v56, %v4197_v38  ;;  %vm16730_vm12 = vcmask 1046528  }
 0x605   :  { %v13311_v44 = vpop.permute.xlu0 %3603  ;;  %v3663_v51 = vsel %vm16716_vm0, %v13048_v62, %v3642_v37  ;;  %vm16724_vm0 = vmmov %vm16720_vm13  ;;  %v13388_v60 = vsel %vm16725_vm7, %v3116_v29, %v3168_v4  ;;  %v4198_v4 = vsel %vm4188_vm9, %v13101_v15, %v13115_v10 }
 0x606   :  { %4352 = vrot.lane.b32.xlu1 %v13314_v42, %s8739_s14  ;;  %v3622_v11 = vsel %vm3210_vm4, %v3602_v26, %v13311_v44  ;;  %v13365_v26 = vsel %vm16718_vm2, %v13085_v0, %v13112_v5  ;;  %v4084_v8 = vsel %vm16724_vm0, %v13237_v21, %v3621_v48  ;;  %vm16726_vm2 = vcmask 506880   ;;  %vm16731_vm8 = vmmov %vm16728_vm3 }
 0x607   :  { %4350 = vrot.lane.b32.xlu0 %v13326_v45, %s8739_s14  ;;  %v4086_v62 = vsel %vm16720_vm13, %v3584_v33, %v3622_v11  ;;  %vm16729_vm13 = vmmov %vm16726_vm2  ;;  %v3170_v21 = vsel %vm3158_vm10, %v13082_v39, %v13094_v47  ;;  %v4252_v57 = vsel %vm16731_vm8, %v13388_v60, %v4196_v30 }
 0x608   :  { %v4425_v20 = vpop.permute.xlu1 %4424  ;;  %v3329_v0 = vsel %vm16729_vm13, %v16619_v22, %v13092_v28  ;;  %vm16733_vm0 = vmmov %vm16730_vm12  ;;  %vm16738_vm13 = vcmask 1041408  }
 0x609   :  { %v13358_v54 = vpop.permute.xlu0 %3643  ;;  %v4487_v33 = vsel %vm16726_vm2, %v12818_v31, %v4425_v20  ;;  %v4273_v31 = vsel %vm16730_vm12, %v4254_v3, %v13365_v26  ;;  %v4272_v39 = vsel %vm16733_vm0, %v4252_v57, %v13380_v53  ;;  %vm16734_vm7 = vmmov %vm16726_vm2  ;;  %vm16735_vm2 = vcmask 523264   ;;  %v16758_v57 = vld [vmem:[#allocation46_spill] sm:$0xff] }
 0x60a   :  { %v3664_v61 = vsel %vm16719_vm11, %v3642_v37, %v13358_v54  ;;  %4376 = vrot.lane.b32.xlu1 %v4271_v13, %s8739_s14  ;;  %vm16727_vm11 = vmmov %vm16723_vm14  ;;  %v13418_v12 = vsel %vm16735_vm2, %v13112_v5, %v13124_v34  ;;  %vm16739_vm12 = vcmask 1040384   ;;  %vm16742_vm0 = vcmask 1043456  }
 0x60b   :  { %4354 = vrot.lane.b32.xlu0 %v13371_v35, %s8739_s14  ;;  %v4117_v37 = vsel %vm16723_vm14, %v4086_v62, %v3664_v61  ;;  %v4114_v40 = vsel %vm16727_vm11, %v4084_v8, %v3663_v51  ;;  %vm16732_vm14 = vcmask 490496   ;;  %vm16736_vm11 = vcmask 1042432   ;;  %vm16740_vm8 = vmmov %vm16734_vm7  ;;  %v16748_v61 = vld [vmem:[#allocation75_spill] sm:$0xff] }
 0x60c   :  { %v4345_v43 = vpop.permute.xlu1 %4344  ;;  %4699 = vmatprep.subr.bf16.mxu0 %v4117_v37  ;;  %v3384_v22 = vsel %vm16732_vm14, %v16622_v23, %v13122_v32  ;;  %vm16737_vm3 = vmmov %vm16736_vm11  ;;  %v3858_v23 = vsel %vm16738_vm13, %v13321_v1, %v3329_v0  ;;  %v13426_v19 = vsel %vm16739_vm12, %v3118_v58, %v3170_v21  ;;  %vm16741_vm14 = vcmask 1044480   ;;  %v16755_v0 = vld [vmem:[#allocation68_spill] sm:$0xff] }
 0x60d   :  { %4700 = vmatpush1.bf16.msra.mxu0 %v4114_v40  ;;  %v4427_v29 = vpop.permute.xlu0 %4426  ;;  %v4571_v15 = vsel %vm16737_vm3, %v4487_v33, 0  ;;  %v13435_v24 = vsel %vm16741_vm14, %v3858_v23, %v3384_v22  ;;  %v4256_v30 = vsel %vm16742_vm0, %v13426_v19, %v4198_v4  ;;  %v3330_v38 = vsel %vm16734_vm7, %v13092_v28, %v13104_v17  ;;  %vm16745_vm3 = vmmov %vm16734_vm7 }
 0x60e   :  { %4380 = vrot.lane.b32.xlu1 %v4273_v31, %s8739_s14  ;;  %v4488_v11 = vsel %vm16734_vm7, %v4425_v20, %v4427_v29  ;;  %v3331_v20 = vsel %vm16740_vm8, %v13104_v17, %v13154_v16  ;;  %vm16743_vm2 = vcmask 490496   ;;  %vm16747_vm12 = vmmov %vm16745_vm3  ;;  %vm16749_vm8 = vcmask 1041408   ;;  %v16757_v31 = vld [vmem:[#allocation65_spill] sm:$0xff] }
 0x60f   :  { %4378 = vrot.lane.b32.xlu0 %v4272_v39, %s8739_s14  ;;  %7548 = vmatprep.subr.msk.bf16.mxu1 %vm16736_vm11, %v4488_v11  ;;  %v3386_v58 = vsel %vm16743_vm2, %v13133_v27, %v13169_v41  ;;  %vm16744_vm11 = vcmask 1046528   ;;  %vm16746_vm13 = vmmov %vm16743_vm2  ;;  %v4450_v28 = vsel %vm16747_vm12, %v13141_v63, %v4345_v43  ;;  %v3862_v62 = vsel %vm16749_vm8, %v13365_v26, %v3331_v20  ;;  %v16764_v20 = vld [vmem:[#allocation69_spill] sm:$0xff] }
 0x610   :  { %v4373_v48 = vpop.permute.xlu1 %4372  ;;  %4665 = vmatpush1.bf16.msra.mxu1 %v4571_v15  ;;  %v3385_v13 = vsel %vm16746_vm13, %v13122_v32, %v13133_v27  ;;  %v13464_v8 = vsel %vm16741_vm14, %v3862_v62, %v3386_v58  ;;  %vm16750_vm0 = vmmov %vm16749_vm8  ;;  %v13471_v32 = vld [vmem:[%s15396_s3 + $0x4] ss:$8 sps:$4 sm:$0xff]   ;;  %v13497_v4 = vsel %vm3417_vm15, %v16758_v57, %v16757_v31  ;;  %v16770_v62 = vld [vmem:[#allocation77_spill] sm:$0xff] }
 0x611   :  { %4732 = vmatprep.subr.bf16.mxu1 %v12903_v36  ;;  %v13432_v5 = vpop.permute.xlu0 %4346  ;;  %v4274_v36 = vsel %vm16744_vm11, %v4256_v30, %v13418_v12  ;;  %v3860_v27 = vsel %vm16750_vm0, %v13380_v53, %v3330_v38  ;;  %vm16751_vm7 = vmmov %vm16745_vm3  ;;  %v13518_v30 = vsel %vm3417_vm15, %v16764_v20, %v13254_v18  ;;  %v13525_v38 = vsel %vm3417_vm15, %v16757_v31, %v16764_v20  ;;  %v16780_v57 = vld [vmem:[#allocation84_spill] sm:$0xff] }
 0x612   :  { %4404 = vrot.lane.b32.xlu1 %v13435_v24, %s8739_s14  ;;  %v4451_v51 = vsel %vm16745_vm3, %v4345_v43, %v13432_v5  ;;  %v3332_v63 = vsel %vm16751_vm7, %v13154_v16, %v13173_v55  ;;  %vm16752_vm2 = vmmov %vm16741_vm14  ;;  %v16778_v31 = vrot.slane %v12436_v49, 5 }
 0x613   :  { %4382 = vrot.lane.b32.xlu0 %v4274_v36, %s8739_s14  ;;  %4679 = vmatmul.mubr.bf16.vlgmr.msra.gmra.mrb[16].mxu1 %v12983_v52  ;;  %v13481_v33 = vsel %vm16752_vm2, %v3860_v27, %v3385_v13  ;;  %vm16753_vm11 = vmmov %vm16745_vm3 }
 0x614   :  { %4701 = vmatprep.subr.bf16.mxu0 %v4451_v51  ;;  %v4401_v17 = vpop.permute.xlu1 %4400  ;;  %4733 = vmatpush1.bf16.msra.mxu1 %v16748_v61  ;;  %vm16754_vm3 = vmmov %vm16746_vm13  ;;  %v13544_v61 = vsel %vm3417_vm15, %v13254_v18, %v13281_v46 }
 0x615   :  { %4702 = vmatpush1.bf16.msra.mxu0 %v4450_v28  ;;  %v13461_v37 = vpop.permute.xlu0 %4374  ;;  %7553 = vmatprep.mubr.msk.bf16.mxu1 %vm4560_vm1, %v13471_v32  ;;  %v3387_v40 = vsel %vm16754_vm3, %v13169_v41, %v13182_v6  ;;  %vm16756_vm13 = vmmov %vm16751_vm7  ;;  %v16769_v28 = vld [vmem:[#allocation83_spill] sm:$0xff] }
 0x616   :  { %4408 = vrot.lane.b32.xlu1 %v13464_v8, %s8739_s14  ;;  %v4464_v43 = vsel %vm16753_vm11, %v4373_v48, %v13461_v37  ;;  %v4463_v16 = vsel %vm16756_vm13, %v16755_v0, %v4373_v48  ;;  %vm16759_vm12 = vmmov %vm16750_vm0  ;;  %vm16767_vm11 = vcmask 1042432   ;;  %vm16771_vm13 = vcmask 1043456   ;;  %v16776_v0 = vld [vmem:[#allocation85_spill] sm:$0xff] }
 0x617   :  { %4406 = vrot.lane.b32.xlu0 %v13481_v33, %s8739_s14  ;;  %4703 = vmatprep.subr.bf16.mxu0 %v4464_v43  ;;  %v3864_v22 = vsel %vm16759_vm12, %v13418_v12, %v3332_v63  ;;  %vm16760_vm8 = vmmov %vm16752_vm2  ;;  %v16772_v63 = vld [vmem:[#allocation81_spill] sm:$0xff] }
 0x618   :  { %v4429_v3 = vpop.permute.xlu1 %4428  ;;  %v13504_v41 = vsel %vm16760_vm8, %v3864_v22, %v3387_v40  ;;  %vm16761_vm14 = vmmov %vm16751_vm7  ;;  %v16774_v40 = vld [vmem:[#allocation79_spill] sm:$0xff]  ;;  %vm16775_vm8 = vcmask 1046528  }
 0x619   :  { %4704 = vmatpush1.bf16.msra.mxu0 %v4463_v16  ;;  %v13492_v21 = vpop.permute.xlu0 %4402  ;;  %vm16762_vm0 = vmmov %vm16751_vm7 }
 0x61a   :  { %4432 = vrot.lane.b32.xlu1 %v13497_v4, %s8739_s14  ;;  %v4477_v39 = vsel %vm16761_vm14, %v4401_v17, %v13492_v21  ;;  %v4476_v15 = vsel %vm16762_vm0, %v13261_v50, %v4401_v17  ;;  %vm16763_vm7 = vmmov %vm16762_vm0 }
 0x61b   :  { %4410 = vrot.lane.b32.xlu0 %v13504_v41, %s8739_s14  ;;  %4705 = vmatprep.subr.bf16.mxu0 %v4477_v39  ;;  %v4489_v48 = vsel %vm16763_vm7, %v4427_v29, %v4429_v3  ;;  %vm16765_vm2 = vmmov %vm16762_vm0  ;;  %v16766_v29 = vld [vmem:[#allocation19_spill] sm:$0xff]  ;;  %v16781_v39 = vld [vmem:[#allocation22_spill] sm:$0xff] }
 0x61c   :  { %v3199_v11 = vpop.permute.xlu1 %3198  ;;  %vm16768_vm3 = vmmov %vm16767_vm11 }
 0x61d   :  { %4706 = vmatpush1.bf16.msra.mxu0 %v4476_v15  ;;  %v13513_v23 = vpop.permute.xlu0 %4430  ;;  %v3217_v58 = vsel %vm3210_vm4, %v16766_v29, %v3199_v11  ;;  %v4577_v51 = vsel %vm16768_vm3, %v4489_v48, 0  ;;  %vm16773_vm12 = vmmov %vm16771_vm13  ;;  %v16783_v15 = vld [vmem:[#allocation87_spill] sm:$0xff]  ;;  %v16784_v48 = vrot.slane %v16781_v39, 5  ;;  %vm16798_vm3 = vcmask 1031168  }
 0x61e   :  { %4436 = vrot.lane.b32.xlu1 %v13518_v30, %s8739_s14  ;;  %v4490_v50 = vsel %vm16765_vm2, %v4429_v3, %v13513_v23  ;;  %v3789_v27 = vsel %vm16771_vm13, %v16770_v62, %v3217_v58  ;;  %vm16777_vm14 = vmmov %vm16775_vm8  ;;  %vm16799_vm13 = vcmask 1014784  }
 0x61f   :  { %4434 = vrot.lane.b32.xlu0 %v13525_v38, %s8739_s14  ;;  %7550 = vmatprep.subr.msk.bf16.mxu0 %vm16767_vm11, %v4490_v50  ;;  %v3821_v16 = vsel %vm16777_vm14, %v3789_v27, %v16776_v0  ;;  %vm16785_vm0 = vmmov %vm16773_vm12  ;;  %vm16807_vm14 = vcmask 1045504  }
 0x620   :  { %v13534_v36 = vpop.permute.xlu1 %4141  ;;  %vm16788_vm7 = vmmov %vm16785_vm0 }
 0x621   :  { %4708 = vmatpush1.bf16.msra.mxu0 %v4577_v51  ;;  %v3201_v13 = vpop.permute.xlu0 %3200  ;;  %v16786_v51 = vld [vmem:[#allocation96_spill] sm:$0xff]  ;;  %vm16789_vm2 = vmmov %vm16775_vm8 }
 0x622   :  { %4775 = vmatprep.subr.bf16.mxu0 %v13326_v45  ;;  %v3218_v17 = vsel %vm3210_vm4, %v3199_v11, %v3201_v13  ;;  %3206 = vrot.lane.b32.xlu1 %v16769_v28, %s8749_s27  ;;  %v16782_v11 = vrot.slane %v16781_v39, 7  ;;  %vm16790_vm11 = vmmov %vm16789_vm2 }
 0x623   :  { %4438 = vrot.lane.b32.xlu0 %v13544_v61, %s8739_s14  ;;  %v3791_v43 = vsel %vm16773_vm12, %v16772_v63, %v3218_v17  ;;  %v16787_v17 = vrot.slane %v16786_v51, 7  ;;  %vm16802_vm12 = vcmask 1042432  }
 0x624   :  { %4722 = vmatmul.mubr.bf16.vlgmr.msra.gmra.mrb[20].mxu0 %v12983_v52  ;;  %v13553_v45 = vpop.permute.xlu1 %4148  ;;  %v3824_v3 = vsel %vm16775_vm8, %v3791_v43, %v16774_v40  ;;  %v16779_v52 = vld [vmem:[#allocation80_spill] sm:$0xff]  ;;  %v16792_v43 = vrot.slane %v16786_v51, 4  ;;  %vm16805_vm8 = vmmov %vm16802_vm12 }
 0x625   :  { %4776 = vmatpush1.bf16.msra.mxu0 %v13284_v2  ;;  %4734 = vmatprep.subr.bf16.mxu1 %v3824_v3  ;;  %v13558_v18 = vpop.permute.xlu0 %4143 }
 0x626   :  { %3454 = vrot.lane.b32.xlu1 %v16778_v31, %s8751_s26  ;;  %4735 = vmatpush1.bf16.msra.mxu1 %v3821_v16  ;;  %v16795_v16 = vrot.slane %v16786_v51, 6 }
 0x627   :  { %3208 = vrot.lane.b32.xlu0 %v16779_v52, %s8749_s27  ;;  %4736 = vmatprep.subr.bf16.mxu1 %v16780_v57 }
 0x628   :  { %v3203_v22 = vpop.permute.xlu1 %3202  ;;  %7555 = vmatprep.mubr.msk.bf16.mxu0 %vm4560_vm1, %v13471_v32 }
 0x629   :  { %v13570_v2 = vpop.permute.xlu0 %4150  ;;  %v3219_v49 = vsel %vm3210_vm4, %v3201_v13, %v3203_v22 }
 0x62a   :  { %3498 = vrot.lane.b32.xlu1 %v16782_v11, %s8728_s28  ;;  %4737 = vmatpush1.bf16.msra.mxu1 %v16783_v15  ;;  %v3793_v58 = vsel %vm16785_vm0, %v13329_v25, %v3219_v49  ;;  %v16791_v25 = vrot.slane %v16786_v51, 5  ;;  %v4152_v11 = vsel %vm16799_vm13, %v13075_v9, %v13553_v45  ;;  %v16800_v49 = vrot.slane %v16786_v51, 3  ;;  %vm16808_vm0 = vmmov %vm16805_vm8 }
 0x62b   :  { %3456 = vrot.lane.b32.xlu0 %v16784_v48, %s8751_s26  ;;  %v3827_v63 = vsel %vm16790_vm11, %v3793_v58, %v13321_v1  ;;  %v16794_v1 = vrot.slane %v16781_v39, 1  ;;  %v16801_v48 = vld [vmem:[#allocation90_spill] sm:$0xff]  ;;  %v16803_v58 = vrot.slane %v16781_v39, 3  ;;  %vm16812_vm11 = vmmov %vm16798_vm3 }
 0x62c   :  { %v4156_v20 = vpop.permute.xlu1 %4155 }
 0x62d   :  { %v13580_v50 = vpop.permute.xlu0 %3204 }
 0x62e   :  { %v3220_v29 = vsel %vm3210_vm4, %v3203_v22, %v13580_v50  ;;  %3537 = vrot.lane.b32.xlu1 %v16779_v52, %s8735_s23  ;;  %v16797_v52 = vrot.slane %v16781_v39, 6 }
 0x62f   :  { %3500 = vrot.lane.b32.xlu0 %v16787_v17, %s8728_s28  ;;  %v3795_v13 = vsel %vm16788_vm7, %v13388_v60, %v3220_v29  ;;  %v16804_v17 = vld [vmem:[#allocation20_spill] sm:$0xff]  ;;  %vm16809_vm7 = vmmov %vm16807_vm14 }
 0x630   :  { %v4185_v28 = vpop.permute.xlu1 %4184  ;;  %v3830_v62 = vsel %vm16789_vm2, %v3795_v13, %v13380_v53  ;;  %v16793_v53 = vrot.slane %v16786_v51, 1  ;;  %vm16811_vm2 = vmmov %vm16809_vm7 }
 0x631   :  { %4777 = vmatprep.subr.bf16.mxu0 %v3830_v62  ;;  %v13595_v27 = vpop.permute.xlu0 %4157  ;;  %v4159_v62 = vsel %vm3158_vm10, %v13094_v47, %v4156_v20 }
 0x632   :  { %3458 = vrot.lane.b32.xlu1 %v16791_v25, %s8751_s26  ;;  %4778 = vmatpush1.bf16.msra.mxu0 %v3827_v63  ;;  %v16806_v25 = vld [vmem:[#allocation61_spill] sm:$0xff] }
 0x633   :  { %3539 = vrot.lane.b32.xlu0 %v16792_v43, %s8735_s23  ;;  %4779 = vmatprep.subr.bf16.mxu0 %v13481_v33  ;;  %v16796_v33 = vld [vmem:[#allocation91_spill] sm:$0xff] }
 0x634   :  { %v3265_v60 = vpop.permute.xlu1 %3264 }
 0x635   :  { %v13606_v40 = vpop.permute.xlu0 %4186 }
 0x636   :  { %3577 = vrot.lane.b32.xlu1 %v16793_v53, %s8750_s24  ;;  %4780 = vmatpush1.bf16.msra.mxu0 %v13435_v24  ;;  %v4145_v24 = vsel %vm16798_vm3, %v13033_v59, %v13534_v36  ;;  %vm16813_vm3 = vcmask 523264  }
 0x637   :  { %3575 = vrot.lane.b32.xlu0 %v16794_v1, %s8750_s24  ;;  %v4216_v53 = vsel %vm16808_vm0, %v16781_v39, %v4145_v24  ;;  %v4199_v1 = vsel %vm4188_vm9, %v13115_v10, %v4185_v28  ;;  %v4153_v10 = vsel %vm16799_vm13, %v13553_v45, %v13570_v2  ;;  %vm16823_vm13 = vcmask 506880  }
 0x638   :  { %v3447_v3 = vpop.permute.xlu1 %3446 }
 0x639   :  { %v13615_v0 = vpop.permute.xlu0 %4202  ;;  %v3467_v31 = vsel %vm3460_vm6, %v16796_v33, %v3447_v3  ;;  %v16810_v33 = vld [vmem:[#allocation32_spill] sm:$0xff] }
 0x63a   :  { %3615 = vrot.lane.b32.xlu1 %v16795_v16, %s8749_s27  ;;  %v3926_v29 = vsel %vm16802_vm12, %v16801_v48, %v3467_v31  ;;  %v4224_v16 = vsel %vm16809_vm7, %v4216_v53, %v4152_v11  ;;  %vm16814_vm12 = vcmask 1040384   ;;  %vm16819_vm7 = vmmov %vm16811_vm2 }
 0x63b   :  { %3613 = vrot.lane.b32.xlu0 %v16797_v52, %s8749_s27  ;;  %v3964_v31 = vsel %vm16811_vm2, %v3926_v29, %v16810_v33  ;;  %v4146_v52 = vsel %vm16812_vm11, %v13534_v36, %v13558_v18  ;;  %v4230_v24 = vsel %vm16814_vm12, %v4152_v11, %v4159_v62  ;;  %v4200_v11 = vsel %vm4188_vm9, %v4185_v28, %v13606_v40  ;;  %vm16820_vm2 = vmmov %vm16813_vm3 }
 0x63c   :  { %v3320_v57 = vpop.permute.xlu1 %3319  ;;  %v4219_v45 = vsel %vm16808_vm0, %v16786_v51, %v4146_v52  ;;  %vm16821_vm11 = vmmov %vm16808_vm0  ;;  %vm16828_vm0 = vcmask 1046528  }
 0x63d   :  { %v3449_v22 = vpop.permute.xlu0 %3448  ;;  %vm16824_vm9 = vmmov %vm16819_vm7 }
 0x63e   :  { %v3468_v15 = vsel %vm3460_vm6, %v3447_v3, %v3449_v22  ;;  %3655 = vrot.lane.b32.xlu1 %v16800_v49, %s8737_s25  ;;  %v16815_v49 = vld [vmem:[#allocation21_spill] sm:$0xff] }
 0x63f   :  { %3653 = vrot.lane.b32.xlu0 %v16803_v58, %s8737_s25  ;;  %v3929_v13 = vsel %vm16805_vm8, %v16804_v17, %v3468_v15  ;;  %v13660_v15 = vsel %vm16813_vm3, %v13124_v34, %v3265_v60  ;;  %v16816_v48 = vrot.slane %v16815_v49, 3  ;;  %vm16817_vm8 = vcmask 1043456   ;;  %vm16822_vm3 = vmmov %vm16814_vm12 }
 0x640   :  { %v3375_v63 = vpop.permute.xlu1 %3374  ;;  %v3967_v43 = vsel %vm16807_vm14, %v3929_v13, %v16806_v25  ;;  %v4258_v36 = vsel %vm16817_vm8, %v4230_v24, %v4199_v1  ;;  %v4160_v34 = vsel %vm3158_vm10, %v4156_v20, %v13595_v27  ;;  %vm16818_vm14 = vcmask 1046528   ;;  %vm16825_vm12 = vmmov %vm16817_vm8 }
 0x641   :  { %4738 = vmatprep.subr.bf16.mxu1 %v3967_v43  ;;  %v13650_v3 = vpop.permute.xlu0 %4206  ;;  %v4275_v17 = vsel %vm16818_vm14, %v4258_v36, %v13660_v15  ;;  %v4226_v13 = vsel %vm16819_vm7, %v4219_v45, %v4153_v10  ;;  %v4204_v20 = vsel %vm16820_vm2, %v3265_v60, %v13615_v0  ;;  %v4222_v62 = vsel %vm16821_vm11, %v16815_v49, %v13558_v18  ;;  %vm16826_vm8 = vmmov %vm16823_vm13  ;;  %v16837_v45 = vld [vmem:[#allocation72_spill] sm:$0xff] }
 0x642   :  { %4356 = vrot.lane.b32.xlu1 %v4224_v16, %s8739_s14  ;;  %4739 = vmatpush1.bf16.msra.mxu1 %v3964_v31  ;;  %v4232_v43 = vsel %vm16822_vm3, %v4153_v10, %v4160_v34  ;;  %v4208_v51 = vsel %vm16823_vm13, %v3320_v57, %v13650_v3  ;;  %v4228_v1 = vsel %vm16824_vm9, %v4222_v62, %v13570_v2  ;;  %vm16827_vm14 = vcmask 490496  }
 0x643   :  { %3657 = vrot.lane.b32.xlu0 %v16816_v48, %s8737_s25  ;;  %v4260_v16 = vsel %vm16825_vm12, %v4232_v43, %v4200_v11  ;;  %v3333_v60 = vsel %vm16826_vm8, %v13173_v55, %v3320_v57  ;;  %vm16829_vm7 = vmmov %vm16827_vm14  ;;  %vm16830_vm2 = vcmask 1041408   ;;  %vm16831_vm11 = vcmask 1044480  }
 0x644   :  { %v3491_v29 = vpop.permute.xlu1 %3490  ;;  %v4277_v18 = vsel %vm16828_vm0, %v4260_v16, %v4204_v20  ;;  %v3388_v52 = vsel %vm16829_vm7, %v13182_v6, %v3375_v63  ;;  %v4283_v49 = vsel %vm16830_vm2, %v4204_v20, %v4208_v51  ;;  %vm16832_vm3 = vmmov %vm16830_vm2  ;;  %vm16834_vm9 = vcmask 1042432  }
 0x645   :  { %v13673_v58 = vpop.permute.xlu0 %4209  ;;  %v3866_v57 = vsel %vm16832_vm3, %v13660_v15, %v3333_v60  ;;  %vm16833_vm13 = vmmov %vm16831_vm11  ;;  %vm16836_vm8 = vcmask 1040384   ;;  %vm16839_vm0 = vcmask 1043456   ;;  %vm16842_vm2 = vcmask 1031168  }
 0x646   :  { %4384 = vrot.lane.b32.xlu1 %v4275_v17, %s8739_s14  ;;  %v4211_v31 = vsel %vm16827_vm14, %v3375_v63, %v13673_v58  ;;  %v13717_v6 = vsel %vm16833_vm13, %v3866_v57, %v3388_v52  ;;  %vm16835_vm12 = vmmov %vm16834_vm9  ;;  %v4234_v34 = vsel %vm16836_vm8, %v13570_v2, %v13595_v27  ;;  %vm16838_vm14 = vcmask 1045504   ;;  %v16844_v2 = vld [vmem:[#allocation26_spill] sm:$0xff] }
 0x647   :  { %4358 = vrot.lane.b32.xlu0 %v4226_v13, %s8739_s14  ;;  %v4289_v55 = vsel %vm16831_vm11, %v4283_v49, %v4211_v31  ;;  %v4262_v13 = vsel %vm16839_vm0, %v4234_v34, %v13606_v40  ;;  %vm16841_vm7 = vmmov %vm16838_vm14  ;;  %vm16843_vm11 = vcmask 1046528   ;;  %vm16846_vm13 = vcmask 1014784   ;;  %v4539_v49 = vld [vmem:[%s15397_s4] sm:$0xff] }
 0x648   :  { %v3451_v53 = vpop.permute.xlu1 %3450  ;;  %vm16845_vm3 = vmmov %vm16842_vm2 }
 0x649   :  { %v13692_v28 = vpop.permute.xlu0 %3492  ;;  %v3469_v10 = vsel %vm3460_vm6, %v3449_v22, %v3451_v53  ;;  %v3508_v27 = vsel %vm16845_vm3, %v16844_v2, %v3491_v29  ;;  %vm16854_vm3 = vcmask 1044480  }
 0x64a   :  { %4360 = vrot.lane.b32.xlu1 %v4228_v1, %s8739_s14  ;;  %v3932_v22 = vsel %vm16834_vm9, %v13497_v4, %v3469_v10  ;;  %v16840_v4 = vld [vmem:[#allocation57_spill] sm:$0xff]  ;;  %v3509_v43 = vsel %vm16842_vm2, %v3491_v29, %v13692_v28  ;;  %vm16847_vm9 = vmmov %vm16846_vm13  ;;  %v3997_v29 = vsel %vm16836_vm8, %v16810_v33, %v3508_v27  ;;  %vm16852_vm2 = vcmask 1041408  }
 0x64b   :  { %4386 = vrot.lane.b32.xlu0 %v4277_v18, %s8739_s14  ;;  %v3970_v62 = vsel %vm16841_vm7, %v3932_v22, %v16840_v4 }
 0x64c   :  { %v3530_v24 = vpop.permute.xlu1 %3529 }
 0x64d   :  { %v13708_v48 = vpop.permute.xlu0 %3452  ;;  %v3547_v40 = vsel %vm16847_vm9, %v13217_v14, %v3530_v24 }
 0x64e   :  { %v3470_v36 = vsel %vm3460_vm6, %v3451_v53, %v13708_v48  ;;  %4414 = vrot.lane.b32.xlu1 %v4289_v55, %s8739_s14 }
 0x64f   :  { %4412 = vrot.lane.b32.xlu0 %v13717_v6, %s8739_s14  ;;  %v3935_v63 = vsel %vm16835_vm12, %v13525_v38, %v3470_v36  ;;  %v4279_v38 = vsel %vm16843_vm11, %v4262_v13, %v13615_v0  ;;  %vm16848_vm12 = vmmov %vm16836_vm8 }
 0x650   :  { %v3568_v17 = vpop.permute.xlu1 %3567  ;;  %v3973_v11 = vsel %vm16838_vm14, %v3935_v63, %v16837_v45  ;;  %v3999_v1 = vsel %vm16848_vm12, %v16806_v25, %v3509_v43  ;;  %vm16849_vm14 = vmmov %vm16839_vm0 }
 0x651   :  { %4781 = vmatprep.subr.bf16.mxu0 %v3973_v11  ;;  %v3532_v20 = vpop.permute.xlu0 %3531  ;;  %v3585_v16 = vsel %vm3158_vm10, %v13239_v7, %v3568_v17  ;;  %vm16850_vm0 = vmmov %vm16843_vm11  ;;  %v4285_v7 = vsel %vm16852_vm2, %v13615_v0, %v13650_v3 }
 0x652   :  { %4782 = vmatpush1.bf16.msra.mxu0 %v3970_v62  ;;  %v3548_v53 = vsel %vm16846_vm13, %v3530_v24, %v3532_v20  ;;  %vm16851_vm7 = vmmov %vm16849_vm14  ;;  %v4291_v24 = vsel %vm16854_vm3, %v4285_v7, %v13673_v58  ;;  %v4540_v58 = vld [vmem:[%s15397_s4 + $0x8] sm:$0xff]  ;;  %vm16855_vm13 = vcmask 1031168   ;;  %vm16864_vm3 = vcmask 523264  }
 0x653   :  { %4388 = vrot.lane.b32.xlu0 %v4279_v38, %s8739_s14  ;;  %v4025_v14 = vsel %vm16849_vm14, %v3999_v1, %v3548_v53  ;;  %v4023_v52 = vsel %vm16851_vm7, %v3997_v29, %v3547_v40  ;;  %vm16853_vm11 = vmmov %vm16850_vm0 }
 0x654   :  { %v3416_v51 = vpop.permute.xlu1 %3415  ;;  %v4055_v33 = vsel %vm16853_vm11, %v4023_v52, %v3585_v16  ;;  %vm16856_vm9 = vmmov %vm16855_vm13 }
 0x655   :  { %v3570_v60 = vpop.permute.xlu0 %3569  ;;  %v13750_v31 = vsel %vm3417_vm15, %v13281_v46, %v3416_v51  ;;  %vm16859_vm14 = vmmov %vm16836_vm8 }
 0x656   :  { %v3586_v18 = vsel %vm3158_vm10, %v3568_v17, %v3570_v60  ;;  %4440 = vrot.lane.b32.xlu1 %v13750_v31, %s8739_s14 }
 0x657   :  { %v4058_v25 = vsel %vm16850_vm0, %v4025_v14, %v3586_v18  ;;  %vm16860_vm0 = vmmov %vm16851_vm7 }
 0x658   :  { %v13763_v46 = vpop.permute.xlu1 %3496  ;;  %4740 = vmatprep.subr.bf16.mxu1 %v4058_v25  ;;  %vm16861_vm7 = vmmov %vm16853_vm11 }
 0x659   :  { %4741 = vmatpush1.bf16.msra.mxu1 %v4055_v33  ;;  %v3495_v10 = vpop.permute.xlu0 %3494  ;;  %vm16862_vm2 = vmmov %vm16860_vm0 }
 0x65a   :  { %4416 = vrot.lane.b32.xlu1 %v4291_v24, %s8739_s14  ;;  %v3511_v34 = vsel %vm16855_vm13, %v3495_v10, %v13763_v46  ;;  %v3510_v17 = vsel %vm16856_vm9, %v13692_v28, %v3495_v10  ;;  %vm16863_vm11 = vmmov %vm16861_vm7  ;;  %vm16866_vm9 = vcmask 1041408  }
 0x65b   :  { %v4003_v43 = vsel %vm16836_vm8, %v16837_v45, %v3511_v34  ;;  %v4001_v27 = vsel %vm16859_vm14, %v16840_v4, %v3510_v17  ;;  %vm16865_vm13 = vmmov %vm16864_vm3 }
 0x65c   :  { %v3534_v55 = vpop.permute.xlu1 %3533  ;;  %vm16870_vm14 = vmmov %vm16864_vm3 }
 0x65d   :  { %v4213_v57 = vpop.permute.xlu0 %4212 }
 0x65e   :  { %v4214_v0 = vsel %vm3417_vm15, %v3416_v51, %v4213_v57  ;;  %4543 = vperm.xlu1 %8364, %v4539_v49   ;;  %vm16857_vm15 = vcmask 1014784  }
 0x65f   :  { %4442 = vrot.lane.b32.xlu0 %v4214_v0, %s8739_s14  ;;  %vm16858_vm12 = vmmov %vm16857_vm15 }
 0x660   :  { %v3606_v3 = vpop.permute.xlu1 %3605  ;;  %v3549_v13 = vsel %vm16858_vm12, %v3532_v20, %v3534_v55  ;;  %vm16868_vm12 = vmmov %vm16866_vm9 }
 0x661   :  { %v13774_v36 = vpop.permute.xlu0 %3535  ;;  %v4027_v51 = vsel %vm16862_vm2, %v4001_v27, %v3549_v13  ;;  %v3623_v45 = vsel %vm3210_vm4, %v13311_v44, %v3606_v3 }
 0x662   :  { %v3550_v11 = vsel %vm16857_vm15, %v3534_v55, %v13774_v36  ;;  %vm16867_vm15 = vcmask 1044480   ;;  %v4088_v7 = vsel %vm16868_vm12, %v3585_v16, %v3623_v45 }
 0x663   :  { %4444 = vrot.lane.b32.xlu0 %v4213_v57, %s8739_s14  ;;  %v4029_v53 = vsel %vm16860_vm0, %v4003_v43, %v3550_v11  ;;  %vm16869_vm8 = vmmov %vm16867_vm15 }
 0x664   :  { %v3572_v22 = vpop.permute.xlu1 %3571  ;;  %vm16871_vm0 = vmmov %vm16864_vm3 }
 0x665   :  { %v3608_v63 = vpop.permute.xlu0 %3607  ;;  %v3587_v38 = vsel %vm3158_vm10, %v3570_v60, %v3572_v22  ;;  %vm16873_vm2 = vmmov %vm16869_vm8 }
 0x666   :  { %v3624_v40 = vsel %vm3210_vm4, %v3606_v3, %v3608_v63  ;;  %v4061_v60 = vsel %vm16863_vm11, %v4027_v51, %v3587_v38 }
 0x667   :  { %4548 = vperm.xlu0 %8293, %v4540_v58   ;;  %v4090_v25 = vsel %vm16866_vm9, %v3586_v18, %v3624_v40 }
 0x668   :  { %v3646_v62 = vpop.permute.xlu1 %3645 }
 0x669   :  { %v13790_v2 = vpop.permute.xlu0 %3573  ;;  %v3665_v4 = vsel %vm16864_vm3, %v13358_v54, %v3646_v62  ;;  %vm16875_vm3 = vmmov %vm16873_vm2 }
 0x66a   :  { %v3588_v28 = vsel %vm3158_vm10, %v3572_v22, %v13790_v2  ;;  %v4120_v44 = vsel %vm16869_vm8, %v4088_v7, %v3665_v4 }
 0x66b   :  { %v4064_v20 = vsel %vm16861_vm7, %v4029_v53, %v3588_v28  ;;  %vm16872_vm7 = vmmov %vm16866_vm9 }
 0x66c   :  { %v3610_v1 = vpop.permute.xlu1 %3609  ;;  %4783 = vmatprep.subr.bf16.mxu0 %v4064_v20  ;;  %vm16874_vm11 = vmmov %vm16872_vm7 }
 0x66d   :  { %4784 = vmatpush1.bf16.msra.mxu0 %v4061_v60  ;;  %v3648_v29 = vpop.permute.xlu0 %3647  ;;  %v3625_v24 = vsel %vm3210_vm4, %v3608_v63, %v3610_v1 }
 0x66e   :  { %v3666_v14 = vsel %vm16865_vm13, %v3646_v62, %v3648_v29  ;;  %v4092_v3 = vsel %vm16874_vm11, %v3587_v38, %v3625_v24  ;;  %vm16876_vm13 = vcmask 506880  }
 0x66f   :  { %v4123_v52 = vsel %vm16867_vm15, %v4090_v25, %v3666_v14  ;;  %vm16877_vm9 = vmmov %vm16876_vm13 }
 0x670   :  { %v3650_v33 = vpop.permute.xlu1 %3649  ;;  %4742 = vmatprep.subr.bf16.mxu1 %v4123_v52  ;;  %vm16878_vm15 = vmmov %vm16877_vm9 }
 0x671   :  { %4743 = vmatpush1.bf16.msra.mxu1 %v4120_v44  ;;  %v13810_v10 = vpop.permute.xlu0 %3611  ;;  %v3667_v55 = vsel %vm16870_vm14, %v3648_v29, %v3650_v33  ;;  %vm16879_vm12 = vmmov %vm16877_vm9 }
 0x672   :  { %v3626_v54 = vsel %vm3210_vm4, %v3610_v1, %v13810_v10  ;;  %v4126_v58 = vsel %vm16875_vm3, %v4092_v3, %v3667_v55  ;;  %vm16880_vm8 = vmmov %vm16877_vm9 }
 0x673   :  { %v4094_v57 = vsel %vm16872_vm7, %v3588_v28, %v3626_v54  ;;  %vm16881_vm14 = vmmov %vm16880_vm8 }
 0x674   :  { %v4349_v49 = vpop.permute.xlu1 %4348 }
 0x675   :  { %v13816_v18 = vpop.permute.xlu0 %3651  ;;  %v4452_v17 = vsel %vm16877_vm9, %v13432_v5, %v4349_v49 }
 0x676   :  { %v3668_v16 = vsel %vm16871_vm0, %v3650_v33, %v13816_v18  ;;  %vm16882_vm0 = vmmov %vm16880_vm8 }
 0x677   :  { %v4129_v0 = vsel %vm16873_vm2, %v4094_v57, %v3668_v16  ;;  %vm16883_vm7 = vmmov %vm16882_vm0 }
 0x678   :  { %v4353_v22 = vpop.permute.xlu1 %4352  ;;  %4785 = vmatprep.subr.bf16.mxu0 %v4129_v0  ;;  %vm16884_vm2 = vmmov %vm16882_vm0 }
 0x679   :  { %4786 = vmatpush1.bf16.msra.mxu0 %v4126_v58  ;;  %v4351_v63 = vpop.permute.xlu0 %4350  ;;  %vm16885_vm11 = vmmov %vm16882_vm0 }
 0x67a   :  { %v4453_v34 = vsel %vm16876_vm13, %v4349_v49, %v4351_v63  ;;  %v4454_v38 = vsel %vm16879_vm12, %v4351_v63, %v4353_v22  ;;  %vm16886_vm3 = vmmov %vm16882_vm0  ;;  %vm16890_vm12 = vcmask 1042432  }
 0x67b   :  { %4744 = vmatprep.subr.bf16.mxu1 %v4453_v34  ;;  %vm16887_vm13 = vmmov %vm16882_vm0  ;;  %v16895_v34 = vmov 0  }
 0x67c   :  { %v4377_v11 = vpop.permute.xlu1 %4376  ;;  %4745 = vmatpush1.bf16.msra.mxu1 %v4452_v17  ;;  %vm16888_vm9 = vmmov %vm16882_vm0 }
 0x67d   :  { %v13827_v13 = vpop.permute.xlu0 %4354  ;;  %v4465_v51 = vsel %vm16881_vm14, %v13461_v37, %v4377_v11  ;;  %vm16892_vm14 = vmmov %vm16882_vm0 }
 0x67e   :  { %v4455_v62 = vsel %vm16878_vm15, %v4353_v22, %v13827_v13  ;;  %v13831_v43 = vpop.f32.mrb[16].mxu0  ;;  %vm16889_vm15 = vmmov %vm16882_vm0  ;;  %v13872_v22 = vld [vmem:[%s15396_s3] ss:$8 sps:$4 sm:$0xff]  }
 0x67f   :  { %4787 = vmatprep.subr.bf16.mxu0 %v4455_v62  ;;  %v13834_v27 = vpop.f32.mrb[17].mxu0 }
 0x680   :  { %v4381_v28 = vpop.permute.xlu1 %4380  ;;  %4788 = vmatpush1.bf16.msra.mxu0 %v4454_v38  ;;  %v13836_v53 = vpop.f32.mrb[18].mxu0 }
 0x681   :  { %v4379_v40 = vpop.permute.xlu0 %4378  ;;  %v13838_v5 = vpop.f32.mrb[19].mxu0 }
 0x682   :  { %v4466_v20 = vsel %vm16880_vm8, %v4377_v11, %v4379_v40  ;;  %v4467_v4 = vsel %vm16883_vm7, %v4379_v40, %v4381_v28  ;;  %vm16891_vm8 = vmmov %vm16890_vm12 }
 0x683   :  { %4746 = vmatprep.subr.bf16.mxu1 %v4466_v20  ;;  %vm16893_vm7 = vmmov %vm16891_vm8 }
 0x684   :  { %v4405_v45 = vpop.permute.xlu1 %4404  ;;  %4747 = vmatpush1.bf16.msra.mxu1 %v4465_v51 }
 0x685   :  { %v13843_v1 = vpop.permute.xlu0 %4382  ;;  %v4478_v52 = vsel %vm16885_vm11, %v13492_v21, %v4405_v45 }
 0x686   :  { %v4468_v60 = vsel %vm16882_vm0, %v4381_v28, %v13843_v1 }
 0x687   :  { %4789 = vmatprep.subr.bf16.mxu0 %v4468_v60  ;;  %v16910_v60 = vld [vmem:[#allocation76_spill] sm:$0xff] }
 0x688   :  { %v4409_v29 = vpop.permute.xlu1 %4408  ;;  %4790 = vmatpush1.bf16.msra.mxu0 %v4467_v4 }
 0x689   :  { %v4407_v14 = vpop.permute.xlu0 %4406 }
 0x68a   :  { %v4479_v25 = vsel %vm16884_vm2, %v4405_v45, %v4407_v14  ;;  %v4480_v44 = vsel %vm16887_vm13, %v4407_v14, %v4409_v29  ;;  %vm16894_vm2 = vmmov %vm16893_vm7  ;;  %vm16898_vm13 = vcmask 1040384  }
 0x68b   :  { %4748 = vmatprep.subr.bf16.mxu1 %v4479_v25  ;;  %vm16896_vm11 = vmmov %vm16894_vm2  ;;  %v3775_v62 = vsel %vm16898_vm13, %v13075_v9, %v13094_v47  ;;  %vm16912_vm13 = vcmask 1014784  }
 0x68c   :  { %v4433_v37 = vpop.permute.xlu1 %4432  ;;  %4749 = vmatpush1.bf16.msra.mxu1 %v4478_v52  ;;  %v3710_v17 = vsel %vm16896_vm11, %v16781_v39, %v13033_v59  ;;  %vm16909_vm11 = vcmask 1031168  }
 0x68d   :  { %v13851_v7 = vpop.permute.xlu0 %4410  ;;  %v4491_v54 = vsel %vm16888_vm9, %v13513_v23, %v4433_v37  ;;  %vm16899_vm9 = vcmask 1045504  }
 0x68e   :  { %v4481_v33 = vsel %vm16886_vm3, %v4409_v29, %v13851_v7  ;;  %v4583_v21 = vsel %vm16891_vm8, %v4491_v54, 0  ;;  %vm16897_vm3 = vcmask 1043456   ;;  %vm16902_vm8 = vcmask 1046528  }
 0x68f   :  { %4791 = vmatprep.subr.bf16.mxu0 %v4481_v33 }
 0x690   :  { %v4437_v24 = vpop.permute.xlu1 %4436  ;;  %4792 = vmatpush1.bf16.msra.mxu0 %v4480_v44 }
 0x691   :  { %v4435_v49 = vpop.permute.xlu0 %4434 }
 0x692   :  { %v4492_v55 = vsel %vm16889_vm15, %v4433_v37, %v4435_v49  ;;  %v4493_v16 = vsel %vm16892_vm14, %v4435_v49, %v4437_v24  ;;  %vm16900_vm15 = vmmov %vm16897_vm3 }
 0x693   :  { %7552 = vmatprep.subr.msk.bf16.mxu1 %vm16890_vm12, %v4492_v55  ;;  %v4589_v58 = vsel %vm16894_vm2, %v4493_v16, 0  ;;  %vm16901_vm12 = vmmov %vm16897_vm3 }
 0x694   :  { %v3207_v57 = vpop.permute.xlu1 %3206  ;;  %4751 = vmatpush1.bf16.msra.mxu1 %v4583_v21  ;;  %vm16903_vm14 = vmmov %vm16902_vm8 }
 0x695   :  { %4818 = vmatprep.subr.bf16.mxu1 %v13371_v35  ;;  %v13863_v0 = vpop.permute.xlu0 %4438  ;;  %v3221_v3 = vsel %vm3210_vm4, %v13580_v50, %v3207_v57 }
 0x696   :  { %v4494_v23 = vsel %vm16882_vm0, %v4437_v24, %v13863_v0  ;;  %v3797_v11 = vsel %vm16897_vm3, %v13375_v56, %v3221_v3  ;;  %vm16904_vm0 = vmmov %vm16902_vm8 }
 0x697   :  { %4765 = vmatmul.mubr.bf16.vlgmr.msra.gmra.mrb[20].mxu1 %v13872_v22  ;;  %7554 = vmatprep.subr.msk.bf16.mxu0 %vm16893_vm7, %v4494_v23  ;;  %v3833_v56 = vsel %vm16903_vm14, %v3797_v11, %v13365_v26  ;;  %v16906_v26 = vld [vmem:[#allocation30_spill] sm:$0xff]  ;;  %vm16907_vm7 = vmmov %vm16899_vm9 }
 0x698   :  { %v3455_v35 = vpop.permute.xlu1 %3454  ;;  %4794 = vmatpush1.bf16.msra.mxu0 %v4589_v58  ;;  %4819 = vmatpush1.bf16.msra.mxu1 %v13314_v42  ;;  %v3748_v42 = vsel %vm16899_vm9, %v3710_v17, %v13075_v9  ;;  %vm16911_vm3 = vmmov %vm16907_vm7 }
 0x699   :  { %v3209_v63 = vpop.permute.xlu0 %3208  ;;  %4861 = vmatprep.subr.bf16.mxu0 %v16895_v34  ;;  %7557 = vmatprep.mubr.msk.bf16.mxu1 %vm4560_vm1, %v13471_v32  ;;  %vm16913_vm9 = vmmov %vm16909_vm11 }
 0x69a   :  { %v3222_v50 = vsel %vm3210_vm4, %v3207_v57, %v3209_v63  ;;  %v3801_v28 = vsel %vm16901_vm12, %v3775_v62, %v3209_v63  ;;  %vm16915_vm12 = vmmov %vm16912_vm13 }
 0x69b   :  { %4808 = vmatmul.mubr.bf16.vlgmr.msra.gmra.mrb[24].mxu0 %v13872_v22  ;;  %v3799_v38 = vsel %vm16900_vm15, %v13426_v19, %v3222_v50  ;;  %v3471_v19 = vsel %vm3460_vm6, %v13708_v48, %v3455_v35 }
 0x69c   :  { %v3499_v40 = vpop.permute.xlu1 %3498  ;;  %4862 = vmatpush1.bf16.msra.mxu0 %v3748_v42  ;;  %v3836_v59 = vsel %vm16902_vm8, %v3799_v38, %v13418_v12  ;;  %7558 = vmatprep.mubr.msk.bf16.mxu0 %vm4560_vm1, %v13471_v32  ;;  %v3839_v12 = vsel %vm16904_vm0, %v3801_v28, %v13660_v15  ;;  %vm16905_vm1 = vmmov %vm16894_vm2 }
 0x69d   :  { %4820 = vmatprep.subr.bf16.mxu1 %v3836_v59  ;;  %v3457_v47 = vpop.permute.xlu0 %3456  ;;  %4863 = vmatprep.subr.bf16.mxu0 %v16895_v34  ;;  %vm16908_vm2 = vmmov %vm16905_vm1 }
 0x69e   :  { %v3472_v9 = vsel %vm3460_vm6, %v3455_v35, %v3457_v47  ;;  %4821 = vmatpush1.bf16.msra.mxu1 %v3833_v56  ;;  %v3938_v48 = vsel %vm16908_vm2, %v13518_v30, %v3471_v19  ;;  %vm16914_vm15 = vmmov %vm16905_vm1 }
 0x69f   :  { %4822 = vmatprep.subr.bf16.mxu1 %v13504_v41  ;;  %v3941_v32 = vsel %vm16905_vm1, %v13544_v61, %v3472_v9  ;;  %v3512_v61 = vsel %vm16909_vm11, %v13763_v46, %v3499_v40  ;;  %v3976_v4 = vsel %vm16911_vm3, %v3938_v48, %v16910_v60  ;;  %v16916_v46 = vld [vmem:[#allocation89_spill] sm:$0xff]  ;;  %vm16917_vm8 = vmmov %vm16911_vm3  ;;  %vm16921_vm1 = vcmask 1043456  }
 0x6a0   :  { %v3538_v39 = vpop.permute.xlu1 %3537  ;;  %4864 = vmatpush1.bf16.msra.mxu0 %v3839_v12  ;;  %v3979_v51 = vsel %vm16907_vm7, %v3941_v32, %v16906_v26  ;;  %vm16922_vm7 = vmmov %vm16921_vm1  ;;  %vm16924_vm11 = vcmask 1046528  }
 0x6a1   :  { %v3501_v20 = vpop.permute.xlu0 %3500  ;;  %4865 = vmatprep.subr.bf16.mxu0 %v16895_v34  ;;  %vm16923_vm2 = vmmov %vm16921_vm1 }
 0x6a2   :  { %4823 = vmatpush1.bf16.msra.mxu1 %v13464_v8  ;;  %v3551_v8 = vsel %vm16912_vm13, %v13774_v36, %v3538_v39  ;;  %v3513_v30 = vsel %vm16913_vm9, %v3499_v40, %v3501_v20  ;;  %vm16925_vm3 = vmmov %vm16924_vm11 }
 0x6a3   :  { %4824 = vmatprep.subr.bf16.mxu1 %v3979_v51  ;;  %vm16926_vm13 = vmmov %vm16925_vm3 }
 0x6a4   :  { %v3459_v41 = vpop.permute.xlu1 %3458  ;;  %4866 = vmatpush1.bf16.msra.mxu0 %v13717_v6 }
 0x6a5   :  { %v3473_v15 = vsel %vm3460_vm6, %v3457_v47, %v3459_v41  ;;  %v3540_v45 = vpop.permute.xlu0 %3539  ;;  %4867 = vmatprep.subr.bf16.mxu0 %v16895_v34  ;;  %vm16918_vm6 = vcmask 1040384  }
 0x6a6   :  { %v3944_v29 = vsel %vm16914_vm15, %v13750_v31, %v3473_v15  ;;  %4825 = vmatpush1.bf16.msra.mxu1 %v3976_v4  ;;  %v3552_v6 = vsel %vm16915_vm12, %v3538_v39, %v3540_v45  ;;  %v4005_v25 = vsel %vm16918_vm6, %v16910_v60, %v3512_v61  ;;  %vm16919_vm14 = vmmov %vm16918_vm6  ;;  %vm16929_vm15 = vcmask 1041408  }
 0x6a7   :  { %v3982_v14 = vsel %vm16917_vm8, %v3944_v29, %v16916_v46  ;;  %v4007_v37 = vsel %vm16919_vm14, %v16906_v26, %v3513_v30  ;;  %vm16920_vm0 = vmmov %vm16918_vm6  ;;  %v4031_v31 = vsel %vm16921_vm1, %v4005_v25, %v3551_v8  ;;  %vm16931_vm8 = vcmask 1044480  }
 0x6a8   :  { %v3578_v52 = vpop.permute.xlu1 %3577  ;;  %4868 = vmatpush1.bf16.msra.mxu0 %v3982_v14  ;;  %v4009_v36 = vsel %vm16920_vm0, %v16916_v46, %v3501_v20  ;;  %v4033_v49 = vsel %vm16923_vm2, %v4007_v37, %v3552_v6  ;;  %vm16930_vm12 = vmmov %vm16929_vm15 }
 0x6a9   :  { %v3576_v33 = vpop.permute.xlu0 %3575  ;;  %4869 = vmatprep.subr.bf16.mxu0 %v16895_v34  ;;  %v4035_v44 = vsel %vm16922_vm7, %v4009_v36, %v3540_v45  ;;  %vm16932_vm6 = vmmov %vm16931_vm8  ;;  %vm16936_vm7 = vcmask 506880  }
 0x6aa   :  { %v3589_v54 = vsel %vm3158_vm10, %v13790_v2, %v3576_v33  ;;  %v3590_v24 = vsel %vm3158_vm10, %v3576_v33, %v3578_v52  ;;  %v4073_v21 = vsel %vm16925_vm3, %v4035_v44, %v3578_v52  ;;  %vm16927_vm10 = vcmask 523264   ;;  %vm16933_vm14 = vmmov %vm16930_vm12 }
 0x6ab   :  { %v4070_v55 = vsel %vm16924_vm11, %v4033_v49, %v3590_v24  ;;  %v4067_v16 = vsel %vm16926_vm13, %v4031_v31, %v3589_v54  ;;  %vm16928_vm9 = vmmov %vm16927_vm10 }
 0x6ac   :  { %v3616_v57 = vpop.permute.xlu1 %3615  ;;  %4826 = vmatprep.subr.bf16.mxu1 %v4070_v55  ;;  %4870 = vmatpush1.bf16.msra.mxu0 %v4073_v21  ;;  %vm16934_vm0 = vmmov %vm16928_vm9 }
 0x6ad   :  { %4827 = vmatpush1.bf16.msra.mxu1 %v4067_v16  ;;  %v3614_v23 = vpop.permute.xlu0 %3613  ;;  %4871 = vmatprep.subr.bf16.mxu0 %v16895_v34  ;;  %v4100_v28 = vsel %vm16933_vm14, %v3578_v52, %v3616_v57  ;;  %vm16935_vm1 = vmmov %vm16932_vm6  ;;  %vm16947_vm14 = vcmask 1042432  }
 0x6ae   :  { %v3627_v2 = vsel %vm3210_vm4, %v13810_v10, %v3614_v23  ;;  %v3628_v3 = vsel %vm3210_vm4, %v3614_v23, %v3616_v57  ;;  %vm16937_vm2 = vmmov %vm16936_vm7 }
 0x6af   :  { %v4098_v17 = vsel %vm16929_vm15, %v3590_v24, %v3628_v3  ;;  %v4096_v11 = vsel %vm16930_vm12, %v3589_v54, %v3627_v2  ;;  %vm16938_vm11 = vmmov %vm16937_vm2 }
 0x6b0   :  { %v3656_v58 = vpop.permute.xlu1 %3655  ;;  %vm16939_vm3 = vmmov %vm16937_vm2 }
 0x6b1   :  { %v3654_v35 = vpop.permute.xlu0 %3653  ;;  %vm16940_vm13 = vmmov %vm16937_vm2 }
 0x6b2   :  { %v3669_v63 = vsel %vm16927_vm10, %v13816_v18, %v3654_v35  ;;  %v3670_v50 = vsel %vm16928_vm9, %v3654_v35, %v3656_v58  ;;  %vm16941_vm10 = vmmov %vm16937_vm2 }
 0x6b3   :  { %v4135_v62 = vsel %vm16931_vm8, %v4098_v17, %v3670_v50  ;;  %v4132_v42 = vsel %vm16932_vm6, %v4096_v11, %v3669_v63  ;;  %vm16942_vm9 = vmmov %vm16937_vm2 }
 0x6b4   :  { %v4357_v38 = vpop.permute.xlu1 %4356  ;;  %4828 = vmatprep.subr.bf16.mxu1 %v4135_v62  ;;  %vm16943_vm15 = vmmov %vm16937_vm2 }
 0x6b5   :  { %4829 = vmatpush1.bf16.msra.mxu1 %v4132_v42  ;;  %v3658_v10 = vpop.permute.xlu0 %3657  ;;  %v4456_v9 = vsel %vm16937_vm2, %v13827_v13, %v4357_v38  ;;  %vm16944_vm12 = vmmov %vm16937_vm2 }
 0x6b6   :  { %v3671_v40 = vsel %vm16934_vm0, %v3656_v58, %v3658_v10  ;;  %vm16945_vm8 = vmmov %vm16937_vm2 }
 0x6b7   :  { %v4138_v18 = vsel %vm16935_vm1, %v4100_v28, %v3671_v40  ;;  %vm16946_vm6 = vmmov %vm16937_vm2 }
 0x6b8   :  { %v4385_v59 = vpop.permute.xlu1 %4384  ;;  %4872 = vmatpush1.bf16.msra.mxu0 %v4138_v18  ;;  %vm16948_vm0 = vmmov %vm16947_vm14 }
 0x6b9   :  { %v4359_v47 = vpop.permute.xlu0 %4358  ;;  %4873 = vmatprep.subr.bf16.mxu0 %v16895_v34  ;;  %v4469_v20 = vsel %vm16940_vm13, %v13843_v1, %v4385_v59  ;;  %vm16949_vm1 = vmmov %vm16937_vm2  ;;  %vm16951_vm2 = vcmask 1031168  }
 0x6ba   :  { %v4457_v56 = vsel %vm16936_vm7, %v4357_v38, %v4359_v47  ;;  %vm16950_vm7 = vmmov %vm16948_vm0 }
 0x6bb   :  { %4830 = vmatprep.subr.bf16.mxu1 %v4457_v56  ;;  %v8626_v56 = vld [vmem:[%s15398_s5 + $0x40] sm:$0xff]   ;;  %vm16954_vm13 = vmmov %vm16951_vm2 }
 0x6bc   :  { %v4361_v19 = vpop.permute.xlu1 %4360  ;;  %4831 = vmatpush1.bf16.msra.mxu1 %v4456_v9  ;;  %v8627_v9 = vld [vmem:[%s15398_s5] sm:$0xff]  }
 0x6bd   :  { %v4458_v12 = vsel %vm16938_vm11, %v4359_v47, %v4361_v19  ;;  %v4387_v32 = vpop.permute.xlu0 %4386  ;;  %v8628_v19 = vld [vmem:[%s15398_s5 + $0x48] sm:$0xff]   ;;  %vm16952_vm11 = vmmov %vm16951_vm2 }
 0x6be   :  { %4874 = vmatpush1.bf16.msra.mxu0 %v4458_v12  ;;  %v4470_v39 = vsel %vm16939_vm3, %v4385_v59, %v4387_v32  ;;  %v8629_v12 = vld [vmem:[%s15398_s5 + $0x8] sm:$0xff]   ;;  %vm16953_vm3 = vmmov %vm16951_vm2 }
 0x6bf   :  { %4832 = vmatprep.subr.bf16.mxu1 %v4470_v39  ;;  %4875 = vmatprep.subr.bf16.mxu0 %v16895_v34  ;;  %v8631_v39 = vld [vmem:[%s15398_s5 + $0x10] sm:$0xff]  }
 0x6c0   :  { %v4415_v26 = vpop.permute.xlu1 %4414  ;;  %4833 = vmatpush1.bf16.msra.mxu1 %v4469_v20  ;;  %v8632_v20 = vld [vmem:[%s15398_s5 + $0x58] sm:$0xff]  }
 0x6c1   :  { %v4413_v51 = vpop.permute.xlu0 %4412 }
 0x6c2   :  { %v4483_v48 = vsel %vm16941_vm10, %v4413_v51, %v4415_v26  ;;  %v4482_v13 = vsel %vm16942_vm9, %v13851_v7, %v4413_v51  ;;  %vm16955_vm10 = vmmov %vm16951_vm2 }
 0x6c3   :  { %4834 = vmatprep.subr.bf16.mxu1 %v4483_v48  ;;  %vm16956_vm9 = vmmov %vm16951_vm2 }
 0x6c4   :  { %4835 = vmatpush1.bf16.msra.mxu1 %v4482_v13 }
 0x6c5   :  { %v4389_v41 = vpop.permute.xlu0 %4388 }
 0x6c6   :  { %v4471_v61 = vsel %vm16943_vm15, %v4387_v32, %v4389_v41  ;;  %v8630_v32 = vld [vmem:[%s15398_s5 + $0x50] sm:$0xff]   ;;  %vm16957_vm15 = vmmov %vm16951_vm2 }
 0x6c7   :  { %4876 = vmatpush1.bf16.msra.mxu0 %v4471_v61  ;;  %v8634_v61 = vld [vmem:[%s15398_s5 + $0x60] sm:$0xff]  }
 0x6c8   :  { %v4441_v15 = vpop.permute.xlu1 %4440  ;;  %4877 = vmatprep.subr.bf16.mxu0 %v16895_v34 }
 0x6c9   :  { %v4495_v60 = vsel %vm16945_vm8, %v13863_v0, %v4441_v15  ;;  %vm16959_vm8 = vmmov %vm16951_vm2 }
 0x6ca   :  { %v4595_v8 = vsel %vm16947_vm14, %v4495_v60, 0  ;;  %vm16961_vm14 = vmmov %vm16951_vm2 }
 0x6cc   :  { %v4417_v1 = vpop.permute.xlu1 %4416 }
 0x6cd   :  { %v4484_v45 = vsel %vm16944_vm12, %v4415_v26, %v4417_v1  ;;  %v8633_v26 = vld [vmem:[%s15398_s5 + $0x18] sm:$0xff]   ;;  %vm16958_vm12 = vmmov %vm16951_vm2 }
 0x6ce   :  { %4878 = vmatpush1.bf16.msra.mxu0 %v4484_v45 }
 0x6cf   :  { %4879 = vmatprep.subr.bf16.mxu0 %v16895_v34 }
 0x6d1   :  { %v4443_v4 = vpop.permute.xlu0 %4442 }
 0x6d2   :  { %v4496_v7 = vsel %vm16946_vm6, %v4441_v15, %v4443_v4  ;;  %v8635_v15 = vld [vmem:[%s15398_s5 + $0x20] sm:$0xff]   ;;  %vm16960_vm6 = vmmov %vm16951_vm2 }
 0x6d3   :  { %7556 = vmatprep.subr.msk.bf16.mxu1 %vm16948_vm0, %v4496_v7  ;;  %vm16962_vm0 = vmmov %vm16951_vm2 }
 0x6d4   :  { %4837 = vmatpush1.bf16.msra.mxu1 %v4595_v8  ;;  %v8636_v8 = vld [vmem:[%s15398_s5 + $0x68] sm:$0xff]  }
 0x6d5   :  { %v4445_v30 = vpop.permute.xlu0 %4444  ;;  %7707 = vmatprep.subr.bf16.mxu1 %v8626_v56 }
 0x6d6   :  { %v4497_v29 = vsel %vm16949_vm1, %v4443_v4, %v4445_v30  ;;  %vm16963_vm1 = vmmov %vm16962_vm0 }
 0x6d7   :  { %v4601_v6 = vsel %vm16950_vm7, %v4497_v29, 0  ;;  %4851 = vmatmul.mubr.bf16.vlgmr.msra.gmra.mrb[24].mxu1 %v13872_v22  ;;  %vm16964_vm7 = vmmov %vm16962_vm0 }
 0x6d8   :  { %4880 = vmatpush1.bf16.msra.mxu0 %v4601_v6  ;;  %7708 = vmatpush3.bf16.msra.mxu1 %v8627_v9 }
 0x6d9   :  { %7709 = vmatprep.subr.bf16.mxu1 %v8628_v19 }
 0x6db   :  { %4894 = vmatmul.mubr.bf16.vlgmr.msra.gmra.mrb[28].mxu0 %v13872_v22 }
 0x6dc   :  { %7710 = vmatpush3.bf16.msra.mxu1 %v8629_v12 }
 0x6dd   :  { %v13987_v46 = vpop.permute.xlu1 %4543  ;;  %7711 = vmatprep.subr.bf16.mxu1 %v8630_v32 }
 0x6de   :  { %v13991_v0 = vadd.f32 %v13834_v27, %v13987_v46  ;;  %v14008_v27 = vadd.f32 %v13831_v43, %v13987_v46 }
 0x6e0   :  { %v4903_v33 = vmax.f32 %v13991_v0, 0.0  ;;  %v4902_v23 = vmax.f32 %v14008_v27, 0.0  ;;  %7712 = vmatpush3.bf16.msra.mxu1 %v8631_v39  ;;  %v8640_v0 = vld [vmem:[%s15398_s5 + $0x78] sm:$0xff]  }
 0x6e1   :  { %7713 = vmatprep.subr.bf16.mxu1 %v8632_v20 }
 0x6e4   :  { %7714 = vmatpush3.bf16.msra.mxu1 %v8633_v26 }
 0x6e5   :  { %7715 = vmatprep.subr.bf16.mxu1 %v8634_v61  ;;  %v8638_v61 = vld [vmem:[%s15398_s5 + $0x70] sm:$0xff]  }
 0x6e6   :  { %v4680_v14 = vpop.f32.mrb[16].mxu1  ;;  %v13993_v25 = vpop.permute.xlu0 %4548 }
 0x6e7   :  { %v13997_v52 = vadd.f32 %v13838_v5, %v13993_v25  ;;  %v4682_v37 = vpop.f32.mrb[17].mxu1  ;;  %v14000_v36 = vadd.f32 %v4680_v14, %v13987_v46  ;;  %v14012_v44 = vadd.f32 %v13836_v53, %v13993_v25 }
 0x6e8   :  { %v14004_v22 = vadd.f32 %v4682_v37, %v13987_v46  ;;  %v4684_v31 = vpop.f32.mrb[18].mxu1  ;;  %7716 = vmatpush3.bf16.msra.mxu1 %v8635_v15 }
 0x6e9   :  { %v4916_v5 = vmax.f32 %v13997_v52, 0.0  ;;  %v14016_v54 = vadd.f32 %v4684_v31, %v13993_v25  ;;  %v4686_v24 = vpop.f32.mrb[19].mxu1  ;;  %v4904_v49 = vmax.f32 %v14000_v36, 0.0  ;;  %v4915_v2 = vmax.f32 %v14012_v44, 0.0  ;;  %v8637_v31 = vld [vmem:[%s15398_s5 + $0x28] sm:$0xff]   ;;  %7717 = vmatprep.subr.bf16.mxu1 %v8636_v8  ;;  %v8639_v44 = vld [vmem:[%s15398_s5 + $0x30] sm:$0xff]  }
 0x6ea   :  { %v4905_v55 = vmax.f32 %v14004_v22, 0.0  ;;  %v14021_v21 = vadd.f32 %v4686_v24, %v13993_v25  ;;  %v8641_v36 = vld [vmem:[%s15398_s5 + $0x38] sm:$0xff]  }
 0x6eb   :  { %v4917_v43 = vmax.f32 %v14016_v54, 0.0  ;;  %v8365_v53 = vpack.i.bf16 %v4904_v49, %v4903_v33  ;;  %v8380_v58 = vpack.i.bf16 %v4915_v2, %v4902_v23 }
 0x6ec   :  { %v8370_v16 = vpack.i.bf16 %v4916_v5, %v4905_v55  ;;  %v4918_v57 = vmax.f32 %v14021_v21, 0.0  ;;  %7718 = vmatpush3.bf16.msra.mxu1 %v8637_v31 }
 0x6ed   :  { %8366 = vrot.lane.b32.xlu1 %v8365_v53, %s8728_s28  ;;  %7719 = vmatprep.subr.bf16.mxu1 %v8638_v61 }
 0x6ee   :  { %v8375_v3 = vpack.i.bf16 %v4918_v57, %v4917_v43  ;;  %8371 = vrot.lane.b32.xlu0 %v8370_v16, %s8728_s28 }
 0x6f0   :  { %7720 = vmatpush3.bf16.msra.mxu1 %v8639_v44 }
 0x6f1   :  { %8376 = vrot.lane.b32.xlu1 %v8375_v3, %s8728_s28  ;;  %7721 = vmatprep.subr.bf16.mxu1 %v8640_v0 }
 0x6f2   :  { %8381 = vrot.lane.b32.xlu0 %v8380_v58, %s8728_s28 }
 0x6f4   :  { %7722 = vmatpush3.bf16.msra.mxu1 %v8641_v36 }
 0x6f7   :  { %v4723_v35 = vpop.f32.mrb[20].mxu0 }
 0x6f8   :  { %v14048_v63 = vadd.f32 %v4723_v35, %v13987_v46  ;;  %v4725_v50 = vpop.f32.mrb[21].mxu0 }
 0x6f9   :  { %v14051_v17 = vadd.f32 %v4725_v50, %v13987_v46  ;;  %v4727_v11 = vpop.f32.mrb[22].mxu0 }
 0x6fa   :  { %v4906_v62 = vmax.f32 %v14048_v63, 0.0  ;;  %v14055_v42 = vadd.f32 %v4727_v11, %v13993_v25  ;;  %v4729_v38 = vpop.f32.mrb[23].mxu0 }
 0x6fb   :  { %v4907_v10 = vmax.f32 %v14051_v17, 0.0  ;;  %v14059_v28 = vadd.f32 %v4729_v38, %v13993_v25 }
 0x6fc   :  { %v4919_v40 = vmax.f32 %v14055_v42, 0.0  ;;  %v8659_v42 = vld [vmem:[%s15398_s5 + $0x100] sm:$0xff]  }
 0x6fd   :  { %v8385_v18 = vpack.i.bf16 %v4907_v10, %v4906_v62  ;;  %v4920_v59 = vmax.f32 %v14059_v28, 0.0 }
 0x6ff   :  { %v8390_v47 = vpack.i.bf16 %v4920_v59, %v4919_v40  ;;  %8386 = vrot.lane.b32.xlu1 %v8385_v18, %s8728_s28 }
 0x701   :  { %8391 = vrot.lane.b32.xlu0 %v8390_v47, %s8728_s28 }
 0x75f   :  { %v8367_v48 = vpop.permute.xlu1 %8366 }
 0x760   :  { %v14097_v51 = vpop.permute.xlu0 %8371  ;;  %v8369_v60 = vunpack.i.h.bf16 %v8367_v48  ;;  %v8368_v4 = vunpack.i.l.bf16 %v8367_v48 }
 0x761   :  { %v8374_v30 = vunpack.i.h.bf16 %v14097_v51  ;;  %v8373_v24 = vunpack.i.l.bf16 %v14097_v51 }
 0x762   :  { %v5008_v56 = vsel %vm16953_vm3, %v8368_v4, %v8369_v60 }
 0x763   :  { %v14099_v41 = vpop.permute.xlu1 %8376  ;;  %v5009_v27 = vsel %vm16956_vm9, %v8369_v60, %v8373_v24  ;;  %vm16970_vm9 = vmmov %vm16962_vm0 }
 0x764   :  { %v8382_v13 = vpop.permute.xlu0 %8381  ;;  %v8379_v29 = vunpack.i.h.bf16 %v14099_v41  ;;  %v8378_v6 = vunpack.i.l.bf16 %v14099_v41  ;;  %v14186_v52 = vmax.f32 %v4904_v49, %v5009_v27 }
 0x765   :  { %v8384_v1 = vunpack.i.h.bf16 %v8382_v13  ;;  %v8383_v45 = vunpack.i.l.bf16 %v8382_v13 }
 0x766   :  { %v5020_v9 = vsel %vm16954_vm13, %v8374_v30, %v8378_v6  ;;  %v5021_v19 = vsel %vm16955_vm10, %v8378_v6, %v8379_v29  ;;  %vm16969_vm10 = vmmov %vm16962_vm0 }
 0x767   :  { %v5019_v3 = vsel %vm16951_vm2, %v8384_v1, %v8374_v30  ;;  %v5007_v58 = vsel %vm16952_vm11, %v8383_v45, %v8368_v4  ;;  %v14169_v1 = vmax.f32 %v4916_v5, %v5020_v9  ;;  %v14173_v45 = vmax.f32 %v4917_v43, %v5021_v19 }
 0x768   :  { %v14141_v39 = vmax.f32 %v4915_v2, %v5019_v3  ;;  %v14145_v20 = vmax.f32 %v4902_v23, %v5007_v58  ;;  %v14182_v4 = vmax.f32 %v4903_v33, %v5008_v56  ;;  %vm16965_vm2 = vcmask 523264  }
 0x769   :  { %vm16966_vm11 = vmmov %vm16965_vm2 }
 0x76a   :  { %v4766_v7 = vpop.f32.mrb[20].mxu1  ;;  %v8405_v43 = vpack.i.bf16 %v14141_v39, %v14145_v20  ;;  %v8410_v6 = vpack.i.bf16 %v14186_v52, %v14182_v4  ;;  %vm16967_vm3 = vmmov %vm16965_vm2 }
 0x76b   :  { %v14114_v14 = vadd.f32 %v4766_v7, %v13987_v46  ;;  %v4768_v37 = vpop.f32.mrb[21].mxu1  ;;  %v8415_v7 = vpack.i.bf16 %v14173_v45, %v14169_v1  ;;  %vm16968_vm13 = vmmov %vm16965_vm2 }
 0x76c   :  { %v14121_v53 = vadd.f32 %v4768_v37, %v13987_v46  ;;  %v4770_v16 = vpop.f32.mrb[22].mxu1  ;;  %v8642_v37 = vld [vmem:[%s15398_s5 + $0xc0] sm:$0xff]  }
 0x76d   :  { %v4908_v35 = vmax.f32 %v14114_v14, 0.0  ;;  %v14127_v50 = vadd.f32 %v4770_v16, %v13993_v25  ;;  %v4772_v11 = vpop.f32.mrb[23].mxu1  ;;  %7729 = vmatprep.subr.bf16.mxu1 %v8642_v37 }
 0x76e   :  { %v4909_v38 = vmax.f32 %v14121_v53, 0.0  ;;  %v14131_v18 = vadd.f32 %v4772_v11, %v13993_v25  ;;  %v4809_v47 = vpop.f32.mrb[24].mxu0  ;;  %v8644_v53 = vld [vmem:[%s15398_s5 + $0xc8] sm:$0xff]  }
 0x76f   :  { %v4921_v12 = vmax.f32 %v14127_v50, 0.0  ;;  %v4811_v32 = vpop.f32.mrb[25].mxu0  ;;  %v14162_v23 = vadd.f32 %v4809_v47, %v13987_v46 }
 0x770   :  { %v8395_v26 = vpack.i.bf16 %v4909_v38, %v4908_v35  ;;  %v4922_v48 = vmax.f32 %v14131_v18, 0.0  ;;  %v4813_v13 = vpop.f32.mrb[26].mxu0  ;;  %v14165_v2 = vadd.f32 %v4811_v32, %v13987_v46  ;;  %v8645_v18 = vld [vmem:[%s15398_s5 + $0x88] sm:$0xff]  }
 0x771   :  { %v4815_v15 = vpop.f32.mrb[27].mxu0  ;;  %v14189_v5 = vadd.f32 %v4813_v13, %v13993_v25  ;;  %v4910_v33 = vmax.f32 %v14162_v23, 0.0  ;;  %v14227_v3 = vpop.permute.xlu1 %8386 }
 0x772   :  { %v8400_v60 = vpack.i.bf16 %v4922_v48, %v4921_v12  ;;  %8396 = vrot.lane.b32.xlu1 %v8395_v26, %s8728_s28  ;;  %v14192_v54 = vadd.f32 %v4815_v15, %v13993_v25  ;;  %v4911_v49 = vmax.f32 %v14165_v2, 0.0  ;;  %v8389_v11 = vunpack.i.h.bf16 %v14227_v3 }
 0x773   :  { %v4923_v8 = vmax.f32 %v14189_v5, 0.0  ;;  %v14229_v58 = vpop.permute.xlu0 %8391  ;;  %v8388_v47 = vunpack.i.l.bf16 %v14227_v3  ;;  %v8647_v5 = vld [vmem:[%s15398_s5 + $0x90] sm:$0xff]  }
 0x774   :  { %8401 = vrot.lane.b32.xlu0 %v8400_v60, %s8728_s28  ;;  %v4924_v30 = vmax.f32 %v14192_v54, 0.0  ;;  %v8420_v31 = vpack.i.bf16 %v4911_v49, %v4910_v33  ;;  %v8394_v9 = vunpack.i.h.bf16 %v14229_v58  ;;  %v8393_v19 = vunpack.i.l.bf16 %v14229_v58 }
 0x775   :  { %v5010_v44 = vsel %vm16957_vm15, %v8373_v24, %v8388_v47  ;;  %v5011_v27 = vsel %vm16958_vm12, %v8388_v47, %v8389_v11  ;;  %vm16971_vm15 = vmmov %vm16962_vm0 }
 0x776   :  { %8406 = vrot.lane.b32.xlu1 %v8405_v43, %s8737_s25  ;;  %v8425_v16 = vpack.i.bf16 %v4924_v30, %v4923_v8  ;;  %v5022_v51 = vsel %vm16959_vm8, %v8379_v29, %v8393_v19  ;;  %v5023_v24 = vsel %vm16960_vm6, %v8393_v19, %v8394_v9  ;;  %vm16972_vm12 = vmmov %vm16962_vm0 }
 0x777   :  { %v14280_v22 = vmax.f32 %v4918_v57, %v5022_v51  ;;  %v8658_v57 = vld [vmem:[%s15398_s5 + $0x140] sm:$0xff]   ;;  %v8667_v51 = vld [vmem:[%s15398_s5 + $0x118] sm:$0xff]   ;;  %vm16973_vm8 = vmmov %vm16962_vm0 }
 0x778   :  { %8416 = vrot.lane.b32.xlu0 %v8415_v7, %s8737_s25  ;;  %7751 = vmatprep.subr.bf16.mxu0 %v8658_v57  ;;  %vm16974_vm6 = vmmov %vm16962_vm0 }
 0x779   :  { %7752 = vmatpush3.bf16.msra.mxu0 %v8659_v42 }
 0x77a   :  { %8411 = vrot.lane.b32.xlu1 %v8410_v6, %s8737_s25 }
 0x77c   :  { %8421 = vrot.lane.b32.xlu0 %v8420_v31, %s8728_s28  ;;  %v14264_v31 = vmax.f32 %v4905_v55, %v5010_v44  ;;  %v14284_v55 = vmax.f32 %v4919_v40, %v5023_v24  ;;  %v8670_v24 = vld [vmem:[%s15398_s5 + $0x160] sm:$0xff]  }
 0x77e   :  { %8426 = vrot.lane.b32.xlu1 %v8425_v16, %s8728_s28  ;;  %v14268_v16 = vmax.f32 %v4906_v62, %v5011_v27  ;;  %v8662_v27 = vld [vmem:[%s15398_s5 + $0x150] sm:$0xff]  }
 0x780   :  { %v8440_v21 = vpack.i.bf16 %v14268_v16, %v14264_v31 }
 0x7aa   :  { %v4852_v56 = vpop.f32.mrb[24].mxu1 }
 0x7ab   :  { %v14236_v32 = vadd.f32 %v4852_v56, %v13987_v46  ;;  %v4854_v26 = vpop.f32.mrb[25].mxu1 }
 0x7ac   :  { %v14239_v13 = vadd.f32 %v4854_v26, %v13987_v46  ;;  %v4856_v61 = vpop.f32.mrb[26].mxu1  ;;  %v8445_v26 = vpack.i.bf16 %v14284_v55, %v14280_v22 }
 0x7ad   :  { %v4912_v15 = vmax.f32 %v14236_v32, 0.0  ;;  %v14249_v60 = vadd.f32 %v4856_v61, %v13993_v25  ;;  %v4858_v43 = vpop.f32.mrb[27].mxu1  ;;  %v8661_v61 = vld [vmem:[%s15398_s5 + $0x108] sm:$0xff]  }
 0x7ae   :  { %v4913_v0 = vmax.f32 %v14239_v13, 0.0  ;;  %v14253_v36 = vadd.f32 %v4858_v43, %v13993_v25  ;;  %v4895_v7 = vpop.f32.mrb[28].mxu0  ;;  %v8663_v43 = vld [vmem:[%s15398_s5 + $0x110] sm:$0xff]   ;;  %v8668_v13 = vld [vmem:[%s15398_s5 + $0x1c8] sm:$0xff]  }
 0x7af   :  { %v4925_v6 = vmax.f32 %v14249_v60, 0.0  ;;  %v4897_v37 = vpop.f32.mrb[29].mxu0  ;;  %v14291_v62 = vadd.f32 %v4895_v7, %v13987_v46  ;;  %v8660_v46 = vld [vmem:[%s15398_s5 + $0x148] sm:$0xff]   ;;  %v8666_v7 = vld [vmem:[%s15398_s5 + $0x158] sm:$0xff]  }
 0x7b0   :  { %v8430_v41 = vpack.i.bf16 %v4913_v0, %v4912_v15  ;;  %v4926_v29 = vmax.f32 %v14253_v36, 0.0  ;;  %v4898_v47 = vpop.f32.mrb[30].mxu0  ;;  %7753 = vmatprep.subr.bf16.mxu0 %v8660_v46  ;;  %v8671_v37 = vld [vmem:[%s15398_s5 + $0x120] sm:$0xff]   ;;  %v8682_v46 = vld [vmem:[%s15398_s5 + $0x178] sm:$0xff]   ;;  %v8672_v36 = vld [vmem:[%s15398_s5 + $0x1d0] sm:$0xff]  }
 0x7b1   :  { %v14276_v56 = vadd.f32 %v4898_v47, %v13993_v25  ;;  %v4900_v19 = vpop.f32.mrb[31].mxu0  ;;  %v4914_v40 = vmax.f32 %v14291_v62, 0.0  ;;  %7754 = vmatpush3.bf16.msra.mxu0 %v8661_v61  ;;  %v8675_v47 = vld [vmem:[%s15398_s5 + $0x128] sm:$0xff]  }
 0x7b2   :  { %v8435_v63 = vpack.i.bf16 %v4926_v29, %v4925_v6  ;;  %8431 = vrot.lane.b32.xlu0 %v8430_v41, %s8728_s28  ;;  %7755 = vmatprep.subr.bf16.mxu0 %v8662_v27  ;;  %v8674_v41 = vld [vmem:[%s15398_s5 + $0x168] sm:$0xff]  }
 0x7b3   :  { %v4927_v25 = vmax.f32 %v14276_v56, 0.0 }
 0x7b4   :  { %8436 = vrot.lane.b32.xlu1 %v8435_v63, %s8728_s28  ;;  %v8678_v63 = vld [vmem:[%s15398_s5 + $0x170] sm:$0xff]  }
 0x7b5   :  { %v8450_v44 = vpack.i.bf16 %v4927_v25, %v4914_v40  ;;  %7756 = vmatpush3.bf16.msra.mxu0 %v8663_v43 }
 0x7b6   :  { %8441 = vrot.lane.b32.xlu0 %v8440_v21, %s8737_s25  ;;  %7757 = vmatprep.subr.bf16.mxu0 %v8666_v7  ;;  %v8679_v21 = vld [vmem:[%s15398_s5 + $0x130] sm:$0xff]   ;;  %v8683_v7 = vld [vmem:[%s15398_s5 + $0x138] sm:$0xff]  }
 0x7b8   :  { %8446 = vrot.lane.b32.xlu1 %v8445_v26, %s8737_s25 }
 0x7b9   :  { %7758 = vmatpush3.bf16.msra.mxu0 %v8667_v51 }
 0x7ba   :  { %8451 = vrot.lane.b32.xlu0 %v8450_v44, %s8728_s28  ;;  %7759 = vmatprep.subr.bf16.mxu0 %v8670_v24 }
 0x7bd   :  { %7760 = vmatpush3.bf16.msra.mxu0 %v8671_v37 }
 0x7be   :  { %7761 = vmatprep.subr.bf16.mxu0 %v8674_v41 }
 0x7c1   :  { %7762 = vmatpush3.bf16.msra.mxu0 %v8675_v47 }
 0x7c2   :  { %7763 = vmatprep.subr.bf16.mxu0 %v8678_v63 }
 0x7c5   :  { %7764 = vmatpush3.bf16.msra.mxu0 %v8679_v21 }
 0x7c6   :  { %7765 = vmatprep.subr.bf16.mxu0 %v8682_v46 }
 0x7c9   :  { %7766 = vmatpush3.bf16.msra.mxu0 %v8683_v7 }
 0x7e4   :  { %v8397_v19 = vpop.permute.xlu1 %8396 }
 0x7e5   :  { %v8399_v57 = vunpack.i.h.bf16 %v8397_v19  ;;  %v8398_v42 = vunpack.i.l.bf16 %v8397_v19 }
 0x7e6   :  { %v8402_v26 = vpop.permute.xlu0 %8401 }
 0x7e7   :  { %v5012_v61 = vsel %vm16961_vm14, %v8389_v11, %v8398_v42  ;;  %v5013_v44 = vsel %vm16962_vm0, %v8398_v42, %v8399_v57  ;;  %v8404_v27 = vunpack.i.h.bf16 %v8402_v26  ;;  %v8403_v43 = vunpack.i.l.bf16 %v8402_v26  ;;  %vm16975_vm14 = vmmov %vm16962_vm0 }
 0x7e8   :  { %v14362_v51 = vmax.f32 %v4907_v10, %v5012_v61  ;;  %v14366_v24 = vmax.f32 %v4908_v35, %v5013_v44  ;;  %v8407_v3 = vpop.permute.xlu1 %8406 }
 0x7e9   :  { %v5024_v11 = vsel %vm16963_vm1, %v8394_v9, %v8403_v43  ;;  %v5025_v37 = vsel %vm16964_vm7, %v8403_v43, %v8404_v27  ;;  %v8409_v35 = vunpack.i.h.bf16 %v8407_v3  ;;  %v8408_v47 = vunpack.i.l.bf16 %v8407_v3  ;;  %vm16976_vm1 = vmmov %vm16965_vm2 }
 0x7ea   :  { %v14374_v41 = vmax.f32 %v4920_v59, %v5024_v11  ;;  %v14378_v17 = vmax.f32 %v4921_v12, %v5025_v37  ;;  %v14380_v10 = vpop.permute.xlu0 %8416  ;;  %v8455_v14 = vpack.i.bf16 %v14366_v24, %v14362_v51  ;;  %vm16977_vm7 = vmmov %vm16976_vm1 }
 0x7eb   :  { %v8419_v58 = vunpack.i.h.bf16 %v14380_v10  ;;  %v8418_v9 = vunpack.i.l.bf16 %v14380_v10 }
 0x7ec   :  { %8456 = vrot.lane.b32.xlu1 %v8455_v14, %s8737_s25  ;;  %v14387_v28 = vpop.permute.xlu1 %8411  ;;  %v8460_v59 = vpack.i.bf16 %v14378_v17, %v14374_v41 }
 0x7ed   :  { %v5174_v50 = vsel %vm16965_vm2, %v8409_v35, %v8418_v9  ;;  %v5175_v12 = vsel %vm16966_vm11, %v8418_v9, %v8419_v58  ;;  %v8414_v19 = vunpack.i.h.bf16 %v14387_v28  ;;  %v8413_v63 = vunpack.i.l.bf16 %v14387_v28  ;;  %vm16978_vm2 = vmmov %vm16976_vm1 }
 0x7ee   :  { %v14397_v21 = vpop.permute.xlu0 %8421  ;;  %8461 = vrot.lane.b32.xlu0 %v8460_v59, %s8737_s25  ;;  %v5225_v44 = vmax.f32 %v14141_v39, %v5174_v50  ;;  %v5226_v11 = vmax.f32 %v14169_v1, %v5175_v12  ;;  %v8649_v12 = vld [vmem:[%s15398_s5 + $0x98] sm:$0xff]   ;;  %vm16979_vm11 = vmmov %vm16976_vm1 }
 0x7ef   :  { %v5162_v42 = vsel %vm16967_vm3, %v8408_v47, %v8413_v63  ;;  %v5163_v46 = vsel %vm16968_vm13, %v8413_v63, %v8414_v19  ;;  %v8424_v26 = vunpack.i.h.bf16 %v14397_v21  ;;  %v8423_v61 = vunpack.i.l.bf16 %v14397_v21  ;;  %v8650_v63 = vld [vmem:[%s15398_s5 + $0xe0] sm:$0xff]   ;;  %vm16980_vm3 = vmmov %vm16962_vm0 }
 0x7f0   :  { %v5212_v43 = vmax.f32 %v14145_v20, %v5162_v42  ;;  %v14408_v7 = vpop.permute.xlu1 %8426  ;;  %v5213_v3 = vmax.f32 %v14182_v4, %v5163_v46  ;;  %v8651_v42 = vld [vmem:[%s15398_s5 + $0xa0] sm:$0xff]   ;;  %v8652_v46 = vld [vmem:[%s15398_s5 + $0xe8] sm:$0xff]   ;;  %vm16981_vm13 = vmmov %vm16962_vm0 }
 0x7f1   :  { %v5014_v37 = vsel %vm16969_vm10, %v8399_v57, %v8423_v61  ;;  %v5015_v14 = vsel %vm16970_vm9, %v8423_v61, %v8424_v26  ;;  %v8429_v35 = vunpack.i.h.bf16 %v14408_v7  ;;  %v8428_v9 = vunpack.i.l.bf16 %v14408_v7  ;;  %v8643_v57 = vld [vmem:[%s15398_s5 + $0x80] sm:$0xff]   ;;  %v8653_v61 = vld [vmem:[%s15398_s5 + $0xa8] sm:$0xff]   ;;  %v8656_v7 = vld [vmem:[%s15398_s5 + $0xf8] sm:$0xff]  }
 0x7f2   :  { %v14420_v39 = vmax.f32 %v4909_v38, %v5014_v37  ;;  %v14424_v20 = vmax.f32 %v4910_v33, %v5015_v14  ;;  %v5239_v4 = vpack.c.bf16 %v5226_v11, %v5213_v3  ;;  %v5238_v1 = vpack.c.bf16 %v5225_v44, %v5212_v43  ;;  %v8690_v38 = vld [vmem:[%s15398_s5 + $0x240] sm:$0xff]   ;;  %v8654_v44 = vld [vmem:[%s15398_s5 + $0xf0] sm:$0xff]   ;;  %v8657_v3 = vld [vmem:[%s15398_s5 + $0xb8] sm:$0xff]  }
 0x7f3   :  { %v5026_v47 = vsel %vm16971_vm15, %v8404_v27, %v8428_v9  ;;  %v5027_v59 = vsel %vm16972_vm12, %v8428_v9, %v8429_v35  ;;  %7795 = vmatprep.subr.bf16.mxu0 %v8690_v38  ;;  %v8655_v43 = vld [vmem:[%s15398_s5 + $0xb0] sm:$0xff]   ;;  %v8664_v11 = vld [vmem:[%s15398_s5 + $0x1c0] sm:$0xff]   ;;  %vm16982_vm10 = vmmov %vm16976_vm1 }
 0x7f4   :  { %v14439_v23 = vmax.f32 %v4922_v48, %v5026_v47  ;;  %v14443_v33 = vmax.f32 %v4923_v8, %v5027_v59  ;;  %6072 = vmatprep.mubr.bf16.mxu1 %v5239_v4  ;;  %v8465_v27 = vpack.i.bf16 %v14424_v20, %v14420_v39  ;;  %v8646_v48 = vld [vmem:[%s15398_s5 + $0xd0] sm:$0xff]   ;;  %v8648_v8 = vld [vmem:[%s15398_s5 + $0xd8] sm:$0xff]   ;;  %vm16983_vm9 = vmmov %vm16976_vm1 }
 0x7f5   :  { %6073 = vmatmul.mubr.bf16.vlgmr.msra.gmra.mrb[28].mxu1 %v5238_v1  ;;  %vm16984_vm15 = vmmov %vm16976_vm1 }
 0x7f6   :  { %8466 = vrot.lane.b32.xlu1 %v8465_v27, %s8737_s25  ;;  %v8470_v50 = vpack.i.bf16 %v14443_v33, %v14439_v23  ;;  %7730 = vmatpush3.bf16.msra.mxu1 %v8643_v57  ;;  %vm16985_vm12 = vmmov %vm16976_vm1 }
 0x7f7   :  { %7731 = vmatprep.subr.bf16.mxu1 %v8644_v53 }
 0x7f8   :  { %8471 = vrot.lane.b32.xlu0 %v8470_v50, %s8737_s25 }
 0x7fa   :  { %7732 = vmatpush3.bf16.msra.mxu1 %v8645_v18 }
 0x7fb   :  { %7733 = vmatprep.subr.bf16.mxu1 %v8646_v48 }
 0x7fe   :  { %7734 = vmatpush3.bf16.msra.mxu1 %v8647_v5 }
 0x7ff   :  { %7735 = vmatprep.subr.bf16.mxu1 %v8648_v8 }
 0x802   :  { %7736 = vmatpush3.bf16.msra.mxu1 %v8649_v12 }
 0x803   :  { %7737 = vmatprep.subr.bf16.mxu1 %v8650_v63 }
 0x806   :  { %7738 = vmatpush3.bf16.msra.mxu1 %v8651_v42 }
 0x807   :  { %7739 = vmatprep.subr.bf16.mxu1 %v8652_v46 }
 0x80a   :  { %7740 = vmatpush3.bf16.msra.mxu1 %v8653_v61 }
 0x80b   :  { %7741 = vmatprep.subr.bf16.mxu1 %v8654_v44  ;;  %v8676_v44 = vld [vmem:[%s15398_s5 + $0x1d8] sm:$0xff]  }
 0x80e   :  { %7742 = vmatpush3.bf16.msra.mxu1 %v8655_v43  ;;  %v8677_v43 = vld [vmem:[%s15398_s5 + $0x198] sm:$0xff]  }
 0x80f   :  { %7743 = vmatprep.subr.bf16.mxu1 %v8656_v7  ;;  %v8680_v7 = vld [vmem:[%s15398_s5 + $0x1e0] sm:$0xff]  }
 0x812   :  { %7744 = vmatpush3.bf16.msra.mxu1 %v8657_v3  ;;  %v8681_v3 = vld [vmem:[%s15398_s5 + $0x1a0] sm:$0xff]  }
 0x813   :  { %7773 = vmatprep.subr.bf16.mxu1 %v8664_v11  ;;  %v8684_v11 = vld [vmem:[%s15398_s5 + $0x1e8] sm:$0xff]  }
 0x824   :  { %v8432_v37 = vpop.permute.xlu0 %8431 }
 0x825   :  { %v8434_v14 = vunpack.i.h.bf16 %v8432_v37  ;;  %v8433_v9 = vunpack.i.l.bf16 %v8432_v37  ;;  %v8685_v37 = vld [vmem:[%s15398_s5 + $0x1a8] sm:$0xff]  }
 0x826   :  { %v8437_v4 = vpop.permute.xlu1 %8436 }
 0x827   :  { %v5016_v1 = vsel %vm16973_vm8, %v8424_v26, %v8433_v9  ;;  %v5017_v57 = vsel %vm16974_vm6, %v8433_v9, %v8434_v14  ;;  %v8439_v47 = vunpack.i.h.bf16 %v8437_v4  ;;  %v8438_v59 = vunpack.i.l.bf16 %v8437_v4  ;;  %v8687_v9 = vld [vmem:[%s15398_s5 + $0x1b0] sm:$0xff]   ;;  %v8688_v4 = vld [vmem:[%s15398_s5 + $0x1f8] sm:$0xff]   ;;  %vm16986_vm8 = vmmov %vm16976_vm1 }
 0x828   :  { %v14499_v53 = vmax.f32 %v4911_v49, %v5016_v1  ;;  %v14503_v38 = vmax.f32 %v4912_v15, %v5017_v57  ;;  %v14505_v27 = vpop.permute.xlu0 %8441  ;;  %v8689_v1 = vld [vmem:[%s15398_s5 + $0x1b8] sm:$0xff]   ;;  %v8694_v57 = vld [vmem:[%s15398_s5 + $0x2c0] sm:$0xff]   ;;  %vm16987_vm6 = vmmov %vm16976_vm1 }
 0x829   :  { %v5028_v50 = vsel %vm16975_vm14, %v8429_v35, %v8438_v59  ;;  %v5029_v21 = vsel %vm16962_vm0, %v8438_v59, %v8439_v47  ;;  %v8444_v26 = vunpack.i.h.bf16 %v14505_v27  ;;  %v8443_v18 = vunpack.i.l.bf16 %v14505_v27  ;;  %vm16988_vm14 = vmmov %vm16976_vm1 }
 0x82a   :  { %v14513_v48 = vmax.f32 %v4924_v30, %v5028_v50  ;;  %v14517_v2 = vmax.f32 %v4925_v6, %v5029_v21  ;;  %v14519_v49 = vpop.permute.xlu1 %8446  ;;  %v8475_v32 = vpack.i.bf16 %v14503_v38, %v14499_v53  ;;  %vm16989_vm0 = vmmov %vm16976_vm1 }
 0x82b   :  { %v5164_v15 = vsel %vm16976_vm1, %v8414_v19, %v8443_v18  ;;  %v5165_v35 = vsel %vm16977_vm7, %v8443_v18, %v8444_v26  ;;  %v8449_v54 = vunpack.i.h.bf16 %v14519_v49  ;;  %v8448_v30 = vunpack.i.l.bf16 %v14519_v49  ;;  %v8692_v49 = vld [vmem:[%s15398_s5 + $0x248] sm:$0xff]   ;;  %vm16991_vm1 = vmmov %vm16989_vm0 }
 0x82c   :  { %v8452_v60 = vpop.permute.xlu0 %8451  ;;  %8476 = vrot.lane.b32.xlu1 %v8475_v32, %s8737_s25  ;;  %v8480_v6 = vpack.i.bf16 %v14517_v2, %v14513_v48  ;;  %v5214_v12 = vmax.f32 %v14186_v52, %v5164_v15  ;;  %v5215_v42 = vmax.f32 %v14264_v31, %v5165_v35  ;;  %vm16992_vm7 = vmmov %vm16989_vm0 }
 0x82d   :  { %v5176_v28 = vsel %vm16978_vm2, %v8419_v58, %v8448_v30  ;;  %v5177_v19 = vsel %vm16979_vm11, %v8448_v30, %v8449_v54  ;;  %v8454_v5 = vunpack.i.h.bf16 %v8452_v60  ;;  %v8453_v8 = vunpack.i.l.bf16 %v8452_v60  ;;  %vm16993_vm2 = vmmov %vm16989_vm0 }
 0x82e   :  { %v5227_v63 = vmax.f32 %v14173_v45, %v5176_v28  ;;  %8481 = vrot.lane.b32.xlu0 %v8480_v6, %s8737_s25  ;;  %v5228_v46 = vmax.f32 %v14280_v22, %v5177_v19  ;;  %vm16994_vm11 = vmmov %vm16989_vm0 }
 0x82f   :  { %v14547_v10 = vmax.f32 %v4927_v25, %v8454_v5  ;;  %v5018_v58 = vsel %vm16980_vm3, %v8434_v14, %v8453_v8  ;;  %v14552_v61 = vmax.f32 %v4914_v40, %v8453_v8  ;;  %v5030_v52 = vsel %vm16981_vm13, %v8439_v47, %v8454_v5  ;;  %v8665_v25 = vld [vmem:[%s15398_s5 + $0x180] sm:$0xff]   ;;  %v8686_v14 = vld [vmem:[%s15398_s5 + $0x1f0] sm:$0xff]   ;;  %vm16996_vm13 = vmmov %vm16989_vm0 }
 0x830   :  { %v14557_v45 = vmax.f32 %v4913_v0, %v5018_v58  ;;  %v14561_v31 = vmax.f32 %v4926_v29, %v5030_v52  ;;  %v5241_v22 = vpack.c.bf16 %v5228_v46, %v5215_v42  ;;  %v5240_v56 = vpack.c.bf16 %v5227_v63, %v5214_v12  ;;  %v8669_v0 = vld [vmem:[%s15398_s5 + $0x188] sm:$0xff]   ;;  %v8673_v29 = vld [vmem:[%s15398_s5 + $0x190] sm:$0xff]   ;;  %v8691_v8 = vld [vmem:[%s15398_s5 + $0x200] sm:$0xff]  }
 0x831   :  { %v8696_v58 = vld [vmem:[%s15398_s5 + $0x250] sm:$0xff]   ;;  %vm16995_vm3 = vcmask 1040384  }
 0x832   :  { %v8485_v62 = vpack.i.bf16 %v14552_v61, %v14557_v45  ;;  %v8490_v40 = vpack.i.bf16 %v14547_v10, %v14561_v31  ;;  %6113 = vmatprep.mubr.bf16.mxu1 %v5241_v22 }
 0x833   :  { %6114 = vmatmul.mubr.bf16.vlgmr.msra.gmra.mrb[32].mxu1 %v5240_v56 }
 0x834   :  { %8486 = vrot.lane.b32.xlu1 %v8485_v62, %s8737_s25  ;;  %8491 = vrot.lane.b32.xlu0 %v8490_v40, %s8737_s25  ;;  %s8763_s25 = smov 100  }
 0x835   :  { %7774 = vmatpush3.bf16.msra.mxu1 %v8665_v25 }
 0x836   :  { %7775 = vmatprep.subr.bf16.mxu1 %v8668_v13  ;;  %v8697_v13 = vld [vmem:[%s15398_s5 + $0x210] sm:$0xff]  }
 0x839   :  { %7776 = vmatpush3.bf16.msra.mxu1 %v8669_v0  ;;  %v8700_v0 = vld [vmem:[%s15398_s5 + $0x258] sm:$0xff]  }
 0x83a   :  { %7777 = vmatprep.subr.bf16.mxu1 %v8672_v36 }
 0x83d   :  { %7778 = vmatpush3.bf16.msra.mxu1 %v8673_v29 }
 0x83e   :  { %7779 = vmatprep.subr.bf16.mxu1 %v8676_v44  ;;  %v8699_v44 = vld [vmem:[%s15398_s5 + $0x288] sm:$0xff]  }
 0x841   :  { %7780 = vmatpush3.bf16.msra.mxu1 %v8677_v43  ;;  %v8702_v43 = vld [vmem:[%s15398_s5 + $0x2d0] sm:$0xff]  }
 0x842   :  { %7781 = vmatprep.subr.bf16.mxu1 %v8680_v7  ;;  %v8705_v7 = vld [vmem:[%s15398_s5 + $0x220] sm:$0xff]  }
 0x845   :  { %7782 = vmatpush3.bf16.msra.mxu1 %v8681_v3  ;;  %v8708_v3 = vld [vmem:[%s15398_s5 + $0x268] sm:$0xff]  }
 0x846   :  { %7783 = vmatprep.subr.bf16.mxu1 %v8684_v11  ;;  %v8703_v11 = vld [vmem:[%s15398_s5 + $0x290] sm:$0xff]  }
 0x849   :  { %7784 = vmatpush3.bf16.msra.mxu1 %v8685_v37  ;;  %v8706_v37 = vld [vmem:[%s15398_s5 + $0x2d8] sm:$0xff]  }
 0x84a   :  { %7785 = vmatprep.subr.bf16.mxu1 %v8686_v14  ;;  %v8709_v14 = vld [vmem:[%s15398_s5 + $0x228] sm:$0xff]  }
 0x84d   :  { %7786 = vmatpush3.bf16.msra.mxu1 %v8687_v9  ;;  %v8712_v9 = vld [vmem:[%s15398_s5 + $0x270] sm:$0xff]  }
 0x84e   :  { %7787 = vmatprep.subr.bf16.mxu1 %v8688_v4  ;;  %v8707_v4 = vld [vmem:[%s15398_s5 + $0x298] sm:$0xff]  }
 0x851   :  { %7788 = vmatpush3.bf16.msra.mxu1 %v8689_v1  ;;  %v8710_v1 = vld [vmem:[%s15398_s5 + $0x2e0] sm:$0xff]  }
 0x852   :  { %7817 = vmatprep.subr.bf16.mxu1 %v8694_v57  ;;  %v8713_v57 = vld [vmem:[%s15398_s5 + $0x230] sm:$0xff]  }
 0x85e   :  { %v8457_v47 = vpop.permute.xlu1 %8456 }
 0x85f   :  { %v8459_v59 = vunpack.i.h.bf16 %v8457_v47  ;;  %v8458_v50 = vunpack.i.l.bf16 %v8457_v47  ;;  %v8716_v47 = vld [vmem:[%s15398_s5 + $0x278] sm:$0xff]  }
 0x860   :  { %v8462_v21 = vpop.permute.xlu0 %8461 }
 0x861   :  { %v5166_v18 = vsel %vm16982_vm10, %v8444_v26, %v8458_v50  ;;  %v5167_v32 = vsel %vm16983_vm9, %v8458_v50, %v8459_v59  ;;  %v8464_v15 = vunpack.i.h.bf16 %v8462_v21  ;;  %v8463_v35 = vunpack.i.l.bf16 %v8462_v21  ;;  %v8714_v50 = vld [vmem:[%s15398_s5 + $0x2e8] sm:$0xff]   ;;  %v8717_v21 = vld [vmem:[%s15398_s5 + $0x238] sm:$0xff]   ;;  %vm16997_vm10 = vmmov %vm16989_vm0 }
 0x862   :  { %v5216_v6 = vmax.f32 %v14268_v16, %v5166_v18  ;;  %v5217_v19 = vmax.f32 %v14362_v51, %v5167_v32  ;;  %v8715_v18 = vld [vmem:[%s15398_s5 + $0x2a8] sm:$0xff]   ;;  %v8718_v32 = vld [vmem:[%s15398_s5 + $0x2f0] sm:$0xff]   ;;  %vm16998_vm9 = vmmov %vm16989_vm0 }
 0x863   :  { %v5178_v30 = vsel %vm16984_vm15, %v8449_v54, %v8463_v35  ;;  %v5179_v60 = vsel %vm16985_vm12, %v8463_v35, %v8464_v15  ;;  %v8719_v35 = vld [vmem:[%s15398_s5 + $0x2b0] sm:$0xff]   ;;  %vm16999_vm15 = vmmov %vm16989_vm0  ;;  %vm6031_vm12 = vcmask 138240  }
 0x864   :  { %v5229_v28 = vmax.f32 %v14284_v55, %v5178_v30  ;;  %v5230_v27 = vmax.f32 %v14374_v41, %v5179_v60  ;;  %v8693_v41 = vld [vmem:[%s15398_s5 + $0x208] sm:$0xff]   ;;  %v8721_v30 = vld [vmem:[%s15398_s5 + $0x2f8] sm:$0xff]  }
 0x865   :  { %v8722_v60 = vld [vmem:[%s15398_s5 + $0x2b8] sm:$0xff]  }
 0x866   :  { %v5243_v5 = vpack.c.bf16 %v5230_v27, %v5217_v19  ;;  %v5242_v26 = vpack.c.bf16 %v5229_v28, %v5216_v6 }
 0x868   :  { %v14635_v54 = vpop.permute.xlu1 %8466  ;;  %6154 = vmatprep.mubr.bf16.mxu0 %v5243_v5 }
 0x869   :  { %v8469_v16 = vunpack.i.h.bf16 %v14635_v54  ;;  %v8468_v55 = vunpack.i.l.bf16 %v14635_v54  ;;  %6155 = vmatmul.mubr.bf16.vlgmr.msra.gmra.mrb[32].mxu0 %v5242_v26 }
 0x86a   :  { %v14639_v51 = vpop.permute.xlu0 %8471  ;;  %7796 = vmatpush3.bf16.msra.mxu0 %v8691_v8 }
 0x86b   :  { %v5168_v12 = vsel %vm16986_vm8, %v8459_v59, %v8468_v55  ;;  %v5169_v63 = vsel %vm16987_vm6, %v8468_v55, %v8469_v16  ;;  %v8474_v42 = vunpack.i.h.bf16 %v14639_v51  ;;  %v8473_v46 = vunpack.i.l.bf16 %v14639_v51  ;;  %7797 = vmatprep.subr.bf16.mxu0 %v8692_v49  ;;  %v8711_v59 = vld [vmem:[%s15398_s5 + $0x2a0] sm:$0xff]  }
 0x86c   :  { %v5218_v56 = vmax.f32 %v14366_v24, %v5168_v12  ;;  %v5219_v62 = vmax.f32 %v14420_v39, %v5169_v63  ;;  %v8695_v24 = vld [vmem:[%s15398_s5 + $0x280] sm:$0xff]   ;;  %v8701_v39 = vld [vmem:[%s15398_s5 + $0x218] sm:$0xff]   ;;  %vm6623_vm8 = vcmask 130048   ;;  %vm7318_vm6 = vcmask 687104  }
 0x86d   :  { %v5180_v52 = vsel %vm16988_vm14, %v8464_v15, %v8473_v46  ;;  %v5181_v22 = vsel %vm16989_vm0, %v8473_v46, %v8474_v42  ;;  %v16990_v15 = vmov 0.0  }
 0x86e   :  { %v5231_v25 = vmax.f32 %v14378_v17, %v5180_v52  ;;  %v5232_v40 = vmax.f32 %v14439_v23, %v5181_v22  ;;  %7798 = vmatpush3.bf16.msra.mxu0 %v8693_v41  ;;  %v8698_v17 = vld [vmem:[%s15398_s5 + $0x2c8] sm:$0xff]   ;;  %v8704_v23 = vld [vmem:[%s15398_s5 + $0x260] sm:$0xff]  }
 0x86f   :  { %7799 = vmatprep.subr.bf16.mxu0 %v8696_v58 }
 0x870   :  { %v5245_v36 = vpack.c.bf16 %v5232_v40, %v5219_v62  ;;  %v5244_v29 = vpack.c.bf16 %v5231_v25, %v5218_v56 }
 0x872   :  { %6195 = vmatprep.mubr.bf16.mxu1 %v5245_v36  ;;  %7800 = vmatpush3.bf16.msra.mxu0 %v8697_v13 }
 0x873   :  { %6196 = vmatmul.mubr.bf16.vlgmr.msra.gmra.mrb[36].mxu1 %v5244_v29  ;;  %7801 = vmatprep.subr.bf16.mxu0 %v8700_v0 }
 0x874   :  { %7818 = vmatpush3.bf16.msra.mxu1 %v8695_v24 }
 0x875   :  { %7819 = vmatprep.subr.bf16.mxu1 %v8698_v17 }
 0x876   :  { %7802 = vmatpush3.bf16.msra.mxu0 %v8701_v39 }
 0x877   :  { %7803 = vmatprep.subr.bf16.mxu0 %v8704_v23 }
 0x878   :  { %7820 = vmatpush3.bf16.msra.mxu1 %v8699_v44 }
 0x879   :  { %7821 = vmatprep.subr.bf16.mxu1 %v8702_v43 }
 0x87a   :  { %7804 = vmatpush3.bf16.msra.mxu0 %v8705_v7 }
 0x87b   :  { %7805 = vmatprep.subr.bf16.mxu0 %v8708_v3 }
 0x87c   :  { %7822 = vmatpush3.bf16.msra.mxu1 %v8703_v11 }
 0x87d   :  { %7823 = vmatprep.subr.bf16.mxu1 %v8706_v37 }
 0x87e   :  { %7806 = vmatpush3.bf16.msra.mxu0 %v8709_v14 }
 0x87f   :  { %7807 = vmatprep.subr.bf16.mxu0 %v8712_v9 }
 0x880   :  { %7824 = vmatpush3.bf16.msra.mxu1 %v8707_v4 }
 0x881   :  { %7825 = vmatprep.subr.bf16.mxu1 %v8710_v1 }
 0x882   :  { %7808 = vmatpush3.bf16.msra.mxu0 %v8713_v57 }
 0x883   :  { %7809 = vmatprep.subr.bf16.mxu0 %v8716_v47 }
 0x884   :  { %7826 = vmatpush3.bf16.msra.mxu1 %v8711_v59 }
 0x885   :  { %7827 = vmatprep.subr.bf16.mxu1 %v8714_v50 }
 0x886   :  { %7810 = vmatpush3.bf16.msra.mxu0 %v8717_v21 }
 0x887   :  { %7986 = vmatprep.subr.bf16.mxu0 %v16990_v15 }
 0x888   :  { %7828 = vmatpush3.bf16.msra.mxu1 %v8715_v18 }
 0x889   :  { %7829 = vmatprep.subr.bf16.mxu1 %v8718_v32 }
 0x88c   :  { %7830 = vmatpush3.bf16.msra.mxu1 %v8719_v35 }
 0x88d   :  { %7831 = vmatprep.subr.bf16.mxu1 %v8721_v30 }
 0x890   :  { %7832 = vmatpush3.bf16.msra.mxu1 %v8722_v60 }
 0x89e   :  { %v8477_v6 = vpop.permute.xlu1 %8476 }
 0x89f   :  { %v8479_v28 = vunpack.i.h.bf16 %v8477_v6  ;;  %v8478_v19 = vunpack.i.l.bf16 %v8477_v6 }
 0x8a0   :  { %v8482_v27 = vpop.permute.xlu0 %8481 }
 0x8a1   :  { %v5170_v5 = vsel %vm16991_vm1, %v8469_v16, %v8478_v19  ;;  %v5171_v26 = vsel %vm16992_vm7, %v8478_v19, %v8479_v28  ;;  %v8484_v8 = vunpack.i.h.bf16 %v8482_v27  ;;  %v8483_v49 = vunpack.i.l.bf16 %v8482_v27  ;;  %v8723_v16 = vld [vmem:[%s15398_s5 + $0x308] ss:$0 sps:$4 sm:$0x11]  }
 0x8a2   :  { %v5220_v12 = vmax.f32 %v14424_v20, %v5170_v5  ;;  %v5221_v46 = vmax.f32 %v14499_v53, %v5171_v26  ;;  %v6036_v20 = vsel %vm16995_vm3, 65535, %v16895_v34  ;;  %vm7515_vm1 = vcmask 15360  }
 0x8a3   :  { %v5182_v55 = vsel %vm16993_vm2, %v8474_v42, %v8483_v49  ;;  %v5183_v41 = vsel %vm16994_vm11, %v8483_v49, %v8484_v8  ;;  %v8720_v42 = vld [vmem:[%s15398_s5 + $0x300] sm:$0xff]   ;;  %v6038_v13 = vand.u32 %v8723_v16, %v6036_v20  ;;  %s8754_s5 = smov 116  }
 0x8a4   :  { %v5233_v63 = vmax.f32 %v14443_v33, %v5182_v55  ;;  %v5234_v54 = vmax.f32 %v14513_v48, %v5183_v41 }
 0x8a6   :  { %v8487_v58 = vpop.permute.xlu1 %8486  ;;  %v8492_v52 = vpop.permute.xlu0 %8491  ;;  %v5247_v22 = vpack.c.bf16 %v5234_v54, %v5221_v46  ;;  %v5246_v51 = vpack.c.bf16 %v5233_v63, %v5220_v12 }
 0x8a7   :  { %v8489_v33 = vunpack.i.h.bf16 %v8487_v58  ;;  %v8488_v56 = vunpack.i.l.bf16 %v8487_v58  ;;  %v8494_v53 = vunpack.i.h.bf16 %v8492_v52  ;;  %v8493_v25 = vunpack.i.l.bf16 %v8492_v52 }
 0x8a8   :  { %6236 = vmatprep.mubr.bf16.mxu0 %v5247_v22 }
 0x8a9   :  { %v5224_v48 = vmax.f32 %v14552_v61, %v8489_v33  ;;  %v5172_v62 = vsel %vm16996_vm13, %v8479_v28, %v8488_v56  ;;  %v5173_v40 = vsel %vm16997_vm10, %v8488_v56, %v8489_v33  ;;  %6237 = vmatmul.mubr.bf16.vlgmr.msra.gmra.mrb[36].mxu0 %v5246_v51  ;;  %v5184_v36 = vsel %vm16998_vm9, %v8484_v8, %v8493_v25 }
 0x8aa   :  { %v5222_v0 = vmax.f32 %v14503_v38, %v5172_v62  ;;  %v5185_v29 = vsel %vm16999_vm15, %v8493_v25, %v8494_v53  ;;  %7987 = vmatpush3.bf16.msra.mxu0 %v8720_v42  ;;  %v5223_v34 = vmax.f32 %v14557_v45, %v5173_v40  ;;  %v5237_v24 = vmax.f32 %v14547_v10, %v8494_v53 }
 0x8ab   :  { %v5235_v17 = vmax.f32 %v14517_v2, %v5184_v36  ;;  %7988 = vmatprep.subr.bf16.mxu0 %v16990_v15  ;;  %v5236_v61 = vmax.f32 %v14561_v31, %v5185_v29  ;;  %7990 = vmatprep.mubr.msk.bf16.mxu0 %vm8747_vm5, %v16990_v15  ;;  %v8753_v36 = vmov 0.0|0.0   ;;  %v6474_v29 = vld [vmem:[%s15399_s6 + $0x8] sm:$0xff] }
 0x8ac   :  { %v5250_v23 = vpack.c.bf16 %v5237_v24, %v5224_v48  ;;  %8135 = vmatprep.subr.bf16.mxu1 %v8753_v36 }
 0x8ad   :  { %v5249_v39 = vpack.c.bf16 %v5236_v61, %v5223_v34  ;;  %v5248_v38 = vpack.c.bf16 %v5235_v17, %v5222_v0 }
 0x8ae   :  { %7989 = vmatpush3.bf16.msra.mxu0 %v6038_v13 }
 0x8af   :  { %6277 = vmatprep.mubr.bf16.mxu1 %v5249_v39 }
 0x8b0   :  { %6278 = vmatmul.mubr.bf16.vlgmr.msra.gmra.mrb[40].mxu1 %v5248_v38 }
 0x8b1   :  { %7991 = vmatmul.mubr.msk.bf16.vlgmr.msra.gmra.mrb[40].mxu0 %vm6031_vm12, %v5250_v23 }
 0x8b2   :  { %6733 = vmatprep.mubr.f32.mxu0 %v6474_v29 }
 0x8c8   :  { %v7723_v45 = vpop.f32.mrb[28].mxu1 }
 0x8c9   :  { %v7724_v44 = vpop.f32.mrb[29].mxu1 }
 0x8ca   :  { %v7725_v10 = vadd.f32 %v7724_v44, %v7723_v45  ;;  %v7726_v43 = vpop.f32.mrb[30].mxu1 }
 0x8cb   :  { %v7727_v2 = vpop.f32.mrb[31].mxu1 }
 0x8cc   :  { %v7728_v7 = vadd.f32 %v7727_v2, %v7726_v43 }
 0x906   :  { %v7745_v3 = vpop.f32.mrb[32].mxu1 }
 0x907   :  { %v7746_v11 = vpop.f32.mrb[33].mxu1 }
 0x908   :  { %v7747_v31 = vadd.f32 %v7746_v11, %v7745_v3  ;;  %v7748_v37 = vpop.f32.mrb[34].mxu1 }
 0x909   :  { %v7749_v14 = vpop.f32.mrb[35].mxu1 }
 0x90a   :  { %v6116_v9 = vadd.f32 %v7747_v31, %v7725_v10  ;;  %v7750_v4 = vadd.f32 %v7749_v14, %v7748_v37 }
 0x90c   :  { %v6119_v1 = vadd.f32 %v7750_v4, %v7728_v7 }
 0x93c   :  { %v7767_v57 = vpop.f32.mrb[32].mxu0 }
 0x93d   :  { %v7768_v47 = vpop.f32.mrb[33].mxu0 }
 0x93e   :  { %v7769_v59 = vadd.f32 %v7768_v47, %v7767_v57  ;;  %v7770_v50 = vpop.f32.mrb[34].mxu0 }
 0x93f   :  { %v7771_v21 = vpop.f32.mrb[35].mxu0 }
 0x940   :  { %v6157_v18 = vadd.f32 %v7769_v59, %v6116_v9  ;;  %v7772_v32 = vadd.f32 %v7771_v21, %v7770_v50 }
 0x942   :  { %v6160_v35 = vadd.f32 %v7772_v32, %v6119_v1  ;;  %v6534_v32 = vld [vmem:[%s15400_s7 + $0x8] sm:$0xff] }
 0x946   :  { %v7789_v30 = vpop.f32.mrb[36].mxu1 }
 0x947   :  { %v7790_v60 = vpop.f32.mrb[37].mxu1 }
 0x948   :  { %v7791_v6 = vadd.f32 %v7790_v60, %v7789_v30  ;;  %v7792_v28 = vpop.f32.mrb[38].mxu1 }
 0x949   :  { %v7793_v19 = vpop.f32.mrb[39].mxu1 }
 0x94a   :  { %v6198_v27 = vadd.f32 %v7791_v6, %v6157_v18  ;;  %v7794_v5 = vadd.f32 %v7793_v19, %v7792_v28 }
 0x94c   :  { %v6201_v26 = vadd.f32 %v7794_v5, %v6160_v35 }
 0x97c   :  { %v7811_v8 = vpop.f32.mrb[36].mxu0 }
 0x97d   :  { %v7812_v49 = vpop.f32.mrb[37].mxu0 }
 0x97e   :  { %v7813_v55 = vadd.f32 %v7812_v49, %v7811_v8  ;;  %v7814_v41 = vpop.f32.mrb[38].mxu0 }
 0x97f   :  { %v7815_v12 = vpop.f32.mrb[39].mxu0 }
 0x980   :  { %v6239_v63 = vadd.f32 %v7813_v55, %v6198_v27  ;;  %v7816_v46 = vadd.f32 %v7815_v12, %v7814_v41 }
 0x982   :  { %v6242_v54 = vadd.f32 %v7816_v46, %v6201_v26  ;;  %v6536_v26 = vld [vmem:[%s15400_s7 + $0x18] sm:$0xff] }
 0x983   :  { %v7833_v16 = vpop.f32.mrb[40].mxu1 }
 0x984   :  { %v7834_v58 = vpop.f32.mrb[41].mxu1  ;;  %v6320_v52 = vpop.f32.mrb[40].mxu0 }
 0x985   :  { %v7835_v22 = vadd.f32 %v7834_v58, %v7833_v16  ;;  %v7836_v51 = vpop.f32.mrb[42].mxu1  ;;  %v7992_v42 = vpop.f32.mrb[41].mxu0  ;;  %v6538_v16 = vld [vmem:[%s15400_s7 + $0x28] sm:$0xff] }
 0x986   :  { %v7837_v20 = vpop.f32.mrb[43].mxu1  ;;  %v6323_v33 = vpop.f32.mrb[42].mxu0 }
 0x987   :  { %v6280_v56 = vadd.f32 %v7835_v22, %v6239_v63  ;;  %v7838_v53 = vadd.f32 %v7837_v20, %v7836_v51  ;;  %v7993_v25 = vpop.f32.mrb[43].mxu0  ;;  %v6540_v20 = vld [vmem:[%s15400_s7 + $0x38] sm:$0xff] }
 0x989   :  { %v14773_v48 = vadd.f32 %v6320_v52, %v6280_v56  ;;  %v6283_v62 = vadd.f32 %v7838_v53, %v6242_v54  ;;  %v6476_v54 = vld [vmem:[%s15399_s6 + $0x18] sm:$0xff]  ;;  %v6533_v56 = vld [vmem:[%s15400_s7] sm:$0xff] }
 0x98a   :  { %7658 = vmatprep.mubr.msk.f32.mxu1 %vm6623_vm8, %v6476_v54  ;;  %v6501_v54 = vld [vmem:[%s15399_s6 + $0xe0] sm:$0xff] }
 0x98b   :  { %v14775_v40 = vadd.f32 %v6323_v33, %v6283_v62 }
 0x98d   :  { %v8500_v13 = vpack.i.bf16 %v14775_v40, %v14773_v48  ;;  %v8105_v0 = vpack.c.bf16 %v14775_v40, %v14773_v48  ;;  %v6542_v40 = vld [vmem:[%s15400_s7 + $0x48] sm:$0xff] }
 0x98f   :  { %8501 = vrot.lane.b32.xlu0 %v8500_v13, %s8735_s23  ;;  %8496 = vrot.lane.b32.xlu1 %v8500_v13, %s8728_s28  ;;  %s8758_s23 = smov 110   ;;  %s8759_s28 = smov 108  }
 0x993   :  { %8511 = vrot.lane.b32.xlu0 %v8500_v13, %s8749_s27  ;;  %8506 = vrot.lane.b32.xlu1 %v8500_v13, %s8750_s24  ;;  %s8760_s27 = smov 106   ;;  %s8761_s24 = smov 104  }
 0x997   :  { %8521 = vrot.lane.b32.xlu0 %v8500_v13, %s8754_s5  ;;  %8516 = vrot.lane.b32.xlu1 %v8500_v13, %s8755_s15 }
 0x99b   :  { %8531 = vrot.lane.b32.xlu0 %v8500_v13, %s8756_s22  ;;  %8526 = vrot.lane.b32.xlu1 %v8500_v13, %s8757_s19 }
 0x99f   :  { %8541 = vrot.lane.b32.xlu0 %v8500_v13, %s8758_s23  ;;  %8536 = vrot.lane.b32.xlu1 %v8500_v13, %s8731_s13 }
 0x9a3   :  { %8546 = vrot.lane.b32.xlu0 %v8500_v13, %s8759_s28 }
 0x9a7   :  { %8551 = vrot.lane.b32.xlu0 %v8500_v13, %s8760_s27 }
 0x9ab   :  { %8556 = vrot.lane.b32.xlu0 %v8500_v13, %s8761_s24 }
 0x9af   :  { %8561 = vrot.lane.b32.xlu0 %v8500_v13, %s8762_s21 }
 0x9b3   :  { %8566 = vrot.lane.b32.xlu0 %v8500_v13, %s8763_s25 }
 0x9b7   :  { %8571 = vrot.lane.b32.xlu0 %v8500_v13, %s8764_s29 }
 0xa01   :  { %v8502_v34 = vpop.permute.xlu0 %8501  ;;  %v8497_v24 = vpop.permute.xlu1 %8496 }
 0xa02   :  { %v8499_v17 = vunpack.i.h.bf16 %v8497_v24  ;;  %v8498_v61 = vunpack.i.l.bf16 %v8497_v24  ;;  %v8504_v39 = vunpack.i.h.bf16 %v8502_v34  ;;  %v8503_v38 = vunpack.i.l.bf16 %v8502_v34  ;;  %8576 = vrot.lane.b32.xlu1 %v8497_v24, %s8731_s13 }
 0xa04   :  { %v8109_v19 = vpack.c.bf16 %v8499_v17, %v8498_v61  ;;  %v8113_v12 = vpack.c.bf16 %v8504_v39, %v8503_v38  ;;  %v6544_v61 = vld [vmem:[%s15400_s7 + $0x58] sm:$0xff]  ;;  %v6537_v38 = vld [vmem:[%s15400_s7 + $0x20] sm:$0xff] }
 0xa05   :  { %v14790_v23 = vpop.permute.xlu0 %8511  ;;  %v8507_v45 = vpop.permute.xlu1 %8506 }
 0xa06   :  { %v8509_v44 = vunpack.i.h.bf16 %v8507_v45  ;;  %v8508_v10 = vunpack.i.l.bf16 %v8507_v45  ;;  %8581 = vrot.lane.b32.xlu1 %v8502_v34, %s8731_s13  ;;  %v8514_v7 = vunpack.i.h.bf16 %v14790_v23  ;;  %v8513_v3 = vunpack.i.l.bf16 %v14790_v23 }
 0xa08   :  { %v8117_v22 = vpack.c.bf16 %v8509_v44, %v8508_v10  ;;  %v8121_v25 = vpack.c.bf16 %v8514_v7, %v8513_v3  ;;  %v6539_v3 = vld [vmem:[%s15400_s7 + $0x30] sm:$0xff] }
 0xa09   :  { %v14793_v43 = vpop.permute.xlu0 %8521  ;;  %v14795_v2 = vpop.permute.xlu1 %8516 }
 0xa0a   :  { %8586 = vrot.lane.b32.xlu1 %v8507_v45, %s8731_s13  ;;  %v8519_v4 = vunpack.i.h.bf16 %v14795_v2  ;;  %v8518_v1 = vunpack.i.l.bf16 %v14795_v2  ;;  %v8524_v60 = vunpack.i.h.bf16 %v14793_v43  ;;  %v8523_v6 = vunpack.i.l.bf16 %v14793_v43 }
 0xa0c   :  { %v8125_v34 = vpack.c.bf16 %v8519_v4, %v8518_v1  ;;  %v8129_v45 = vpack.c.bf16 %v8524_v60, %v8523_v6  ;;  %v6543_v4 = vld [vmem:[%s15400_s7 + $0x50] sm:$0xff]  ;;  %v6477_v1 = vld [vmem:[%s15399_s6 + $0x20] sm:$0xff]  ;;  %v6976_v6 = vld [vmem:[%s15401_s9 + $0x8] sm:$0xff] }
 0xa0d   :  { %v8532_v11 = vpop.permute.xlu0 %8531  ;;  %v14800_v31 = vpop.permute.xlu1 %8526  ;;  %v6983_v60 = vld [vmem:[%s15401_s9 + $0x40] sm:$0xff] }
 0xa0e   :  { %v8534_v37 = vunpack.i.h.bf16 %v8532_v11  ;;  %v8533_v14 = vunpack.i.l.bf16 %v8532_v11  ;;  %8611 = vrot.lane.b32.xlu0 %v8532_v11, %s8731_s13  ;;  %8591 = vrot.lane.b32.xlu1 %v14790_v23, %s8731_s13  ;;  %v8529_v49 = vunpack.i.h.bf16 %v14800_v31  ;;  %v8528_v55 = vunpack.i.l.bf16 %v14800_v31 }
 0xa10   :  { %v8103_v9 = vpack.c.bf16 %v8534_v37, %v8533_v14  ;;  %v8133_v11 = vpack.c.bf16 %v8529_v49, %v8528_v55  ;;  %v6473_v37 = vld [vmem:[%s15399_s6] sm:$0xff]  ;;  %v6478_v14 = vld [vmem:[%s15399_s6 + $0x28] sm:$0xff] }
 0xa11   :  { %v8542_v57 = vpop.permute.xlu0 %8541  ;;  %v8537_v47 = vpop.permute.xlu1 %8536  ;;  %v7223_v49 = vld [vmem:[%s15402_s11 + $0x8] sm:$0xff] }
 0xa12   :  { %v8544_v59 = vunpack.i.h.bf16 %v8542_v57  ;;  %v8543_v50 = vunpack.i.l.bf16 %v8542_v57  ;;  %v8539_v21 = vunpack.i.h.bf16 %v8537_v47  ;;  %v8538_v18 = vunpack.i.l.bf16 %v8537_v47  ;;  %8104 = vmatprep.subr.bf16.mxu0 %v8103_v9  ;;  %6555 = vperm.xlu0 %8293, %v6534_v32   ;;  %v6977_v9 = vld [vmem:[%s15401_s9 + $0x10] sm:$0xff]  ;;  %v6482_v57 = vld [vmem:[%s15399_s6 + $0x48] sm:$0xff]  ;;  %v6979_v47 = vld [vmem:[%s15401_s9 + $0x20] sm:$0xff] }
 0xa13   :  { %8106 = vmatpush3.bf16.msra.mxu0 %v8105_v0  ;;  %8596 = vrot.lane.b32.xlu1 %v14795_v2, %s8731_s13  ;;  %v6535_v0 = vld [vmem:[%s15400_s7 + $0x10] sm:$0xff]  ;;  %v6546_v2 = vld [vmem:[%s15400_s7 + $0x68] sm:$0xff] }
 0xa14   :  { %v8107_v35 = vpack.c.bf16 %v8544_v59, %v8543_v50  ;;  %v8136_v30 = vpack.c.bf16 %v8539_v21, %v8538_v18  ;;  %v6545_v59 = vld [vmem:[%s15400_s7 + $0x60] sm:$0xff]  ;;  %v6486_v21 = vld [vmem:[%s15399_s6 + $0x68] sm:$0xff]  ;;  %v6981_v18 = vld [vmem:[%s15401_s9 + $0x30] sm:$0xff] }
 0xa15   :  { %v8547_v28 = vpop.permute.xlu0 %8546  ;;  %v6481_v50 = vld [vmem:[%s15399_s6 + $0x40] sm:$0xff]  ;;  %v6547_v32 = vld [vmem:[%s15400_s7 + $0x70] sm:$0xff]  ;;  %v6980_v55 = vld [vmem:[%s15401_s9 + $0x28] sm:$0xff] }
 0xa16   :  { %v8549_v27 = vunpack.i.h.bf16 %v8547_v28  ;;  %v8548_v5 = vunpack.i.l.bf16 %v8547_v28  ;;  %8137 = vmatpush1.bf16.msra.mxu1 %v8136_v30  ;;  %8108 = vmatprep.subr.bf16.mxu0 %v8107_v35  ;;  %v6485_v35 = vld [vmem:[%s15399_s6 + $0x60] sm:$0xff]  ;;  %v6490_v30 = vld [vmem:[%s15399_s6 + $0x88] sm:$0xff] }
 0xa17   :  { %8110 = vmatpush3.bf16.msra.mxu0 %v8109_v19  ;;  %8138 = vmatprep.subr.bf16.mxu1 %v8753_v36  ;;  %v6489_v28 = vld [vmem:[%s15399_s6 + $0x80] sm:$0xff]  ;;  %v6494_v19 = vld [vmem:[%s15399_s6 + $0xa8] sm:$0xff] }
 0xa18   :  { %v8111_v8 = vpack.c.bf16 %v8549_v27, %v8548_v5  ;;  %6565 = vperm.xlu0 %8293, %v6536_v26   ;;  %8601 = vrot.lane.b32.xlu1 %v14793_v43, %s8731_s13  ;;  %v6975_v43 = vld [vmem:[%s15401_s9] sm:$0xff]  ;;  %v6985_v27 = vld [vmem:[%s15401_s9 + $0x50] sm:$0xf]  ;;  %v6978_v5 = vld [vmem:[%s15401_s9 + $0x18] sm:$0xff] }
 0xa19   :  { %v8552_v41 = vpop.permute.xlu0 %8551  ;;  %v6493_v26 = vld [vmem:[%s15399_s6 + $0xa0] sm:$0xff] }
 0xa1a   :  { %v8554_v63 = vunpack.i.h.bf16 %v8552_v41  ;;  %v8553_v46 = vunpack.i.l.bf16 %v8552_v41  ;;  %8112 = vmatprep.subr.bf16.mxu0 %v8111_v8  ;;  %v6498_v8 = vld [vmem:[%s15399_s6 + $0xc8] sm:$0xff]  ;;  %v6497_v41 = vld [vmem:[%s15399_s6 + $0xc0] sm:$0xff] }
 0xa1b   :  { %8114 = vmatpush3.bf16.msra.mxu0 %v8113_v12  ;;  %v6502_v12 = vld [vmem:[%s15399_s6 + $0xe8] sm:$0xff] }
 0xa1c   :  { %v8115_v58 = vpack.c.bf16 %v8554_v63, %v8553_v46  ;;  %6575 = vperm.xlu0 %8293, %v6538_v16   ;;  %8606 = vrot.lane.b32.xlu1 %v14800_v31, %s8731_s13  ;;  %v6541_v31 = vld [vmem:[%s15400_s7 + $0x40] sm:$0xff]  ;;  %v7225_v63 = vld [vmem:[%s15402_s11 + $0x18] sm:$0xff]  ;;  %v6506_v16 = vld [vmem:[%s15399_s6 + $0x108] sm:$0xff] }
 0xa1d   :  { %v8557_v52 = vpop.permute.xlu0 %8556  ;;  %v6982_v46 = vld [vmem:[%s15401_s9 + $0x38] sm:$0xff] }
 0xa1e   :  { %v8559_v51 = vunpack.i.h.bf16 %v8557_v52  ;;  %v8558_v42 = vunpack.i.l.bf16 %v8557_v52  ;;  %8116 = vmatprep.subr.bf16.mxu0 %v8115_v58  ;;  %v7227_v58 = vld [vmem:[%s15402_s11 + $0x28] sm:$0xff] }
 0xa1f   :  { %8118 = vmatpush3.bf16.msra.mxu0 %v8117_v22  ;;  %v6984_v52 = vld [vmem:[%s15401_s9 + $0x48] sm:$0xff]  ;;  %v6505_v22 = vld [vmem:[%s15399_s6 + $0x100] sm:$0xff] }
 0xa20   :  { %v8119_v33 = vpack.c.bf16 %v8559_v51, %v8558_v42  ;;  %6585 = vperm.xlu0 %8293, %v6540_v20   ;;  %6550 = vperm.xlu1 %8364, %v6533_v56   ;;  %v6510_v51 = vld [vmem:[%s15399_s6 + $0x128] sm:$0xff]  ;;  %v7229_v42 = vld [vmem:[%s15402_s11 + $0x38] sm:$0xff]  ;;  %v7222_v20 = vld [vmem:[%s15402_s11] sm:$0xff] }
 0xa21   :  { %v8562_v53 = vpop.permute.xlu0 %8561  ;;  %v6514_v56 = vld [vmem:[%s15399_s6 + $0x148] sm:$0xff] }
 0xa22   :  { %v8564_v48 = vunpack.i.h.bf16 %v8562_v53  ;;  %v8563_v62 = vunpack.i.l.bf16 %v8562_v53  ;;  %8120 = vmatprep.subr.bf16.mxu0 %v8119_v33  ;;  %v6509_v33 = vld [vmem:[%s15399_s6 + $0x120] sm:$0xff]  ;;  %v7231_v53 = vld [vmem:[%s15402_s11 + $0x48] sm:$0xff] }
 0xa23   :  { %8122 = vmatpush3.bf16.msra.mxu0 %v8121_v25  ;;  %v7224_v25 = vld [vmem:[%s15402_s11 + $0x10] sm:$0xff] }
 0xa24   :  { %v8123_v13 = vpack.c.bf16 %v8564_v48, %v8563_v62  ;;  %6595 = vperm.xlu0 %8293, %v6542_v40   ;;  %6560 = vperm.xlu1 %8364, %v6535_v0   ;;  %v6513_v48 = vld [vmem:[%s15399_s6 + $0x140] sm:$0xff]  ;;  %v6518_v62 = vld [vmem:[%s15399_s6 + $0x168] sm:$0xff]  ;;  %v7233_v40 = vld [vmem:[%s15402_s11 + $0x58] sm:$0xff] }
 0xa25   :  { %v8567_v29 = vpop.permute.xlu0 %8566  ;;  %v6517_v0 = vld [vmem:[%s15399_s6 + $0x160] sm:$0xff] }
 0xa26   :  { %v8569_v24 = vunpack.i.h.bf16 %v8567_v29  ;;  %v8568_v17 = vunpack.i.l.bf16 %v8567_v29  ;;  %8124 = vmatprep.subr.bf16.mxu0 %v8123_v13  ;;  %v7226_v13 = vld [vmem:[%s15402_s11 + $0x20] sm:$0xff]  ;;  %v6522_v29 = vld [vmem:[%s15399_s6 + $0x188] sm:$0xff] }
 0xa27   :  { %8126 = vmatpush3.bf16.msra.mxu0 %v8125_v34  ;;  %v7235_v34 = vld [vmem:[%s15402_s11 + $0x68] sm:$0xff] }
 0xa28   :  { %v8127_v39 = vpack.c.bf16 %v8569_v24, %v8568_v17  ;;  %6605 = vperm.xlu0 %8293, %v6544_v61   ;;  %6570 = vperm.xlu1 %8364, %v6537_v38   ;;  %v7228_v24 = vld [vmem:[%s15402_s11 + $0x30] sm:$0xff]  ;;  %v6521_v17 = vld [vmem:[%s15399_s6 + $0x180] sm:$0xff]  ;;  %v6526_v61 = vld [vmem:[%s15399_s6 + $0x1a8] sm:$0xff] }
 0xa29   :  { %v8572_v23 = vpop.permute.xlu0 %8571  ;;  %v7230_v38 = vld [vmem:[%s15402_s11 + $0x40] sm:$0xff] }
 0xa2a   :  { %v8574_v44 = vunpack.i.h.bf16 %v8572_v23  ;;  %v8573_v10 = vunpack.i.l.bf16 %v8572_v23  ;;  %8128 = vmatprep.subr.bf16.mxu0 %v8127_v39  ;;  %v7237_v39 = vld [vmem:[%s15402_s11 + $0x78] sm:$0xff]  ;;  %v6525_v23 = vld [vmem:[%s15399_s6 + $0x1a0] sm:$0xff] }
 0xa2b   :  { %8130 = vmatpush3.bf16.msra.mxu0 %v8129_v45  ;;  %v6530_v45 = vld [vmem:[%s15399_s6 + $0x1c8] sm:$0xff] }
 0xa2c   :  { %v8131_v7 = vpack.c.bf16 %v8574_v44, %v8573_v10  ;;  %6615 = vperm.xlu0 %8293, %v6546_v2   ;;  %6580 = vperm.xlu1 %8364, %v6539_v3   ;;  %v7232_v44 = vld [vmem:[%s15402_s11 + $0x50] sm:$0xff]  ;;  %v6529_v10 = vld [vmem:[%s15399_s6 + $0x1c0] sm:$0xff] }
 0xa2d   :  { %v7234_v2 = vld [vmem:[%s15402_s11 + $0x60] sm:$0xff] }
 0xa2e   :  { %8132 = vmatprep.subr.bf16.mxu0 %v8131_v7  ;;  %v7236_v7 = vld [vmem:[%s15402_s11 + $0x70] sm:$0xff] }
 0xa2f   :  { %8134 = vmatpush3.bf16.msra.mxu0 %v8133_v11 }
 0xa30   :  { %8162 = vmatprep.subr.bf16.mxu0 %v8753_v36  ;;  %6988 = vperm.xlu0 %8293, %v6975_v43  }
 0xa31   :  { %6590 = vperm.xlu1 %8364, %v6541_v31  }
 0xa32   :  { %6734 = vmatmul.mubr.f32.vlgmr.msra.gmra.mrb[44].mxu0 %v6473_v37 }
 0xa33   :  { %6738 = vmatprep.mubr.f32.mxu0 %v6478_v14 }
 0xa34   :  { %6998 = vperm.xlu0 %8293, %v6977_v9  }
 0xa35   :  { %6600 = vperm.xlu1 %8364, %v6543_v4  }
 0xa36   :  { %6739 = vmatmul.mubr.f32.gmra.mrb[46].mxu0 %v6477_v1 }
 0xa37   :  { %6743 = vmatprep.mubr.f32.mxu0 %v6482_v57 }
 0xa38   :  { %7008 = vperm.xlu0 %8293, %v6979_v47  }
 0xa39   :  { %6610 = vperm.xlu1 %8364, %v6545_v59  }
 0xa3a   :  { %6744 = vmatmul.mubr.f32.gmra.mrb[48].mxu0 %v6481_v50 }
 0xa3b   :  { %6748 = vmatprep.mubr.f32.mxu0 %v6486_v21 }
 0xa3c   :  { %7018 = vperm.xlu0 %8293, %v6981_v18  }
 0xa3d   :  { %6620 = vperm.xlu1 %8364, %v6547_v32  }
 0xa3e   :  { %6749 = vmatmul.mubr.f32.gmra.mrb[50].mxu0 %v6485_v35 }
 0xa3f   :  { %6753 = vmatprep.mubr.f32.mxu0 %v6490_v30 }
 0xa40   :  { %7028 = vperm.xlu0 %8293, %v6983_v60  }
 0xa41   :  { %6993 = vperm.xlu1 %8364, %v6976_v6  }
 0xa42   :  { %6754 = vmatmul.mubr.f32.gmra.mrb[52].mxu0 %v6489_v28 }
 0xa43   :  { %6758 = vmatprep.mubr.f32.mxu0 %v6494_v19 }
 0xa44   :  { %7038 = vperm.xlu0 %8293, %v6985_v27  }
 0xa45   :  { %7003 = vperm.xlu1 %8364, %v6978_v5  }
 0xa46   :  { %6759 = vmatmul.mubr.f32.gmra.mrb[54].mxu0 %v6493_v26 }
 0xa47   :  { %6763 = vmatprep.mubr.f32.mxu0 %v6498_v8 }
 0xa48   :  { %7245 = vperm.xlu0 %8293, %v7223_v49  }
 0xa49   :  { %7013 = vperm.xlu1 %8364, %v6980_v55  }
 0xa4a   :  { %6764 = vmatmul.mubr.f32.gmra.mrb[56].mxu0 %v6497_v41 }
 0xa4b   :  { %6768 = vmatprep.mubr.f32.mxu0 %v6502_v12 }
 0xa4c   :  { %7255 = vperm.xlu0 %8293, %v7225_v63  }
 0xa4d   :  { %7023 = vperm.xlu1 %8364, %v6982_v46  }
 0xa4e   :  { %6769 = vmatmul.mubr.f32.gmra.mrb[58].mxu0 %v6501_v54  ;;  %v6475_v54 = vld [vmem:[%s15399_s6 + $0x10] sm:$0xff] }
 0xa4f   :  { %6773 = vmatprep.mubr.f32.mxu0 %v6506_v16  ;;  %v6480_v16 = vld [vmem:[%s15399_s6 + $0x38] sm:$0xff] }
 0xa50   :  { %7265 = vperm.xlu0 %8293, %v7227_v58   ;;  %v6479_v58 = vld [vmem:[%s15399_s6 + $0x30] sm:$0xff] }
 0xa51   :  { %7033 = vperm.xlu1 %8364, %v6984_v52   ;;  %v6484_v52 = vld [vmem:[%s15399_s6 + $0x58] sm:$0xff] }
 0xa52   :  { %6774 = vmatmul.mubr.f32.gmra.mrb[60].mxu0 %v6505_v22  ;;  %v6483_v22 = vld [vmem:[%s15399_s6 + $0x50] sm:$0xff] }
 0xa53   :  { %6778 = vmatprep.mubr.f32.mxu0 %v6510_v51  ;;  %v6488_v51 = vld [vmem:[%s15399_s6 + $0x78] sm:$0xff] }
 0xa54   :  { %7275 = vperm.xlu0 %8293, %v7229_v42   ;;  %v6487_v42 = vld [vmem:[%s15399_s6 + $0x70] sm:$0xff] }
 0xa55   :  { %7240 = vperm.xlu1 %8364, %v7222_v20   ;;  %v6492_v20 = vld [vmem:[%s15399_s6 + $0x98] sm:$0xff] }
 0xa56   :  { %6779 = vmatmul.mubr.f32.gmra.mrb[62].mxu0 %v6509_v33  ;;  %v6491_v33 = vld [vmem:[%s15399_s6 + $0x90] sm:$0xff] }
 0xa57   :  { %6783 = vmatprep.mubr.f32.mxu0 %v6514_v56  ;;  %v6496_v56 = vld [vmem:[%s15399_s6 + $0xb8] sm:$0xff] }
 0xa58   :  { %7285 = vperm.xlu0 %8293, %v7231_v53   ;;  %v6495_v53 = vld [vmem:[%s15399_s6 + $0xb0] sm:$0xff] }
 0xa59   :  { %7250 = vperm.xlu1 %8364, %v7224_v25   ;;  %v6500_v25 = vld [vmem:[%s15399_s6 + $0xd8] sm:$0xff] }
 0xa5a   :  { %6784 = vmatmul.mubr.f32.gmra.mrb[64].mxu0 %v6513_v48  ;;  %v6499_v48 = vld [vmem:[%s15399_s6 + $0xd0] sm:$0xff] }
 0xa5b   :  { %6788 = vmatprep.mubr.f32.mxu0 %v6518_v62  ;;  %v6504_v62 = vld [vmem:[%s15399_s6 + $0xf8] sm:$0xff] }
 0xa5c   :  { %7295 = vperm.xlu0 %8293, %v7233_v40   ;;  %v6503_v40 = vld [vmem:[%s15399_s6 + $0xf0] sm:$0xff] }
 0xa5d   :  { %7260 = vperm.xlu1 %8364, %v7226_v13   ;;  %v6508_v13 = vld [vmem:[%s15399_s6 + $0x118] sm:$0xff] }
 0xa5e   :  { %6789 = vmatmul.mubr.f32.gmra.mrb[66].mxu0 %v6517_v0  ;;  %v6507_v0 = vld [vmem:[%s15399_s6 + $0x110] sm:$0xff] }
 0xa5f   :  { %6793 = vmatprep.mubr.f32.mxu0 %v6522_v29  ;;  %v6512_v29 = vld [vmem:[%s15399_s6 + $0x138] sm:$0xff] }
 0xa60   :  { %7305 = vperm.xlu0 %8293, %v7235_v34   ;;  %v6511_v34 = vld [vmem:[%s15399_s6 + $0x130] sm:$0xff] }
 0xa61   :  { %7270 = vperm.xlu1 %8364, %v7228_v24   ;;  %v6516_v24 = vld [vmem:[%s15399_s6 + $0x158] sm:$0xff] }
 0xa62   :  { %6794 = vmatmul.mubr.f32.gmra.mrb[68].mxu0 %v6521_v17  ;;  %v6515_v17 = vld [vmem:[%s15399_s6 + $0x150] sm:$0xff] }
 0xa63   :  { %6798 = vmatprep.mubr.f32.mxu0 %v6526_v61  ;;  %v6520_v61 = vld [vmem:[%s15399_s6 + $0x178] sm:$0xff] }
 0xa64   :  { %7315 = vperm.xlu0 %8293, %v7237_v39   ;;  %v6519_v39 = vld [vmem:[%s15399_s6 + $0x170] sm:$0xff] }
 0xa65   :  { %7280 = vperm.xlu1 %8364, %v7230_v38   ;;  %v6524_v38 = vld [vmem:[%s15399_s6 + $0x198] sm:$0xff] }
 0xa66   :  { %6799 = vmatmul.mubr.f32.gmra.mrb[70].mxu0 %v6525_v23  ;;  %v6523_v23 = vld [vmem:[%s15399_s6 + $0x190] sm:$0xff] }
 0xa67   :  { %6803 = vmatprep.mubr.f32.mxu0 %v6530_v45  ;;  %v6528_v45 = vld [vmem:[%s15399_s6 + $0x1b8] sm:$0xff] }
 0xa69   :  { %7290 = vperm.xlu1 %8364, %v7232_v44   ;;  %v6527_v44 = vld [vmem:[%s15399_s6 + $0x1b0] sm:$0xff] }
 0xa6a   :  { %6804 = vmatmul.mubr.f32.gmra.mrb[72].mxu0 %v6529_v10  ;;  %v6532_v10 = vld [vmem:[%s15399_s6 + $0x1d8] sm:$0xff] }
 0xa6b   :  { %8024 = vmatprep.mubr.msk.f32.mxu0 %vm8747_vm5, %v16990_v15 }
 0xa6d   :  { %7300 = vperm.xlu1 %8364, %v7234_v2   ;;  %v6531_v2 = vld [vmem:[%s15399_s6 + $0x1d0] sm:$0xff] }
 0xa71   :  { %7310 = vperm.xlu1 %8364, %v7236_v7  }
 0xa74   :  { %v8577_v3 = vpop.permute.xlu1 %8576 }
 0xa75   :  { %v8579_v11 = vunpack.i.h.bf16 %v8577_v3  ;;  %v8578_v43 = vunpack.i.l.bf16 %v8577_v3 }
 0xa77   :  { %v8139_v31 = vpack.c.bf16 %v8579_v11, %v8578_v43 }
 0xa78   :  { %v8582_v37 = vpop.permute.xlu1 %8581 }
 0xa79   :  { %v8584_v14 = vunpack.i.h.bf16 %v8582_v37  ;;  %v8583_v9 = vunpack.i.l.bf16 %v8582_v37  ;;  %8140 = vmatpush1.bf16.msra.mxu1 %v8139_v31 }
 0xa7a   :  { %8141 = vmatprep.subr.bf16.mxu1 %v8753_v36 }
 0xa7b   :  { %v8142_v4 = vpack.c.bf16 %v8584_v14, %v8583_v9 }
 0xa7c   :  { %v8587_v1 = vpop.permute.xlu1 %8586 }
 0xa7d   :  { %v8589_v57 = vunpack.i.h.bf16 %v8587_v1  ;;  %v8588_v47 = vunpack.i.l.bf16 %v8587_v1  ;;  %8143 = vmatpush1.bf16.msra.mxu1 %v8142_v4 }
 0xa7e   :  { %8144 = vmatprep.subr.bf16.mxu1 %v8753_v36 }
 0xa7f   :  { %v8145_v59 = vpack.c.bf16 %v8589_v57, %v8588_v47 }
 0xa80   :  { %v8592_v50 = vpop.permute.xlu1 %8591  ;;  %v8612_v26 = vpop.permute.xlu0 %8611 }
 0xa81   :  { %8146 = vmatpush1.bf16.msra.mxu1 %v8145_v59  ;;  %v8594_v21 = vunpack.i.h.bf16 %v8592_v50  ;;  %v8593_v18 = vunpack.i.l.bf16 %v8592_v50  ;;  %v8614_v41 = vunpack.i.h.bf16 %v8612_v26  ;;  %v8613_v12 = vunpack.i.l.bf16 %v8612_v26 }
 0xa82   :  { %8147 = vmatprep.subr.bf16.mxu1 %v8753_v36 }
 0xa83   :  { %v8148_v32 = vpack.c.bf16 %v8594_v21, %v8593_v18  ;;  %v8160_v46 = vpack.c.bf16 %v8614_v41, %v8613_v12 }
 0xa85   :  { %v8597_v35 = vpop.permute.xlu1 %8596  ;;  %8149 = vmatpush1.bf16.msra.mxu1 %v8148_v32 }
 0xa86   :  { %v8599_v30 = vunpack.i.h.bf16 %v8597_v35  ;;  %v8598_v60 = vunpack.i.l.bf16 %v8597_v35  ;;  %8150 = vmatprep.subr.bf16.mxu1 %v8753_v36 }
 0xa88   :  { %v8151_v6 = vpack.c.bf16 %v8599_v30, %v8598_v60 }
 0xa8a   :  { %v8602_v28 = vpop.permute.xlu1 %8601  ;;  %8152 = vmatpush1.bf16.msra.mxu1 %v8151_v6 }
 0xa8b   :  { %v8604_v19 = vunpack.i.h.bf16 %v8602_v28  ;;  %v8603_v27 = vunpack.i.l.bf16 %v8602_v28  ;;  %8153 = vmatprep.subr.bf16.mxu1 %v8753_v36 }
 0xa8d   :  { %v8154_v5 = vpack.c.bf16 %v8604_v19, %v8603_v27 }
 0xa8e   :  { %v8607_v8 = vpop.permute.xlu1 %8606 }
 0xa8f   :  { %v8609_v49 = vunpack.i.h.bf16 %v8607_v8  ;;  %v8608_v55 = vunpack.i.l.bf16 %v8607_v8  ;;  %8155 = vmatpush1.bf16.msra.mxu1 %v8154_v5 }
 0xa90   :  { %8156 = vmatprep.subr.bf16.mxu1 %v8753_v36 }
 0xa91   :  { %v8157_v63 = vpack.c.bf16 %v8609_v49, %v8608_v55 }
 0xa93   :  { %8158 = vmatpush1.bf16.msra.mxu1 %v8157_v63 }
 0xa94   :  { %8159 = vmatprep.subr.bf16.mxu1 %v8753_v36 }
 0xa97   :  { %8161 = vmatpush1.bf16.msra.mxu1 %v8160_v46 }
 0xa9a   :  { %6874 = vmatmul.mubr.f32.vlgmr.msra.gmra.mrb[44].mxu1 %v6475_v54 }
 0xa9b   :  { %7659 = vmatprep.mubr.msk.f32.mxu1 %vm6623_vm8, %v6480_v16 }
 0xa9e   :  { %6879 = vmatmul.mubr.f32.gmra.mrb[46].mxu1 %v6479_v58 }
 0xa9f   :  { %7660 = vmatprep.mubr.msk.f32.mxu1 %vm6623_vm8, %v6484_v52 }
 0xaa2   :  { %6884 = vmatmul.mubr.f32.gmra.mrb[48].mxu1 %v6483_v22 }
 0xaa3   :  { %7661 = vmatprep.mubr.msk.f32.mxu1 %vm6623_vm8, %v6488_v51 }
 0xaa6   :  { %6889 = vmatmul.mubr.f32.gmra.mrb[50].mxu1 %v6487_v42 }
 0xaa7   :  { %7662 = vmatprep.mubr.msk.f32.mxu1 %vm6623_vm8, %v6492_v20 }
 0xaaa   :  { %6894 = vmatmul.mubr.f32.gmra.mrb[52].mxu1 %v6491_v33 }
 0xaab   :  { %7663 = vmatprep.mubr.msk.f32.mxu1 %vm6623_vm8, %v6496_v56 }
 0xaae   :  { %6899 = vmatmul.mubr.f32.gmra.mrb[54].mxu1 %v6495_v53 }
 0xaaf   :  { %7664 = vmatprep.mubr.msk.f32.mxu1 %vm6623_vm8, %v6500_v25 }
 0xab2   :  { %6904 = vmatmul.mubr.f32.gmra.mrb[56].mxu1 %v6499_v48  ;;  %v6551_v48 = vpop.permute.xlu1 %6550 }
 0xab3   :  { %7665 = vmatprep.mubr.msk.f32.mxu1 %vm6623_vm8, %v6504_v62 }
 0xab6   :  { %6909 = vmatmul.mubr.f32.gmra.mrb[58].mxu1 %v6503_v40 }
 0xab7   :  { %7666 = vmatprep.mubr.msk.f32.mxu1 %vm6623_vm8, %v6508_v13 }
 0xaba   :  { %6914 = vmatmul.mubr.f32.gmra.mrb[60].mxu1 %v6507_v0 }
 0xabb   :  { %7667 = vmatprep.mubr.msk.f32.mxu1 %vm6623_vm8, %v6512_v29  ;;  %v6556_v29 = vpop.permute.xlu0 %6555 }
 0xabe   :  { %6919 = vmatmul.mubr.f32.gmra.mrb[62].mxu1 %v6511_v34 }
 0xabf   :  { %7668 = vmatprep.mubr.msk.f32.mxu1 %vm6623_vm8, %v6516_v24 }
 0xac2   :  { %6924 = vmatmul.mubr.f32.gmra.mrb[64].mxu1 %v6515_v17 }
 0xac3   :  { %7669 = vmatprep.mubr.msk.f32.mxu1 %vm6623_vm8, %v6520_v61 }
 0xac6   :  { %6929 = vmatmul.mubr.f32.gmra.mrb[66].mxu1 %v6519_v39  ;;  %v6561_v39 = vpop.permute.xlu1 %6560 }
 0xac7   :  { %7670 = vmatprep.mubr.msk.f32.mxu1 %vm6623_vm8, %v6524_v38 }
 0xaca   :  { %6934 = vmatmul.mubr.f32.gmra.mrb[68].mxu1 %v6523_v23 }
 0xacb   :  { %7671 = vmatprep.mubr.msk.f32.mxu1 %vm6623_vm8, %v6528_v45 }
 0xace   :  { %6939 = vmatmul.mubr.f32.gmra.mrb[70].mxu1 %v6527_v44 }
 0xacf   :  { %7672 = vmatprep.mubr.msk.f32.mxu1 %vm6623_vm8, %v6532_v10 }
 0xad2   :  { %6944 = vmatmul.mubr.f32.gmra.mrb[72].mxu1 %v6531_v2 }
 0xb05   :  { %v7874_v7 = vpop.f32.mrb[44].mxu0 }
 0xb06   :  { %v7875_v3 = vpop.f32.mrb[45].mxu0 }
 0xb07   :  { %v7876_v11 = vadd.f32 %v7875_v3, %v7874_v7  ;;  %v6566_v3 = vpop.permute.xlu0 %6565 }
 0xb09   :  { %v7877_v43 = vpop.f32.mrb[46].mxu0  ;;  %v6736_v62 = vadd.f32 %v7876_v11, %v6551_v48 }
 0xb0a   :  { %v7878_v31 = vpop.f32.mrb[47].mxu0 }
 0xb0b   :  { %v7879_v37 = vadd.f32 %v7878_v31, %v7877_v43 }
 0xb0d   :  { %v7880_v14 = vpop.f32.mrb[48].mxu0  ;;  %v6741_v34 = vadd.f32 %v7879_v37, %v6556_v29  ;;  %v6571_v37 = vpop.permute.xlu1 %6570 }
 0xb0e   :  { %v7881_v9 = vpop.f32.mrb[49].mxu0 }
 0xb0f   :  { %v7882_v4 = vadd.f32 %v7881_v9, %v7880_v14 }
 0xb11   :  { %v7883_v1 = vpop.f32.mrb[50].mxu0  ;;  %v6746_v45 = vadd.f32 %v7882_v4, %v6561_v39 }
 0xb12   :  { %v7884_v57 = vpop.f32.mrb[51].mxu0 }
 0xb13   :  { %v7885_v47 = vadd.f32 %v7884_v57, %v7883_v1 }
 0xb15   :  { %v7886_v59 = vpop.f32.mrb[52].mxu0  ;;  %v6751_v43 = vadd.f32 %v7885_v47, %v6566_v3 }
 0xb16   :  { %v7887_v50 = vpop.f32.mrb[53].mxu0 }
 0xb17   :  { %v7888_v21 = vadd.f32 %v7887_v50, %v7886_v59 }
 0xb19   :  { %v7889_v18 = vpop.f32.mrb[54].mxu0  ;;  %v6756_v57 = vadd.f32 %v7888_v21, %v6571_v37 }
 0xb1a   :  { %v7890_v32 = vpop.f32.mrb[55].mxu0 }
 0xb1b   :  { %v15160_v35 = vadd.f32 %v7890_v32, %v7889_v18  ;;  %v6576_v32 = vpop.permute.xlu0 %6575 }
 0xb1d   :  { %v7892_v30 = vpop.f32.mrb[56].mxu0 }
 0xb1e   :  { %v7893_v60 = vpop.f32.mrb[57].mxu0 }
 0xb1f   :  { %v15162_v6 = vadd.f32 %v7893_v60, %v7892_v30  ;;  %v6761_v30 = vadd.f32 %v15160_v35, %v6576_v32 }
 0xb21   :  { %v7895_v28 = vpop.f32.mrb[58].mxu0 }
 0xb22   :  { %v7896_v19 = vpop.f32.mrb[59].mxu0 }
 0xb23   :  { %v15164_v27 = vadd.f32 %v7896_v19, %v7895_v28  ;;  %v6581_v19 = vpop.permute.xlu1 %6580 }
 0xb25   :  { %v7898_v5 = vpop.f32.mrb[60].mxu0 }
 0xb26   :  { %v7899_v26 = vpop.f32.mrb[61].mxu0 }
 0xb27   :  { %v15166_v8 = vadd.f32 %v7899_v26, %v7898_v5 }
 0xb29   :  { %v7901_v49 = vpop.f32.mrb[62].mxu0 }
 0xb2a   :  { %v7902_v55 = vpop.f32.mrb[63].mxu0 }
 0xb2b   :  { %v15168_v41 = vadd.f32 %v7902_v55, %v7901_v49  ;;  %v6766_v49 = vadd.f32 %v15162_v6, %v6581_v19 }
 0xb2d   :  { %v7904_v12 = vpop.f32.mrb[64].mxu0 }
 0xb2e   :  { %v7905_v63 = vpop.f32.mrb[65].mxu0 }
 0xb2f   :  { %v15170_v46 = vadd.f32 %v7905_v63, %v7904_v12 }
 0xb31   :  { %v7907_v54 = vpop.f32.mrb[66].mxu0 }
 0xb32   :  { %v7908_v16 = vpop.f32.mrb[67].mxu0 }
 0xb33   :  { %v15172_v58 = vadd.f32 %v7908_v16, %v7907_v54  ;;  %v6586_v54 = vpop.permute.xlu0 %6585 }
 0xb34   :  { %v6771_v16 = vadd.f32 %v15164_v27, %v6586_v54  ;;  %v6974_v54 = vld [vmem:[%s15403_s8 + $0x50] sm:$0xf] }
 0xb35   :  { %v7910_v52 = vpop.f32.mrb[68].mxu0 }
 0xb36   :  { %v7911_v22 = vpop.f32.mrb[69].mxu0 }
 0xb37   :  { %v15174_v51 = vadd.f32 %v7911_v22, %v7910_v52 }
 0xb39   :  { %v7913_v42 = vpop.f32.mrb[70].mxu0 }
 0xb3a   :  { %v7914_v20 = vpop.f32.mrb[71].mxu0 }
 0xb3b   :  { %v15176_v33 = vadd.f32 %v7914_v20, %v7913_v42  ;;  %v6591_v42 = vpop.permute.xlu1 %6590 }
 0xb3d   :  { %v7916_v56 = vpop.f32.mrb[72].mxu0 }
 0xb3e   :  { %v7917_v53 = vpop.f32.mrb[73].mxu0 }
 0xb3f   :  { %v15178_v25 = vadd.f32 %v7917_v53, %v7916_v56  ;;  %v6776_v53 = vadd.f32 %v15166_v8, %v6591_v42 }
 0xb6d   :  { %v6875_v40 = vpop.f32.mrb[44].mxu1 }
 0xb6e   :  { %v6876_v13 = vadd.f32 %v6875_v40, %v6736_v62  ;;  %v6877_v0 = vpop.f32.mrb[45].mxu1 }
 0xb70   :  { %v6949_v38 = vmax.f32 %v6876_v13, 0.0  ;;  %v6596_v13 = vpop.permute.xlu0 %6595 }
 0xb71   :  { %v6880_v24 = vpop.f32.mrb[46].mxu1  ;;  %v6781_v0 = vadd.f32 %v15168_v41, %v6596_v13 }
 0xb72   :  { %v6881_v17 = vadd.f32 %v6880_v24, %v6741_v34  ;;  %v6882_v61 = vpop.f32.mrb[47].mxu1  ;;  %v6601_v24 = vpop.permute.xlu1 %6600 }
 0xb73   :  { %v6786_v39 = vadd.f32 %v15170_v46, %v6601_v24 }
 0xb74   :  { %v6950_v23 = vmax.f32 %v6881_v17, 0.0 }
 0xb75   :  { %v6885_v44 = vpop.f32.mrb[48].mxu1 }
 0xb76   :  { %v8163_v10 = vpack.c.bf16 %v6950_v23, %v6949_v38  ;;  %v6886_v2 = vadd.f32 %v6885_v44, %v6746_v45  ;;  %v6887_v7 = vpop.f32.mrb[49].mxu1  ;;  %v6606_v44 = vpop.permute.xlu0 %6605 }
 0xb77   :  { %v6611_v3 = vpop.permute.xlu1 %6610 }
 0xb78   :  { %8164 = vmatpush3.bf16.msra.mxu0 %v8163_v10  ;;  %v6951_v9 = vmax.f32 %v6886_v2, 0.0  ;;  %v6791_v10 = vadd.f32 %v15172_v58, %v6606_v44 }
 0xb79   :  { %v6890_v11 = vpop.f32.mrb[50].mxu1  ;;  %8165 = vmatprep.subr.bf16.mxu0 %v8753_v36 }
 0xb7a   :  { %v6891_v31 = vadd.f32 %v6890_v11, %v6751_v43  ;;  %v6892_v14 = vpop.f32.mrb[51].mxu1 }
 0xb7c   :  { %v6952_v1 = vmax.f32 %v6891_v31, 0.0  ;;  %v6796_v31 = vadd.f32 %v15174_v51, %v6611_v3 }
 0xb7d   :  { %v6895_v59 = vpop.f32.mrb[52].mxu1 }
 0xb7e   :  { %v8166_v50 = vpack.c.bf16 %v6952_v1, %v6951_v9  ;;  %v6896_v18 = vadd.f32 %v6895_v59, %v6756_v57  ;;  %v6897_v4 = vpop.f32.mrb[53].mxu1  ;;  %v6616_v1 = vpop.permute.xlu0 %6615 }
 0xb7f   :  { %v6801_v57 = vadd.f32 %v15176_v33, %v6616_v1  ;;  %v6964_v33 = vld [vmem:[%s15403_s8] sm:$0xff] }
 0xb80   :  { %8167 = vmatpush3.bf16.msra.mxu0 %v8166_v50  ;;  %v6953_v5 = vmax.f32 %v6896_v18, 0.0  ;;  %v6621_v18 = vpop.permute.xlu1 %6620 }
 0xb81   :  { %v6900_v60 = vpop.f32.mrb[54].mxu1  ;;  %8168 = vmatprep.subr.bf16.mxu0 %v8753_v36 }
 0xb82   :  { %v6901_v47 = vadd.f32 %v6900_v60, %v6761_v30  ;;  %v6902_v28 = vpop.f32.mrb[55].mxu1  ;;  %v6806_v30 = vadd.f32 %v15178_v25, %v6621_v18  ;;  %v6966_v25 = vld [vmem:[%s15403_s8 + $0x10] sm:$0xff] }
 0xb84   :  { %v6954_v26 = vmax.f32 %v6901_v47, 0.0 }
 0xb85   :  { %v6905_v55 = vpop.f32.mrb[56].mxu1 }
 0xb86   :  { %v8169_v21 = vpack.c.bf16 %v6954_v26, %v6953_v5  ;;  %v6906_v12 = vadd.f32 %v6905_v55, %v6766_v49  ;;  %v6907_v63 = vpop.f32.mrb[57].mxu1  ;;  %v6967_v5 = vld [vmem:[%s15403_s8 + $0x18] sm:$0xff]  ;;  %v6968_v26 = vld [vmem:[%s15403_s8 + $0x20] sm:$0xff]  ;;  %v6969_v49 = vld [vmem:[%s15403_s8 + $0x28] sm:$0xff] }
 0xb87   :  { %v6970_v55 = vld [vmem:[%s15403_s8 + $0x30] sm:$0xff]  ;;  %v6973_v63 = vld [vmem:[%s15403_s8 + $0x48] sm:$0xff] }
 0xb88   :  { %8170 = vmatpush3.bf16.msra.mxu0 %v8169_v21  ;;  %v6955_v20 = vmax.f32 %v6906_v12, 0.0  ;;  %v6971_v21 = vld [vmem:[%s15403_s8 + $0x38] sm:$0xff]  ;;  %v6972_v12 = vld [vmem:[%s15403_s8 + $0x40] sm:$0xff] }
 0xb89   :  { %v6910_v52 = vpop.f32.mrb[58].mxu1  ;;  %8171 = vmatprep.subr.bf16.mxu0 %v8753_v36 }
 0xb8a   :  { %v6911_v35 = vadd.f32 %v6910_v52, %v6771_v16  ;;  %v6912_v22 = vpop.f32.mrb[59].mxu1  ;;  %v7206_v16 = vld [vmem:[%s15404_s10] sm:$0xff]  ;;  %v7208_v52 = vld [vmem:[%s15404_s10 + $0x10] sm:$0xff] }
 0xb8b   :  { %8082 = vmatprep.mubr.msk.f32.mxu1 %vm7318_vm6, %v7208_v52  ;;  %v6989_v22 = vpop.permute.xlu0 %6988  ;;  %v7211_v52 = vld [vmem:[%s15404_s10 + $0x28] sm:$0xff] }
 0xb8c   :  { %v6956_v56 = vmax.f32 %v6911_v35, 0.0 }
 0xb8d   :  { %v6915_v48 = vpop.f32.mrb[60].mxu1 }
 0xb8e   :  { %v8172_v6 = vpack.c.bf16 %v6956_v56, %v6955_v20  ;;  %v6916_v62 = vadd.f32 %v6915_v48, %v6776_v53  ;;  %v6917_v40 = vpop.f32.mrb[61].mxu1  ;;  %v6994_v20 = vpop.permute.xlu1 %6993 }
 0xb90   :  { %8173 = vmatpush3.bf16.msra.mxu0 %v8172_v6  ;;  %v6957_v17 = vmax.f32 %v6916_v62, 0.0 }
 0xb91   :  { %v6920_v29 = vpop.f32.mrb[62].mxu1  ;;  %8174 = vmatprep.subr.bf16.mxu0 %v8753_v36 }
 0xb92   :  { %v6921_v27 = vadd.f32 %v6920_v29, %v6781_v0  ;;  %v6922_v34 = vpop.f32.mrb[63].mxu1  ;;  %v6999_v29 = vpop.permute.xlu0 %6998 }
 0xb93   :  { %v7004_v34 = vpop.permute.xlu1 %7003 }
 0xb94   :  { %v6958_v61 = vmax.f32 %v6921_v27, 0.0 }
 0xb95   :  { %v6925_v38 = vpop.f32.mrb[64].mxu1 }
 0xb96   :  { %v8175_v8 = vpack.c.bf16 %v6958_v61, %v6957_v17  ;;  %v6926_v23 = vadd.f32 %v6925_v38, %v6786_v39  ;;  %v6927_v45 = vpop.f32.mrb[65].mxu1  ;;  %v7009_v44 = vpop.permute.xlu0 %7008 }
 0xb98   :  { %8176 = vmatpush3.bf16.msra.mxu0 %v8175_v8  ;;  %v6959_v43 = vmax.f32 %v6926_v23, 0.0 }
 0xb99   :  { %v6930_v2 = vpop.f32.mrb[66].mxu1  ;;  %8177 = vmatprep.subr.bf16.mxu0 %v8753_v36 }
 0xb9a   :  { %v6931_v41 = vadd.f32 %v6930_v2, %v6791_v10  ;;  %v6932_v7 = vpop.f32.mrb[67].mxu1  ;;  %v7014_v2 = vpop.permute.xlu1 %7013 }
 0xb9c   :  { %v6960_v11 = vmax.f32 %v6931_v41, 0.0 }
 0xb9d   :  { %v6935_v14 = vpop.f32.mrb[68].mxu1 }
 0xb9e   :  { %v8178_v46 = vpack.c.bf16 %v6960_v11, %v6959_v43  ;;  %v6936_v37 = vadd.f32 %v6935_v14, %v6796_v31  ;;  %v6937_v9 = vpop.f32.mrb[69].mxu1  ;;  %v7024_v1 = vpop.permute.xlu1 %7023 }
 0xba0   :  { %8179 = vmatpush3.bf16.msra.mxu0 %v8178_v46  ;;  %v6961_v4 = vmax.f32 %v6936_v37, 0.0  ;;  %v7019_v37 = vpop.permute.xlu0 %7018 }
 0xba1   :  { %v6940_v59 = vpop.f32.mrb[70].mxu1  ;;  %8180 = vmatprep.subr.bf16.mxu0 %v8753_v36  ;;  %v6965_v36 = vld [vmem:[%s15403_s8 + $0x8] sm:$0xff] }
 0xba2   :  { %v6941_v58 = vadd.f32 %v6940_v59, %v6801_v57  ;;  %v6942_v50 = vpop.f32.mrb[71].mxu1 }
 0xba4   :  { %v6962_v32 = vmax.f32 %v6941_v58, 0.0 }
 0xba5   :  { %v6945_v60 = vpop.f32.mrb[72].mxu1 }
 0xba6   :  { %v8181_v51 = vpack.c.bf16 %v6962_v32, %v6961_v4  ;;  %v6946_v47 = vadd.f32 %v6945_v60, %v6806_v30  ;;  %v6947_v28 = vpop.f32.mrb[73].mxu1  ;;  %v7029_v60 = vpop.permute.xlu0 %7028 }
 0xba8   :  { %8182 = vmatpush3.bf16.msra.mxu0 %v8181_v51  ;;  %v6963_v19 = vmax.f32 %v6946_v47, 0.0  ;;  %v7034_v47 = vpop.permute.xlu1 %7033 }
 0xba9   :  { %8022 = vmatprep.subr.mxu0 %v16990_v15 }
 0xbac   :  { %8023 = vmatpush3.msra.mxu0 %v6963_v19 }
 0xbad   :  { %8025 = vmatmul.mubr.msk.f32.vlgmr.msra.gmra.mrb[74].mxu0 %vm3210_vm4, %v6964_v33 }
 0xbae   :  { %8027 = vmatprep.mubr.msk.f32.mxu0 %vm8747_vm5, %v16990_v15 }
 0xbb1   :  { %8028 = vmatmul.mubr.msk.f32.gmra.mrb[76].mxu0 %vm3210_vm4, %v6965_v36 }
 0xbb2   :  { %8030 = vmatprep.mubr.msk.f32.mxu0 %vm8747_vm5, %v16990_v15 }
 0xbb5   :  { %8031 = vmatmul.mubr.msk.f32.gmra.mrb[78].mxu0 %vm3210_vm4, %v6966_v25 }
 0xbb6   :  { %8033 = vmatprep.mubr.msk.f32.mxu0 %vm8747_vm5, %v16990_v15 }
 0xbb9   :  { %8034 = vmatmul.mubr.msk.f32.gmra.mrb[80].mxu0 %vm3210_vm4, %v6967_v5  ;;  %v7039_v5 = vpop.permute.xlu0 %7038 }
 0xbba   :  { %8036 = vmatprep.mubr.msk.f32.mxu0 %vm8747_vm5, %v16990_v15 }
 0xbbd   :  { %8037 = vmatmul.mubr.msk.f32.gmra.mrb[82].mxu0 %vm3210_vm4, %v6968_v26 }
 0xbbe   :  { %8039 = vmatprep.mubr.msk.f32.mxu0 %vm8747_vm5, %v16990_v15 }
 0xbc1   :  { %8040 = vmatmul.mubr.msk.f32.gmra.mrb[84].mxu0 %vm3210_vm4, %v6969_v49 }
 0xbc2   :  { %8042 = vmatprep.mubr.msk.f32.mxu0 %vm8747_vm5, %v16990_v15 }
 0xbc5   :  { %8043 = vmatmul.mubr.msk.f32.gmra.mrb[86].mxu0 %vm3210_vm4, %v6970_v55 }
 0xbc6   :  { %8045 = vmatprep.mubr.msk.f32.mxu0 %vm8747_vm5, %v16990_v15 }
 0xbc9   :  { %8046 = vmatmul.mubr.msk.f32.gmra.mrb[88].mxu0 %vm3210_vm4, %v6971_v21 }
 0xbca   :  { %8048 = vmatprep.mubr.msk.f32.mxu0 %vm8747_vm5, %v16990_v15 }
 0xbcd   :  { %8049 = vmatmul.mubr.msk.f32.gmra.mrb[90].mxu0 %vm3210_vm4, %v6972_v12 }
 0xbce   :  { %8051 = vmatprep.mubr.msk.f32.mxu0 %vm8747_vm5, %v16990_v15 }
 0xbd1   :  { %8052 = vmatmul.mubr.msk.f32.gmra.mrb[92].mxu0 %vm3210_vm4, %v6973_v63  ;;  %v7207_v63 = vld [vmem:[%s15404_s10 + $0x8] sm:$0xff] }
 0xbd2   :  { %8054 = vmatprep.mubr.msk.f32.mxu0 %vm8747_vm5, %v16990_v15  ;;  %vm17000_vm5 = vcmask 1043456  }
 0xbd5   :  { %8055 = vmatmul.mubr.msk.f32.gmra.mrb[94].mxu0 %vm3210_vm4, %v6974_v54  ;;  %vm17001_vm4 = vmmov %vm17000_vm5  ;;  %v7209_v54 = vld [vmem:[%s15404_s10 + $0x18] sm:$0xff] }
 0xbd6   :  { %8079 = vmatprep.mubr.msk.f32.mxu0 %vm7318_vm6, %v7206_v16  ;;  %v7210_v16 = vld [vmem:[%s15404_s10 + $0x20] sm:$0xff]  ;;  %vm17002_vm14 = vmmov %vm17001_vm4 }
 0xbd7   :  { %vm17003_vm0 = vmmov %vm17001_vm4 }
 0xc80   :  { %v7141_v15 = vpop.f32.mrb[74].mxu0 }
 0xc81   :  { %v8026_v35 = vpop.f32.mrb[75].mxu0  ;;  %v7142_v42 = vadd.f32 %v7141_v15, %v6989_v22  ;;  %v7212_v15 = vld [vmem:[%s15404_s10 + $0x30] sm:$0xff]  ;;  %v7214_v22 = vld [vmem:[%s15404_s10 + $0x40] sm:$0xff] }
 0xc82   :  { %v7213_v35 = vld [vmem:[%s15404_s10 + $0x38] sm:$0xff] }
 0xc83   :  { %v7195_v6 = vmax.f32 %v7142_v42, 0.0  ;;  %v7215_v42 = vld [vmem:[%s15404_s10 + $0x48] sm:$0xff] }
 0xc84   :  { %v7146_v56 = vpop.f32.mrb[76].mxu0 }
 0xc85   :  { %v7147_v53 = vadd.f32 %v7146_v56, %v6994_v20  ;;  %v8029_v48 = vpop.f32.mrb[77].mxu0  ;;  %v7216_v20 = vld [vmem:[%s15404_s10 + $0x50] sm:$0xff]  ;;  %v7217_v56 = vld [vmem:[%s15404_s10 + $0x58] sm:$0xff] }
 0xc86   :  { %v7219_v48 = vld [vmem:[%s15404_s10 + $0x68] sm:$0xff] }
 0xc87   :  { %v7196_v62 = vmax.f32 %v7147_v53, 0.0  ;;  %v7218_v53 = vld [vmem:[%s15404_s10 + $0x60] sm:$0xff] }
 0xc88   :  { %v7151_v40 = vpop.f32.mrb[78].mxu0 }
 0xc89   :  { %v8183_v13 = vpack.c.bf16 %v7196_v62, %v7195_v6  ;;  %v8032_v0 = vpop.f32.mrb[79].mxu0  ;;  %v7152_v27 = vadd.f32 %v7151_v40, %v6999_v29  ;;  %v7220_v6 = vld [vmem:[%s15404_s10 + $0x70] sm:$0xff]  ;;  %v7221_v62 = vld [vmem:[%s15404_s10 + $0x78] sm:$0xff]  ;;  %v7246_v40 = vpop.permute.xlu0 %7245 }
 0xc8b   :  { %8184 = vmatprep.subr.bf16.mxu0 %v8183_v13  ;;  %8203 = vmatprep.subr.bf16.mxu1 %v8183_v13  ;;  %v7197_v39 = vmax.f32 %v7152_v27, 0.0 }
 0xc8c   :  { %v7156_v24 = vpop.f32.mrb[80].mxu0  ;;  %8186 = vmatpush3.bf16.msra.mxu0 %v8183_v13  ;;  %8209 = vmatpush3.bf16.msra.mxu1 %v8183_v13  ;;  %v7241_v13 = vpop.permute.xlu1 %7240 }
 0xc8d   :  { %v7157_v17 = vadd.f32 %v7156_v24, %v7004_v34  ;;  %v8035_v61 = vpop.f32.mrb[81].mxu0  ;;  %v7256_v0 = vpop.permute.xlu0 %7255 }
 0xc8f   :  { %v7198_v38 = vmax.f32 %v7157_v17, 0.0 }
 0xc90   :  { %v7161_v8 = vpop.f32.mrb[82].mxu0  ;;  %v7251_v29 = vpop.permute.xlu1 %7250 }
 0xc91   :  { %v8187_v23 = vpack.c.bf16 %v7198_v38, %v7197_v39  ;;  %v8038_v45 = vpop.f32.mrb[83].mxu0  ;;  %v7162_v10 = vadd.f32 %v7161_v8, %v7009_v44  ;;  %v7266_v27 = vpop.permute.xlu0 %7265 }
 0xc93   :  { %8188 = vmatprep.subr.bf16.mxu0 %v8187_v23  ;;  %8204 = vmatprep.subr.bf16.mxu1 %v8187_v23  ;;  %v7199_v43 = vmax.f32 %v7162_v10, 0.0 }
 0xc94   :  { %v7166_v41 = vpop.f32.mrb[84].mxu0  ;;  %8190 = vmatpush3.bf16.msra.mxu0 %v8187_v23  ;;  %8210 = vmatpush3.bf16.msra.mxu1 %v8187_v23  ;;  %v7261_v34 = vpop.permute.xlu1 %7260 }
 0xc95   :  { %v7167_v7 = vadd.f32 %v7166_v41, %v7014_v2  ;;  %v8041_v3 = vpop.f32.mrb[85].mxu0  ;;  %v7276_v24 = vpop.permute.xlu0 %7275 }
 0xc97   :  { %v7200_v11 = vmax.f32 %v7167_v7, 0.0 }
 0xc98   :  { %v7171_v31 = vpop.f32.mrb[86].mxu0  ;;  %v7271_v17 = vpop.permute.xlu1 %7270 }
 0xc99   :  { %v8191_v14 = vpack.c.bf16 %v7200_v11, %v7199_v43  ;;  %v8044_v46 = vpop.f32.mrb[87].mxu0  ;;  %v7172_v9 = vadd.f32 %v7171_v31, %v7019_v37  ;;  %v7286_v3 = vpop.permute.xlu0 %7285 }
 0xc9b   :  { %8192 = vmatprep.subr.bf16.mxu0 %v8191_v14  ;;  %8205 = vmatprep.subr.bf16.mxu1 %v8191_v14  ;;  %v7201_v50 = vmax.f32 %v7172_v9, 0.0 }
 0xc9c   :  { %v7176_v57 = vpop.f32.mrb[88].mxu0  ;;  %8194 = vmatpush3.bf16.msra.mxu0 %v8191_v14  ;;  %8211 = vmatpush3.bf16.msra.mxu1 %v8191_v14  ;;  %v7281_v11 = vpop.permute.xlu1 %7280 }
 0xc9d   :  { %v7177_v59 = vadd.f32 %v7176_v57, %v7024_v1  ;;  %v8047_v58 = vpop.f32.mrb[89].mxu0  ;;  %v7296_v9 = vpop.permute.xlu0 %7295 }
 0xc9f   :  { %v7202_v18 = vmax.f32 %v7177_v59, 0.0 }
 0xca0   :  { %v7181_v4 = vpop.f32.mrb[90].mxu0  ;;  %v7291_v57 = vpop.permute.xlu1 %7290 }
 0xca1   :  { %v8195_v32 = vpack.c.bf16 %v7202_v18, %v7201_v50  ;;  %v8050_v30 = vpop.f32.mrb[91].mxu0  ;;  %v7182_v51 = vadd.f32 %v7181_v4, %v7029_v60 }
 0xca2   :  { %v7306_v30 = vpop.permute.xlu0 %7305 }
 0xca3   :  { %8196 = vmatprep.subr.bf16.mxu0 %v8195_v32  ;;  %8206 = vmatprep.subr.bf16.mxu1 %v8195_v32  ;;  %v7203_v36 = vmax.f32 %v7182_v51, 0.0 }
 0xca4   :  { %v7186_v28 = vpop.f32.mrb[92].mxu0  ;;  %8198 = vmatpush3.bf16.msra.mxu0 %v8195_v32  ;;  %8212 = vmatpush3.bf16.msra.mxu1 %v8195_v32  ;;  %v7301_v51 = vpop.permute.xlu1 %7300 }
 0xca5   :  { %v7187_v19 = vadd.f32 %v7186_v28, %v7034_v47  ;;  %v8053_v33 = vpop.f32.mrb[93].mxu0 }
 0xca7   :  { %v7204_v25 = vmax.f32 %v7187_v19, 0.0 }
 0xca8   :  { %v7191_v26 = vpop.f32.mrb[94].mxu0 }
 0xca9   :  { %v8199_v49 = vpack.c.bf16 %v7204_v25, %v7203_v36  ;;  %v7192_v55 = vadd.f32 %v7191_v26, %v7039_v5  ;;  %v8056_v21 = vpop.f32.mrb[95].mxu0  ;;  %v7316_v36 = vpop.permute.xlu0 %7315 }
 0xcaa   :  { %v7311_v5 = vpop.permute.xlu1 %7310 }
 0xcab   :  { %v7205_v12 = vmax.f32 %v7192_v55, 0.0  ;;  %8200 = vmatprep.subr.bf16.mxu0 %v8199_v49  ;;  %8207 = vmatprep.subr.bf16.mxu1 %v8199_v49 }
 0xcac   :  { %8202 = vmatpush3.bf16.msra.mxu0 %v8199_v49  ;;  %8213 = vmatpush3.bf16.msra.mxu1 %v8199_v49 }
 0xcad   :  { %8077 = vmatprep.subr.msk.mxu0 %vm17000_vm5, %v7205_v12  ;;  %8208 = vmatprep.subr.msk.mxu1 %vm17001_vm4, %v7205_v12 }
 0xcb0   :  { %8078 = vmatpush3.msk.msra.mxu0 %vm17002_vm14, %v7205_v12  ;;  %8214 = vmatpush3.msk.msra.mxu1 %vm17003_vm0, %v7205_v12 }
 0xcb1   :  { %8080 = vmatmul.mubr.msk.f32.vlgmr.msra.gmra.mrb[96].mxu0 %vm7318_vm6, %v7207_v63  ;;  %8083 = vmatmul.mubr.msk.f32.vlgmr.msra.gmra.mrb[74].mxu1 %vm7318_vm6, %v7209_v54 }
 0xcb2   :  { %8085 = vmatprep.mubr.msk.f32.mxu1 %vm7318_vm6, %v7210_v16 }
 0xcb5   :  { %8086 = vmatmul.mubr.msk.f32.gmra.mrb[76].mxu1 %vm7318_vm6, %v7211_v52 }
 0xcb6   :  { %8088 = vmatprep.mubr.msk.f32.mxu1 %vm7318_vm6, %v7212_v15 }
 0xcb9   :  { %8089 = vmatmul.mubr.msk.f32.gmra.mrb[78].mxu1 %vm7318_vm6, %v7213_v35 }
 0xcba   :  { %8091 = vmatprep.mubr.msk.f32.mxu1 %vm7318_vm6, %v7214_v22 }
 0xcbd   :  { %8092 = vmatmul.mubr.msk.f32.gmra.mrb[80].mxu1 %vm7318_vm6, %v7215_v42 }
 0xcbe   :  { %8094 = vmatprep.mubr.msk.f32.mxu1 %vm7318_vm6, %v7216_v20 }
 0xcc1   :  { %8095 = vmatmul.mubr.msk.f32.gmra.mrb[82].mxu1 %vm7318_vm6, %v7217_v56 }
 0xcc2   :  { %8097 = vmatprep.mubr.msk.f32.mxu1 %vm7318_vm6, %v7218_v53 }
 0xcc5   :  { %8098 = vmatmul.mubr.msk.f32.gmra.mrb[84].mxu1 %vm7318_vm6, %v7219_v48 }
 0xcc6   :  { %8100 = vmatprep.mubr.msk.f32.mxu1 %vm7318_vm6, %v7220_v6 }
 0xcc9   :  { %8101 = vmatmul.mubr.msk.f32.gmra.mrb[86].mxu1 %vm7318_vm6, %v7221_v62 }
 0xd84   :  { %v8081_v61 = vpop.f32.mrb[96].mxu0  ;;  %v8084_v39 = vpop.f32.mrb[74].mxu1 }
 0xd85   :  { %v7442_v38 = vadd.f32 %v8081_v61, %v7246_v40  ;;  %v7452_v8 = vadd.f32 %v8084_v39, %v7256_v0  ;;  %v7436_v23 = vpop.f32.mrb[97].mxu0  ;;  %v7446_v45 = vpop.f32.mrb[75].mxu1 }
 0xd86   :  { %v7437_v44 = vadd.f32 %v7436_v23, %v7241_v13  ;;  %v7447_v10 = vadd.f32 %v7446_v45, %v7251_v29 }
 0xd87   :  { %7517 = vst.msk [vmem:[%s15405_s12 + $0x8] sm:$0xff] %vm7515_vm1, %v7442_v38  ;;  %7519 = vst.msk [vmem:[%s15405_s12 + $0x18] sm:$0xff] %vm7515_vm1, %v7452_v8 }
 0xd88   :  { %7516 = vst.msk [vmem:[%s15405_s12] sm:$0xff] %vm7515_vm1, %v7437_v44  ;;  %7518 = vst.msk [vmem:[%s15405_s12 + $0x10] sm:$0xff] %vm7515_vm1, %v7447_v10  ;;  %v8087_v2 = vpop.f32.mrb[76].mxu1 }
 0xd89   :  { %v7462_v41 = vadd.f32 %v8087_v2, %v7266_v27  ;;  %v7456_v7 = vpop.f32.mrb[77].mxu1 }
 0xd8a   :  { %v7457_v43 = vadd.f32 %v7456_v7, %v7261_v34 }
 0xd8b   :  { %7521 = vst.msk [vmem:[%s15405_s12 + $0x28] sm:$0xff] %vm7515_vm1, %v7462_v41 }
 0xd8c   :  { %7520 = vst.msk [vmem:[%s15405_s12 + $0x20] sm:$0xff] %vm7515_vm1, %v7457_v43  ;;  %v8090_v31 = vpop.f32.mrb[78].mxu1 }
 0xd8d   :  { %v7472_v14 = vadd.f32 %v8090_v31, %v7276_v24  ;;  %v7466_v46 = vpop.f32.mrb[79].mxu1 }
 0xd8e   :  { %v7467_v37 = vadd.f32 %v7466_v46, %v7271_v17 }
 0xd8f   :  { %7523 = vst.msk [vmem:[%s15405_s12 + $0x38] sm:$0xff] %vm7515_vm1, %v7472_v14 }
 0xd90   :  { %7522 = vst.msk [vmem:[%s15405_s12 + $0x30] sm:$0xff] %vm7515_vm1, %v7467_v37  ;;  %v8093_v1 = vpop.f32.mrb[80].mxu1 }
 0xd91   :  { %v7482_v59 = vadd.f32 %v8093_v1, %v7286_v3  ;;  %v7476_v58 = vpop.f32.mrb[81].mxu1 }
 0xd92   :  { %v7477_v50 = vadd.f32 %v7476_v58, %v7281_v11 }
 0xd93   :  { %7525 = vst.msk [vmem:[%s15405_s12 + $0x48] sm:$0xff] %vm7515_vm1, %v7482_v59 }
 0xd94   :  { %7524 = vst.msk [vmem:[%s15405_s12 + $0x40] sm:$0xff] %vm7515_vm1, %v7477_v50  ;;  %v8096_v18 = vpop.f32.mrb[82].mxu1 }
 0xd95   :  { %v7492_v4 = vadd.f32 %v8096_v18, %v7296_v9  ;;  %v7486_v32 = vpop.f32.mrb[83].mxu1 }
 0xd96   :  { %v7487_v60 = vadd.f32 %v7486_v32, %v7291_v57 }
 0xd97   :  { %7527 = vst.msk [vmem:[%s15405_s12 + $0x58] sm:$0xff] %vm7515_vm1, %v7492_v4 }
 0xd98   :  { %7526 = vst.msk [vmem:[%s15405_s12 + $0x50] sm:$0xff] %vm7515_vm1, %v7487_v60  ;;  %v8099_v47 = vpop.f32.mrb[84].mxu1 }
 0xd99   :  { %v7502_v28 = vadd.f32 %v8099_v47, %v7306_v30  ;;  %v7496_v19 = vpop.f32.mrb[85].mxu1 }
 0xd9a   :  { %v7497_v33 = vadd.f32 %v7496_v19, %v7301_v51 }
 0xd9b   :  { %7529 = vst.msk [vmem:[%s15405_s12 + $0x68] sm:$0xff] %vm7515_vm1, %v7502_v28 }
 0xd9c   :  { %7528 = vst.msk [vmem:[%s15405_s12 + $0x60] sm:$0xff] %vm7515_vm1, %v7497_v33  ;;  %v8102_v25 = vpop.f32.mrb[86].mxu1 }
 0xd9d   :  { %v7512_v26 = vadd.f32 %v8102_v25, %v7316_v36  ;;  %v7506_v49 = vpop.f32.mrb[87].mxu1 }
 0xd9e   :  { %v7507_v55 = vadd.f32 %v7506_v49, %v7311_v5 }
 0xd9f   :  { %7531 = vst.msk [vmem:[%s15405_s12 + $0x78] sm:$0xff] %vm7515_vm1, %v7512_v26 }
 0xda0   :  { %7530 = vst.msk [vmem:[%s15405_s12 + $0x70] sm:$0xff] %vm7515_vm1, %v7507_v55 }

</bundles_post_ra>
